<compile_context>
chip_gen: v7x
topology: tpu7x:2x2x1
jax: 0.10.0
libtpu: 0.0.40
codegen_flags: <defaults>
</compile_context>

<pallas_src>
import functools
import math

import jax
import jax.numpy as jnp
from jax.experimental import pallas as pl
from jax.experimental.pallas import tpu as pltpu

HIDLIN = 512
SIGMA_BOOST = 2.0      # matches sparse.SIGMA_BOOST
EPSILON = 1e-6         # matches sparse.EPSILON (10e-7)
_VMEM_LIMIT = 32 * 1024 * 1024


def _round_up(a, m):
    return (a + m - 1) // m * m


# ----------------------------------------------------------------------------
# Fused 3x3 conv (+ReLU) (+MaxPool) kernel -- one batch element per grid step.
# ----------------------------------------------------------------------------
def _conv3x3_pool_kernel(x_ref, w_ref, b_ref, o_ref, xpad_ref, *, H, W, Ws,
                         pool, relu):
    """x_ref: (1,H,W,Cx) bf16; w_ref: (9,Cx,Coutp) bf16 (tap-major);
    b_ref: (1,Coutp) f32; o_ref: (1,H,W,Coutp) or (1,Ho,Wo*Coutp) bf16;
    xpad_ref: VMEM (H+2, Ws+2, Cx) scratch (spatially zero-padded image)."""
    Cx = x_ref.shape[-1]
    Coutp = b_ref.shape[-1]

    # Zero-pad spatially inside VMEM (removes XLA pad / im2col HBM round trips).
    xpad_ref[...] = jnp.zeros_like(xpad_ref)
    xpad_ref[1:H + 1, 1:W + 1, :] = x_ref[0]

    # 9-tap accumulation on the MXU, f32 accumulator.
    acc = None
    t = 0
    for dy in range(3):
        for dx in range(3):
            xi = xpad_ref[dy:dy + H, dx:dx + Ws, :].reshape(H * Ws, Cx)
            d = jnp.dot(xi, w_ref[t], preferred_element_type=jnp.float32)
            acc = d if acc is None else acc + d
            t += 1
    acc = acc + b_ref[...]
    if relu:
        acc = jnp.maximum(acc, 0.0)
    y = acc.reshape(H, Ws, Coutp)           # columns >= W are bias-only, never read

    if not pool or pool == 1:
        o_ref[0] = y[:, :W, :].astype(o_ref.dtype)
        return

    # Fused MaxPool(pool): only leading-dim reshapes, full sublane-extent max,
    # and a lane-dim concat -> output store is lane-dense (Wo * 128 lanes).
    p = pool
    Ho, Wo = H // p, W // p
    y = y[:Ho * p]
    cols = []
    for j in range(Wo):
        blk = y[:, j * p:(j + 1) * p, :]               # (Ho*p, p, Coutp)
        blk = blk.reshape(Ho, p, p, Coutp)             # split leading dim only
        m = blk[:, 0]
        for di in range(1, p):
            m = jnp.maximum(m, blk[:, di])             # (Ho, p, Coutp)
        cols.append(jnp.max(m, axis=1))                # (Ho, Coutp)
    o_ref[0] = jnp.concatenate(cols, axis=-1).astype(o_ref.dtype)  # (Ho, Wo*Coutp)


def conv3x3_pool(x, w, b, *, pool=None, relu=True):
    """x: (B,H,W,Cx) NHWC bf16 (channels lane-padded, zeros beyond cin).
    w: (9*cin, cout) tap-major weights; returns (B,Ho,Wo,Coutp) bf16."""
    B, H, W, Cx = x.shape
    cin = w.shape[0] // 9
    cout = w.shape[1]
    assert cin <= Cx
    Coutp = _round_up(cout, 128)
    Ws = _round_up(W, 8)     # compute-width padded to sublane multiple

    w9 = w.reshape(9, cin, cout)
    w9 = jnp.pad(w9, ((0, 0), (0, Cx - cin), (0, Coutp - cout))).astype(jnp.bfloat16)
    bp = jnp.pad(b, (0, Coutp - cout)).astype(jnp.float32).reshape(1, Coutp)

    if pool and pool > 1:
        Ho, Wo = H // pool, W // pool
        out_shape = jax.ShapeDtypeStruct((B, Ho, Wo * Coutp), jnp.bfloat16)
        out_spec = pl.BlockSpec((1, Ho, Wo * Coutp), lambda bi: (bi, 0, 0))
    else:
        Ho, Wo = H, W
        out_shape = jax.ShapeDtypeStruct((B, H, W, Coutp), jnp.bfloat16)
        out_spec = pl.BlockSpec((1, H, W, Coutp), lambda bi: (bi, 0, 0, 0))

    out = pl.pallas_call(
        functools.partial(_conv3x3_pool_kernel, H=H, W=W, Ws=Ws, pool=pool,
                          relu=relu),
        out_shape=out_shape,
        grid=(B,),
        in_specs=[
            pl.BlockSpec((1, H, W, Cx), lambda bi: (bi, 0, 0, 0)),
            # TODO(synk): single-buffer these constant-index weight/bias blocks
            # (pipeline_mode=pl.Buffered(1)) to halve their VMEM footprint.
            pl.BlockSpec((9, Cx, Coutp), lambda bi: (0, 0, 0)),
            pl.BlockSpec((1, Coutp), lambda bi: (0, 0)),
        ],
        out_specs=out_spec,
        scratch_shapes=[pltpu.VMEM((H + 2, Ws + 2, Cx), jnp.bfloat16)],
        compiler_params=pltpu.CompilerParams(
            dimension_semantics=("parallel",),
            vmem_limit_bytes=_VMEM_LIMIT),
    )(x.astype(jnp.bfloat16), w9, bp)

    if pool and pool > 1:
        out = out.reshape(B, Ho, Wo, Coutp)   # same bytes, row-major: free reshape
    # TODO(synk): for large images add an H-tile grid axis with a halo so a
    # single image does not have to fit in one VMEM block.
    return out


# ----------------------------------------------------------------------------
# Fused 3-layer MLP head, K-tiled over hid with an f32 VMEM accumulator.
# ----------------------------------------------------------------------------
def _mlp_kernel(x_ref, w1_ref, b1_ref, w2_ref, b2_ref, w3_ref, b3_ref, o_ref,
                acc_ref):
    k = pl.program_id(1)

    @pl.when(k == 0)
    def _():
        acc_ref[...] = jnp.zeros_like(acc_ref)

    acc_ref[...] += jnp.dot(x_ref[...], w1_ref[...],
                            preferred_element_type=jnp.float32)

    @pl.when(k == pl.num_programs(1) - 1)
    def _():
        h1 = jnp.maximum(acc_ref[...] + b1_ref[...], 0.0).astype(jnp.bfloat16)
        h2 = jnp.dot(h1, w2_ref[...], preferred_element_type=jnp.float32)
        h2 = jnp.maximum(h2 + b2_ref[...], 0.0)
        # Final linear kept in f32 for parity of the sampling head.
        o = jnp.dot(h2, w3_ref[...], preferred_element_type=jnp.float32)
        o_ref[...] = (o + b3_ref[...]).astype(o_ref.dtype)


def mlp_head(x, lin_params):
    """Linear(hid,512)+ReLU -> Linear(512,512)+ReLU -> Linear(512,G*3)."""
    (w1, b1), (w2, b2), (w3, b3) = lin_params
    M, K = x.shape
    H1, H2, N3 = w1.shape[1], w2.shape[1], w3.shape[1]
    Np3 = _round_up(N3, 128)
    Kp = _round_up(K, 128)

    x = x.astype(jnp.bfloat16)
    if Kp != K:
        x = jnp.pad(x, ((0, 0), (0, Kp - K)))
        w1 = jnp.pad(w1, ((0, Kp - K), (0, 0)))
    w1 = w1.astype(jnp.bfloat16)
    w2 = w2.astype(jnp.bfloat16)
    w3 = jnp.pad(w3, ((0, 0), (0, Np3 - N3))).astype(jnp.float32)
    b1 = b1.astype(jnp.float32).reshape(1, H1)
    b2 = b2.astype(jnp.float32).reshape(1, H2)
    b3 = jnp.pad(b3, (0, Np3 - N3)).astype(jnp.float32).reshape(1, Np3)

    tm = min(512, _round_up(max(M, 8), 8))
    Mp = _round_up(M, tm)
    if Mp != M:
        x = jnp.pad(x, ((0, Mp - M), (0, 0)))
    tk = next(c for c in (1024, 512, 256, 128) if Kp % c == 0)

    out = pl.pallas_call(
        _mlp_kernel,
        out_shape=jax.ShapeDtypeStruct((Mp, Np3), jnp.float32),
        grid=(Mp // tm, Kp // tk),
        in_specs=[
            pl.BlockSpec((tm, tk), lambda i, k: (i, k)),
            pl.BlockSpec((tk, H1), lambda i, k: (k, 0)),
            pl.BlockSpec((1, H1), lambda i, k: (0, 0)),
            pl.BlockSpec((H1, H2), lambda i, k: (0, 0)),
            pl.BlockSpec((1, H2), lambda i, k: (0, 0)),
            pl.BlockSpec((H2, Np3), lambda i, k: (0, 0)),
            pl.BlockSpec((1, Np3), lambda i, k: (0, 0)),
        ],
        out_specs=pl.BlockSpec((tm, Np3), lambda i, k: (i, 0)),
        scratch_shapes=[pltpu.VMEM((tm, H1), jnp.float32)],
        compiler_params=pltpu.CompilerParams(
            dimension_semantics=("parallel", "arbitrary"),
            vmem_limit_bytes=_VMEM_LIMIT),
    )(x, w1, b1, w2, b2, w3, b3)
    return out[:M, :N3]


# ----------------------------------------------------------------------------
# Parameter init (deterministic, synthetic -- mirrors the shapes in prep())
# ----------------------------------------------------------------------------
def init_params(key, ci, hi, wi, glimpses, pool):
    ch1, ch2, ch3 = 32, 64, 128
    hid = int(max(1.0, math.floor(wi / (pool ** 3 * 2)) *
                  math.floor(hi / (pool ** 3 * 2)) * ch3))
    layer_defs = [
        ("conv", ci, ch1), ("conv", ch1, ch1), ("conv", ch1, ch2),
        ("conv", ch2, ch2), ("conv", ch2, ch3), ("conv", ch3, ch3),
        ("lin", hid, HIDLIN), ("lin", HIDLIN, HIDLIN), ("lin", HIDLIN, glimpses * 3),
    ]
    params = []
    for kind, cin, cout in layer_defs:
        key, kw, kb = jax.random.split(key, 3)
        K = 9 * cin if kind == "conv" else cin
        scale = 1.0 / math.sqrt(K)
        w = jax.random.uniform(kw, (K, cout), jnp.float32, -scale, scale)
        b = jax.random.uniform(kb, (cout,), jnp.float32, -scale, scale)
        params.append((w, b))
    return params, hid


# ----------------------------------------------------------------------------
# ReinforceLayer.forward
# ----------------------------------------------------------------------------
def reinforce_forward(params, image_nchw, sample_key, *, in_shape, glimpses,
                      glimpse_size, pool):
    ci, hi, wi = in_shape
    hg, wg = glimpse_size
    B = image_nchw.shape[0]

    conv_params = params[:6]
    lin_params = params[6:]
    pools = [pool, pool, pool, 2, None, None]

    # NCHW -> NHWC, channels lane-padded to 128 so every conv contraction K is
    # a multiple of 128.  TODO(synk): for large images keep the first layer at
    # K = 9*ci (im2col variant) instead of 128/ci-inflating the input image.
    x = jnp.transpose(image_nchw, (0, 2, 3, 1)).astype(jnp.bfloat16)
    Cx0 = _round_up(ci, 128)
    if Cx0 != ci:
        x = jnp.pad(x, ((0, 0), (0, 0), (0, 0), (0, Cx0 - ci)))

    # --- preprocess CNN (prep()): fused conv+ReLU(+pool) Pallas kernels ---
    for (w, b), p in zip(conv_params, pools):
        x = conv3x3_pool(x, w, b, pool=p, relu=True)

    # --- flatten: fold PyTorch's NCHW-flatten permutation into w1's rows so
    # the NHWC feature map feeds the MLP directly (no feature-map transpose).
    Bx, Hf, Wf, Cp = x.shape
    ch3 = conv_params[-1][0].shape[1]
    w1, b1 = lin_params[0]
    assert w1.shape[0] == ch3 * Hf * Wf, "hid mismatch with conv output"
    w1p = jnp.transpose(w1.reshape(ch3, Hf, Wf, w1.shape[1]), (1, 2, 0, 3))
    if Cp != ch3:
        w1p = jnp.pad(w1p, ((0, 0), (0, 0), (0, Cp - ch3), (0, 0)))
    w1p = w1p.reshape(Hf * Wf * Cp, w1.shape[1])
    flat = x.reshape(B, Hf * Wf * Cp)

    prep_out = mlp_head(flat, ((w1p, b1), lin_params[1], lin_params[2]))
    prep_out = prep_out.reshape(B, glimpses, 3)

    # --- reinforce head: transform_sigmas / Normal sample / transform_means ---
    means_raw = prep_out[:, :, :2]                # (B, G, 2)
    sigmas_raw = prep_out[:, :, 2]                # (B, G)
    size_hw = jnp.array([hi, wi], jnp.float32)
    sigmas = (jax.nn.softplus(sigmas_raw + SIGMA_BOOST) + EPSILON)[:, :, None] * size_hw

    noise = jax.random.normal(sample_key, means_raw.shape, jnp.float32)
    sample = means_raw + sigmas * noise           # Normal(means, sigmas).sample()

    # (size - 1) scaling matches sparse.transform_means' convention.
    mean_scale = jnp.array([hi - hg, wi - wg], jnp.float32) - 1.0
    point = jnp.round(jax.nn.sigmoid(sample) * mean_scale).astype(jnp.int32)

    # --- glimpse extraction: batched dynamic slices ---
    # TODO(synk): replace with a Pallas scalar-prefetch gather (point table in
    # SMEM, per-glimpse DMA) once B*glimpses is large enough to matter.
    def _extract_one(img, pt):
        return jax.lax.dynamic_slice(img, (0, pt[0], pt[1]), (ci, hg, wg))

    extract = jax.vmap(jax.vmap(_extract_one, in_axes=(None, 0)), in_axes=(0, 0))
    result = extract(image_nchw, point)           # (B, G, C, hg, wg)

    # stoch_means (a torch Normal) is returned as its (loc, scale) parameters.
    return result, (means_raw, sigmas), sample


# ----------------------------------------------------------------------------
if __name__ == "__main__":
    B = 2
    in_shape = (4, 16, 16)         # (ci, hi, wi)
    glimpses = 2
    glimpse_size = (4, 4)
    pool = 2                       # pool=2 so a 16x16 input survives all 4 pooling stages

    key = jax.random.PRNGKey(0)
    k_img, k_par, k_smp = jax.random.split(key, 3)

    image = jax.random.normal(k_img, (B,) + in_shape, jnp.float32)
    params, hid = init_params(k_par, *in_shape, glimpses, pool)

    fwd = jax.jit(functools.partial(
        reinforce_forward, in_shape=in_shape, glimpses=glimpses,
        glimpse_size=glimpse_size, pool=pool))

    result, (means, sigmas), sample = fwd(params, image, k_smp)

    jax.block_until_ready(result)
    jax.block_until_ready(sample)

    assert result.shape == (B, glimpses, in_shape[0], glimpse_size[0], glimpse_size[1])
    assert means.shape == (B, glimpses, 2)
    assert sigmas.shape == (B, glimpses, 2)
    assert sample.shape == (B, glimpses, 2)
    assert bool(jnp.all(jnp.isfinite(sample)))
    assert bool(jnp.all(jnp.isfinite(result)))
    print("KERNEL_OK")
</pallas_src>

<mosaic_0001>
module attributes {stable_mosaic.version = 11 : i64} {
  func.func @_conv3x3_pool_kernel(%arg0: i32, %arg1: memref<1x16x16x128xbf16, #tpu.memory_space<vmem>>, %arg2: memref<9x128x128xbf16, #tpu.memory_space<vmem>>, %arg3: memref<1x128xf32, #tpu.memory_space<vmem>>, %arg4: memref<1x8x1024xbf16, #tpu.memory_space<vmem>>, %arg5: memref<18x18x128xbf16, #tpu.memory_space<vmem>>) attributes {dimension_semantics = [#tpu.dimension_semantics<parallel>], iteration_bounds = array<i64: 2>, scalar_prefetch = 0 : i64, scratch_operands = 1 : i64, tpu.core_type = #tpu.core_type<tc>, window_params = [{transform_indices = @transform_0, window_bounds = array<i64: 1, 16, 16, 128>}, {pipeline_mode = #tpu.pipeline_mode<synchronous>, transform_indices = @transform_1, window_bounds = array<i64: 9, 128, 128>}, {pipeline_mode = #tpu.pipeline_mode<synchronous>, transform_indices = @transform_2, window_bounds = array<i64: 1, 128>}, {transform_indices = @transform_3, window_bounds = array<i64: 1, 8, 1024>}]} {
    %cst = arith.constant 0.000000e+00 : bf16
    %0 = vector.broadcast %cst : bf16 to vector<18x18x128xbf16>
    %c0 = arith.constant 0 : index
    %c0_0 = arith.constant 0 : index
    %c0_1 = arith.constant 0 : index
    %1 = vector.load %arg5[%c0, %c0_0, %c0_1] : memref<18x18x128xbf16, #tpu.memory_space<vmem>>, vector<18x18x128xbf16>
    tpu.vector_store %arg5[%c0, %c0_0, %c0_1], %0 {strides = array<i32>} : memref<18x18x128xbf16, #tpu.memory_space<vmem>>, vector<18x18x128xbf16>,
    %c0_2 = arith.constant 0 : index
    %c0_3 = arith.constant 0 : index
    %c0_4 = arith.constant 0 : index
    %c0_5 = arith.constant 0 : index
    %2 = vector.load %arg1[%c0_2, %c0_3, %c0_4, %c0_5] : memref<1x16x16x128xbf16, #tpu.memory_space<vmem>>, vector<1x16x16x128xbf16>
    %3 = vector.shape_cast %2 : vector<1x16x16x128xbf16> to vector<16x16x128xbf16>
    %c1 = arith.constant 1 : index
    %c1_6 = arith.constant 1 : index
    %c0_7 = arith.constant 0 : index
    %4 = vector.load %arg5[%c1, %c1_6, %c0_7] : memref<18x18x128xbf16, #tpu.memory_space<vmem>>, vector<16x16x128xbf16>
    tpu.vector_store %arg5[%c1, %c1_6, %c0_7], %3 {strides = array<i32>} : memref<18x18x128xbf16, #tpu.memory_space<vmem>>, vector<16x16x128xbf16>,
    %c0_8 = arith.constant 0 : index
    %c0_9 = arith.constant 0 : index
    %c0_10 = arith.constant 0 : index
    %5 = vector.load %arg5[%c0_8, %c0_9, %c0_10] : memref<18x18x128xbf16, #tpu.memory_space<vmem>>, vector<16x16x128xbf16>
    %6 = vector.shape_cast %5 : vector<16x16x128xbf16> to vector<256x128xbf16>
    %c0_11 = arith.constant 0 : index
    %c0_12 = arith.constant 0 : index
    %c0_13 = arith.constant 0 : index
    %7 = vector.load %arg2[%c0_11, %c0_12, %c0_13] : memref<9x128x128xbf16, #tpu.memory_space<vmem>>, vector<1x128x128xbf16>
    %8 = vector.shape_cast %7 : vector<1x128x128xbf16> to vector<128x128xbf16>
    %cst_14 = arith.constant dense<0.000000e+00> : vector<256x128xf32>
    %9 = tpu.matmul %6, %8, %cst_14 {dimension_numbers = #tpu.dot_dimension_numbers<[1], [0], [0], [1], [0, 0, 1, 1], [], []>} : vector<256x128xbf16>, vector<128x128xbf16>, vector<256x128xf32> -> vector<256x128xf32>
    %c0_15 = arith.constant 0 : index
    %c1_16 = arith.constant 1 : index
    %c0_17 = arith.constant 0 : index
    %10 = vector.load %arg5[%c0_15, %c1_16, %c0_17] : memref<18x18x128xbf16, #tpu.memory_space<vmem>>, vector<16x16x128xbf16>
    %11 = vector.shape_cast %10 : vector<16x16x128xbf16> to vector<256x128xbf16>
    %c1_18 = arith.constant 1 : index
    %c0_19 = arith.constant 0 : index
    %c0_20 = arith.constant 0 : index
    %12 = vector.load %arg2[%c1_18, %c0_19, %c0_20] : memref<9x128x128xbf16, #tpu.memory_space<vmem>>, vector<1x128x128xbf16>
    %13 = vector.shape_cast %12 : vector<1x128x128xbf16> to vector<128x128xbf16>
    %cst_21 = arith.constant dense<0.000000e+00> : vector<256x128xf32>
    %14 = tpu.matmul %11, %13, %cst_21 {dimension_numbers = #tpu.dot_dimension_numbers<[1], [0], [0], [1], [0, 0, 1, 1], [], []>} : vector<256x128xbf16>, vector<128x128xbf16>, vector<256x128xf32> -> vector<256x128xf32>
    %15 = arith.addf %9, %14 : vector<256x128xf32>
    %c0_22 = arith.constant 0 : index
    %c2 = arith.constant 2 : index
    %c0_23 = arith.constant 0 : index
    %16 = vector.load %arg5[%c0_22, %c2, %c0_23] : memref<18x18x128xbf16, #tpu.memory_space<vmem>>, vector<16x16x128xbf16>
    %17 = vector.shape_cast %16 : vector<16x16x128xbf16> to vector<256x128xbf16>
    %c2_24 = arith.constant 2 : index
    %c0_25 = arith.constant 0 : index
    %c0_26 = arith.constant 0 : index
    %18 = vector.load %arg2[%c2_24, %c0_25, %c0_26] : memref<9x128x128xbf16, #tpu.memory_space<vmem>>, vector<1x128x128xbf16>
    %19 = vector.shape_cast %18 : vector<1x128x128xbf16> to vector<128x128xbf16>
    %cst_27 = arith.constant dense<0.000000e+00> : vector<256x128xf32>
    %20 = tpu.matmul %17, %19, %cst_27 {dimension_numbers = #tpu.dot_dimension_numbers<[1], [0], [0], [1], [0, 0, 1, 1], [], []>} : vector<256x128xbf16>, vector<128x128xbf16>, vector<256x128xf32> -> vector<256x128xf32>
    %21 = arith.addf %15, %20 : vector<256x128xf32>
    %c1_28 = arith.constant 1 : index
    %c0_29 = arith.constant 0 : index
    %c0_30 = arith.constant 0 : index
    %22 = vector.load %arg5[%c1_28, %c0_29, %c0_30] : memref<18x18x128xbf16, #tpu.memory_space<vmem>>, vector<16x16x128xbf16>
    %23 = vector.shape_cast %22 : vector<16x16x128xbf16> to vector<256x128xbf16>
    %c3 = arith.constant 3 : index
    %c0_31 = arith.constant 0 : index
    %c0_32 = arith.constant 0 : index
    %24 = vector.load %arg2[%c3, %c0_31, %c0_32] : memref<9x128x128xbf16, #tpu.memory_space<vmem>>, vector<1x128x128xbf16>
    %25 = vector.shape_cast %24 : vector<1x128x128xbf16> to vector<128x128xbf16>
    %cst_33 = arith.constant dense<0.000000e+00> : vector<256x128xf32>
    %26 = tpu.matmul %23, %25, %cst_33 {dimension_numbers = #tpu.dot_dimension_numbers<[1], [0], [0], [1], [0, 0, 1, 1], [], []>} : vector<256x128xbf16>, vector<128x128xbf16>, vector<256x128xf32> -> vector<256x128xf32>
    %27 = arith.addf %21, %26 : vector<256x128xf32>
    %c1_34 = arith.constant 1 : index
    %c1_35 = arith.constant 1 : index
    %c0_36 = arith.constant 0 : index
    %28 = vector.load %arg5[%c1_34, %c1_35, %c0_36] : memref<18x18x128xbf16, #tpu.memory_space<vmem>>, vector<16x16x128xbf16>
    %29 = vector.shape_cast %28 : vector<16x16x128xbf16> to vector<256x128xbf16>
    %c4 = arith.constant 4 : index
    %c0_37 = arith.constant 0 : index
    %c0_38 = arith.constant 0 : index
    %30 = vector.load %arg2[%c4, %c0_37, %c0_38] : memref<9x128x128xbf16, #tpu.memory_space<vmem>>, vector<1x128x128xbf16>
    %31 = vector.shape_cast %30 : vector<1x128x128xbf16> to vector<128x128xbf16>
    %cst_39 = arith.constant dense<0.000000e+00> : vector<256x128xf32>
    %32 = tpu.matmul %29, %31, %cst_39 {dimension_numbers = #tpu.dot_dimension_numbers<[1], [0], [0], [1], [0, 0, 1, 1], [], []>} : vector<256x128xbf16>, vector<128x128xbf16>, vector<256x128xf32> -> vector<256x128xf32>
    %33 = arith.addf %27, %32 : vector<256x128xf32>
    %c1_40 = arith.constant 1 : index
    %c2_41 = arith.constant 2 : index
    %c0_42 = arith.constant 0 : index
    %34 = vector.load %arg5[%c1_40, %c2_41, %c0_42] : memref<18x18x128xbf16, #tpu.memory_space<vmem>>, vector<16x16x128xbf16>
    %35 = vector.shape_cast %34 : vector<16x16x128xbf16> to vector<256x128xbf16>
    %c5 = arith.constant 5 : index
    %c0_43 = arith.constant 0 : index
    %c0_44 = arith.constant 0 : index
    %36 = vector.load %arg2[%c5, %c0_43, %c0_44] : memref<9x128x128xbf16, #tpu.memory_space<vmem>>, vector<1x128x128xbf16>
    %37 = vector.shape_cast %36 : vector<1x128x128xbf16> to vector<128x128xbf16>
    %cst_45 = arith.constant dense<0.000000e+00> : vector<256x128xf32>
    %38 = tpu.matmul %35, %37, %cst_45 {dimension_numbers = #tpu.dot_dimension_numbers<[1], [0], [0], [1], [0, 0, 1, 1], [], []>} : vector<256x128xbf16>, vector<128x128xbf16>, vector<256x128xf32> -> vector<256x128xf32>
    %39 = arith.addf %33, %38 : vector<256x128xf32>
    %c2_46 = arith.constant 2 : index
    %c0_47 = arith.constant 0 : index
    %c0_48 = arith.constant 0 : index
    %40 = vector.load %arg5[%c2_46, %c0_47, %c0_48] : memref<18x18x128xbf16, #tpu.memory_space<vmem>>, vector<16x16x128xbf16>
    %41 = vector.shape_cast %40 : vector<16x16x128xbf16> to vector<256x128xbf16>
    %c6 = arith.constant 6 : index
    %c0_49 = arith.constant 0 : index
    %c0_50 = arith.constant 0 : index
    %42 = vector.load %arg2[%c6, %c0_49, %c0_50] : memref<9x128x128xbf16, #tpu.memory_space<vmem>>, vector<1x128x128xbf16>
    %43 = vector.shape_cast %42 : vector<1x128x128xbf16> to vector<128x128xbf16>
    %cst_51 = arith.constant dense<0.000000e+00> : vector<256x128xf32>
    %44 = tpu.matmul %41, %43, %cst_51 {dimension_numbers = #tpu.dot_dimension_numbers<[1], [0], [0], [1], [0, 0, 1, 1], [], []>} : vector<256x128xbf16>, vector<128x128xbf16>, vector<256x128xf32> -> vector<256x128xf32>
    %45 = arith.addf %39, %44 : vector<256x128xf32>
    %c2_52 = arith.constant 2 : index
    %c1_53 = arith.constant 1 : index
    %c0_54 = arith.constant 0 : index
    %46 = vector.load %arg5[%c2_52, %c1_53, %c0_54] : memref<18x18x128xbf16, #tpu.memory_space<vmem>>, vector<16x16x128xbf16>
    %47 = vector.shape_cast %46 : vector<16x16x128xbf16> to vector<256x128xbf16>
    %c7 = arith.constant 7 : index
    %c0_55 = arith.constant 0 : index
    %c0_56 = arith.constant 0 : index
    %48 = vector.load %arg2[%c7, %c0_55, %c0_56] : memref<9x128x128xbf16, #tpu.memory_space<vmem>>, vector<1x128x128xbf16>
    %49 = vector.shape_cast %48 : vector<1x128x128xbf16> to vector<128x128xbf16>
    %cst_57 = arith.constant dense<0.000000e+00> : vector<256x128xf32>
    %50 = tpu.matmul %47, %49, %cst_57 {dimension_numbers = #tpu.dot_dimension_numbers<[1], [0], [0], [1], [0, 0, 1, 1], [], []>} : vector<256x128xbf16>, vector<128x128xbf16>, vector<256x128xf32> -> vector<256x128xf32>
    %51 = arith.addf %45, %50 : vector<256x128xf32>
    %c2_58 = arith.constant 2 : index
    %c2_59 = arith.constant 2 : index
    %c0_60 = arith.constant 0 : index
    %52 = vector.load %arg5[%c2_58, %c2_59, %c0_60] : memref<18x18x128xbf16, #tpu.memory_space<vmem>>, vector<16x16x128xbf16>
    %53 = vector.shape_cast %52 : vector<16x16x128xbf16> to vector<256x128xbf16>
    %c8 = arith.constant 8 : index
    %c0_61 = arith.constant 0 : index
    %c0_62 = arith.constant 0 : index
    %54 = vector.load %arg2[%c8, %c0_61, %c0_62] : memref<9x128x128xbf16, #tpu.memory_space<vmem>>, vector<1x128x128xbf16>
    %55 = vector.shape_cast %54 : vector<1x128x128xbf16> to vector<128x128xbf16>
    %cst_63 = arith.constant dense<0.000000e+00> : vector<256x128xf32>
    %56 = tpu.matmul %53, %55, %cst_63 {dimension_numbers = #tpu.dot_dimension_numbers<[1], [0], [0], [1], [0, 0, 1, 1], [], []>} : vector<256x128xbf16>, vector<128x128xbf16>, vector<256x128xf32> -> vector<256x128xf32>
    %57 = arith.addf %51, %56 : vector<256x128xf32>
    %c0_64 = arith.constant 0 : index
    %c0_65 = arith.constant 0 : index
    %58 = vector.load %arg3[%c0_64, %c0_65] : memref<1x128xf32, #tpu.memory_space<vmem>>, vector<1x128xf32>
    %59 = vector.broadcast %58 : vector<1x128xf32> to vector<256x128xf32>
    %60 = arith.addf %57, %59 : vector<256x128xf32>
    %cst_66 = arith.constant 0.000000e+00 : f32
    %61 = vector.broadcast %cst_66 : f32 to vector<256x128xf32>
    %62 = arith.maximumf %60, %61 : vector<256x128xf32>
    %63 = vector.shape_cast %62 : vector<256x128xf32> to vector<16x16x128xf32>
    %64 = vector.extract_strided_slice %63 {offsets = [0, 0, 0], sizes = [16, 2, 128], strides = [1, 1, 1]} : vector<16x16x128xf32> to vector<16x2x128xf32>
    %65 = vector.shape_cast %64 : vector<16x2x128xf32> to vector<8x2x2x128xf32>
    %66 = vector.extract_strided_slice %65 {offsets = [0, 0, 0, 0], sizes = [8, 1, 2, 128], strides = [1, 1, 1, 1]} : vector<8x2x2x128xf32> to vector<8x1x2x128xf32>
    %67 = vector.shape_cast %66 : vector<8x1x2x128xf32> to vector<8x2x128xf32>
    %68 = vector.extract_strided_slice %65 {offsets = [0, 1, 0, 0], sizes = [8, 1, 2, 128], strides = [1, 1, 1, 1]} : vector<8x2x2x128xf32> to vector<8x1x2x128xf32>
    %69 = vector.shape_cast %68 : vector<8x1x2x128xf32> to vector<8x2x128xf32>
    %70 = arith.maximumf %67, %69 : vector<8x2x128xf32>
    %cst_67 = arith.constant dense<0xFF800000> : vector<8x128xf32>
    %71 = vector.multi_reduction <maximumf>, %70, %cst_67 [1] : vector<8x2x128xf32> to vector<8x128xf32>
    %72 = vector.extract_strided_slice %63 {offsets = [0, 2, 0], sizes = [16, 2, 128], strides = [1, 1, 1]} : vector<16x16x128xf32> to vector<16x2x128xf32>
    %73 = vector.shape_cast %72 : vector<16x2x128xf32> to vector<8x2x2x128xf32>
    %74 = vector.extract_strided_slice %73 {offsets = [0, 0, 0, 0], sizes = [8, 1, 2, 128], strides = [1, 1, 1, 1]} : vector<8x2x2x128xf32> to vector<8x1x2x128xf32>
    %75 = vector.shape_cast %74 : vector<8x1x2x128xf32> to vector<8x2x128xf32>
    %76 = vector.extract_strided_slice %73 {offsets = [0, 1, 0, 0], sizes = [8, 1, 2, 128], strides = [1, 1, 1, 1]} : vector<8x2x2x128xf32> to vector<8x1x2x128xf32>
    %77 = vector.shape_cast %76 : vector<8x1x2x128xf32> to vector<8x2x128xf32>
    %78 = arith.maximumf %75, %77 : vector<8x2x128xf32>
    %cst_68 = arith.constant dense<0xFF800000> : vector<8x128xf32>
    %79 = vector.multi_reduction <maximumf>, %78, %cst_68 [1] : vector<8x2x128xf32> to vector<8x128xf32>
    %80 = vector.extract_strided_slice %63 {offsets = [0, 4, 0], sizes = [16, 2, 128], strides = [1, 1, 1]} : vector<16x16x128xf32> to vector<16x2x128xf32>
    %81 = vector.shape_cast %80 : vector<16x2x128xf32> to vector<8x2x2x128xf32>
    %82 = vector.extract_strided_slice %81 {offsets = [0, 0, 0, 0], sizes = [8, 1, 2, 128], strides = [1, 1, 1, 1]} : vector<8x2x2x128xf32> to vector<8x1x2x128xf32>
    %83 = vector.shape_cast %82 : vector<8x1x2x128xf32> to vector<8x2x128xf32>
    %84 = vector.extract_strided_slice %81 {offsets = [0, 1, 0, 0], sizes = [8, 1, 2, 128], strides = [1, 1, 1, 1]} : vector<8x2x2x128xf32> to vector<8x1x2x128xf32>
    %85 = vector.shape_cast %84 : vector<8x1x2x128xf32> to vector<8x2x128xf32>
    %86 = arith.maximumf %83, %85 : vector<8x2x128xf32>
    %cst_69 = arith.constant dense<0xFF800000> : vector<8x128xf32>
    %87 = vector.multi_reduction <maximumf>, %86, %cst_69 [1] : vector<8x2x128xf32> to vector<8x128xf32>
    %88 = vector.extract_strided_slice %63 {offsets = [0, 6, 0], sizes = [16, 2, 128], strides = [1, 1, 1]} : vector<16x16x128xf32> to vector<16x2x128xf32>
    %89 = vector.shape_cast %88 : vector<16x2x128xf32> to vector<8x2x2x128xf32>
    %90 = vector.extract_strided_slice %89 {offsets = [0, 0, 0, 0], sizes = [8, 1, 2, 128], strides = [1, 1, 1, 1]} : vector<8x2x2x128xf32> to vector<8x1x2x128xf32>
    %91 = vector.shape_cast %90 : vector<8x1x2x128xf32> to vector<8x2x128xf32>
    %92 = vector.extract_strided_slice %89 {offsets = [0, 1, 0, 0], sizes = [8, 1, 2, 128], strides = [1, 1, 1, 1]} : vector<8x2x2x128xf32> to vector<8x1x2x128xf32>
    %93 = vector.shape_cast %92 : vector<8x1x2x128xf32> to vector<8x2x128xf32>
    %94 = arith.maximumf %91, %93 : vector<8x2x128xf32>
    %cst_70 = arith.constant dense<0xFF800000> : vector<8x128xf32>
    %95 = vector.multi_reduction <maximumf>, %94, %cst_70 [1] : vector<8x2x128xf32> to vector<8x128xf32>
    %96 = vector.extract_strided_slice %63 {offsets = [0, 8, 0], sizes = [16, 2, 128], strides = [1, 1, 1]} : vector<16x16x128xf32> to vector<16x2x128xf32>
    %97 = vector.shape_cast %96 : vector<16x2x128xf32> to vector<8x2x2x128xf32>
    %98 = vector.extract_strided_slice %97 {offsets = [0, 0, 0, 0], sizes = [8, 1, 2, 128], strides = [1, 1, 1, 1]} : vector<8x2x2x128xf32> to vector<8x1x2x128xf32>
    %99 = vector.shape_cast %98 : vector<8x1x2x128xf32> to vector<8x2x128xf32>
    %100 = vector.extract_strided_slice %97 {offsets = [0, 1, 0, 0], sizes = [8, 1, 2, 128], strides = [1, 1, 1, 1]} : vector<8x2x2x128xf32> to vector<8x1x2x128xf32>
    %101 = vector.shape_cast %100 : vector<8x1x2x128xf32> to vector<8x2x128xf32>
    %102 = arith.maximumf %99, %101 : vector<8x2x128xf32>
    %cst_71 = arith.constant dense<0xFF800000> : vector<8x128xf32>
    %103 = vector.multi_reduction <maximumf>, %102, %cst_71 [1] : vector<8x2x128xf32> to vector<8x128xf32>
    %104 = vector.extract_strided_slice %63 {offsets = [0, 10, 0], sizes = [16, 2, 128], strides = [1, 1, 1]} : vector<16x16x128xf32> to vector<16x2x128xf32>
    %105 = vector.shape_cast %104 : vector<16x2x128xf32> to vector<8x2x2x128xf32>
    %106 = vector.extract_strided_slice %105 {offsets = [0, 0, 0, 0], sizes = [8, 1, 2, 128], strides = [1, 1, 1, 1]} : vector<8x2x2x128xf32> to vector<8x1x2x128xf32>
    %107 = vector.shape_cast %106 : vector<8x1x2x128xf32> to vector<8x2x128xf32>
    %108 = vector.extract_strided_slice %105 {offsets = [0, 1, 0, 0], sizes = [8, 1, 2, 128], strides = [1, 1, 1, 1]} : vector<8x2x2x128xf32> to vector<8x1x2x128xf32>
    %109 = vector.shape_cast %108 : vector<8x1x2x128xf32> to vector<8x2x128xf32>
    %110 = arith.maximumf %107, %109 : vector<8x2x128xf32>
    %cst_72 = arith.constant dense<0xFF800000> : vector<8x128xf32>
    %111 = vector.multi_reduction <maximumf>, %110, %cst_72 [1] : vector<8x2x128xf32> to vector<8x128xf32>
    %112 = vector.extract_strided_slice %63 {offsets = [0, 12, 0], sizes = [16, 2, 128], strides = [1, 1, 1]} : vector<16x16x128xf32> to vector<16x2x128xf32>
    %113 = vector.shape_cast %112 : vector<16x2x128xf32> to vector<8x2x2x128xf32>
    %114 = vector.extract_strided_slice %113 {offsets = [0, 0, 0, 0], sizes = [8, 1, 2, 128], strides = [1, 1, 1, 1]} : vector<8x2x2x128xf32> to vector<8x1x2x128xf32>
    %115 = vector.shape_cast %114 : vector<8x1x2x128xf32> to vector<8x2x128xf32>
    %116 = vector.extract_strided_slice %113 {offsets = [0, 1, 0, 0], sizes = [8, 1, 2, 128], strides = [1, 1, 1, 1]} : vector<8x2x2x128xf32> to vector<8x1x2x128xf32>
    %117 = vector.shape_cast %116 : vector<8x1x2x128xf32> to vector<8x2x128xf32>
    %118 = arith.maximumf %115, %117 : vector<8x2x128xf32>
    %cst_73 = arith.constant dense<0xFF800000> : vector<8x128xf32>
    %119 = vector.multi_reduction <maximumf>, %118, %cst_73 [1] : vector<8x2x128xf32> to vector<8x128xf32>
    %120 = vector.extract_strided_slice %63 {offsets = [0, 14, 0], sizes = [16, 2, 128], strides = [1, 1, 1]} : vector<16x16x128xf32> to vector<16x2x128xf32>
    %121 = vector.shape_cast %120 : vector<16x2x128xf32> to vector<8x2x2x128xf32>
    %122 = vector.extract_strided_slice %121 {offsets = [0, 0, 0, 0], sizes = [8, 1, 2, 128], strides = [1, 1, 1, 1]} : vector<8x2x2x128xf32> to vector<8x1x2x128xf32>
    %123 = vector.shape_cast %122 : vector<8x1x2x128xf32> to vector<8x2x128xf32>
    %124 = vector.extract_strided_slice %121 {offsets = [0, 1, 0, 0], sizes = [8, 1, 2, 128], strides = [1, 1, 1, 1]} : vector<8x2x2x128xf32> to vector<8x1x2x128xf32>
    %125 = vector.shape_cast %124 : vector<8x1x2x128xf32> to vector<8x2x128xf32>
    %126 = arith.maximumf %123, %125 : vector<8x2x128xf32>
    %cst_74 = arith.constant dense<0xFF800000> : vector<8x128xf32>
    %127 = vector.multi_reduction <maximumf>, %126, %cst_74 [1] : vector<8x2x128xf32> to vector<8x128xf32>
    %128 = tpu.concatenate %71, %79, %87, %95, %103, %111, %119, %127 in 1 : vector<8x128xf32>, vector<8x128xf32>, vector<8x128xf32>, vector<8x128xf32>, vector<8x128xf32>, vector<8x128xf32>, vector<8x128xf32>, vector<8x128xf32> -> vector<8x1024xf32>
    %129 = arith.truncf %128 : vector<8x1024xf32> to vector<8x1024xbf16>
    %c0_75 = arith.constant 0 : index
    %c0_76 = arith.constant 0 : index
    %c0_77 = arith.constant 0 : index
    %130 = vector.load %arg4[%c0_75, %c0_76, %c0_77] : memref<1x8x1024xbf16, #tpu.memory_space<vmem>>, vector<1x8x1024xbf16>
    %131 = vector.shape_cast %130 : vector<1x8x1024xbf16> to vector<8x1024xbf16>
    %132 = vector.shape_cast %129 : vector<8x1024xbf16> to vector<1x8x1024xbf16>
    tpu.vector_store %arg4[%c0_75, %c0_76, %c0_77], %132 {strides = array<i32>} : memref<1x8x1024xbf16, #tpu.memory_space<vmem>>, vector<1x8x1024xbf16>,
    return
  }
  func.func @transform_0(%arg0: i32) -> (i32, i32, i32, i32) {
    %c0_i32 = arith.constant 0 : i32
    %c0_i32_0 = arith.constant 0 : i32
    %c0_i32_1 = arith.constant 0 : i32
    %c0_i32_2 = arith.constant 0 : i32
    return %arg0, %c0_i32, %c0_i32_0, %c0_i32_1 : i32, i32, i32, i32
  }
  func.func @transform_1(%arg0: i32) -> (i32, i32, i32) {
    %c0_i32 = arith.constant 0 : i32
    %c0_i32_0 = arith.constant 0 : i32
    %c0_i32_1 = arith.constant 0 : i32
    %c0_i32_2 = arith.constant 0 : i32
    return %c0_i32, %c0_i32_0, %c0_i32_1 : i32, i32, i32
  }
  func.func @transform_2(%arg0: i32) -> (i32, i32) {
    %c0_i32 = arith.constant 0 : i32
    %c0_i32_0 = arith.constant 0 : i32
    %c0_i32_1 = arith.constant 0 : i32
    return %c0_i32, %c0_i32_0 : i32, i32
  }
  func.func @transform_3(%arg0: i32) -> (i32, i32, i32) {
    %c0_i32 = arith.constant 0 : i32
    %c0_i32_0 = arith.constant 0 : i32
    %c0_i32_1 = arith.constant 0 : i32
    return %arg0, %c0_i32, %c0_i32_0 : i32, i32, i32
  }
}

module attributes {stable_mosaic.version = 11 : i64} {
  func.func @_conv3x3_pool_kernel(%arg0: i32, %arg1: memref<1x8x8x128xbf16, #tpu.memory_space<vmem>>, %arg2: memref<9x128x128xbf16, #tpu.memory_space<vmem>>, %arg3: memref<1x128xf32, #tpu.memory_space<vmem>>, %arg4: memref<1x4x512xbf16, #tpu.memory_space<vmem>>, %arg5: memref<10x10x128xbf16, #tpu.memory_space<vmem>>) attributes {dimension_semantics = [#tpu.dimension_semantics<parallel>], iteration_bounds = array<i64: 2>, scalar_prefetch = 0 : i64, scratch_operands = 1 : i64, tpu.core_type = #tpu.core_type<tc>, window_params = [{transform_indices = @transform_0, window_bounds = array<i64: 1, 8, 8, 128>}, {pipeline_mode = #tpu.pipeline_mode<synchronous>, transform_indices = @transform_1, window_bounds = array<i64: 9, 128, 128>}, {pipeline_mode = #tpu.pipeline_mode<synchronous>, transform_indices = @transform_2, window_bounds = array<i64: 1, 128>}, {transform_indices = @transform_3, window_bounds = array<i64: 1, 4, 512>}]} {
    %cst = arith.constant 0.000000e+00 : bf16
    %0 = vector.broadcast %cst : bf16 to vector<10x10x128xbf16>
    %c0 = arith.constant 0 : index
    %c0_0 = arith.constant 0 : index
    %c0_1 = arith.constant 0 : index
    %1 = vector.load %arg5[%c0, %c0_0, %c0_1] : memref<10x10x128xbf16, #tpu.memory_space<vmem>>, vector<10x10x128xbf16>
    tpu.vector_store %arg5[%c0, %c0_0, %c0_1], %0 {strides = array<i32>} : memref<10x10x128xbf16, #tpu.memory_space<vmem>>, vector<10x10x128xbf16>,
    %c0_2 = arith.constant 0 : index
    %c0_3 = arith.constant 0 : index
    %c0_4 = arith.constant 0 : index
    %c0_5 = arith.constant 0 : index
    %2 = vector.load %arg1[%c0_2, %c0_3, %c0_4, %c0_5] : memref<1x8x8x128xbf16, #tpu.memory_space<vmem>>, vector<1x8x8x128xbf16>
    %3 = vector.shape_cast %2 : vector<1x8x8x128xbf16> to vector<8x8x128xbf16>
    %c1 = arith.constant 1 : index
    %c1_6 = arith.constant 1 : index
    %c0_7 = arith.constant 0 : index
    %4 = vector.load %arg5[%c1, %c1_6, %c0_7] : memref<10x10x128xbf16, #tpu.memory_space<vmem>>, vector<8x8x128xbf16>
    tpu.vector_store %arg5[%c1, %c1_6, %c0_7], %3 {strides = array<i32>} : memref<10x10x128xbf16, #tpu.memory_space<vmem>>, vector<8x8x128xbf16>,
    %c0_8 = arith.constant 0 : index
    %c0_9 = arith.constant 0 : index
    %c0_10 = arith.constant 0 : index
    %5 = vector.load %arg5[%c0_8, %c0_9, %c0_10] : memref<10x10x128xbf16, #tpu.memory_space<vmem>>, vector<8x8x128xbf16>
    %6 = vector.shape_cast %5 : vector<8x8x128xbf16> to vector<64x128xbf16>
    %c0_11 = arith.constant 0 : index
    %c0_12 = arith.constant 0 : index
    %c0_13 = arith.constant 0 : index
    %7 = vector.load %arg2[%c0_11, %c0_12, %c0_13] : memref<9x128x128xbf16, #tpu.memory_space<vmem>>, vector<1x128x128xbf16>
    %8 = vector.shape_cast %7 : vector<1x128x128xbf16> to vector<128x128xbf16>
    %cst_14 = arith.constant dense<0.000000e+00> : vector<64x128xf32>
    %9 = tpu.matmul %6, %8, %cst_14 {dimension_numbers = #tpu.dot_dimension_numbers<[1], [0], [0], [1], [0, 0, 1, 1], [], []>} : vector<64x128xbf16>, vector<128x128xbf16>, vector<64x128xf32> -> vector<64x128xf32>
    %c0_15 = arith.constant 0 : index
    %c1_16 = arith.constant 1 : index
    %c0_17 = arith.constant 0 : index
    %10 = vector.load %arg5[%c0_15, %c1_16, %c0_17] : memref<10x10x128xbf16, #tpu.memory_space<vmem>>, vector<8x8x128xbf16>
    %11 = vector.shape_cast %10 : vector<8x8x128xbf16> to vector<64x128xbf16>
    %c1_18 = arith.constant 1 : index
    %c0_19 = arith.constant 0 : index
    %c0_20 = arith.constant 0 : index
    %12 = vector.load %arg2[%c1_18, %c0_19, %c0_20] : memref<9x128x128xbf16, #tpu.memory_space<vmem>>, vector<1x128x128xbf16>
    %13 = vector.shape_cast %12 : vector<1x128x128xbf16> to vector<128x128xbf16>
    %cst_21 = arith.constant dense<0.000000e+00> : vector<64x128xf32>
    %14 = tpu.matmul %11, %13, %cst_21 {dimension_numbers = #tpu.dot_dimension_numbers<[1], [0], [0], [1], [0, 0, 1, 1], [], []>} : vector<64x128xbf16>, vector<128x128xbf16>, vector<64x128xf32> -> vector<64x128xf32>
    %15 = arith.addf %9, %14 : vector<64x128xf32>
    %c0_22 = arith.constant 0 : index
    %c2 = arith.constant 2 : index
    %c0_23 = arith.constant 0 : index
    %16 = vector.load %arg5[%c0_22, %c2, %c0_23] : memref<10x10x128xbf16, #tpu.memory_space<vmem>>, vector<8x8x128xbf16>
    %17 = vector.shape_cast %16 : vector<8x8x128xbf16> to vector<64x128xbf16>
    %c2_24 = arith.constant 2 : index
    %c0_25 = arith.constant 0 : index
    %c0_26 = arith.constant 0 : index
    %18 = vector.load %arg2[%c2_24, %c0_25, %c0_26] : memref<9x128x128xbf16, #tpu.memory_space<vmem>>, vector<1x128x128xbf16>
    %19 = vector.shape_cast %18 : vector<1x128x128xbf16> to vector<128x128xbf16>
    %cst_27 = arith.constant dense<0.000000e+00> : vector<64x128xf32>
    %20 = tpu.matmul %17, %19, %cst_27 {dimension_numbers = #tpu.dot_dimension_numbers<[1], [0], [0], [1], [0, 0, 1, 1], [], []>} : vector<64x128xbf16>, vector<128x128xbf16>, vector<64x128xf32> -> vector<64x128xf32>
    %21 = arith.addf %15, %20 : vector<64x128xf32>
    %c1_28 = arith.constant 1 : index
    %c0_29 = arith.constant 0 : index
    %c0_30 = arith.constant 0 : index
    %22 = vector.load %arg5[%c1_28, %c0_29, %c0_30] : memref<10x10x128xbf16, #tpu.memory_space<vmem>>, vector<8x8x128xbf16>
    %23 = vector.shape_cast %22 : vector<8x8x128xbf16> to vector<64x128xbf16>
    %c3 = arith.constant 3 : index
    %c0_31 = arith.constant 0 : index
    %c0_32 = arith.constant 0 : index
    %24 = vector.load %arg2[%c3, %c0_31, %c0_32] : memref<9x128x128xbf16, #tpu.memory_space<vmem>>, vector<1x128x128xbf16>
    %25 = vector.shape_cast %24 : vector<1x128x128xbf16> to vector<128x128xbf16>
    %cst_33 = arith.constant dense<0.000000e+00> : vector<64x128xf32>
    %26 = tpu.matmul %23, %25, %cst_33 {dimension_numbers = #tpu.dot_dimension_numbers<[1], [0], [0], [1], [0, 0, 1, 1], [], []>} : vector<64x128xbf16>, vector<128x128xbf16>, vector<64x128xf32> -> vector<64x128xf32>
    %27 = arith.addf %21, %26 : vector<64x128xf32>
    %c1_34 = arith.constant 1 : index
    %c1_35 = arith.constant 1 : index
    %c0_36 = arith.constant 0 : index
    %28 = vector.load %arg5[%c1_34, %c1_35, %c0_36] : memref<10x10x128xbf16, #tpu.memory_space<vmem>>, vector<8x8x128xbf16>
    %29 = vector.shape_cast %28 : vector<8x8x128xbf16> to vector<64x128xbf16>
    %c4 = arith.constant 4 : index
    %c0_37 = arith.constant 0 : index
    %c0_38 = arith.constant 0 : index
    %30 = vector.load %arg2[%c4, %c0_37, %c0_38] : memref<9x128x128xbf16, #tpu.memory_space<vmem>>, vector<1x128x128xbf16>
    %31 = vector.shape_cast %30 : vector<1x128x128xbf16> to vector<128x128xbf16>
    %cst_39 = arith.constant dense<0.000000e+00> : vector<64x128xf32>
    %32 = tpu.matmul %29, %31, %cst_39 {dimension_numbers = #tpu.dot_dimension_numbers<[1], [0], [0], [1], [0, 0, 1, 1], [], []>} : vector<64x128xbf16>, vector<128x128xbf16>, vector<64x128xf32> -> vector<64x128xf32>
    %33 = arith.addf %27, %32 : vector<64x128xf32>
    %c1_40 = arith.constant 1 : index
    %c2_41 = arith.constant 2 : index
    %c0_42 = arith.constant 0 : index
    %34 = vector.load %arg5[%c1_40, %c2_41, %c0_42] : memref<10x10x128xbf16, #tpu.memory_space<vmem>>, vector<8x8x128xbf16>
    %35 = vector.shape_cast %34 : vector<8x8x128xbf16> to vector<64x128xbf16>
    %c5 = arith.constant 5 : index
    %c0_43 = arith.constant 0 : index
    %c0_44 = arith.constant 0 : index
    %36 = vector.load %arg2[%c5, %c0_43, %c0_44] : memref<9x128x128xbf16, #tpu.memory_space<vmem>>, vector<1x128x128xbf16>
    %37 = vector.shape_cast %36 : vector<1x128x128xbf16> to vector<128x128xbf16>
    %cst_45 = arith.constant dense<0.000000e+00> : vector<64x128xf32>
    %38 = tpu.matmul %35, %37, %cst_45 {dimension_numbers = #tpu.dot_dimension_numbers<[1], [0], [0], [1], [0, 0, 1, 1], [], []>} : vector<64x128xbf16>, vector<128x128xbf16>, vector<64x128xf32> -> vector<64x128xf32>
    %39 = arith.addf %33, %38 : vector<64x128xf32>
    %c2_46 = arith.constant 2 : index
    %c0_47 = arith.constant 0 : index
    %c0_48 = arith.constant 0 : index
    %40 = vector.load %arg5[%c2_46, %c0_47, %c0_48] : memref<10x10x128xbf16, #tpu.memory_space<vmem>>, vector<8x8x128xbf16>
    %41 = vector.shape_cast %40 : vector<8x8x128xbf16> to vector<64x128xbf16>
    %c6 = arith.constant 6 : index
    %c0_49 = arith.constant 0 : index
    %c0_50 = arith.constant 0 : index
    %42 = vector.load %arg2[%c6, %c0_49, %c0_50] : memref<9x128x128xbf16, #tpu.memory_space<vmem>>, vector<1x128x128xbf16>
    %43 = vector.shape_cast %42 : vector<1x128x128xbf16> to vector<128x128xbf16>
    %cst_51 = arith.constant dense<0.000000e+00> : vector<64x128xf32>
    %44 = tpu.matmul %41, %43, %cst_51 {dimension_numbers = #tpu.dot_dimension_numbers<[1], [0], [0], [1], [0, 0, 1, 1], [], []>} : vector<64x128xbf16>, vector<128x128xbf16>, vector<64x128xf32> -> vector<64x128xf32>
    %45 = arith.addf %39, %44 : vector<64x128xf32>
    %c2_52 = arith.constant 2 : index
    %c1_53 = arith.constant 1 : index
    %c0_54 = arith.constant 0 : index
    %46 = vector.load %arg5[%c2_52, %c1_53, %c0_54] : memref<10x10x128xbf16, #tpu.memory_space<vmem>>, vector<8x8x128xbf16>
    %47 = vector.shape_cast %46 : vector<8x8x128xbf16> to vector<64x128xbf16>
    %c7 = arith.constant 7 : index
    %c0_55 = arith.constant 0 : index
    %c0_56 = arith.constant 0 : index
    %48 = vector.load %arg2[%c7, %c0_55, %c0_56] : memref<9x128x128xbf16, #tpu.memory_space<vmem>>, vector<1x128x128xbf16>
    %49 = vector.shape_cast %48 : vector<1x128x128xbf16> to vector<128x128xbf16>
    %cst_57 = arith.constant dense<0.000000e+00> : vector<64x128xf32>
    %50 = tpu.matmul %47, %49, %cst_57 {dimension_numbers = #tpu.dot_dimension_numbers<[1], [0], [0], [1], [0, 0, 1, 1], [], []>} : vector<64x128xbf16>, vector<128x128xbf16>, vector<64x128xf32> -> vector<64x128xf32>
    %51 = arith.addf %45, %50 : vector<64x128xf32>
    %c2_58 = arith.constant 2 : index
    %c2_59 = arith.constant 2 : index
    %c0_60 = arith.constant 0 : index
    %52 = vector.load %arg5[%c2_58, %c2_59, %c0_60] : memref<10x10x128xbf16, #tpu.memory_space<vmem>>, vector<8x8x128xbf16>
    %53 = vector.shape_cast %52 : vector<8x8x128xbf16> to vector<64x128xbf16>
    %c8 = arith.constant 8 : index
    %c0_61 = arith.constant 0 : index
    %c0_62 = arith.constant 0 : index
    %54 = vector.load %arg2[%c8, %c0_61, %c0_62] : memref<9x128x128xbf16, #tpu.memory_space<vmem>>, vector<1x128x128xbf16>
    %55 = vector.shape_cast %54 : vector<1x128x128xbf16> to vector<128x128xbf16>
    %cst_63 = arith.constant dense<0.000000e+00> : vector<64x128xf32>
    %56 = tpu.matmul %53, %55, %cst_63 {dimension_numbers = #tpu.dot_dimension_numbers<[1], [0], [0], [1], [0, 0, 1, 1], [], []>} : vector<64x128xbf16>, vector<128x128xbf16>, vector<64x128xf32> -> vector<64x128xf32>
    %57 = arith.addf %51, %56 : vector<64x128xf32>
    %c0_64 = arith.constant 0 : index
    %c0_65 = arith.constant 0 : index
    %58 = vector.load %arg3[%c0_64, %c0_65] : memref<1x128xf32, #tpu.memory_space<vmem>>, vector<1x128xf32>
    %59 = vector.broadcast %58 : vector<1x128xf32> to vector<64x128xf32>
    %60 = arith.addf %57, %59 : vector<64x128xf32>
    %cst_66 = arith.constant 0.000000e+00 : f32
    %61 = vector.broadcast %cst_66 : f32 to vector<64x128xf32>
    %62 = arith.maximumf %60, %61 : vector<64x128xf32>
    %63 = vector.shape_cast %62 : vector<64x128xf32> to vector<8x8x128xf32>
    %64 = vector.extract_strided_slice %63 {offsets = [0, 0, 0], sizes = [8, 2, 128], strides = [1, 1, 1]} : vector<8x8x128xf32> to vector<8x2x128xf32>
    %65 = vector.shape_cast %64 : vector<8x2x128xf32> to vector<4x2x2x128xf32>
    %66 = vector.extract_strided_slice %65 {offsets = [0, 0, 0, 0], sizes = [4, 1, 2, 128], strides = [1, 1, 1, 1]} : vector<4x2x2x128xf32> to vector<4x1x2x128xf32>
    %67 = vector.shape_cast %66 : vector<4x1x2x128xf32> to vector<4x2x128xf32>
    %68 = vector.extract_strided_slice %65 {offsets = [0, 1, 0, 0], sizes = [4, 1, 2, 128], strides = [1, 1, 1, 1]} : vector<4x2x2x128xf32> to vector<4x1x2x128xf32>
    %69 = vector.shape_cast %68 : vector<4x1x2x128xf32> to vector<4x2x128xf32>
    %70 = arith.maximumf %67, %69 : vector<4x2x128xf32>
    %cst_67 = arith.constant dense<0xFF800000> : vector<4x128xf32>
    %71 = vector.multi_reduction <maximumf>, %70, %cst_67 [1] : vector<4x2x128xf32> to vector<4x128xf32>
    %72 = vector.extract_strided_slice %63 {offsets = [0, 2, 0], sizes = [8, 2, 128], strides = [1, 1, 1]} : vector<8x8x128xf32> to vector<8x2x128xf32>
    %73 = vector.shape_cast %72 : vector<8x2x128xf32> to vector<4x2x2x128xf32>
    %74 = vector.extract_strided_slice %73 {offsets = [0, 0, 0, 0], sizes = [4, 1, 2, 128], strides = [1, 1, 1, 1]} : vector<4x2x2x128xf32> to vector<4x1x2x128xf32>
    %75 = vector.shape_cast %74 : vector<4x1x2x128xf32> to vector<4x2x128xf32>
    %76 = vector.extract_strided_slice %73 {offsets = [0, 1, 0, 0], sizes = [4, 1, 2, 128], strides = [1, 1, 1, 1]} : vector<4x2x2x128xf32> to vector<4x1x2x128xf32>
    %77 = vector.shape_cast %76 : vector<4x1x2x128xf32> to vector<4x2x128xf32>
    %78 = arith.maximumf %75, %77 : vector<4x2x128xf32>
    %cst_68 = arith.constant dense<0xFF800000> : vector<4x128xf32>
    %79 = vector.multi_reduction <maximumf>, %78, %cst_68 [1] : vector<4x2x128xf32> to vector<4x128xf32>
    %80 = vector.extract_strided_slice %63 {offsets = [0, 4, 0], sizes = [8, 2, 128], strides = [1, 1, 1]} : vector<8x8x128xf32> to vector<8x2x128xf32>
    %81 = vector.shape_cast %80 : vector<8x2x128xf32> to vector<4x2x2x128xf32>
    %82 = vector.extract_strided_slice %81 {offsets = [0, 0, 0, 0], sizes = [4, 1, 2, 128], strides = [1, 1, 1, 1]} : vector<4x2x2x128xf32> to vector<4x1x2x128xf32>
    %83 = vector.shape_cast %82 : vector<4x1x2x128xf32> to vector<4x2x128xf32>
    %84 = vector.extract_strided_slice %81 {offsets = [0, 1, 0, 0], sizes = [4, 1, 2, 128], strides = [1, 1, 1, 1]} : vector<4x2x2x128xf32> to vector<4x1x2x128xf32>
    %85 = vector.shape_cast %84 : vector<4x1x2x128xf32> to vector<4x2x128xf32>
    %86 = arith.maximumf %83, %85 : vector<4x2x128xf32>
    %cst_69 = arith.constant dense<0xFF800000> : vector<4x128xf32>
    %87 = vector.multi_reduction <maximumf>, %86, %cst_69 [1] : vector<4x2x128xf32> to vector<4x128xf32>
    %88 = vector.extract_strided_slice %63 {offsets = [0, 6, 0], sizes = [8, 2, 128], strides = [1, 1, 1]} : vector<8x8x128xf32> to vector<8x2x128xf32>
    %89 = vector.shape_cast %88 : vector<8x2x128xf32> to vector<4x2x2x128xf32>
    %90 = vector.extract_strided_slice %89 {offsets = [0, 0, 0, 0], sizes = [4, 1, 2, 128], strides = [1, 1, 1, 1]} : vector<4x2x2x128xf32> to vector<4x1x2x128xf32>
    %91 = vector.shape_cast %90 : vector<4x1x2x128xf32> to vector<4x2x128xf32>
    %92 = vector.extract_strided_slice %89 {offsets = [0, 1, 0, 0], sizes = [4, 1, 2, 128], strides = [1, 1, 1, 1]} : vector<4x2x2x128xf32> to vector<4x1x2x128xf32>
    %93 = vector.shape_cast %92 : vector<4x1x2x128xf32> to vector<4x2x128xf32>
    %94 = arith.maximumf %91, %93 : vector<4x2x128xf32>
    %cst_70 = arith.constant dense<0xFF800000> : vector<4x128xf32>
    %95 = vector.multi_reduction <maximumf>, %94, %cst_70 [1] : vector<4x2x128xf32> to vector<4x128xf32>
    %96 = tpu.concatenate %71, %79, %87, %95 in 1 : vector<4x128xf32>, vector<4x128xf32>, vector<4x128xf32>, vector<4x128xf32> -> vector<4x512xf32>
    %97 = arith.truncf %96 : vector<4x512xf32> to vector<4x512xbf16>
    %c0_71 = arith.constant 0 : index
    %c0_72 = arith.constant 0 : index
    %c0_73 = arith.constant 0 : index
    %98 = vector.load %arg4[%c0_71, %c0_72, %c0_73] : memref<1x4x512xbf16, #tpu.memory_space<vmem>>, vector<1x4x512xbf16>
    %99 = vector.shape_cast %98 : vector<1x4x512xbf16> to vector<4x512xbf16>
    %100 = vector.shape_cast %97 : vector<4x512xbf16> to vector<1x4x512xbf16>
    tpu.vector_store %arg4[%c0_71, %c0_72, %c0_73], %100 {strides = array<i32>} : memref<1x4x512xbf16, #tpu.memory_space<vmem>>, vector<1x4x512xbf16>,
    return
  }
  func.func @transform_0(%arg0: i32) -> (i32, i32, i32, i32) {
    %c0_i32 = arith.constant 0 : i32
    %c0_i32_0 = arith.constant 0 : i32
    %c0_i32_1 = arith.constant 0 : i32
    %c0_i32_2 = arith.constant 0 : i32
    return %arg0, %c0_i32, %c0_i32_0, %c0_i32_1 : i32, i32, i32, i32
  }
  func.func @transform_1(%arg0: i32) -> (i32, i32, i32) {
    %c0_i32 = arith.constant 0 : i32
    %c0_i32_0 = arith.constant 0 : i32
    %c0_i32_1 = arith.constant 0 : i32
    %c0_i32_2 = arith.constant 0 : i32
    return %c0_i32, %c0_i32_0, %c0_i32_1 : i32, i32, i32
  }
  func.func @transform_2(%arg0: i32) -> (i32, i32) {
    %c0_i32 = arith.constant 0 : i32
    %c0_i32_0 = arith.constant 0 : i32
    %c0_i32_1 = arith.constant 0 : i32
    return %c0_i32, %c0_i32_0 : i32, i32
  }
  func.func @transform_3(%arg0: i32) -> (i32, i32, i32) {
    %c0_i32 = arith.constant 0 : i32
    %c0_i32_0 = arith.constant 0 : i32
    %c0_i32_1 = arith.constant 0 : i32
    return %arg0, %c0_i32, %c0_i32_0 : i32, i32, i32
  }
}

module attributes {stable_mosaic.version = 11 : i64} {
  func.func @_conv3x3_pool_kernel(%arg0: i32, %arg1: memref<1x4x4x128xbf16, #tpu.memory_space<vmem>>, %arg2: memref<9x128x128xbf16, #tpu.memory_space<vmem>>, %arg3: memref<1x128xf32, #tpu.memory_space<vmem>>, %arg4: memref<1x2x256xbf16, #tpu.memory_space<vmem>>, %arg5: memref<6x10x128xbf16, #tpu.memory_space<vmem>>) attributes {dimension_semantics = [#tpu.dimension_semantics<parallel>], iteration_bounds = array<i64: 2>, scalar_prefetch = 0 : i64, scratch_operands = 1 : i64, tpu.core_type = #tpu.core_type<tc>, window_params = [{transform_indices = @transform_0, window_bounds = array<i64: 1, 4, 4, 128>}, {pipeline_mode = #tpu.pipeline_mode<synchronous>, transform_indices = @transform_1, window_bounds = array<i64: 9, 128, 128>}, {pipeline_mode = #tpu.pipeline_mode<synchronous>, transform_indices = @transform_2, window_bounds = array<i64: 1, 128>}, {transform_indices = @transform_3, window_bounds = array<i64: 1, 2, 256>}]} {
    %cst = arith.constant 0.000000e+00 : bf16
    %0 = vector.broadcast %cst : bf16 to vector<6x10x128xbf16>
    %c0 = arith.constant 0 : index
    %c0_0 = arith.constant 0 : index
    %c0_1 = arith.constant 0 : index
    %1 = vector.load %arg5[%c0, %c0_0, %c0_1] : memref<6x10x128xbf16, #tpu.memory_space<vmem>>, vector<6x10x128xbf16>
    tpu.vector_store %arg5[%c0, %c0_0, %c0_1], %0 {strides = array<i32>} : memref<6x10x128xbf16, #tpu.memory_space<vmem>>, vector<6x10x128xbf16>,
    %c0_2 = arith.constant 0 : index
    %c0_3 = arith.constant 0 : index
    %c0_4 = arith.constant 0 : index
    %c0_5 = arith.constant 0 : index
    %2 = vector.load %arg1[%c0_2, %c0_3, %c0_4, %c0_5] : memref<1x4x4x128xbf16, #tpu.memory_space<vmem>>, vector<1x4x4x128xbf16>
    %3 = vector.shape_cast %2 : vector<1x4x4x128xbf16> to vector<4x4x128xbf16>
    %c1 = arith.constant 1 : index
    %c1_6 = arith.constant 1 : index
    %c0_7 = arith.constant 0 : index
    %4 = vector.load %arg5[%c1, %c1_6, %c0_7] : memref<6x10x128xbf16, #tpu.memory_space<vmem>>, vector<4x4x128xbf16>
    tpu.vector_store %arg5[%c1, %c1_6, %c0_7], %3 {strides = array<i32>} : memref<6x10x128xbf16, #tpu.memory_space<vmem>>, vector<4x4x128xbf16>,
    %c0_8 = arith.constant 0 : index
    %c0_9 = arith.constant 0 : index
    %c0_10 = arith.constant 0 : index
    %5 = vector.load %arg5[%c0_8, %c0_9, %c0_10] : memref<6x10x128xbf16, #tpu.memory_space<vmem>>, vector<4x8x128xbf16>
    %6 = vector.shape_cast %5 : vector<4x8x128xbf16> to vector<32x128xbf16>
    %c0_11 = arith.constant 0 : index
    %c0_12 = arith.constant 0 : index
    %c0_13 = arith.constant 0 : index
    %7 = vector.load %arg2[%c0_11, %c0_12, %c0_13] : memref<9x128x128xbf16, #tpu.memory_space<vmem>>, vector<1x128x128xbf16>
    %8 = vector.shape_cast %7 : vector<1x128x128xbf16> to vector<128x128xbf16>
    %cst_14 = arith.constant dense<0.000000e+00> : vector<32x128xf32>
    %9 = tpu.matmul %6, %8, %cst_14 {dimension_numbers = #tpu.dot_dimension_numbers<[1], [0], [0], [1], [0, 0, 1, 1], [], []>} : vector<32x128xbf16>, vector<128x128xbf16>, vector<32x128xf32> -> vector<32x128xf32>
    %c0_15 = arith.constant 0 : index
    %c1_16 = arith.constant 1 : index
    %c0_17 = arith.constant 0 : index
    %10 = vector.load %arg5[%c0_15, %c1_16, %c0_17] : memref<6x10x128xbf16, #tpu.memory_space<vmem>>, vector<4x8x128xbf16>
    %11 = vector.shape_cast %10 : vector<4x8x128xbf16> to vector<32x128xbf16>
    %c1_18 = arith.constant 1 : index
    %c0_19 = arith.constant 0 : index
    %c0_20 = arith.constant 0 : index
    %12 = vector.load %arg2[%c1_18, %c0_19, %c0_20] : memref<9x128x128xbf16, #tpu.memory_space<vmem>>, vector<1x128x128xbf16>
    %13 = vector.shape_cast %12 : vector<1x128x128xbf16> to vector<128x128xbf16>
    %cst_21 = arith.constant dense<0.000000e+00> : vector<32x128xf32>
    %14 = tpu.matmul %11, %13, %cst_21 {dimension_numbers = #tpu.dot_dimension_numbers<[1], [0], [0], [1], [0, 0, 1, 1], [], []>} : vector<32x128xbf16>, vector<128x128xbf16>, vector<32x128xf32> -> vector<32x128xf32>
    %15 = arith.addf %9, %14 : vector<32x128xf32>
    %c0_22 = arith.constant 0 : index
    %c2 = arith.constant 2 : index
    %c0_23 = arith.constant 0 : index
    %16 = vector.load %arg5[%c0_22, %c2, %c0_23] : memref<6x10x128xbf16, #tpu.memory_space<vmem>>, vector<4x8x128xbf16>
    %17 = vector.shape_cast %16 : vector<4x8x128xbf16> to vector<32x128xbf16>
    %c2_24 = arith.constant 2 : index
    %c0_25 = arith.constant 0 : index
    %c0_26 = arith.constant 0 : index
    %18 = vector.load %arg2[%c2_24, %c0_25, %c0_26] : memref<9x128x128xbf16, #tpu.memory_space<vmem>>, vector<1x128x128xbf16>
    %19 = vector.shape_cast %18 : vector<1x128x128xbf16> to vector<128x128xbf16>
    %cst_27 = arith.constant dense<0.000000e+00> : vector<32x128xf32>
    %20 = tpu.matmul %17, %19, %cst_27 {dimension_numbers = #tpu.dot_dimension_numbers<[1], [0], [0], [1], [0, 0, 1, 1], [], []>} : vector<32x128xbf16>, vector<128x128xbf16>, vector<32x128xf32> -> vector<32x128xf32>
    %21 = arith.addf %15, %20 : vector<32x128xf32>
    %c1_28 = arith.constant 1 : index
    %c0_29 = arith.constant 0 : index
    %c0_30 = arith.constant 0 : index
    %22 = vector.load %arg5[%c1_28, %c0_29, %c0_30] : memref<6x10x128xbf16, #tpu.memory_space<vmem>>, vector<4x8x128xbf16>
    %23 = vector.shape_cast %22 : vector<4x8x128xbf16> to vector<32x128xbf16>
    %c3 = arith.constant 3 : index
    %c0_31 = arith.constant 0 : index
    %c0_32 = arith.constant 0 : index
    %24 = vector.load %arg2[%c3, %c0_31, %c0_32] : memref<9x128x128xbf16, #tpu.memory_space<vmem>>, vector<1x128x128xbf16>
    %25 = vector.shape_cast %24 : vector<1x128x128xbf16> to vector<128x128xbf16>
    %cst_33 = arith.constant dense<0.000000e+00> : vector<32x128xf32>
    %26 = tpu.matmul %23, %25, %cst_33 {dimension_numbers = #tpu.dot_dimension_numbers<[1], [0], [0], [1], [0, 0, 1, 1], [], []>} : vector<32x128xbf16>, vector<128x128xbf16>, vector<32x128xf32> -> vector<32x128xf32>
    %27 = arith.addf %21, %26 : vector<32x128xf32>
    %c1_34 = arith.constant 1 : index
    %c1_35 = arith.constant 1 : index
    %c0_36 = arith.constant 0 : index
    %28 = vector.load %arg5[%c1_34, %c1_35, %c0_36] : memref<6x10x128xbf16, #tpu.memory_space<vmem>>, vector<4x8x128xbf16>
    %29 = vector.shape_cast %28 : vector<4x8x128xbf16> to vector<32x128xbf16>
    %c4 = arith.constant 4 : index
    %c0_37 = arith.constant 0 : index
    %c0_38 = arith.constant 0 : index
    %30 = vector.load %arg2[%c4, %c0_37, %c0_38] : memref<9x128x128xbf16, #tpu.memory_space<vmem>>, vector<1x128x128xbf16>
    %31 = vector.shape_cast %30 : vector<1x128x128xbf16> to vector<128x128xbf16>
    %cst_39 = arith.constant dense<0.000000e+00> : vector<32x128xf32>
    %32 = tpu.matmul %29, %31, %cst_39 {dimension_numbers = #tpu.dot_dimension_numbers<[1], [0], [0], [1], [0, 0, 1, 1], [], []>} : vector<32x128xbf16>, vector<128x128xbf16>, vector<32x128xf32> -> vector<32x128xf32>
    %33 = arith.addf %27, %32 : vector<32x128xf32>
    %c1_40 = arith.constant 1 : index
    %c2_41 = arith.constant 2 : index
    %c0_42 = arith.constant 0 : index
    %34 = vector.load %arg5[%c1_40, %c2_41, %c0_42] : memref<6x10x128xbf16, #tpu.memory_space<vmem>>, vector<4x8x128xbf16>
    %35 = vector.shape_cast %34 : vector<4x8x128xbf16> to vector<32x128xbf16>
    %c5 = arith.constant 5 : index
    %c0_43 = arith.constant 0 : index
    %c0_44 = arith.constant 0 : index
    %36 = vector.load %arg2[%c5, %c0_43, %c0_44] : memref<9x128x128xbf16, #tpu.memory_space<vmem>>, vector<1x128x128xbf16>
    %37 = vector.shape_cast %36 : vector<1x128x128xbf16> to vector<128x128xbf16>
    %cst_45 = arith.constant dense<0.000000e+00> : vector<32x128xf32>
    %38 = tpu.matmul %35, %37, %cst_45 {dimension_numbers = #tpu.dot_dimension_numbers<[1], [0], [0], [1], [0, 0, 1, 1], [], []>} : vector<32x128xbf16>, vector<128x128xbf16>, vector<32x128xf32> -> vector<32x128xf32>
    %39 = arith.addf %33, %38 : vector<32x128xf32>
    %c2_46 = arith.constant 2 : index
    %c0_47 = arith.constant 0 : index
    %c0_48 = arith.constant 0 : index
    %40 = vector.load %arg5[%c2_46, %c0_47, %c0_48] : memref<6x10x128xbf16, #tpu.memory_space<vmem>>, vector<4x8x128xbf16>
    %41 = vector.shape_cast %40 : vector<4x8x128xbf16> to vector<32x128xbf16>
    %c6 = arith.constant 6 : index
    %c0_49 = arith.constant 0 : index
    %c0_50 = arith.constant 0 : index
    %42 = vector.load %arg2[%c6, %c0_49, %c0_50] : memref<9x128x128xbf16, #tpu.memory_space<vmem>>, vector<1x128x128xbf16>
    %43 = vector.shape_cast %42 : vector<1x128x128xbf16> to vector<128x128xbf16>
    %cst_51 = arith.constant dense<0.000000e+00> : vector<32x128xf32>
    %44 = tpu.matmul %41, %43, %cst_51 {dimension_numbers = #tpu.dot_dimension_numbers<[1], [0], [0], [1], [0, 0, 1, 1], [], []>} : vector<32x128xbf16>, vector<128x128xbf16>, vector<32x128xf32> -> vector<32x128xf32>
    %45 = arith.addf %39, %44 : vector<32x128xf32>
    %c2_52 = arith.constant 2 : index
    %c1_53 = arith.constant 1 : index
    %c0_54 = arith.constant 0 : index
    %46 = vector.load %arg5[%c2_52, %c1_53, %c0_54] : memref<6x10x128xbf16, #tpu.memory_space<vmem>>, vector<4x8x128xbf16>
    %47 = vector.shape_cast %46 : vector<4x8x128xbf16> to vector<32x128xbf16>
    %c7 = arith.constant 7 : index
    %c0_55 = arith.constant 0 : index
    %c0_56 = arith.constant 0 : index
    %48 = vector.load %arg2[%c7, %c0_55, %c0_56] : memref<9x128x128xbf16, #tpu.memory_space<vmem>>, vector<1x128x128xbf16>
    %49 = vector.shape_cast %48 : vector<1x128x128xbf16> to vector<128x128xbf16>
    %cst_57 = arith.constant dense<0.000000e+00> : vector<32x128xf32>
    %50 = tpu.matmul %47, %49, %cst_57 {dimension_numbers = #tpu.dot_dimension_numbers<[1], [0], [0], [1], [0, 0, 1, 1], [], []>} : vector<32x128xbf16>, vector<128x128xbf16>, vector<32x128xf32> -> vector<32x128xf32>
    %51 = arith.addf %45, %50 : vector<32x128xf32>
    %c2_58 = arith.constant 2 : index
    %c2_59 = arith.constant 2 : index
    %c0_60 = arith.constant 0 : index
    %52 = vector.load %arg5[%c2_58, %c2_59, %c0_60] : memref<6x10x128xbf16, #tpu.memory_space<vmem>>, vector<4x8x128xbf16>
    %53 = vector.shape_cast %52 : vector<4x8x128xbf16> to vector<32x128xbf16>
    %c8 = arith.constant 8 : index
    %c0_61 = arith.constant 0 : index
    %c0_62 = arith.constant 0 : index
    %54 = vector.load %arg2[%c8, %c0_61, %c0_62] : memref<9x128x128xbf16, #tpu.memory_space<vmem>>, vector<1x128x128xbf16>
    %55 = vector.shape_cast %54 : vector<1x128x128xbf16> to vector<128x128xbf16>
    %cst_63 = arith.constant dense<0.000000e+00> : vector<32x128xf32>
    %56 = tpu.matmul %53, %55, %cst_63 {dimension_numbers = #tpu.dot_dimension_numbers<[1], [0], [0], [1], [0, 0, 1, 1], [], []>} : vector<32x128xbf16>, vector<128x128xbf16>, vector<32x128xf32> -> vector<32x128xf32>
    %57 = arith.addf %51, %56 : vector<32x128xf32>
    %c0_64 = arith.constant 0 : index
    %c0_65 = arith.constant 0 : index
    %58 = vector.load %arg3[%c0_64, %c0_65] : memref<1x128xf32, #tpu.memory_space<vmem>>, vector<1x128xf32>
    %59 = vector.broadcast %58 : vector<1x128xf32> to vector<32x128xf32>
    %60 = arith.addf %57, %59 : vector<32x128xf32>
    %cst_66 = arith.constant 0.000000e+00 : f32
    %61 = vector.broadcast %cst_66 : f32 to vector<32x128xf32>
    %62 = arith.maximumf %60, %61 : vector<32x128xf32>
    %63 = vector.shape_cast %62 : vector<32x128xf32> to vector<4x8x128xf32>
    %64 = vector.extract_strided_slice %63 {offsets = [0, 0, 0], sizes = [4, 2, 128], strides = [1, 1, 1]} : vector<4x8x128xf32> to vector<4x2x128xf32>
    %65 = vector.shape_cast %64 : vector<4x2x128xf32> to vector<2x2x2x128xf32>
    %66 = vector.extract_strided_slice %65 {offsets = [0, 0, 0, 0], sizes = [2, 1, 2, 128], strides = [1, 1, 1, 1]} : vector<2x2x2x128xf32> to vector<2x1x2x128xf32>
    %67 = vector.shape_cast %66 : vector<2x1x2x128xf32> to vector<2x2x128xf32>
    %68 = vector.extract_strided_slice %65 {offsets = [0, 1, 0, 0], sizes = [2, 1, 2, 128], strides = [1, 1, 1, 1]} : vector<2x2x2x128xf32> to vector<2x1x2x128xf32>
    %69 = vector.shape_cast %68 : vector<2x1x2x128xf32> to vector<2x2x128xf32>
    %70 = arith.maximumf %67, %69 : vector<2x2x128xf32>
    %cst_67 = arith.constant dense<0xFF800000> : vector<2x128xf32>
    %71 = vector.multi_reduction <maximumf>, %70, %cst_67 [1] : vector<2x2x128xf32> to vector<2x128xf32>
    %72 = vector.extract_strided_slice %63 {offsets = [0, 2, 0], sizes = [4, 2, 128], strides = [1, 1, 1]} : vector<4x8x128xf32> to vector<4x2x128xf32>
    %73 = vector.shape_cast %72 : vector<4x2x128xf32> to vector<2x2x2x128xf32>
    %74 = vector.extract_strided_slice %73 {offsets = [0, 0, 0, 0], sizes = [2, 1, 2, 128], strides = [1, 1, 1, 1]} : vector<2x2x2x128xf32> to vector<2x1x2x128xf32>
    %75 = vector.shape_cast %74 : vector<2x1x2x128xf32> to vector<2x2x128xf32>
    %76 = vector.extract_strided_slice %73 {offsets = [0, 1, 0, 0], sizes = [2, 1, 2, 128], strides = [1, 1, 1, 1]} : vector<2x2x2x128xf32> to vector<2x1x2x128xf32>
    %77 = vector.shape_cast %76 : vector<2x1x2x128xf32> to vector<2x2x128xf32>
    %78 = arith.maximumf %75, %77 : vector<2x2x128xf32>
    %cst_68 = arith.constant dense<0xFF800000> : vector<2x128xf32>
    %79 = vector.multi_reduction <maximumf>, %78, %cst_68 [1] : vector<2x2x128xf32> to vector<2x128xf32>
    %80 = tpu.concatenate %71, %79 in 1 : vector<2x128xf32>, vector<2x128xf32> -> vector<2x256xf32>
    %81 = arith.truncf %80 : vector<2x256xf32> to vector<2x256xbf16>
    %c0_69 = arith.constant 0 : index
    %c0_70 = arith.constant 0 : index
    %c0_71 = arith.constant 0 : index
    %82 = vector.load %arg4[%c0_69, %c0_70, %c0_71] : memref<1x2x256xbf16, #tpu.memory_space<vmem>>, vector<1x2x256xbf16>
    %83 = vector.shape_cast %82 : vector<1x2x256xbf16> to vector<2x256xbf16>
    %84 = vector.shape_cast %81 : vector<2x256xbf16> to vector<1x2x256xbf16>
    tpu.vector_store %arg4[%c0_69, %c0_70, %c0_71], %84 {strides = array<i32>} : memref<1x2x256xbf16, #tpu.memory_space<vmem>>, vector<1x2x256xbf16>,
    return
  }
  func.func @transform_0(%arg0: i32) -> (i32, i32, i32, i32) {
    %c0_i32 = arith.constant 0 : i32
    %c0_i32_0 = arith.constant 0 : i32
    %c0_i32_1 = arith.constant 0 : i32
    %c0_i32_2 = arith.constant 0 : i32
    return %arg0, %c0_i32, %c0_i32_0, %c0_i32_1 : i32, i32, i32, i32
  }
  func.func @transform_1(%arg0: i32) -> (i32, i32, i32) {
    %c0_i32 = arith.constant 0 : i32
    %c0_i32_0 = arith.constant 0 : i32
    %c0_i32_1 = arith.constant 0 : i32
    %c0_i32_2 = arith.constant 0 : i32
    return %c0_i32, %c0_i32_0, %c0_i32_1 : i32, i32, i32
  }
  func.func @transform_2(%arg0: i32) -> (i32, i32) {
    %c0_i32 = arith.constant 0 : i32
    %c0_i32_0 = arith.constant 0 : i32
    %c0_i32_1 = arith.constant 0 : i32
    return %c0_i32, %c0_i32_0 : i32, i32
  }
  func.func @transform_3(%arg0: i32) -> (i32, i32, i32) {
    %c0_i32 = arith.constant 0 : i32
    %c0_i32_0 = arith.constant 0 : i32
    %c0_i32_1 = arith.constant 0 : i32
    return %arg0, %c0_i32, %c0_i32_0 : i32, i32, i32
  }
}

module attributes {stable_mosaic.version = 11 : i64} {
  func.func @_conv3x3_pool_kernel(%arg0: i32, %arg1: memref<1x2x2x128xbf16, #tpu.memory_space<vmem>>, %arg2: memref<9x128x128xbf16, #tpu.memory_space<vmem>>, %arg3: memref<1x128xf32, #tpu.memory_space<vmem>>, %arg4: memref<1x1x128xbf16, #tpu.memory_space<vmem>>, %arg5: memref<4x10x128xbf16, #tpu.memory_space<vmem>>) attributes {dimension_semantics = [#tpu.dimension_semantics<parallel>], iteration_bounds = array<i64: 2>, scalar_prefetch = 0 : i64, scratch_operands = 1 : i64, tpu.core_type = #tpu.core_type<tc>, window_params = [{transform_indices = @transform_0, window_bounds = array<i64: 1, 2, 2, 128>}, {pipeline_mode = #tpu.pipeline_mode<synchronous>, transform_indices = @transform_1, window_bounds = array<i64: 9, 128, 128>}, {pipeline_mode = #tpu.pipeline_mode<synchronous>, transform_indices = @transform_2, window_bounds = array<i64: 1, 128>}, {transform_indices = @transform_3, window_bounds = array<i64: 1, 1, 128>}]} {
    %cst = arith.constant 0.000000e+00 : bf16
    %0 = vector.broadcast %cst : bf16 to vector<4x10x128xbf16>
    %c0 = arith.constant 0 : index
    %c0_0 = arith.constant 0 : index
    %c0_1 = arith.constant 0 : index
    %1 = vector.load %arg5[%c0, %c0_0, %c0_1] : memref<4x10x128xbf16, #tpu.memory_space<vmem>>, vector<4x10x128xbf16>
    tpu.vector_store %arg5[%c0, %c0_0, %c0_1], %0 {strides = array<i32>} : memref<4x10x128xbf16, #tpu.memory_space<vmem>>, vector<4x10x128xbf16>,
    %c0_2 = arith.constant 0 : index
    %c0_3 = arith.constant 0 : index
    %c0_4 = arith.constant 0 : index
    %c0_5 = arith.constant 0 : index
    %2 = vector.load %arg1[%c0_2, %c0_3, %c0_4, %c0_5] : memref<1x2x2x128xbf16, #tpu.memory_space<vmem>>, vector<1x2x2x128xbf16>
    %3 = vector.shape_cast %2 : vector<1x2x2x128xbf16> to vector<2x2x128xbf16>
    %c1 = arith.constant 1 : index
    %c1_6 = arith.constant 1 : index
    %c0_7 = arith.constant 0 : index
    %4 = vector.load %arg5[%c1, %c1_6, %c0_7] : memref<4x10x128xbf16, #tpu.memory_space<vmem>>, vector<2x2x128xbf16>
    tpu.vector_store %arg5[%c1, %c1_6, %c0_7], %3 {strides = array<i32>} : memref<4x10x128xbf16, #tpu.memory_space<vmem>>, vector<2x2x128xbf16>,
    %c0_8 = arith.constant 0 : index
    %c0_9 = arith.constant 0 : index
    %c0_10 = arith.constant 0 : index
    %5 = vector.load %arg5[%c0_8, %c0_9, %c0_10] : memref<4x10x128xbf16, #tpu.memory_space<vmem>>, vector<2x8x128xbf16>
    %6 = vector.shape_cast %5 : vector<2x8x128xbf16> to vector<16x128xbf16>
    %c0_11 = arith.constant 0 : index
    %c0_12 = arith.constant 0 : index
    %c0_13 = arith.constant 0 : index
    %7 = vector.load %arg2[%c0_11, %c0_12, %c0_13] : memref<9x128x128xbf16, #tpu.memory_space<vmem>>, vector<1x128x128xbf16>
    %8 = vector.shape_cast %7 : vector<1x128x128xbf16> to vector<128x128xbf16>
    %cst_14 = arith.constant dense<0.000000e+00> : vector<16x128xf32>
    %9 = tpu.matmul %6, %8, %cst_14 {dimension_numbers = #tpu.dot_dimension_numbers<[1], [0], [0], [1], [0, 0, 1, 1], [], []>} : vector<16x128xbf16>, vector<128x128xbf16>, vector<16x128xf32> -> vector<16x128xf32>
    %c0_15 = arith.constant 0 : index
    %c1_16 = arith.constant 1 : index
    %c0_17 = arith.constant 0 : index
    %10 = vector.load %arg5[%c0_15, %c1_16, %c0_17] : memref<4x10x128xbf16, #tpu.memory_space<vmem>>, vector<2x8x128xbf16>
    %11 = vector.shape_cast %10 : vector<2x8x128xbf16> to vector<16x128xbf16>
    %c1_18 = arith.constant 1 : index
    %c0_19 = arith.constant 0 : index
    %c0_20 = arith.constant 0 : index
    %12 = vector.load %arg2[%c1_18, %c0_19, %c0_20] : memref<9x128x128xbf16, #tpu.memory_space<vmem>>, vector<1x128x128xbf16>
    %13 = vector.shape_cast %12 : vector<1x128x128xbf16> to vector<128x128xbf16>
    %cst_21 = arith.constant dense<0.000000e+00> : vector<16x128xf32>
    %14 = tpu.matmul %11, %13, %cst_21 {dimension_numbers = #tpu.dot_dimension_numbers<[1], [0], [0], [1], [0, 0, 1, 1], [], []>} : vector<16x128xbf16>, vector<128x128xbf16>, vector<16x128xf32> -> vector<16x128xf32>
    %15 = arith.addf %9, %14 : vector<16x128xf32>
    %c0_22 = arith.constant 0 : index
    %c2 = arith.constant 2 : index
    %c0_23 = arith.constant 0 : index
    %16 = vector.load %arg5[%c0_22, %c2, %c0_23] : memref<4x10x128xbf16, #tpu.memory_space<vmem>>, vector<2x8x128xbf16>
    %17 = vector.shape_cast %16 : vector<2x8x128xbf16> to vector<16x128xbf16>
    %c2_24 = arith.constant 2 : index
    %c0_25 = arith.constant 0 : index
    %c0_26 = arith.constant 0 : index
    %18 = vector.load %arg2[%c2_24, %c0_25, %c0_26] : memref<9x128x128xbf16, #tpu.memory_space<vmem>>, vector<1x128x128xbf16>
    %19 = vector.shape_cast %18 : vector<1x128x128xbf16> to vector<128x128xbf16>
    %cst_27 = arith.constant dense<0.000000e+00> : vector<16x128xf32>
    %20 = tpu.matmul %17, %19, %cst_27 {dimension_numbers = #tpu.dot_dimension_numbers<[1], [0], [0], [1], [0, 0, 1, 1], [], []>} : vector<16x128xbf16>, vector<128x128xbf16>, vector<16x128xf32> -> vector<16x128xf32>
    %21 = arith.addf %15, %20 : vector<16x128xf32>
    %c1_28 = arith.constant 1 : index
    %c0_29 = arith.constant 0 : index
    %c0_30 = arith.constant 0 : index
    %22 = vector.load %arg5[%c1_28, %c0_29, %c0_30] : memref<4x10x128xbf16, #tpu.memory_space<vmem>>, vector<2x8x128xbf16>
    %23 = vector.shape_cast %22 : vector<2x8x128xbf16> to vector<16x128xbf16>
    %c3 = arith.constant 3 : index
    %c0_31 = arith.constant 0 : index
    %c0_32 = arith.constant 0 : index
    %24 = vector.load %arg2[%c3, %c0_31, %c0_32] : memref<9x128x128xbf16, #tpu.memory_space<vmem>>, vector<1x128x128xbf16>
    %25 = vector.shape_cast %24 : vector<1x128x128xbf16> to vector<128x128xbf16>
    %cst_33 = arith.constant dense<0.000000e+00> : vector<16x128xf32>
    %26 = tpu.matmul %23, %25, %cst_33 {dimension_numbers = #tpu.dot_dimension_numbers<[1], [0], [0], [1], [0, 0, 1, 1], [], []>} : vector<16x128xbf16>, vector<128x128xbf16>, vector<16x128xf32> -> vector<16x128xf32>
    %27 = arith.addf %21, %26 : vector<16x128xf32>
    %c1_34 = arith.constant 1 : index
    %c1_35 = arith.constant 1 : index
    %c0_36 = arith.constant 0 : index
    %28 = vector.load %arg5[%c1_34, %c1_35, %c0_36] : memref<4x10x128xbf16, #tpu.memory_space<vmem>>, vector<2x8x128xbf16>
    %29 = vector.shape_cast %28 : vector<2x8x128xbf16> to vector<16x128xbf16>
    %c4 = arith.constant 4 : index
    %c0_37 = arith.constant 0 : index
    %c0_38 = arith.constant 0 : index
    %30 = vector.load %arg2[%c4, %c0_37, %c0_38] : memref<9x128x128xbf16, #tpu.memory_space<vmem>>, vector<1x128x128xbf16>
    %31 = vector.shape_cast %30 : vector<1x128x128xbf16> to vector<128x128xbf16>
    %cst_39 = arith.constant dense<0.000000e+00> : vector<16x128xf32>
    %32 = tpu.matmul %29, %31, %cst_39 {dimension_numbers = #tpu.dot_dimension_numbers<[1], [0], [0], [1], [0, 0, 1, 1], [], []>} : vector<16x128xbf16>, vector<128x128xbf16>, vector<16x128xf32> -> vector<16x128xf32>
    %33 = arith.addf %27, %32 : vector<16x128xf32>
    %c1_40 = arith.constant 1 : index
    %c2_41 = arith.constant 2 : index
    %c0_42 = arith.constant 0 : index
    %34 = vector.load %arg5[%c1_40, %c2_41, %c0_42] : memref<4x10x128xbf16, #tpu.memory_space<vmem>>, vector<2x8x128xbf16>
    %35 = vector.shape_cast %34 : vector<2x8x128xbf16> to vector<16x128xbf16>
    %c5 = arith.constant 5 : index
    %c0_43 = arith.constant 0 : index
    %c0_44 = arith.constant 0 : index
    %36 = vector.load %arg2[%c5, %c0_43, %c0_44] : memref<9x128x128xbf16, #tpu.memory_space<vmem>>, vector<1x128x128xbf16>
    %37 = vector.shape_cast %36 : vector<1x128x128xbf16> to vector<128x128xbf16>
    %cst_45 = arith.constant dense<0.000000e+00> : vector<16x128xf32>
    %38 = tpu.matmul %35, %37, %cst_45 {dimension_numbers = #tpu.dot_dimension_numbers<[1], [0], [0], [1], [0, 0, 1, 1], [], []>} : vector<16x128xbf16>, vector<128x128xbf16>, vector<16x128xf32> -> vector<16x128xf32>
    %39 = arith.addf %33, %38 : vector<16x128xf32>
    %c2_46 = arith.constant 2 : index
    %c0_47 = arith.constant 0 : index
    %c0_48 = arith.constant 0 : index
    %40 = vector.load %arg5[%c2_46, %c0_47, %c0_48] : memref<4x10x128xbf16, #tpu.memory_space<vmem>>, vector<2x8x128xbf16>
    %41 = vector.shape_cast %40 : vector<2x8x128xbf16> to vector<16x128xbf16>
    %c6 = arith.constant 6 : index
    %c0_49 = arith.constant 0 : index
    %c0_50 = arith.constant 0 : index
    %42 = vector.load %arg2[%c6, %c0_49, %c0_50] : memref<9x128x128xbf16, #tpu.memory_space<vmem>>, vector<1x128x128xbf16>
    %43 = vector.shape_cast %42 : vector<1x128x128xbf16> to vector<128x128xbf16>
    %cst_51 = arith.constant dense<0.000000e+00> : vector<16x128xf32>
    %44 = tpu.matmul %41, %43, %cst_51 {dimension_numbers = #tpu.dot_dimension_numbers<[1], [0], [0], [1], [0, 0, 1, 1], [], []>} : vector<16x128xbf16>, vector<128x128xbf16>, vector<16x128xf32> -> vector<16x128xf32>
    %45 = arith.addf %39, %44 : vector<16x128xf32>
    %c2_52 = arith.constant 2 : index
    %c1_53 = arith.constant 1 : index
    %c0_54 = arith.constant 0 : index
    %46 = vector.load %arg5[%c2_52, %c1_53, %c0_54] : memref<4x10x128xbf16, #tpu.memory_space<vmem>>, vector<2x8x128xbf16>
    %47 = vector.shape_cast %46 : vector<2x8x128xbf16> to vector<16x128xbf16>
    %c7 = arith.constant 7 : index
    %c0_55 = arith.constant 0 : index
    %c0_56 = arith.constant 0 : index
    %48 = vector.load %arg2[%c7, %c0_55, %c0_56] : memref<9x128x128xbf16, #tpu.memory_space<vmem>>, vector<1x128x128xbf16>
    %49 = vector.shape_cast %48 : vector<1x128x128xbf16> to vector<128x128xbf16>
    %cst_57 = arith.constant dense<0.000000e+00> : vector<16x128xf32>
    %50 = tpu.matmul %47, %49, %cst_57 {dimension_numbers = #tpu.dot_dimension_numbers<[1], [0], [0], [1], [0, 0, 1, 1], [], []>} : vector<16x128xbf16>, vector<128x128xbf16>, vector<16x128xf32> -> vector<16x128xf32>
    %51 = arith.addf %45, %50 : vector<16x128xf32>
    %c2_58 = arith.constant 2 : index
    %c2_59 = arith.constant 2 : index
    %c0_60 = arith.constant 0 : index
    %52 = vector.load %arg5[%c2_58, %c2_59, %c0_60] : memref<4x10x128xbf16, #tpu.memory_space<vmem>>, vector<2x8x128xbf16>
    %53 = vector.shape_cast %52 : vector<2x8x128xbf16> to vector<16x128xbf16>
    %c8 = arith.constant 8 : index
    %c0_61 = arith.constant 0 : index
    %c0_62 = arith.constant 0 : index
    %54 = vector.load %arg2[%c8, %c0_61, %c0_62] : memref<9x128x128xbf16, #tpu.memory_space<vmem>>, vector<1x128x128xbf16>
    %55 = vector.shape_cast %54 : vector<1x128x128xbf16> to vector<128x128xbf16>
    %cst_63 = arith.constant dense<0.000000e+00> : vector<16x128xf32>
    %56 = tpu.matmul %53, %55, %cst_63 {dimension_numbers = #tpu.dot_dimension_numbers<[1], [0], [0], [1], [0, 0, 1, 1], [], []>} : vector<16x128xbf16>, vector<128x128xbf16>, vector<16x128xf32> -> vector<16x128xf32>
    %57 = arith.addf %51, %56 : vector<16x128xf32>
    %c0_64 = arith.constant 0 : index
    %c0_65 = arith.constant 0 : index
    %58 = vector.load %arg3[%c0_64, %c0_65] : memref<1x128xf32, #tpu.memory_space<vmem>>, vector<1x128xf32>
    %59 = vector.broadcast %58 : vector<1x128xf32> to vector<16x128xf32>
    %60 = arith.addf %57, %59 : vector<16x128xf32>
    %cst_66 = arith.constant 0.000000e+00 : f32
    %61 = vector.broadcast %cst_66 : f32 to vector<16x128xf32>
    %62 = arith.maximumf %60, %61 : vector<16x128xf32>
    %63 = vector.shape_cast %62 : vector<16x128xf32> to vector<2x8x128xf32>
    %64 = vector.extract_strided_slice %63 {offsets = [0, 0, 0], sizes = [2, 2, 128], strides = [1, 1, 1]} : vector<2x8x128xf32> to vector<2x2x128xf32>
    %65 = vector.shape_cast %64 : vector<2x2x128xf32> to vector<1x2x2x128xf32>
    %66 = vector.extract_strided_slice %65 {offsets = [0, 0, 0, 0], sizes = [1, 1, 2, 128], strides = [1, 1, 1, 1]} : vector<1x2x2x128xf32> to vector<1x1x2x128xf32>
    %67 = vector.shape_cast %66 : vector<1x1x2x128xf32> to vector<1x2x128xf32>
    %68 = vector.extract_strided_slice %65 {offsets = [0, 1, 0, 0], sizes = [1, 1, 2, 128], strides = [1, 1, 1, 1]} : vector<1x2x2x128xf32> to vector<1x1x2x128xf32>
    %69 = vector.shape_cast %68 : vector<1x1x2x128xf32> to vector<1x2x128xf32>
    %70 = arith.maximumf %67, %69 : vector<1x2x128xf32>
    %cst_67 = arith.constant dense<0xFF800000> : vector<1x128xf32>
    %71 = vector.multi_reduction <maximumf>, %70, %cst_67 [1] : vector<1x2x128xf32> to vector<1x128xf32>
    %72 = arith.truncf %71 : vector<1x128xf32> to vector<1x128xbf16>
    %c0_68 = arith.constant 0 : index
    %c0_69 = arith.constant 0 : index
    %c0_70 = arith.constant 0 : index
    %73 = vector.load %arg4[%c0_68, %c0_69, %c0_70] : memref<1x1x128xbf16, #tpu.memory_space<vmem>>, vector<1x1x128xbf16>
    %74 = vector.shape_cast %73 : vector<1x1x128xbf16> to vector<1x128xbf16>
    %75 = vector.shape_cast %72 : vector<1x128xbf16> to vector<1x1x128xbf16>
    tpu.vector_store %arg4[%c0_68, %c0_69, %c0_70], %75 {strides = array<i32>} : memref<1x1x128xbf16, #tpu.memory_space<vmem>>, vector<1x1x128xbf16>,
    return
  }
  func.func @transform_0(%arg0: i32) -> (i32, i32, i32, i32) {
    %c0_i32 = arith.constant 0 : i32
    %c0_i32_0 = arith.constant 0 : i32
    %c0_i32_1 = arith.constant 0 : i32
    %c0_i32_2 = arith.constant 0 : i32
    return %arg0, %c0_i32, %c0_i32_0, %c0_i32_1 : i32, i32, i32, i32
  }
  func.func @transform_1(%arg0: i32) -> (i32, i32, i32) {
    %c0_i32 = arith.constant 0 : i32
    %c0_i32_0 = arith.constant 0 : i32
    %c0_i32_1 = arith.constant 0 : i32
    %c0_i32_2 = arith.constant 0 : i32
    return %c0_i32, %c0_i32_0, %c0_i32_1 : i32, i32, i32
  }
  func.func @transform_2(%arg0: i32) -> (i32, i32) {
    %c0_i32 = arith.constant 0 : i32
    %c0_i32_0 = arith.constant 0 : i32
    %c0_i32_1 = arith.constant 0 : i32
    return %c0_i32, %c0_i32_0 : i32, i32
  }
  func.func @transform_3(%arg0: i32) -> (i32, i32, i32) {
    %c0_i32 = arith.constant 0 : i32
    %c0_i32_0 = arith.constant 0 : i32
    %c0_i32_1 = arith.constant 0 : i32
    return %arg0, %c0_i32, %c0_i32_0 : i32, i32, i32
  }
}

module attributes {stable_mosaic.version = 11 : i64} {
  func.func @_conv3x3_pool_kernel(%arg0: i32, %arg1: memref<1x1x1x128xbf16, #tpu.memory_space<vmem>>, %arg2: memref<9x128x128xbf16, #tpu.memory_space<vmem>>, %arg3: memref<1x128xf32, #tpu.memory_space<vmem>>, %arg4: memref<1x1x1x128xbf16, #tpu.memory_space<vmem>>, %arg5: memref<3x10x128xbf16, #tpu.memory_space<vmem>>) attributes {dimension_semantics = [#tpu.dimension_semantics<parallel>], iteration_bounds = array<i64: 2>, scalar_prefetch = 0 : i64, scratch_operands = 1 : i64, tpu.core_type = #tpu.core_type<tc>, window_params = [{transform_indices = @transform_0, window_bounds = array<i64: 1, 1, 1, 128>}, {pipeline_mode = #tpu.pipeline_mode<synchronous>, transform_indices = @transform_1, window_bounds = array<i64: 9, 128, 128>}, {pipeline_mode = #tpu.pipeline_mode<synchronous>, transform_indices = @transform_2, window_bounds = array<i64: 1, 128>}, {transform_indices = @transform_3, window_bounds = array<i64: 1, 1, 1, 128>}]} {
    %cst = arith.constant 0.000000e+00 : bf16
    %0 = vector.broadcast %cst : bf16 to vector<3x10x128xbf16>
    %c0 = arith.constant 0 : index
    %c0_0 = arith.constant 0 : index
    %c0_1 = arith.constant 0 : index
    %1 = vector.load %arg5[%c0, %c0_0, %c0_1] : memref<3x10x128xbf16, #tpu.memory_space<vmem>>, vector<3x10x128xbf16>
    tpu.vector_store %arg5[%c0, %c0_0, %c0_1], %0 {strides = array<i32>} : memref<3x10x128xbf16, #tpu.memory_space<vmem>>, vector<3x10x128xbf16>,
    %c0_2 = arith.constant 0 : index
    %c0_3 = arith.constant 0 : index
    %c0_4 = arith.constant 0 : index
    %c0_5 = arith.constant 0 : index
    %2 = vector.load %arg1[%c0_2, %c0_3, %c0_4, %c0_5] : memref<1x1x1x128xbf16, #tpu.memory_space<vmem>>, vector<1x1x1x128xbf16>
    %3 = vector.shape_cast %2 : vector<1x1x1x128xbf16> to vector<1x1x128xbf16>
    %c1 = arith.constant 1 : index
    %c1_6 = arith.constant 1 : index
    %c0_7 = arith.constant 0 : index
    %4 = vector.load %arg5[%c1, %c1_6, %c0_7] : memref<3x10x128xbf16, #tpu.memory_space<vmem>>, vector<1x1x128xbf16>
    tpu.vector_store %arg5[%c1, %c1_6, %c0_7], %3 {strides = array<i32>} : memref<3x10x128xbf16, #tpu.memory_space<vmem>>, vector<1x1x128xbf16>,
    %c0_8 = arith.constant 0 : index
    %c0_9 = arith.constant 0 : index
    %c0_10 = arith.constant 0 : index
    %5 = vector.load %arg5[%c0_8, %c0_9, %c0_10] : memref<3x10x128xbf16, #tpu.memory_space<vmem>>, vector<1x8x128xbf16>
    %6 = vector.shape_cast %5 : vector<1x8x128xbf16> to vector<8x128xbf16>
    %c0_11 = arith.constant 0 : index
    %c0_12 = arith.constant 0 : index
    %c0_13 = arith.constant 0 : index
    %7 = vector.load %arg2[%c0_11, %c0_12, %c0_13] : memref<9x128x128xbf16, #tpu.memory_space<vmem>>, vector<1x128x128xbf16>
    %8 = vector.shape_cast %7 : vector<1x128x128xbf16> to vector<128x128xbf16>
    %cst_14 = arith.constant dense<0.000000e+00> : vector<8x128xf32>
    %9 = tpu.matmul %6, %8, %cst_14 {dimension_numbers = #tpu.dot_dimension_numbers<[1], [0], [0], [1], [0, 0, 1, 1], [], []>} : vector<8x128xbf16>, vector<128x128xbf16>, vector<8x128xf32> -> vector<8x128xf32>
    %c0_15 = arith.constant 0 : index
    %c1_16 = arith.constant 1 : index
    %c0_17 = arith.constant 0 : index
    %10 = vector.load %arg5[%c0_15, %c1_16, %c0_17] : memref<3x10x128xbf16, #tpu.memory_space<vmem>>, vector<1x8x128xbf16>
    %11 = vector.shape_cast %10 : vector<1x8x128xbf16> to vector<8x128xbf16>
    %c1_18 = arith.constant 1 : index
    %c0_19 = arith.constant 0 : index
    %c0_20 = arith.constant 0 : index
    %12 = vector.load %arg2[%c1_18, %c0_19, %c0_20] : memref<9x128x128xbf16, #tpu.memory_space<vmem>>, vector<1x128x128xbf16>
    %13 = vector.shape_cast %12 : vector<1x128x128xbf16> to vector<128x128xbf16>
    %cst_21 = arith.constant dense<0.000000e+00> : vector<8x128xf32>
    %14 = tpu.matmul %11, %13, %cst_21 {dimension_numbers = #tpu.dot_dimension_numbers<[1], [0], [0], [1], [0, 0, 1, 1], [], []>} : vector<8x128xbf16>, vector<128x128xbf16>, vector<8x128xf32> -> vector<8x128xf32>
    %15 = arith.addf %9, %14 : vector<8x128xf32>
    %c0_22 = arith.constant 0 : index
    %c2 = arith.constant 2 : index
    %c0_23 = arith.constant 0 : index
    %16 = vector.load %arg5[%c0_22, %c2, %c0_23] : memref<3x10x128xbf16, #tpu.memory_space<vmem>>, vector<1x8x128xbf16>
    %17 = vector.shape_cast %16 : vector<1x8x128xbf16> to vector<8x128xbf16>
    %c2_24 = arith.constant 2 : index
    %c0_25 = arith.constant 0 : index
    %c0_26 = arith.constant 0 : index
    %18 = vector.load %arg2[%c2_24, %c0_25, %c0_26] : memref<9x128x128xbf16, #tpu.memory_space<vmem>>, vector<1x128x128xbf16>
    %19 = vector.shape_cast %18 : vector<1x128x128xbf16> to vector<128x128xbf16>
    %cst_27 = arith.constant dense<0.000000e+00> : vector<8x128xf32>
    %20 = tpu.matmul %17, %19, %cst_27 {dimension_numbers = #tpu.dot_dimension_numbers<[1], [0], [0], [1], [0, 0, 1, 1], [], []>} : vector<8x128xbf16>, vector<128x128xbf16>, vector<8x128xf32> -> vector<8x128xf32>
    %21 = arith.addf %15, %20 : vector<8x128xf32>
    %c1_28 = arith.constant 1 : index
    %c0_29 = arith.constant 0 : index
    %c0_30 = arith.constant 0 : index
    %22 = vector.load %arg5[%c1_28, %c0_29, %c0_30] : memref<3x10x128xbf16, #tpu.memory_space<vmem>>, vector<1x8x128xbf16>
    %23 = vector.shape_cast %22 : vector<1x8x128xbf16> to vector<8x128xbf16>
    %c3 = arith.constant 3 : index
    %c0_31 = arith.constant 0 : index
    %c0_32 = arith.constant 0 : index
    %24 = vector.load %arg2[%c3, %c0_31, %c0_32] : memref<9x128x128xbf16, #tpu.memory_space<vmem>>, vector<1x128x128xbf16>
    %25 = vector.shape_cast %24 : vector<1x128x128xbf16> to vector<128x128xbf16>
    %cst_33 = arith.constant dense<0.000000e+00> : vector<8x128xf32>
    %26 = tpu.matmul %23, %25, %cst_33 {dimension_numbers = #tpu.dot_dimension_numbers<[1], [0], [0], [1], [0, 0, 1, 1], [], []>} : vector<8x128xbf16>, vector<128x128xbf16>, vector<8x128xf32> -> vector<8x128xf32>
    %27 = arith.addf %21, %26 : vector<8x128xf32>
    %c1_34 = arith.constant 1 : index
    %c1_35 = arith.constant 1 : index
    %c0_36 = arith.constant 0 : index
    %28 = vector.load %arg5[%c1_34, %c1_35, %c0_36] : memref<3x10x128xbf16, #tpu.memory_space<vmem>>, vector<1x8x128xbf16>
    %29 = vector.shape_cast %28 : vector<1x8x128xbf16> to vector<8x128xbf16>
    %c4 = arith.constant 4 : index
    %c0_37 = arith.constant 0 : index
    %c0_38 = arith.constant 0 : index
    %30 = vector.load %arg2[%c4, %c0_37, %c0_38] : memref<9x128x128xbf16, #tpu.memory_space<vmem>>, vector<1x128x128xbf16>
    %31 = vector.shape_cast %30 : vector<1x128x128xbf16> to vector<128x128xbf16>
    %cst_39 = arith.constant dense<0.000000e+00> : vector<8x128xf32>
    %32 = tpu.matmul %29, %31, %cst_39 {dimension_numbers = #tpu.dot_dimension_numbers<[1], [0], [0], [1], [0, 0, 1, 1], [], []>} : vector<8x128xbf16>, vector<128x128xbf16>, vector<8x128xf32> -> vector<8x128xf32>
    %33 = arith.addf %27, %32 : vector<8x128xf32>
    %c1_40 = arith.constant 1 : index
    %c2_41 = arith.constant 2 : index
    %c0_42 = arith.constant 0 : index
    %34 = vector.load %arg5[%c1_40, %c2_41, %c0_42] : memref<3x10x128xbf16, #tpu.memory_space<vmem>>, vector<1x8x128xbf16>
    %35 = vector.shape_cast %34 : vector<1x8x128xbf16> to vector<8x128xbf16>
    %c5 = arith.constant 5 : index
    %c0_43 = arith.constant 0 : index
    %c0_44 = arith.constant 0 : index
    %36 = vector.load %arg2[%c5, %c0_43, %c0_44] : memref<9x128x128xbf16, #tpu.memory_space<vmem>>, vector<1x128x128xbf16>
    %37 = vector.shape_cast %36 : vector<1x128x128xbf16> to vector<128x128xbf16>
    %cst_45 = arith.constant dense<0.000000e+00> : vector<8x128xf32>
    %38 = tpu.matmul %35, %37, %cst_45 {dimension_numbers = #tpu.dot_dimension_numbers<[1], [0], [0], [1], [0, 0, 1, 1], [], []>} : vector<8x128xbf16>, vector<128x128xbf16>, vector<8x128xf32> -> vector<8x128xf32>
    %39 = arith.addf %33, %38 : vector<8x128xf32>
    %c2_46 = arith.constant 2 : index
    %c0_47 = arith.constant 0 : index
    %c0_48 = arith.constant 0 : index
    %40 = vector.load %arg5[%c2_46, %c0_47, %c0_48] : memref<3x10x128xbf16, #tpu.memory_space<vmem>>, vector<1x8x128xbf16>
    %41 = vector.shape_cast %40 : vector<1x8x128xbf16> to vector<8x128xbf16>
    %c6 = arith.constant 6 : index
    %c0_49 = arith.constant 0 : index
    %c0_50 = arith.constant 0 : index
    %42 = vector.load %arg2[%c6, %c0_49, %c0_50] : memref<9x128x128xbf16, #tpu.memory_space<vmem>>, vector<1x128x128xbf16>
    %43 = vector.shape_cast %42 : vector<1x128x128xbf16> to vector<128x128xbf16>
    %cst_51 = arith.constant dense<0.000000e+00> : vector<8x128xf32>
    %44 = tpu.matmul %41, %43, %cst_51 {dimension_numbers = #tpu.dot_dimension_numbers<[1], [0], [0], [1], [0, 0, 1, 1], [], []>} : vector<8x128xbf16>, vector<128x128xbf16>, vector<8x128xf32> -> vector<8x128xf32>
    %45 = arith.addf %39, %44 : vector<8x128xf32>
    %c2_52 = arith.constant 2 : index
    %c1_53 = arith.constant 1 : index
    %c0_54 = arith.constant 0 : index
    %46 = vector.load %arg5[%c2_52, %c1_53, %c0_54] : memref<3x10x128xbf16, #tpu.memory_space<vmem>>, vector<1x8x128xbf16>
    %47 = vector.shape_cast %46 : vector<1x8x128xbf16> to vector<8x128xbf16>
    %c7 = arith.constant 7 : index
    %c0_55 = arith.constant 0 : index
    %c0_56 = arith.constant 0 : index
    %48 = vector.load %arg2[%c7, %c0_55, %c0_56] : memref<9x128x128xbf16, #tpu.memory_space<vmem>>, vector<1x128x128xbf16>
    %49 = vector.shape_cast %48 : vector<1x128x128xbf16> to vector<128x128xbf16>
    %cst_57 = arith.constant dense<0.000000e+00> : vector<8x128xf32>
    %50 = tpu.matmul %47, %49, %cst_57 {dimension_numbers = #tpu.dot_dimension_numbers<[1], [0], [0], [1], [0, 0, 1, 1], [], []>} : vector<8x128xbf16>, vector<128x128xbf16>, vector<8x128xf32> -> vector<8x128xf32>
    %51 = arith.addf %45, %50 : vector<8x128xf32>
    %c2_58 = arith.constant 2 : index
    %c2_59 = arith.constant 2 : index
    %c0_60 = arith.constant 0 : index
    %52 = vector.load %arg5[%c2_58, %c2_59, %c0_60] : memref<3x10x128xbf16, #tpu.memory_space<vmem>>, vector<1x8x128xbf16>
    %53 = vector.shape_cast %52 : vector<1x8x128xbf16> to vector<8x128xbf16>
    %c8 = arith.constant 8 : index
    %c0_61 = arith.constant 0 : index
    %c0_62 = arith.constant 0 : index
    %54 = vector.load %arg2[%c8, %c0_61, %c0_62] : memref<9x128x128xbf16, #tpu.memory_space<vmem>>, vector<1x128x128xbf16>
    %55 = vector.shape_cast %54 : vector<1x128x128xbf16> to vector<128x128xbf16>
    %cst_63 = arith.constant dense<0.000000e+00> : vector<8x128xf32>
    %56 = tpu.matmul %53, %55, %cst_63 {dimension_numbers = #tpu.dot_dimension_numbers<[1], [0], [0], [1], [0, 0, 1, 1], [], []>} : vector<8x128xbf16>, vector<128x128xbf16>, vector<8x128xf32> -> vector<8x128xf32>
    %57 = arith.addf %51, %56 : vector<8x128xf32>
    %c0_64 = arith.constant 0 : index
    %c0_65 = arith.constant 0 : index
    %58 = vector.load %arg3[%c0_64, %c0_65] : memref<1x128xf32, #tpu.memory_space<vmem>>, vector<1x128xf32>
    %59 = vector.broadcast %58 : vector<1x128xf32> to vector<8x128xf32>
    %60 = arith.addf %57, %59 : vector<8x128xf32>
    %cst_66 = arith.constant 0.000000e+00 : f32
    %61 = vector.broadcast %cst_66 : f32 to vector<8x128xf32>
    %62 = arith.maximumf %60, %61 : vector<8x128xf32>
    %63 = vector.shape_cast %62 : vector<8x128xf32> to vector<1x8x128xf32>
    %64 = vector.extract_strided_slice %63 {offsets = [0, 0, 0], sizes = [1, 1, 128], strides = [1, 1, 1]} : vector<1x8x128xf32> to vector<1x1x128xf32>
    %65 = arith.truncf %64 : vector<1x1x128xf32> to vector<1x1x128xbf16>
    %c0_67 = arith.constant 0 : index
    %c0_68 = arith.constant 0 : index
    %c0_69 = arith.constant 0 : index
    %c0_70 = arith.constant 0 : index
    %66 = vector.load %arg4[%c0_67, %c0_68, %c0_69, %c0_70] : memref<1x1x1x128xbf16, #tpu.memory_space<vmem>>, vector<1x1x1x128xbf16>
    %67 = vector.shape_cast %66 : vector<1x1x1x128xbf16> to vector<1x1x128xbf16>
    %68 = vector.shape_cast %65 : vector<1x1x128xbf16> to vector<1x1x1x128xbf16>
    tpu.vector_store %arg4[%c0_67, %c0_68, %c0_69, %c0_70], %68 {strides = array<i32>} : memref<1x1x1x128xbf16, #tpu.memory_space<vmem>>, vector<1x1x1x128xbf16>,
    return
  }
  func.func @transform_0(%arg0: i32) -> (i32, i32, i32, i32) {
    %c0_i32 = arith.constant 0 : i32
    %c0_i32_0 = arith.constant 0 : i32
    %c0_i32_1 = arith.constant 0 : i32
    %c0_i32_2 = arith.constant 0 : i32
    return %arg0, %c0_i32, %c0_i32_0, %c0_i32_1 : i32, i32, i32, i32
  }
  func.func @transform_1(%arg0: i32) -> (i32, i32, i32) {
    %c0_i32 = arith.constant 0 : i32
    %c0_i32_0 = arith.constant 0 : i32
    %c0_i32_1 = arith.constant 0 : i32
    %c0_i32_2 = arith.constant 0 : i32
    return %c0_i32, %c0_i32_0, %c0_i32_1 : i32, i32, i32
  }
  func.func @transform_2(%arg0: i32) -> (i32, i32) {
    %c0_i32 = arith.constant 0 : i32
    %c0_i32_0 = arith.constant 0 : i32
    %c0_i32_1 = arith.constant 0 : i32
    return %c0_i32, %c0_i32_0 : i32, i32
  }
  func.func @transform_3(%arg0: i32) -> (i32, i32, i32, i32) {
    %c0_i32 = arith.constant 0 : i32
    %c0_i32_0 = arith.constant 0 : i32
    %c0_i32_1 = arith.constant 0 : i32
    %c0_i32_2 = arith.constant 0 : i32
    return %arg0, %c0_i32, %c0_i32_0, %c0_i32_1 : i32, i32, i32, i32
  }
}

module attributes {stable_mosaic.version = 11 : i64} {
  func.func @_mlp_kernel(%arg0: i32, %arg1: i32, %arg2: memref<8x128xbf16, #tpu.memory_space<vmem>>, %arg3: memref<128x512xbf16, #tpu.memory_space<vmem>>, %arg4: memref<1x512xf32, #tpu.memory_space<vmem>>, %arg5: memref<512x512xbf16, #tpu.memory_space<vmem>>, %arg6: memref<1x512xf32, #tpu.memory_space<vmem>>, %arg7: memref<512x128xf32, #tpu.memory_space<vmem>>, %arg8: memref<1x128xf32, #tpu.memory_space<vmem>>, %arg9: memref<8x128xf32, #tpu.memory_space<vmem>>, %arg10: memref<8x512xf32, #tpu.memory_space<vmem>>) attributes {dimension_semantics = [#tpu.dimension_semantics<parallel>, #tpu.dimension_semantics<arbitrary>], iteration_bounds = array<i64: 1, 1>, scalar_prefetch = 0 : i64, scratch_operands = 1 : i64, tpu.core_type = #tpu.core_type<tc>, window_params = [{transform_indices = @transform_0, window_bounds = array<i64: 8, 128>}, {transform_indices = @transform_1, window_bounds = array<i64: 128, 512>}, {pipeline_mode = #tpu.pipeline_mode<synchronous>, transform_indices = @transform_2, window_bounds = array<i64: 1, 512>}, {pipeline_mode = #tpu.pipeline_mode<synchronous>, transform_indices = @transform_3, window_bounds = array<i64: 512, 512>}, {pipeline_mode = #tpu.pipeline_mode<synchronous>, transform_indices = @transform_4, window_bounds = array<i64: 1, 512>}, {pipeline_mode = #tpu.pipeline_mode<synchronous>, transform_indices = @transform_5, window_bounds = array<i64: 512, 128>}, {pipeline_mode = #tpu.pipeline_mode<synchronous>, transform_indices = @transform_6, window_bounds = array<i64: 1, 128>}, {transform_indices = @transform_7, window_bounds = array<i64: 8, 128>}]} {
    %c0_i32 = arith.constant 0 : i32
    %0 = arith.cmpi eq, %arg1, %c0_i32 : i32
    %1 = arith.extui %0 : i1 to i32
    %c0_i32_0 = arith.constant 0 : i32
    %2 = arith.cmpi ne, %1, %c0_i32_0 : i32
    scf.if %2 {
      %cst_10 = arith.constant 0.000000e+00 : f32
      %12 = vector.broadcast %cst_10 : f32 to vector<8x512xf32>
      %c0_11 = arith.constant 0 : index
      %c0_12 = arith.constant 0 : index
      %13 = vector.load %arg10[%c0_11, %c0_12] : memref<8x512xf32, #tpu.memory_space<vmem>>, vector<8x512xf32>
      tpu.vector_store %arg10[%c0_11, %c0_12], %12 {strides = array<i32>} : memref<8x512xf32, #tpu.memory_space<vmem>>, vector<8x512xf32>,
    } else {
    }
    %c0 = arith.constant 0 : index
    %c0_1 = arith.constant 0 : index
    %3 = vector.load %arg10[%c0, %c0_1] : memref<8x512xf32, #tpu.memory_space<vmem>>, vector<8x512xf32>
    %c0_2 = arith.constant 0 : index
    %c0_3 = arith.constant 0 : index
    %4 = vector.load %arg2[%c0_2, %c0_3] : memref<8x128xbf16, #tpu.memory_space<vmem>>, vector<8x128xbf16>
    %c0_4 = arith.constant 0 : index
    %c0_5 = arith.constant 0 : index
    %5 = vector.load %arg3[%c0_4, %c0_5] : memref<128x512xbf16, #tpu.memory_space<vmem>>, vector<128x512xbf16>
    %cst = arith.constant dense<0.000000e+00> : vector<8x512xf32>
    %6 = tpu.matmul %4, %5, %cst {dimension_numbers = #tpu.dot_dimension_numbers<[1], [0], [0], [1], [0, 0, 1, 1], [], []>} : vector<8x128xbf16>, vector<128x512xbf16>, vector<8x512xf32> -> vector<8x512xf32>
    %7 = arith.addf %3, %6 : vector<8x512xf32>
    %c0_6 = arith.constant 0 : index
    %c0_7 = arith.constant 0 : index
    %8 = vector.load %arg10[%c0_6, %c0_7] : memref<8x512xf32, #tpu.memory_space<vmem>>, vector<8x512xf32>
    tpu.vector_store %arg10[%c0_6, %c0_7], %7 {strides = array<i32>} : memref<8x512xf32, #tpu.memory_space<vmem>>, vector<8x512xf32>,
    %c0_i32_8 = arith.constant 0 : i32
    %9 = arith.cmpi eq, %arg1, %c0_i32_8 : i32
    %10 = arith.extui %9 : i1 to i32
    %c0_i32_9 = arith.constant 0 : i32
    %11 = arith.cmpi ne, %10, %c0_i32_9 : i32
    scf.if %11 {
      %c0_10 = arith.constant 0 : index
      %c0_11 = arith.constant 0 : index
      %12 = vector.load %arg10[%c0_10, %c0_11] : memref<8x512xf32, #tpu.memory_space<vmem>>, vector<8x512xf32>
      %c0_12 = arith.constant 0 : index
      %c0_13 = arith.constant 0 : index
      %13 = vector.load %arg4[%c0_12, %c0_13] : memref<1x512xf32, #tpu.memory_space<vmem>>, vector<1x512xf32>
      %14 = vector.broadcast %13 : vector<1x512xf32> to vector<8x512xf32>
      %15 = arith.addf %12, %14 : vector<8x512xf32>
      %cst_14 = arith.constant 0.000000e+00 : f32
      %16 = vector.broadcast %cst_14 : f32 to vector<8x512xf32>
      %17 = arith.maximumf %15, %16 : vector<8x512xf32>
      %18 = arith.truncf %17 : vector<8x512xf32> to vector<8x512xbf16>
      %c0_15 = arith.constant 0 : index
      %c0_16 = arith.constant 0 : index
      %19 = vector.load %arg5[%c0_15, %c0_16] : memref<512x512xbf16, #tpu.memory_space<vmem>>, vector<512x512xbf16>
      %cst_17 = arith.constant dense<0.000000e+00> : vector<8x512xf32>
      %20 = tpu.matmul %18, %19, %cst_17 {dimension_numbers = #tpu.dot_dimension_numbers<[1], [0], [0], [1], [0, 0, 1, 1], [], []>} : vector<8x512xbf16>, vector<512x512xbf16>, vector<8x512xf32> -> vector<8x512xf32>
      %c0_18 = arith.constant 0 : index
      %c0_19 = arith.constant 0 : index
      %21 = vector.load %arg6[%c0_18, %c0_19] : memref<1x512xf32, #tpu.memory_space<vmem>>, vector<1x512xf32>
      %22 = vector.broadcast %21 : vector<1x512xf32> to vector<8x512xf32>
      %23 = arith.addf %20, %22 : vector<8x512xf32>
      %cst_20 = arith.constant 0.000000e+00 : f32
      %24 = vector.broadcast %cst_20 : f32 to vector<8x512xf32>
      %25 = arith.maximumf %23, %24 : vector<8x512xf32>
      %c0_21 = arith.constant 0 : index
      %c0_22 = arith.constant 0 : index
      %26 = vector.load %arg7[%c0_21, %c0_22] : memref<512x128xf32, #tpu.memory_space<vmem>>, vector<512x128xf32>
      %cst_23 = arith.constant dense<0.000000e+00> : vector<8x128xf32>
      %27 = tpu.matmul %25, %26, %cst_23 {dimension_numbers = #tpu.dot_dimension_numbers<[1], [0], [0], [1], [0, 0, 1, 1], [], []>} : vector<8x512xf32>, vector<512x128xf32>, vector<8x128xf32> -> vector<8x128xf32>
      %c0_24 = arith.constant 0 : index
      %c0_25 = arith.constant 0 : index
      %28 = vector.load %arg8[%c0_24, %c0_25] : memref<1x128xf32, #tpu.memory_space<vmem>>, vector<1x128xf32>
      %29 = vector.broadcast %28 : vector<1x128xf32> to vector<8x128xf32>
      %30 = arith.addf %27, %29 : vector<8x128xf32>
      %c0_26 = arith.constant 0 : index
      %c0_27 = arith.constant 0 : index
      %31 = vector.load %arg9[%c0_26, %c0_27] : memref<8x128xf32, #tpu.memory_space<vmem>>, vector<8x128xf32>
      tpu.vector_store %arg9[%c0_26, %c0_27], %30 {strides = array<i32>} : memref<8x128xf32, #tpu.memory_space<vmem>>, vector<8x128xf32>,
    } else {
    }
    return
  }
  func.func @transform_0(%arg0: i32, %arg1: i32) -> (i32, i32) {
    %c0_i32 = arith.constant 0 : i32
    return %arg0, %arg1 : i32, i32
  }
  func.func @transform_1(%arg0: i32, %arg1: i32) -> (i32, i32) {
    %c0_i32 = arith.constant 0 : i32
    %c0_i32_0 = arith.constant 0 : i32
    return %arg1, %c0_i32 : i32, i32
  }
  func.func @transform_2(%arg0: i32, %arg1: i32) -> (i32, i32) {
    %c0_i32 = arith.constant 0 : i32
    %c0_i32_0 = arith.constant 0 : i32
    %c0_i32_1 = arith.constant 0 : i32
    return %c0_i32, %c0_i32_0 : i32, i32
  }
  func.func @transform_3(%arg0: i32, %arg1: i32) -> (i32, i32) {
    %c0_i32 = arith.constant 0 : i32
    %c0_i32_0 = arith.constant 0 : i32
    %c0_i32_1 = arith.constant 0 : i32
    return %c0_i32, %c0_i32_0 : i32, i32
  }
  func.func @transform_4(%arg0: i32, %arg1: i32) -> (i32, i32) {
    %c0_i32 = arith.constant 0 : i32
    %c0_i32_0 = arith.constant 0 : i32
    %c0_i32_1 = arith.constant 0 : i32
    return %c0_i32, %c0_i32_0 : i32, i32
  }
  func.func @transform_5(%arg0: i32, %arg1: i32) -> (i32, i32) {
    %c0_i32 = arith.constant 0 : i32
    %c0_i32_0 = arith.constant 0 : i32
    %c0_i32_1 = arith.constant 0 : i32
    return %c0_i32, %c0_i32_0 : i32, i32
  }
  func.func @transform_6(%arg0: i32, %arg1: i32) -> (i32, i32) {
    %c0_i32 = arith.constant 0 : i32
    %c0_i32_0 = arith.constant 0 : i32
    %c0_i32_1 = arith.constant 0 : i32
    return %c0_i32, %c0_i32_0 : i32, i32
  }
  func.func @transform_7(%arg0: i32, %arg1: i32) -> (i32, i32) {
    %c0_i32 = arith.constant 0 : i32
    %c0_i32_0 = arith.constant 0 : i32
    return %arg0, %c0_i32 : i32, i32
  }
}

</mosaic_0001>

<bundles_post_ra>
// kernel: reinforce_forward.8
= control target key start
LH: loop header
LB: loop body
LE: loop exit
PB: predicated region body
PF: predicated region fallthrough
CT: control target
= control target key end

     0   :  { %s3367_s12 = smov 0   ;;  %s4017_s0 = inlined_call_operand.vmem [shape: bf16[2,8,8,128], index: 0, kind: input, shape index: {}]   ;;  %s4018_s1 = inlined_call_operand.vmem [shape: bf16[9,128,128], index: 1, kind: input, shape index: {}]   ;;  %s4019_s2 = inlined_call_operand.vmem [shape: f32[1,128], index: 2, kind: input, shape index: {}]   ;;  %s4020_s3 = inlined_call_operand.vmem [shape: bf16[2,4,512], index: 3, kind: output, shape index: {}]  }
   0x1 LB: > { %s2563_s13 = sadd.s32 4294967295, %s3343_s12   ;;  %p2567_p0 = scmp.ge.s32.totalorder %s3343_s12, 1  ;;  %s3343_s12 = sphi %s3367_s12, %s13_s12  }
   0x2   : > { %p137_p1 = scmp.lt.s32.totalorder %s3343_s12, 3 }
   0x4   : > { %p138_p2 = pnand %p2567_p0, %p137_p1 }
   0x5   : > { %v3253_v0 = vld [vmem:[%s4018_s1 + $0x40] sm:$0xff] (!%p138_p2)   ;;  %v3255_v2 = vld [vmem:[%s4018_s1 + $0x48] sm:$0xff] (!%p138_p2)   ;;  %p3386_p3 = scmp.lt.s32.totalorder (!%p138_p2), %s2563_s13, 1  ;;  %v3345_v3 = vmov (!%p138_p2), 0   ;;  %v3257_v5 = vld [vmem:[%s4018_s1 + $0x50] sm:$0xff] (!%p138_p2)   ;;  %vm281_vm0 = vcmask (!%p138_p2), 1043456  }
   0x6   : > { %141 = sbr.rel (%p138_p2) target bundleno = 452 (0x1c4), region = 32  ;;  %v3254_v1 = vld [vmem:[%s4018_s1 + $0x100] sm:$0xff] (!%p138_p2)   ;;  %2947 = vmatprep.subr.bf16.mxu1 (!%p138_p2), %v3253_v0  ;;  %172 = vst [vmem:[#allocation2] sm:$0xf] (!%p138_p2), %v3345_v3  ;;  %173 = vst [vmem:[#allocation2 + $0x4] sm:$0x1] (!%p138_p2), %v3345_v3 }
   0x7   : > { %174 = vst [vmem:[#allocation2 + $0x8] sm:$0xf] (!%p138_p2), %v3345_v3  ;;  %175 = vst [vmem:[#allocation2 + $0xc] sm:$0x1] (!%p138_p2), %v3345_v3  ;;  %3043 = vmatprep.subr.bf16.mxu0 (!%p138_p2), %v3254_v1  ;;  %2948 = vmatpush3.bf16.msra.mxu1 (!%p138_p2), %v3253_v0  ;;  %v3256_v4 = vld [vmem:[%s4018_s1 + $0x108] sm:$0xff] (!%p138_p2)   ;;  %v3258_v6 = vld [vmem:[%s4018_s1 + $0x110] sm:$0xff] (!%p138_p2)  }
   0x8   : > { %176 = vst [vmem:[#allocation2 + $0x10] sm:$0xf] (!%p138_p2), %v3345_v3  ;;  %177 = vst [vmem:[#allocation2 + $0x14] sm:$0x1] (!%p138_p2), %v3345_v3  ;;  %3044 = vmatpush3.bf16.msra.mxu0 (!%p138_p2), %v3254_v1  ;;  %2949 = vmatprep.subr.bf16.mxu1 (!%p138_p2), %v3255_v2  ;;  %v3259_v7 = vld [vmem:[%s4018_s1 + $0x58] sm:$0xff] (!%p138_p2)   ;;  %v3261_v9 = vld [vmem:[%s4018_s1 + $0x60] sm:$0xff] (!%p138_p2)  }
   0x9   : > { %178 = vst [vmem:[#allocation2 + $0x18] sm:$0xf] (!%p138_p2), %v3345_v3  ;;  %179 = vst [vmem:[#allocation2 + $0x1c] sm:$0x1] (!%p138_p2), %v3345_v3  ;;  %3045 = vmatprep.subr.bf16.mxu0 (!%p138_p2), %v3256_v4  ;;  %v3260_v8 = vld [vmem:[%s4018_s1 + $0x118] sm:$0xff] (!%p138_p2)   ;;  %v3262_v10 = vld [vmem:[%s4018_s1 + $0x120] sm:$0xff] (!%p138_p2)  }
   0xa   : > { %180 = vst [vmem:[#allocation2 + $0x20] sm:$0xf] (!%p138_p2), %v3345_v3  ;;  %181 = vst [vmem:[#allocation2 + $0x24] sm:$0x1] (!%p138_p2), %v3345_v3  ;;  %v3263_v11 = vld [vmem:[%s4018_s1 + $0x68] sm:$0xff] (!%p138_p2)   ;;  %vm287_vm2 = vcmask (!%p138_p2), 1040384  }
   0xb   : > { %182 = vst [vmem:[#allocation2 + $0x28] sm:$0xf] (!%p138_p2), %v3345_v3  ;;  %183 = vst [vmem:[#allocation2 + $0x2c] sm:$0x1] (!%p138_p2), %v3345_v3  ;;  %2950 = vmatpush3.bf16.msra.mxu1 (!%p138_p2), %v3255_v2  ;;  %vm282_vm1 = vsmask.f32 (!%p138_p2), 7938 }
   0xc   : > { %184 = vst [vmem:[#allocation2 + $0x30] sm:$0xf] (!%p138_p2), %v3345_v3  ;;  %185 = vst [vmem:[#allocation2 + $0x34] sm:$0x1] (!%p138_p2), %v3345_v3  ;;  %3046 = vmatpush3.bf16.msra.mxu0 (!%p138_p2), %v3256_v4  ;;  %2951 = vmatprep.subr.bf16.mxu1 (!%p138_p2), %v3257_v5  ;;  %v3264_v13 = vld [vmem:[%s4018_s1 + $0x128] sm:$0xff] (!%p138_p2)   ;;  %v3265_v16 = vld [vmem:[%s4018_s1 + $0x70] sm:$0xff] (!%p138_p2)  }
   0xd   : > { %186 = vst [vmem:[#allocation2 + $0x38] sm:$0xf] %v3345_v3  ;;  %187 = vst [vmem:[#allocation2 + $0x3c] sm:$0x1] %v3345_v3  ;;  %s4031_s13 = smov (!%p3386_p3, %s2563_s13), 1  ;;  %3047 = vmatprep.subr.bf16.mxu0 %v3258_v6  ;;  %v3266_v26 = vld [vmem:[%s4018_s1 + $0x130] sm:$0xff]  }
   0xe   : > { %188 = vst [vmem:[#allocation2 + $0x40] sm:$0xf] %v3345_v3  ;;  %189 = vst [vmem:[#allocation2 + $0x44] sm:$0x1] %v3345_v3  ;;  %s2837_s4 = sshll.u32 %s4031_s13, 5  ;;  %v3267_v32 = vld [vmem:[%s4018_s1 + $0x78] sm:$0xff]  }
   0xf   : > { %190 = vst [vmem:[#allocation2 + $0x48] sm:$0xf] %v3345_v3  ;;  %191 = vst [vmem:[#allocation2 + $0x4c] sm:$0x1] %v3345_v3  ;;  %2952 = vmatpush3.bf16.msra.mxu1 %v3257_v5  ;;  %s3421_s11 = scalar_lea.vmem %s4017_s0, %s2837_s4  ;;  %vm288_vm3 = vsmask.f32 256 }
  0x10   : > { %3048 = vmatpush3.bf16.msra.mxu0 %v3258_v6  ;;  %2953 = vmatprep.subr.bf16.mxu1 %v3259_v7  ;;  %v192_v12 = vld [vmem:[%s3421_s11] sm:$0xf]  ;;  %v284_v17 = vld [vmem:[#allocation2 + $0x8] sm:$0xf]  ;;  %vm3435_vm4 = vmand %vm281_vm0, %vm282_vm1  ;;  %vm367_vm6 = vsmask.f32 3328 }
  0x11   : > { %3049 = vmatprep.subr.bf16.mxu0 %v3260_v8  ;;  %v201_v14 = vshrl.u32 %v192_v12, 16  ;;  %v204_v15 = vshll.u32 %v192_v12, 16  ;;  %v3433_v18 = vld [vmem:[#allocation2] sm:$0xf]  ;;  %v290_v21 = vld [vmem:[#allocation2 + $0xc] sm:$0x1]  ;;  %vm3441_vm5 = vmand %vm287_vm2, %vm288_vm3 }
  0x12   : > { %v3439_v22 = vld [vmem:[#allocation2 + $0x4] sm:$0x1]  ;;  %v371_v24 = vshrl.u32 %v3433_v18, 16  ;;  %v374_v25 = vshll.u32 %v3433_v18, 16  ;;  %v3268_v36 = vld [vmem:[%s4018_s1 + $0x138] sm:$0xff]   ;;  %v3279_v23 = vld [vmem:[%s4018_s1 + $0x28] sm:$0xff]  }
  0x13   : > { %2954 = vmatpush3.bf16.msra.mxu1 %v3259_v7  ;;  %v203_v19 = vrot.slane %v201_v14, 7  ;;  %v193_v29 = vld [vmem:[%s3421_s11 + $0x4] sm:$0xf]  ;;  %v380_v35 = vshll.u32 %v3439_v22, 16  ;;  %vm368_vm7 = vsmask.f32 7440 }
  0x14   : > { %3050 = vmatpush3.bf16.msra.mxu0 %v3260_v8  ;;  %2955 = vmatprep.subr.bf16.mxu1 %v3261_v9  ;;  %v209_v30 = vshrl.u32 %v193_v29, 16  ;;  %v212_v31 = vshll.u32 %v193_v29, 16  ;;  %v373_v37 = vrot.slane %v371_v24, 4  ;;  %v376_v38 = vrot.slane %v374_v25, 5  ;;  %v194_v40 = vld [vmem:[%s3421_s11 + $0x8] sm:$0xf]  ;;  %vm3498_vm8 = vmor %vm367_vm6, %vm368_vm7 }
  0x15   : > { %3051 = vmatprep.subr.bf16.mxu0 %v3262_v10  ;;  %v206_v27 = vor.u32 %v204_v15, %v203_v19  ;;  %v207_v28 = vrot.slane %v203_v19, 4  ;;  %v293_v41 = vld [vmem:[#allocation2 + $0x10] sm:$0xf]  ;;  %v296_v42 = vld [vmem:[#allocation2 + $0x14] sm:$0x1]  ;;  %v217_v43 = vshrl.u32 %v194_v40, 16 }
  0x16   : > { %v211_v39 = vrot.slane %v209_v30, 7  ;;  %v220_v44 = vshll.u32 %v194_v40, 16  ;;  %v3466_v45 = vld [vmem:[%s4018_s1] sm:$0xff]   ;;  %v299_v48 = vld [vmem:[#allocation2 + $0x18] sm:$0xf]  ;;  %v3469_v50 = vrot.slane %v380_v35, 5  ;;  %v377_v56 = vor.u32 %v376_v38, %v373_v37 }
  0x17   : > { %2956 = vmatpush3.bf16.msra.mxu1 %v3261_v9  ;;  %v285_v33 = vsel %vm3435_vm4, %v206_v27, %v284_v17  ;;  %v291_v34 = vsel %vm3441_vm5, %v207_v28, %v290_v21  ;;  %v195_v49 = vld [vmem:[%s3421_s11 + $0xc] sm:$0xf]  ;;  %v3474_v51 = vld [vmem:[%s4018_s1 + $0x140] sm:$0xff]   ;;  %v219_v52 = vrot.slane %v217_v43, 7  ;;  %v302_v53 = vld [vmem:[#allocation2 + $0x1c] sm:$0x1] }
  0x18   : > { %3052 = vmatpush3.bf16.msra.mxu0 %v3262_v10  ;;  %2957 = vmatprep.subr.bf16.mxu1 %v3263_v11  ;;  %286 = vst [vmem:[#allocation2 + $0x8] sm:$0xf] %v285_v33  ;;  %292 = vst [vmem:[#allocation2 + $0xc] sm:$0x1] %v291_v34  ;;  %v214_v46 = vor.u32 %v212_v31, %v211_v39  ;;  %v215_v47 = vrot.slane %v211_v39, 4  ;;  %v225_v54 = vshrl.u32 %v195_v49, 16 }
  0x19   : > { %3053 = vmatprep.subr.bf16.mxu0 %v3264_v13  ;;  %v228_v55 = vshll.u32 %v195_v49, 16  ;;  %v222_v59 = vor.u32 %v220_v44, %v219_v52  ;;  %v223_v60 = vrot.slane %v219_v52, 4  ;;  %v305_v62 = vld [vmem:[#allocation2 + $0x20] sm:$0xf]  ;;  %v378_v5 = vrot.slane %v377_v56, 4 }
  0x1a   : > { %v294_v57 = vsel %vm3435_vm4, %v214_v46, %v293_v41  ;;  %v297_v58 = vsel %vm3441_vm5, %v215_v47, %v296_v42  ;;  %v227_v61 = vrot.slane %v225_v54, 7  ;;  %v308_v12 = vld [vmem:[#allocation2 + $0x24] sm:$0x1]  ;;  %vm789_vm9 = vcmask 1042432  }
  0x1b   : > { %2958 = vmatpush3.bf16.msra.mxu1 %v3263_v11  ;;  %295 = vst [vmem:[#allocation2 + $0x10] sm:$0xf] %v294_v57  ;;  %298 = vst [vmem:[#allocation2 + $0x14] sm:$0x1] %v297_v58  ;;  %v300_v2 = vsel %vm3435_vm4, %v222_v59, %v299_v48  ;;  %v303_v3 = vsel %vm3441_vm5, %v223_v60, %v302_v53  ;;  %v3278_v20 = vld [vmem:[%s4018_s1 + $0x160] sm:$0xff]   ;;  %vm790_vm10 = vcmask 1046532  }
  0x1c   : > { %3054 = vmatpush3.bf16.msra.mxu0 %v3264_v13  ;;  %2959 = vmatprep.subr.bf16.mxu1 %v3265_v16  ;;  %v230_v4 = vor.u32 %v228_v55, %v227_v61  ;;  %301 = vst [vmem:[#allocation2 + $0x18] sm:$0xf] %v300_v2  ;;  %304 = vst [vmem:[#allocation2 + $0x1c] sm:$0x1] %v303_v3  ;;  %v3333_v17 = vld [vmem:[%s4018_s1 + $0x220] sm:$0xff]   ;;  %vm2330_vm12 = vcmask 1041408  }
  0x1d   : > { %3055 = vmatprep.subr.bf16.mxu0 %v3266_v26  ;;  %vm3684_vm11 = vmor %vm789_vm9, %vm790_vm10  ;;  %vm2359_vm13 = vcmask 1043458   ;;  %vm2388_vm14 = vcmask 1045508   ;;  %vm2417_vm15 = vcmask 1047558   ;;  %vm2450_vm0 = vcmask 1041409  }
  0x1e   : > { %v306_v25 = vsel %vm3435_vm4, %v230_v4, %v305_v62  ;;  %vm2452_vm1 = vcmask 1042434   ;;  %vm2454_vm2 = vcmask 1043459  }
  0x1f   : > { %2960 = vmatpush3.bf16.msra.mxu1 %v3265_v16  ;;  %v3480_v63 = vld [vmem:[#allocation2 + $0x8] sm:$0xf]  ;;  %v3482_v0 = vld [vmem:[#allocation2 + $0xc] sm:$0x1]  ;;  %v231_v16 = vrot.slane %v227_v61, 4 }
  0x20   : > { %3056 = vmatpush3.bf16.msra.mxu0 %v3266_v26  ;;  %2961 = vmatprep.subr.bf16.mxu1 %v3267_v32  ;;  %v1148_v1 = vld [vmem:[#allocation2 + $0x8] sm:$0xf]  ;;  %v385_v6 = vshrl.u32 %v3480_v63, 16  ;;  %v388_v7 = vshll.u32 %v3480_v63, 16  ;;  %v394_v8 = vshll.u32 %v3482_v0, 16 }
  0x21   : > { %3057 = vmatprep.subr.bf16.mxu0 %v3268_v36  ;;  %v3492_v9 = vld [vmem:[#allocation2 + $0xc] sm:$0x1]  ;;  %v1165_v10 = vshrl.u32 %v1148_v1, 16  ;;  %v1168_v11 = vshll.u32 %v1148_v1, 16  ;;  %307 = vst [vmem:[#allocation2 + $0x20] sm:$0xf] %v306_v25  ;;  %v309_v30 = vsel %vm3441_vm5, %v231_v16, %v308_v12 }
  0x22   : > { %v387_v13 = vrot.slane %v385_v6, 4  ;;  %v390_v14 = vrot.slane %v388_v7, 5  ;;  %v1174_v15 = vshll.u32 %v3492_v9, 16  ;;  %v396_v19 = vrot.slane %v394_v8, 5  ;;  %v1150_v27 = vld [vmem:[#allocation2 + $0x10] sm:$0xf] }
  0x23   : > { %2962 = vmatpush3.bf16.msra.mxu1 %v3267_v32  ;;  %v1167_v21 = vrot.slane %v1165_v10, 4  ;;  %v1170_v24 = vrot.slane %v1168_v11, 5  ;;  %v3504_v28 = vld [vmem:[#allocation2 + $0x14] sm:$0x1]  ;;  %v3506_v29 = vld [vmem:[#allocation2 + $0x10] sm:$0xf] }
  0x24   : > { %3058 = vmatpush3.bf16.msra.mxu0 %v3268_v36  ;;  %2971 = vmatprep.subr.bf16.mxu1 %v3466_v45  ;;  %v391_v26 = vor.u32 %v390_v14, %v387_v13  ;;  %v1179_v32 = vshrl.u32 %v1150_v27, 16  ;;  %v1182_v33 = vshll.u32 %v1150_v27, 16  ;;  %v1188_v34 = vshll.u32 %v3504_v28, 16  ;;  %v3511_v35 = vld [vmem:[#allocation2 + $0x14] sm:$0x1] }
  0x25   : > { %3067 = vmatprep.subr.bf16.mxu0 %v3474_v51  ;;  %v1171_v31 = vor.u32 %v1170_v24, %v1167_v21  ;;  %310 = vst [vmem:[#allocation2 + $0x24] sm:$0x1] %v309_v30  ;;  %v383_v36 = vsel %vm3498_vm8, %v378_v5, %v3469_v50  ;;  %v399_v38 = vshrl.u32 %v3506_v29, 16  ;;  %v402_v39 = vshll.u32 %v3506_v29, 16  ;;  %v3518_v44 = vld [vmem:[#allocation2 + $0x18] sm:$0xf] }
  0x26   : > { %v392_v37 = vrot.slane %v391_v26, 4  ;;  %v1176_v41 = vrot.slane %v1174_v15, 5  ;;  %v1181_v42 = vrot.slane %v1179_v32, 4  ;;  %v1184_v43 = vrot.slane %v1182_v33, 5  ;;  %v3522_v47 = vld [vmem:[#allocation2 + $0x1c] sm:$0x1] }
  0x27   : > { %v1172_v40 = vrot.slane %v1171_v31, 4  ;;  %v401_v48 = vrot.slane %v399_v38, 4  ;;  %v404_v49 = vrot.slane %v402_v39, 5  ;;  %v408_v50 = vshll.u32 %v3511_v35, 16  ;;  %v1152_v56 = vld [vmem:[#allocation2 + $0x18] sm:$0xf] }
  0x28   : > { %v397_v46 = vsel %vm3498_vm8, %v392_v37, %v396_v19  ;;  %v1185_v53 = vor.u32 %v1184_v43, %v1181_v42  ;;  %v1190_v54 = vrot.slane %v1188_v34, 5  ;;  %v413_v55 = vshrl.u32 %v3518_v44, 16  ;;  %v3528_v60 = vld [vmem:[#allocation2 + $0x1c] sm:$0x1]  ;;  %v1154_v2 = vld [vmem:[#allocation2 + $0x20] sm:$0xf] }
  0x29   : > { %v2588_v52 = vcombine.low %v383_v36, %v397_v46  ;;  %v405_v57 = vor.u32 %v404_v49, %v401_v48  ;;  %v416_v58 = vshll.u32 %v3518_v44, 16  ;;  %v422_v59 = vshll.u32 %v3522_v47, 16  ;;  %v196_v36 = vld [vmem:[%s3421_s11 + $0x10] sm:$0xf]  ;;  %v3546_v42 = vld [vmem:[#allocation2 + $0x20] sm:$0xf] }
  0x2a   : > { %v1177_v61 = vsel %vm3498_vm8, %v1172_v40, %v1176_v41  ;;  %v1186_v62 = vrot.slane %v1185_v53, 4  ;;  %v415_v1 = vrot.slane %v413_v55, 4  ;;  %v410_v4 = vrot.slane %v408_v50, 5  ;;  %v3271_v40 = vld [vmem:[%s4018_s1 + $0x8] sm:$0xff]  }
  0x2b   : > { %2963 = vmatprep.mubr.bf16.mxu1 %v2588_v52  ;;  %v406_v3 = vrot.slane %v405_v57, 4  ;;  %v418_v5 = vrot.slane %v416_v58, 5  ;;  %v1193_v7 = vshrl.u32 %v1152_v56, 16  ;;  %v1196_v10 = vshll.u32 %v1152_v56, 16  ;;  %v311_v48 = vld [vmem:[#allocation2 + $0x28] sm:$0xf] }
  0x2c   : > { %v3532_v6 = vld [vmem:[#allocation2 + $0x24] sm:$0x1]  ;;  %v1191_v8 = vsel %vm3498_vm8, %v1186_v62, %v1190_v54  ;;  %v1202_v11 = vshll.u32 %v3528_v60, 16  ;;  %v1207_v12 = vshrl.u32 %v1154_v2, 16  ;;  %v424_v15 = vrot.slane %v422_v59, 5  ;;  %v3272_v59 = vld [vmem:[%s4018_s1 + $0x148] sm:$0xff]  }
  0x2d   : > { %v2692_v13 = vcombine.low %v1177_v61, %v1191_v8  ;;  %v419_v14 = vor.u32 %v418_v5, %v415_v1  ;;  %v1195_v16 = vrot.slane %v1193_v7, 4  ;;  %v1198_v19 = vrot.slane %v1196_v10, 5  ;;  %v314_v54 = vld [vmem:[#allocation2 + $0x2c] sm:$0x1]  ;;  %v197_v57 = vld [vmem:[%s3421_s11 + $0x14] sm:$0xf] }
  0x2e   : > { %v1209_v21 = vrot.slane %v1207_v12, 4  ;;  %v1210_v24 = vshll.u32 %v1154_v2, 16  ;;  %v411_v25 = vsel %vm3498_vm8, %v406_v3, %v410_v4  ;;  %v1216_v27 = vshll.u32 %v3532_v6, 16  ;;  %v3273_v61 = vld [vmem:[%s4018_s1 + $0x10] sm:$0xff]   ;;  %v3275_v5 = vld [vmem:[%s4018_s1 + $0x18] sm:$0xff]  }
  0x2f   : > { %3059 = vmatprep.mubr.bf16.mxu0 %v2692_v13  ;;  %v420_v26 = vrot.slane %v419_v14, 4  ;;  %v1199_v30 = vor.u32 %v1198_v19, %v1195_v16  ;;  %v1204_v31 = vrot.slane %v1202_v11, 5  ;;  %v233_v41 = vshrl.u32 %v196_v36, 16  ;;  %v317_v10 = vld [vmem:[#allocation2 + $0x30] sm:$0xf] }
  0x30   : > { %v1212_v32 = vrot.slane %v1210_v24, 5  ;;  %v1218_v34 = vrot.slane %v1216_v27, 5  ;;  %v794_v43 = vrot.slane %v3439_v22, 5  ;;  %v236_v46 = vshll.u32 %v196_v36, 16  ;;  %v320_v11 = vld [vmem:[#allocation2 + $0x34] sm:$0x1] }
  0x31   : > { %v425_v33 = vsel %vm3498_vm8, %v420_v26, %v424_v15  ;;  %v1200_v38 = vrot.slane %v1199_v30, 4  ;;  %v427_v49 = vshrl.u32 %v3546_v42, 16  ;;  %v235_v53 = vrot.slane %v233_v41, 7  ;;  %v198_v12 = vld [vmem:[%s3421_s11 + $0x18] sm:$0xf]  ;;  %v3274_v13 = vld [vmem:[%s4018_s1 + $0x150] sm:$0xff]  }
  0x32   : > { %v2589_v37 = vcombine.low %v411_v25, %v425_v33  ;;  %v1213_v39 = vor.u32 %v1212_v32, %v1209_v21  ;;  %v798_v55 = vrot.slane %v3482_v0, 5  ;;  %v430_v56 = vshll.u32 %v3546_v42, 16  ;;  %v3577_v14 = vld [vmem:[#allocation2 + $0x24] sm:$0x1]  ;;  %v199_v24 = vld [vmem:[%s3421_s11 + $0x1c] sm:$0xf] }
  0x33   : > { %v1205_v50 = vsel %vm3498_vm8, %v1200_v38, %v1204_v31  ;;  %v238_v62 = vor.u32 %v236_v46, %v235_v53  ;;  %v239_v1 = vrot.slane %v235_v53, 4  ;;  %v3564_v2 = vrot.slane %v427_v49, 4  ;;  %v323_v25 = vld [vmem:[#allocation2 + $0x38] sm:$0xf]  ;;  %v326_v26 = vld [vmem:[#allocation2 + $0x3c] sm:$0x1] }
  0x34   : > { %2964 = vmatmul.mubr.bf16.vlgmr.msra.gmra.mrb[0].mxu1 %v2589_v37  ;;  %v1214_v52 = vrot.slane %v1213_v39, 4  ;;  %v241_v3 = vshrl.u32 %v197_v57, 16  ;;  %v244_v4 = vshll.u32 %v197_v57, 16  ;;  %v432_v15 = vrot.slane %v430_v56, 5  ;;  %v332_v36 = vld [vmem:[#allocation2 + $0x44] sm:$0x1] }
  0x35   : > { %2972 = vmatpush3.bf16.msra.mxu1 %v3466_v45  ;;  %v312_v7 = vsel %vm3435_vm4, %v238_v62, %v311_v48  ;;  %v315_v8 = vsel %vm3441_vm5, %v239_v1, %v314_v54  ;;  %v249_v19 = vshrl.u32 %v198_v12, 16  ;;  %v252_v21 = vshll.u32 %v198_v12, 16  ;;  %v3277_v46 = vld [vmem:[%s4018_s1 + $0x20] sm:$0xff]   ;;  %v3276_v54 = vld [vmem:[%s4018_s1 + $0x158] sm:$0xff]   ;;  %s2838_s11 = sshll.u32 %s4031_s13, 3 }
  0x36   : > { %v1219_v58 = vsel %vm3498_vm8, %v1214_v52, %v1218_v34  ;;  %2973 = vmatprep.subr.bf16.mxu1 %v3271_v40  ;;  %313 = vst [vmem:[#allocation2 + $0x28] sm:$0xf] %v312_v7  ;;  %316 = vst [vmem:[#allocation2 + $0x2c] sm:$0x1] %v315_v8  ;;  %v243_v16 = vrot.slane %v241_v3, 7  ;;  %v257_v27 = vshrl.u32 %v199_v24, 16  ;;  %v433_v48 = vor.u32 %v432_v15, %v3564_v2  ;;  %s170_s18 = scalar_lea.vmem %s4020_s3, %s2838_s11 }
  0x37   : > { %v2693_v45 = vcombine.low %v1205_v50, %v1219_v58  ;;  %v260_v30 = vshll.u32 %v199_v24, 16  ;;  %v251_v33 = vrot.slane %v249_v19, 7  ;;  %v329_v34 = vld [vmem:[#allocation2 + $0x40] sm:$0xf]  ;;  %v1456_v37 = vrot.slane %v3492_v9, 5 }
  0x38   : > { %v246_v31 = vor.u32 %v244_v4, %v243_v16  ;;  %v247_v32 = vrot.slane %v243_v16, 4  ;;  %v259_v38 = vrot.slane %v257_v27, 7  ;;  %v436_v49 = vshll.u32 %v3577_v14, 16  ;;  %v3620_v24 = vld [vmem:[#allocation2 + $0x8] sm:$0xe] }
  0x39   : > { %3060 = vmatmul.mubr.bf16.vlgmr.msra.gmra.mrb[0].mxu0 %v2693_v45  ;;  %2974 = vmatpush3.bf16.msra.mxu1 %v3271_v40  ;;  %v254_v40 = vor.u32 %v252_v21, %v251_v33  ;;  %v255_v41 = vrot.slane %v251_v33, 4  ;;  %v1460_v53 = vrot.slane %v3504_v28, 5  ;;  %v802_v8 = vrot.slane %v3511_v35, 5  ;;  %v3293_v35 = vld [vmem:[%s4018_s1 + $0x98] sm:$0xff]  }
  0x3a   : > { %3068 = vmatpush3.bf16.msra.mxu0 %v3474_v51  ;;  %2975 = vmatprep.subr.bf16.mxu1 %v3273_v61  ;;  %v318_v39 = vsel %vm3435_vm4, %v246_v31, %v317_v10  ;;  %v321_v51 = vsel %vm3441_vm5, %v247_v32, %v320_v11  ;;  %v262_v50 = vor.u32 %v260_v30, %v259_v38  ;;  %v263_v52 = vrot.slane %v259_v38, 4  ;;  %v3281_v31 = vld [vmem:[%s4018_s1 + $0x30] sm:$0xff]  }
  0x3b   : > { %3069 = vmatprep.subr.bf16.mxu0 %v3272_v59  ;;  %319 = vst [vmem:[#allocation2 + $0x30] sm:$0xf] %v318_v39  ;;  %322 = vst [vmem:[#allocation2 + $0x34] sm:$0x1] %v321_v51  ;;  %v324_v56 = vsel %vm3435_vm4, %v254_v40, %v323_v25  ;;  %v327_v57 = vsel %vm3441_vm5, %v255_v41, %v326_v26  ;;  %v438_v10 = vrot.slane %v436_v49, 5  ;;  %v3280_v39 = vld [vmem:[%s4018_s1 + $0x168] sm:$0xff]  }
  0x3c   : > { %325 = vst [vmem:[#allocation2 + $0x38] sm:$0xf] %v324_v56  ;;  %328 = vst [vmem:[#allocation2 + $0x3c] sm:$0x1] %v327_v57  ;;  %v330_v62 = vsel %vm3435_vm4, %v262_v50, %v329_v34  ;;  %v333_v1 = vsel %vm3441_vm5, %v263_v52, %v332_v36  ;;  %v2704_v56 = vrot.slane %v3620_v24, 9  ;;  %v1464_v9 = vrot.slane %v3528_v60, 5 }
  0x3d   : > { %2976 = vmatpush3.bf16.msra.mxu1 %v3273_v61  ;;  %v3599_v58 = vld [vmem:[#allocation2 + $0x28] sm:$0xf]  ;;  %v3610_v4 = vld [vmem:[#allocation2 + $0x2c] sm:$0x1]  ;;  %331 = vst [vmem:[#allocation2 + $0x40] sm:$0xf] %v330_v62  ;;  %v2601_v60 = vcombine.low %v3506_v29, %v3518_v44 }
  0x3e   : > { %3070 = vmatpush3.bf16.msra.mxu0 %v3272_v59  ;;  %2977 = vmatprep.subr.bf16.mxu1 %v3275_v5  ;;  %v3601_v59 = vld [vmem:[#allocation2 + $0x2c] sm:$0x1]  ;;  %v1156_v61 = vld [vmem:[#allocation2 + $0x28] sm:$0xf]  ;;  %v441_v2 = vshrl.u32 %v3599_v58, 16  ;;  %v444_v45 = vshll.u32 %v3599_v58, 16 }
  0x3f   : > { %3071 = vmatprep.subr.bf16.mxu0 %v3274_v13  ;;  %v450_v3 = vshll.u32 %v3601_v59, 16  ;;  %v1221_v7 = vshrl.u32 %v1156_v61, 16  ;;  %334 = vst [vmem:[#allocation2 + $0x44] sm:$0x1] %v333_v1  ;;  %v1224_v11 = vshll.u32 %v1156_v61, 16  ;;  %v1230_v19 = vshll.u32 %v3610_v4, 16 }
  0x40   : > { %v443_v12 = vrot.slane %v441_v2, 4  ;;  %v446_v15 = vrot.slane %v444_v45, 5  ;;  %v3283_v45 = vld [vmem:[%s4018_s1 + $0x38] sm:$0xff]   ;;  %v1468_v24 = vrot.slane %v3532_v6, 5  ;;  %v3289_v6 = vld [vmem:[%s4018_s1 + $0x88] sm:$0xff]  }
  0x41   : > { %2978 = vmatpush3.bf16.msra.mxu1 %v3275_v5  ;;  %v434_v5 = vrot.slane %v433_v48, 4  ;;  %v1223_v16 = vrot.slane %v1221_v7, 4  ;;  %v452_v21 = vrot.slane %v450_v3, 5  ;;  %v1232_v41 = vrot.slane %v1230_v19, 5 }
  0x42   : > { %3072 = vmatpush3.bf16.msra.mxu0 %v3274_v13  ;;  %2979 = vmatprep.subr.bf16.mxu1 %v3277_v46  ;;  %v1226_v13 = vrot.slane %v1224_v11, 5  ;;  %v447_v25 = vor.u32 %v446_v15, %v443_v12  ;;  %v1158_v26 = vld [vmem:[#allocation2 + $0x30] sm:$0xf]  ;;  %v3622_v27 = vld [vmem:[#allocation2 + $0x34] sm:$0x1] }
  0x43   : > { %3073 = vmatprep.subr.bf16.mxu0 %v3276_v54  ;;  %v3624_v30 = vld [vmem:[#allocation2 + $0x30] sm:$0xf]  ;;  %v1235_v33 = vshrl.u32 %v1158_v26, 16  ;;  %v1238_v34 = vshll.u32 %v1158_v26, 16  ;;  %v1244_v36 = vshll.u32 %v3622_v27, 16  ;;  %v439_v51 = vsel %vm3498_vm8, %v434_v5, %v438_v10 }
  0x44   : > { %v1227_v32 = vor.u32 %v1226_v13, %v1223_v16  ;;  %v3630_v38 = vld [vmem:[#allocation2 + $0x34] sm:$0x1]  ;;  %v448_v40 = vrot.slane %v447_v25, 4  ;;  %v455_v48 = vshrl.u32 %v3624_v30, 16  ;;  %v458_v62 = vshll.u32 %v3624_v30, 16 }
  0x45   : > { %2980 = vmatpush3.bf16.msra.mxu1 %v3277_v46  ;;  %v3637_v46 = vld [vmem:[#allocation2 + $0x38] sm:$0xf]  ;;  %v1237_v50 = vrot.slane %v1235_v33, 4  ;;  %v1240_v52 = vrot.slane %v1238_v34, 5  ;;  %v464_v1 = vshll.u32 %v3630_v38, 16  ;;  %v1246_v5 = vrot.slane %v1244_v36, 5 }
  0x46   : > { %3074 = vmatpush3.bf16.msra.mxu0 %v3276_v54  ;;  %2981 = vmatprep.subr.bf16.mxu1 %v3279_v23  ;;  %v1228_v49 = vrot.slane %v1227_v32, 4  ;;  %v3640_v54 = vld [vmem:[#allocation2 + $0x3c] sm:$0x1]  ;;  %v453_v57 = vsel %vm3498_vm8, %v448_v40, %v452_v21  ;;  %v457_v61 = vrot.slane %v455_v48, 4  ;;  %v1160_v2 = vld [vmem:[#allocation2 + $0x38] sm:$0xf] }
  0x47   : > { %3075 = vmatprep.subr.bf16.mxu0 %v3278_v20  ;;  %v2590_v3 = vcombine.low %v439_v51, %v453_v57  ;;  %v1241_v7 = vor.u32 %v1240_v52, %v1237_v50  ;;  %v3651_v10 = vld [vmem:[#allocation2 + $0x3c] sm:$0x1]  ;;  %v1162_v11 = vld [vmem:[#allocation2 + $0x40] sm:$0xf]  ;;  %v3282_v15 = vld [vmem:[%s4018_s1 + $0x170] sm:$0xff]   ;;  %v460_v16 = vrot.slane %v458_v62, 5 }
  0x48   : > { %v1233_v12 = vsel %vm3498_vm8, %v1228_v49, %v1232_v41  ;;  %v478_v19 = vshll.u32 %v3640_v54, 16  ;;  %v3660_v21 = vld [vmem:[#allocation2 + $0x44] sm:$0x1]  ;;  %v1249_v26 = vshrl.u32 %v1160_v2, 16  ;;  %v1252_v32 = vshll.u32 %v1160_v2, 16  ;;  %v3284_v41 = vld [vmem:[%s4018_s1 + $0x178] sm:$0xff]  }
  0x49   : > { %2982 = vmatpush3.bf16.msra.mxu1 %v3279_v23  ;;  %v469_v23 = vshrl.u32 %v3637_v46, 16  ;;  %2967 = vmatprep.mubr.bf16.mxu1 %v2590_v3  ;;  %v1242_v13 = vrot.slane %v1241_v7, 4  ;;  %v1431_v33 = vld [vmem:[#allocation2 + $0x10] sm:$0xe]  ;;  %v461_v34 = vor.u32 %v460_v16, %v457_v61  ;;  %v466_v36 = vrot.slane %v464_v1, 5  ;;  %v3671_v57 = vld [vmem:[%s4018_s1 + $0x80] sm:$0xff]  }
  0x4a   : > { %3076 = vmatpush3.bf16.msra.mxu0 %v3278_v20  ;;  %2983 = vmatprep.subr.bf16.mxu1 %v3281_v31  ;;  %v472_v20 = vshll.u32 %v3637_v46, 16  ;;  %v1258_v40 = vshll.u32 %v3651_v10, 16  ;;  %v1251_v49 = vrot.slane %v1249_v26, 4  ;;  %v1254_v50 = vrot.slane %v1252_v32, 5  ;;  %v1432_v32 = vld [vmem:[#allocation2 + $0x18] sm:$0xe] }
  0x4b   : > { %3077 = vmatprep.subr.bf16.mxu0 %v3280_v39  ;;  %v471_v25 = vrot.slane %v469_v23, 4  ;;  %v1247_v48 = vsel %vm3498_vm8, %v1242_v13, %v1246_v5  ;;  %v1263_v52 = vshrl.u32 %v1162_v11, 16  ;;  %v462_v61 = vrot.slane %v461_v34, 4  ;;  %v1435_v28 = vld [vmem:[#allocation2 + $0x30] sm:$0xe] }
  0x4c   : > { %v474_v51 = vrot.slane %v472_v20, 5  ;;  %v480_v1 = vrot.slane %v478_v19, 5  ;;  %v1255_v2 = vor.u32 %v1254_v50, %v1251_v49  ;;  %v1272_v7 = vshll.u32 %v3660_v21, 16 }
  0x4d   : > { %2984 = vmatpush3.bf16.msra.mxu1 %v3281_v31  ;;  %v2694_v31 = vcombine.low %v1233_v12, %v1247_v48  ;;  %v1265_v3 = vrot.slane %v1263_v52, 4  ;;  %v467_v5 = vsel %vm3498_vm8, %v462_v61, %v466_v36  ;;  %v2705_v16 = vrot.slane %v1431_v33, 9  ;;  %v3679_v12 = vld [vmem:[%s4018_s1 + $0x180] sm:$0xff]   ;;  %v1434_v48 = vld [vmem:[#allocation2 + $0x28] sm:$0xe] }
  0x4e   : > { %3078 = vmatpush3.bf16.msra.mxu0 %v3280_v39  ;;  %2985 = vmatprep.subr.bf16.mxu1 %v3283_v45  ;;  %v475_v62 = vor.u32 %v474_v51, %v471_v25  ;;  %v1266_v39 = vshll.u32 %v1162_v11, 16  ;;  %v1256_v20 = vrot.slane %v1255_v2, 4  ;;  %v1260_v13 = vrot.slane %v1258_v40, 5  ;;  %v1433_v33 = vld [vmem:[#allocation2 + $0x20] sm:$0xe] }
  0x4f   : > { %3079 = vmatprep.subr.bf16.mxu0 %v3282_v15  ;;  %3063 = vmatprep.mubr.bf16.mxu0 %v2694_v31  ;;  %v1274_v25 = vrot.slane %v1272_v7, 5  ;;  %v2600_v26 = vcombine.low %v3433_v18, %v3480_v63  ;;  %v1461_v51 = vsel %vm3684_vm11, %v2705_v16, %v1460_v53  ;;  %v806_v40 = vrot.slane %v3522_v47, 5  ;;  %v765_v2 = vld [vmem:[#allocation2] sm:$0xe] }
  0x50   : > { %v476_v23 = vrot.slane %v475_v62, 4  ;;  %v1268_v19 = vrot.slane %v1266_v39, 5  ;;  %v1261_v18 = vsel %vm3498_vm8, %v1256_v20, %v1260_v13  ;;  %v2706_v47 = vrot.slane %v1432_v32, 9  ;;  %v1437_v62 = vld [vmem:[#allocation2 + $0x40] sm:$0xe] }
  0x51   : > { %2986 = vmatpush3.bf16.msra.mxu1 %v3283_v45  ;;  %v2708_v50 = vrot.slane %v1434_v48, 9  ;;  %v1472_v52 = vrot.slane %v3610_v4, 5  ;;  %v2709_v31 = vrot.slane %v1435_v28, 9  ;;  %v1476_v61 = vrot.slane %v3622_v27, 5  ;;  %v3291_v27 = vld [vmem:[%s4018_s1 + $0x90] sm:$0xff]  }
  0x52   : > { %3080 = vmatpush3.bf16.msra.mxu0 %v3282_v15  ;;  %2995 = vmatprep.subr.bf16.mxu1 %v3671_v57  ;;  %v481_v45 = vsel %vm3498_vm8, %v476_v23, %v480_v1  ;;  %v1269_v36 = vor.u32 %v1268_v19, %v1265_v3  ;;  %v1457_v15 = vsel %vm3684_vm11, %v2704_v56, %v1456_v37  ;;  %v2707_v56 = vrot.slane %v1433_v33, 9  ;;  %v766_v3 = vld [vmem:[#allocation2 + $0x8] sm:$0xe]  ;;  %v768_v13 = vld [vmem:[#allocation2 + $0x18] sm:$0xe] }
  0x53   : > { %3081 = vmatprep.subr.bf16.mxu0 %v3284_v41  ;;  %v2591_v34 = vcombine.low %v467_v5, %v481_v45  ;;  %v2728_v53 = vcombine.low %v1457_v15, %v1461_v51  ;;  %v2602_v1 = vcombine.low %v3546_v42, %v3599_v58  ;;  %v1465_v4 = vsel %vm3684_vm11, %v2706_v47, %v1464_v9  ;;  %v3297_v15 = vld [vmem:[%s4018_s1 + $0xa8] sm:$0xff]   ;;  %v3296_v51 = vld [vmem:[%s4018_s1 + $0x1a0] sm:$0xff]   ;;  %v3301_v9 = vld [vmem:[%s4018_s1 + $0x1b0] sm:$0xff]  }
  0x54   : > { %v1270_v63 = vrot.slane %v1269_v36, 4  ;;  %v1469_v29 = vsel %vm3684_vm11, %v2707_v56, %v1468_v24  ;;  %v2612_v39 = vrot.slane %v765_v2, 9  ;;  %v1480_v7 = vrot.slane %v3651_v10, 5  ;;  %v767_v10 = vld [vmem:[#allocation2 + $0x10] sm:$0xe]  ;;  %v3303_v24 = vld [vmem:[%s4018_s1 + $0xb8] sm:$0xff]  }
  0x55   : > { %2968 = vmatmul.mubr.bf16.gmra.mrb[4].mxu1 %v2591_v34  ;;  %v2613_v5 = vrot.slane %v766_v3, 9  ;;  %v1473_v42 = vsel %vm3684_vm11, %v2708_v50, %v1472_v52  ;;  %v1477_v58 = vsel %vm3684_vm11, %v2709_v31, %v1476_v61  ;;  %v2711_v23 = vrot.slane %v1437_v62, 9  ;;  %v3295_v34 = vld [vmem:[%s4018_s1 + $0xa0] sm:$0xff]   ;;  %v3306_v36 = vld [vmem:[#allocation2 + $0x10] ss:$8 sps:$4 sm:$0xff]  }
  0x56   : > { %3082 = vmatpush3.bf16.msra.mxu0 %v3284_v41  ;;  %2987 = vmatprep.mubr.bf16.mxu1 %v2600_v26  ;;  %v1275_v37 = vsel %vm3498_vm8, %v1270_v63, %v1274_v25  ;;  %v1436_v41 = vld [vmem:[#allocation2 + $0x38] sm:$0xe]  ;;  %v1484_v16 = vrot.slane %v3660_v21, 5  ;;  %v2729_v20 = vcombine.low %v1465_v4, %v1469_v29  ;;  %v795_v19 = vsel %vm3684_vm11, %v2612_v39, %v794_v43  ;;  %v3290_v21 = vld [vmem:[%s4018_s1 + $0x188] sm:$0xff]   ;;  %v769_v63 = vld [vmem:[#allocation2 + $0x20] sm:$0xe] }
  0x57   : > { %3091 = vmatprep.subr.bf16.mxu0 %v3679_v12  ;;  %v2695_v49 = vcombine.low %v1261_v18, %v1275_v37  ;;  %v2710_v44 = vrot.slane %v1436_v41, 9  ;;  %v799_v25 = vsel %vm3684_vm11, %v2613_v5, %v798_v55  ;;  %v2614_v45 = vrot.slane %v767_v10, 9  ;;  %v3300_v18 = vld [vmem:[%s4018_s1 + $0xb0] sm:$0xff]   ;;  %v770_v48 = vld [vmem:[#allocation2 + $0x28] sm:$0xe]  ;;  %v3305_v61 = vld [vmem:[%s4018_s1 + $0xc0] sm:$0xff]  }
  0x58   : > { %v2615_v26 = vrot.slane %v768_v13, 9  ;;  %v2603_v32 = vcombine.low %v3624_v30, %v3637_v46  ;;  %v2636_v43 = vcombine.low %v795_v19, %v799_v25  ;;  %v1485_v30 = vsel %vm3684_vm11, %v2711_v23, %v1484_v16  ;;  %v3292_v46 = vld [vmem:[%s4018_s1 + $0x190] sm:$0xff]   ;;  %v772_v50 = vld [vmem:[#allocation2 + $0x38] sm:$0xe]  ;;  %v3308_v19 = vld [vmem:[#allocation2 + $0x20] ss:$8 sps:$4 sm:$0xff]  }
  0x59   : > { %3064 = vmatmul.mubr.bf16.gmra.mrb[4].mxu0 %v2695_v49  ;;  %v3750_v22 = vsel %vm3684_vm11, %v2614_v45, %v802_v8  ;;  %v1481_v8 = vsel %vm3684_vm11, %v2710_v44, %v1480_v7  ;;  %v2616_v28 = vrot.slane %v769_v63, 9  ;;  %v810_v37 = vrot.slane %v3577_v14, 5  ;;  %v1811_v56 = vld [vmem:[#allocation2 + $0x10] sm:$0xf]  ;;  %v1813_v52 = vld [vmem:[#allocation2 + $0x18] sm:$0xf] }
  0x5a   : > { %3083 = vmatprep.mubr.bf16.mxu0 %v2728_v53  ;;  %v3754_v0 = vsel %vm3684_vm11, %v2615_v26, %v806_v40  ;;  %v2731_v33 = vcombine.low %v1481_v8, %v1485_v30  ;;  %v3298_v40 = vld [vmem:[%s4018_s1 + $0x1a8] sm:$0xff]   ;;  %v2617_v53 = vrot.slane %v770_v48, 9  ;;  %v814_v47 = vrot.slane %v3601_v59, 5  ;;  %v771_v49 = vld [vmem:[#allocation2 + $0x30] sm:$0xe]  ;;  %v3304_v62 = vld [vmem:[%s4018_s1 + $0x1b8] sm:$0xff]  }
  0x5b   : > { %v2637_v55 = vcombine.low %v3750_v22, %v3754_v0  ;;  %v1828_v41 = vshrl.u32 %v1811_v56, 16  ;;  %v1845_v31 = vshll.u32 %v1813_v52, 16  ;;  %v811_v14 = vsel %vm3684_vm11, %v2616_v28, %v810_v37  ;;  %v3311_v25 = vld [vmem:[%s4018_s1 + $0xd0] sm:$0xff]   ;;  %v3310_v45 = vld [vmem:[%s4018_s1 + $0x1c8] sm:$0xff]  }
  0x5c   : > { %v815_v59 = vsel %vm3684_vm11, %v2617_v53, %v814_v47  ;;  %v818_v2 = vrot.slane %v3630_v38, 5  ;;  %v2619_v4 = vrot.slane %v772_v50, 9  ;;  %v822_v29 = vrot.slane %v3640_v54, 5  ;;  %v3307_v38 = vld [vmem:[%s4018_s1 + $0x1c0] sm:$0xff]   ;;  %v3319_v26 = vld [vmem:[#allocation2 + $0x30] ss:$8 sps:$4 sm:$0xff]  }
  0x5d   : > { %2988 = vmatmul.mubr.bf16.vlgmr.msra.gmra.mrb[0].mxu1 %v2601_v60  ;;  %v1831_v60 = vshll.u32 %v1811_v56, 16  ;;  %v1830_v44 = vrot.slane %v1828_v41, 4  ;;  %v1847_v7 = vrot.slane %v1845_v31, 5  ;;  %v2638_v5 = vcombine.low %v811_v14, %v815_v59  ;;  %v3312_v8 = vld [vmem:[%s4018_s1 + $0x1d0] sm:$0xff]   ;;  %v1817_v30 = vld [vmem:[#allocation2 + $0x28] sm:$0xf] }
  0x5e   : > { %2996 = vmatpush3.bf16.msra.mxu1 %v3671_v57  ;;  %2991 = vmatprep.mubr.bf16.mxu1 %v2602_v1  ;;  %v2730_v57 = vcombine.low %v1473_v42, %v1477_v58  ;;  %v2618_v1 = vrot.slane %v771_v49, 9  ;;  %v3809_v42 = vld [vmem:[#allocation2 + $0x1c] sm:$0x1]  ;;  %v3309_v58 = vld [vmem:[%s4018_s1 + $0xc8] sm:$0xff]   ;;  %v823_v23 = vsel %vm3684_vm11, %v2619_v4, %v822_v29  ;;  %v1870_v63 = vshrl.u32 %v1817_v30, 16  ;;  %v3316_v47 = vld [vmem:[%s4018_s1 + $0x1e0] sm:$0xff]  }
  0x5f   : > { %2997 = vmatprep.subr.bf16.mxu1 %v3289_v6  ;;  %v1833_v3 = vrot.slane %v1831_v60, 5  ;;  %v1851_v13 = vshll.u32 %v3809_v42, 16  ;;  %v1873_v48 = vshll.u32 %v1817_v30, 16  ;;  %v3317_v56 = vld [vmem:[%s4018_s1 + $0xe8] sm:$0xff]   ;;  %v3854_v49 = vld [vmem:[#allocation2 + $0x24] sm:$0x1] }
  0x60   : > { %v819_v54 = vsel %vm3684_vm11, %v2618_v1, %v818_v2  ;;  %v1872_v41 = vrot.slane %v1870_v63, 4  ;;  %v3860_v1 = vld [vmem:[#allocation2 + $0x3c] sm:$0x1]  ;;  %v3320_v2 = vld [vmem:[%s4018_s1 + $0xf0] sm:$0xff]   ;;  %v1823_v4 = vld [vmem:[#allocation2 + $0x40] sm:$0xf] }
  0x61   : > { %3084 = vmatmul.mubr.bf16.vlgmr.msra.gmra.mrb[0].mxu0 %v2729_v20  ;;  %v1834_v16 = vor.u32 %v1833_v3, %v1830_v44  ;;  %v1853_v0 = vrot.slane %v1851_v13, 5  ;;  %v1875_v60 = vrot.slane %v1873_v48, 5  ;;  %v1825_v29 = vld [vmem:[#allocation2 + $0x48] sm:$0xf] }
  0x62   : > { %2998 = vmatpush3.bf16.msra.mxu1 %v3289_v6  ;;  %3092 = vmatpush3.bf16.msra.mxu0 %v3679_v12  ;;  %v3294_v12 = vld [vmem:[%s4018_s1 + $0x198] sm:$0xff]   ;;  %v1842_v6 = vshrl.u32 %v1813_v52, 16  ;;  %v3318_v44 = vld [vmem:[%s4018_s1 + $0x1e8] sm:$0xff]   ;;  %v1929_v13 = vshll.u32 %v1825_v29, 16 }
  0x63   : > { %2999 = vmatprep.subr.bf16.mxu1 %v3291_v27  ;;  %3093 = vmatprep.subr.bf16.mxu0 %v3290_v21 }
  0x64   : > { %3087 = vmatprep.mubr.bf16.mxu0 %v2730_v57  ;;  %v1844_v39 = vrot.slane %v1842_v6, 4  ;;  %v1835_v57 = vrot.slane %v1834_v16, 4  ;;  %v3856_v6 = vld [vmem:[#allocation2 + $0x2c] sm:$0x1]  ;;  %v1912_v16 = vshrl.u32 %v1823_v4, 16 }
  0x65   : > { %2992 = vmatmul.mubr.bf16.gmra.mrb[4].mxu1 %v2603_v32 }
  0x66   : > { %3000 = vmatpush3.bf16.msra.mxu1 %v3291_v27  ;;  %3011 = vmatprep.mubr.bf16.mxu1 %v2636_v43  ;;  %v3807_v27 = vld [vmem:[#allocation2 + $0x14] sm:$0x1]  ;;  %v1848_v10 = vor.u32 %v1847_v7, %v1844_v39  ;;  %v3325_v43 = vld [vmem:[#allocation2 + $0x8] ss:$8 sps:$4 sm:$0xff]   ;;  %v1865_v39 = vshll.u32 %v3854_v49, 16  ;;  %v1876_v7 = vor.u32 %v1875_v60, %v1872_v41  ;;  %v2139_v41 = vrot.slane %v3860_v1, 5 }
  0x67   : > { %3094 = vmatpush3.bf16.msra.mxu0 %v3290_v21  ;;  %3001 = vmatprep.subr.bf16.mxu1 %v3293_v35  ;;  %v1837_v20 = vshll.u32 %v3807_v27, 16  ;;  %v2639_v21 = vcombine.low %v819_v54, %v823_v23  ;;  %v1907_v23 = vshll.u32 %v3860_v1, 16 }
  0x68   : > { %3095 = vmatprep.subr.bf16.mxu0 %v3292_v46  ;;  %v1849_v22 = vrot.slane %v1848_v10, 4  ;;  %v1926_v10 = vshrl.u32 %v1825_v29, 16 }
  0x69   : > { %3088 = vmatmul.mubr.bf16.gmra.mrb[4].mxu0 %v2731_v33  ;;  %v1839_v32 = vrot.slane %v1837_v20, 5  ;;  %v1915_v20 = vshll.u32 %v1823_v4, 16 }
  0x6a   : > { %3002 = vmatpush3.bf16.msra.mxu1 %v3293_v35  ;;  %3107 = vmatprep.mubr.bf16.mxu0 %v3306_v36  ;;  %v1815_v35 = vld [vmem:[#allocation2 + $0x20] sm:$0xf]  ;;  %v1821_v36 = vld [vmem:[#allocation2 + $0x38] sm:$0xf] }
  0x6b   : > { %3096 = vmatpush3.bf16.msra.mxu0 %v3292_v46  ;;  %3003 = vmatprep.subr.bf16.mxu1 %v3295_v34  ;;  %v1819_v46 = vld [vmem:[#allocation2 + $0x30] sm:$0xf]  ;;  %v1840_v33 = vsel %vm3498_vm8, %v1835_v57, %v1839_v32  ;;  %v1898_v37 = vshrl.u32 %v1821_v36, 16  ;;  %v1901_v53 = vshll.u32 %v1821_v36, 16  ;;  %v1917_v30 = vrot.slane %v1915_v20, 5 }
  0x6c   : > { %3097 = vmatprep.subr.bf16.mxu0 %v3294_v12  ;;  %v2097_v36 = vld [vmem:[#allocation2 + $0x30] sm:$0xe] }
  0x6d   : > { %v1900_v14 = vrot.slane %v1898_v37, 4  ;;  %v1903_v59 = vrot.slane %v1901_v53, 5 }
  0x6e   : > { %3004 = vmatpush3.bf16.msra.mxu1 %v3295_v34  ;;  %v1854_v34 = vsel %vm3498_vm8, %v1849_v22, %v1853_v0 }
  0x6f   : > { %3098 = vmatpush3.bf16.msra.mxu0 %v3294_v12  ;;  %3005 = vmatprep.subr.bf16.mxu1 %v3297_v15  ;;  %v3315_v12 = vld [vmem:[%s4018_s1 + $0xe0] sm:$0xff]   ;;  %v2784_v28 = vcombine.low %v1840_v33, %v1854_v34  ;;  %v1904_v54 = vor.u32 %v1903_v59, %v1900_v14  ;;  %v3324_v34 = vld [vmem:[%s4018_s1 + $0x1f8] sm:$0xff]   ;;  %v2093_v59 = vld [vmem:[#allocation2 + $0x10] sm:$0xe] }
  0x70   : > { %3099 = vmatprep.subr.bf16.mxu0 %v3296_v51  ;;  %v3327_v33 = vld [vmem:[%s4018_s1 + $0x200] sm:$0xff]  }
  0x71   : > { %v1905_v0 = vrot.slane %v1904_v54, 4 }
  0x72   : > { %3006 = vmatpush3.bf16.msra.mxu1 %v3297_v15  ;;  %v3314_v15 = vld [vmem:[%s4018_s1 + $0x1d8] sm:$0xff]  }
  0x73   : > { %3100 = vmatpush3.bf16.msra.mxu0 %v3296_v51  ;;  %3007 = vmatprep.subr.bf16.mxu1 %v3300_v18  ;;  %v3321_v51 = vld [vmem:[#allocation2 + $0x40] ss:$8 sps:$4 sm:$0xff]  }
  0x74   : > { %3101 = vmatprep.subr.bf16.mxu0 %v3298_v40 }
  0x76   : > { %3008 = vmatpush3.bf16.msra.mxu1 %v3300_v18  ;;  %v1859_v18 = vshll.u32 %v1815_v35, 16 }
  0x77   : > { %3102 = vmatpush3.bf16.msra.mxu0 %v3298_v40  ;;  %3009 = vmatprep.subr.bf16.mxu1 %v3303_v24  ;;  %v1856_v40 = vshrl.u32 %v1815_v35, 16  ;;  %v3880_v35 = vld [vmem:[#allocation2 + $0x4c] sm:$0x1] }
  0x78   : > { %3103 = vmatprep.subr.bf16.mxu0 %v3301_v9  ;;  %v1861_v52 = vrot.slane %v1859_v18, 5  ;;  %v1935_v48 = vshll.u32 %v3880_v35, 16 }
  0x79   : > { %v1858_v50 = vrot.slane %v1856_v40, 4 }
  0x7a   : > { %3010 = vmatpush3.bf16.msra.mxu1 %v3303_v24  ;;  %v1887_v24 = vshll.u32 %v1819_v46, 16  ;;  %v1937_v14 = vrot.slane %v1935_v48, 5 }
  0x7b   : > { %3104 = vmatpush3.bf16.msra.mxu0 %v3301_v9  ;;  %3019 = vmatprep.subr.bf16.mxu1 %v3305_v61  ;;  %v1884_v9 = vshrl.u32 %v1819_v46, 16  ;;  %v1862_v3 = vor.u32 %v1861_v52, %v1858_v50  ;;  %v1928_v46 = vrot.slane %v1926_v10, 4 }
  0x7c   : > { %3105 = vmatprep.subr.bf16.mxu0 %v3304_v62 }
  0x7d   : > { %3012 = vmatmul.mubr.bf16.vlgmr.msra.gmra.mrb[0].mxu1 %v2637_v55  ;;  %v3313_v55 = vld [vmem:[%s4018_s1 + $0xd8] sm:$0xff]   ;;  %v1886_v31 = vrot.slane %v1884_v9, 4  ;;  %v3329_v9 = vld [vmem:[#allocation2 + $0x28] ss:$8 sps:$4 sm:$0xff]  }
  0x7e   : > { %3020 = vmatpush3.bf16.msra.mxu1 %v3305_v61  ;;  %3015 = vmatprep.mubr.bf16.mxu1 %v2638_v5  ;;  %v1889_v61 = vrot.slane %v1887_v24, 5  ;;  %v1879_v5 = vshll.u32 %v3856_v6, 16 }
  0x7f   : > { %3106 = vmatpush3.bf16.msra.mxu0 %v3304_v62  ;;  %3021 = vmatprep.subr.bf16.mxu1 %v3309_v58  ;;  %v3858_v62 = vld [vmem:[#allocation2 + $0x34] sm:$0x1] }
  0x80   : > { %3115 = vmatprep.subr.bf16.mxu0 %v3307_v38  ;;  %v1881_v57 = vrot.slane %v1879_v5, 5  ;;  %v2135_v50 = vrot.slane %v3858_v62, 5 }
  0x82   : > { %3108 = vmatmul.mubr.bf16.vlgmr.msra.gmra.mrb[0].mxu0 %v3308_v19  ;;  %3022 = vmatpush3.bf16.msra.mxu1 %v3309_v58  ;;  %v1890_v58 = vor.u32 %v1889_v61, %v1886_v31  ;;  %v3323_v19 = vld [vmem:[%s4018_s1 + $0xf8] sm:$0xff]  }
  0x83   : > { %3116 = vmatpush3.bf16.msra.mxu0 %v3307_v38  ;;  %3023 = vmatprep.subr.bf16.mxu1 %v3311_v25  ;;  %v1893_v38 = vshll.u32 %v3858_v62, 16 }
  0x84   : > { %3117 = vmatprep.subr.bf16.mxu0 %v3310_v45  ;;  %3111 = vmatprep.mubr.bf16.mxu0 %v3319_v26  ;;  %v1867_v26 = vrot.slane %v1865_v39, 5  ;;  %v1891_v32 = vrot.slane %v1890_v58, 4  ;;  %v2796_v39 = vrot.slane %v2093_v59, 9  ;;  %v2123_v58 = vrot.slane %v3809_v42, 5 }
  0x85   : > { %3016 = vmatmul.mubr.bf16.gmra.mrb[4].mxu1 %v2639_v21  ;;  %v1877_v21 = vrot.slane %v1876_v7, 4  ;;  %v1895_v22 = vrot.slane %v1893_v38, 5  ;;  %v2119_v7 = vrot.slane %v3807_v27, 5 }
  0x86   : > { %3024 = vmatpush3.bf16.msra.mxu1 %v3311_v25  ;;  %3035 = vmatprep.mubr.bf16.mxu1 %v3325_v43  ;;  %v3322_v25 = vld [vmem:[%s4018_s1 + $0x1f0] sm:$0xff]   ;;  %v1909_v43 = vrot.slane %v1907_v23, 5 }
  0x87   : > { %3118 = vmatpush3.bf16.msra.mxu0 %v3310_v45  ;;  %3025 = vmatprep.subr.bf16.mxu1 %v3313_v55  ;;  %v1863_v45 = vrot.slane %v1862_v3, 4  ;;  %v1882_v18 = vsel %vm3498_vm8, %v1877_v21, %v1881_v57  ;;  %v1896_v24 = vsel %vm3498_vm8, %v1891_v32, %v1895_v22  ;;  %v3330_v3 = vld [vmem:[#allocation2 + $0x38] ss:$8 sps:$4 sm:$0xff]   ;;  %v2120_v27 = vsel %vm3684_vm11, %v2796_v39, %v2119_v7 }
  0x88   : > { %3119 = vmatprep.subr.bf16.mxu0 %v3312_v8  ;;  %v2147_v21 = vrot.slane %v3880_v35, 5  ;;  %v3336_v22 = vld [vmem:[%s4018_s1 + $0x238] sm:$0xff]  }
  0x89   : > { %v1868_v40 = vsel %vm3498_vm8, %v1863_v45, %v1867_v26  ;;  %v2100_v45 = vld [vmem:[#allocation2 + $0x48] sm:$0xe] }
  0x8a   : > { %3026 = vmatpush3.bf16.msra.mxu1 %v3313_v55  ;;  %3112 = vmatmul.mubr.bf16.gmra.mrb[4].mxu0 %v3321_v51  ;;  %v3878_v55 = vld [vmem:[#allocation2 + $0x44] sm:$0x1]  ;;  %v3326_v51 = vld [vmem:[#allocation2 + $0x18] ss:$8 sps:$4 sm:$0xff]   ;;  %v2785_v60 = vcombine.low %v1868_v40, %v1882_v18  ;;  %v2803_v32 = vrot.slane %v2100_v45, 9 }
  0x8b   : > { %3120 = vmatpush3.bf16.msra.mxu0 %v3312_v8  ;;  %3027 = vmatprep.subr.bf16.mxu1 %v3315_v12  ;;  %v1914_v8 = vrot.slane %v1912_v16, 4  ;;  %v1921_v63 = vshll.u32 %v3878_v55, 16  ;;  %v3332_v16 = vld [vmem:[%s4018_s1 + $0x218] sm:$0xff]   ;;  %v2143_v26 = vrot.slane %v3878_v55, 5 }
  0x8c   : > { %3121 = vmatprep.subr.bf16.mxu0 %v3314_v15  ;;  %3131 = vmatprep.mubr.bf16.mxu0 %v2784_v28  ;;  %v1910_v28 = vsel %vm3498_vm8, %v1905_v0, %v1909_v43  ;;  %v2095_v0 = vld [vmem:[#allocation2 + $0x20] sm:$0xe]  ;;  %v2096_v43 = vld [vmem:[#allocation2 + $0x28] sm:$0xe]  ;;  %v2148_v55 = vsel %vm3684_vm11, %v2803_v32, %v2147_v21 }
  0x8d   : > { %v1918_v37 = vor.u32 %v1917_v30, %v1914_v8  ;;  %v2786_v31 = vcombine.low %v1896_v24, %v1910_v28  ;;  %v1923_v61 = vrot.slane %v1921_v63, 5  ;;  %v2798_v35 = vrot.slane %v2095_v0, 9 }
  0x8e   : > { %3028 = vmatpush3.bf16.msra.mxu1 %v3315_v12  ;;  %v1931_v12 = vrot.slane %v1929_v13, 5  ;;  %v3334_v13 = vld [vmem:[%s4018_s1 + $0x228] sm:$0xff]   ;;  %v2127_v30 = vrot.slane %v3854_v49, 5 }
  0x8f   : > { %3122 = vmatpush3.bf16.msra.mxu0 %v3314_v15  ;;  %3029 = vmatprep.subr.bf16.mxu1 %v3317_v56  ;;  %v2098_v15 = vld [vmem:[#allocation2 + $0x38] sm:$0xe]  ;;  %v1919_v4 = vrot.slane %v1918_v37, 4 }
  0x90   : > { %3123 = vmatprep.subr.bf16.mxu0 %v3316_v47  ;;  %v1932_v53 = vor.u32 %v1931_v12, %v1928_v46  ;;  %v2801_v52 = vrot.slane %v2098_v15, 9  ;;  %v2799_v46 = vrot.slane %v2096_v43, 9  ;;  %v2131_v12 = vrot.slane %v3856_v6, 5 }
  0x91   : > { %v1924_v54 = vsel %vm3498_vm8, %v1919_v4, %v1923_v61 }
  0x92   : > { %3030 = vmatpush3.bf16.msra.mxu1 %v3317_v56  ;;  %v2800_v56 = vrot.slane %v2097_v36, 9  ;;  %v1933_v29 = vrot.slane %v1932_v53, 4  ;;  %v2140_v1 = vsel %vm3684_vm11, %v2801_v52, %v2139_v41  ;;  %v2132_v36 = vsel %vm3684_vm11, %v2799_v46, %v2131_v12  ;;  %v2832_v52 = vld [vmem:[%s4019_s2] ss:$0 sm:$0xff] }
  0x93   : > { %3124 = vmatpush3.bf16.msra.mxu0 %v3316_v47  ;;  %3031 = vmatprep.subr.bf16.mxu1 %v3320_v2  ;;  %v3328_v47 = vld [vmem:[%s4018_s1 + $0x208] sm:$0xff]  }
  0x94   : > { %3125 = vmatprep.subr.bf16.mxu0 %v3318_v44  ;;  %v2136_v62 = vsel %vm3684_vm11, %v2800_v56, %v2135_v50  ;;  %v1938_v23 = vsel %vm3498_vm8, %v1933_v29, %v1937_v14 }
  0x95   : > { %v2822_v38 = vcombine.low %v2136_v62, %v2140_v1  ;;  %v2787_v20 = vcombine.low %v1924_v54, %v1938_v23 }
  0x96   : > { %3032 = vmatpush3.bf16.msra.mxu1 %v3320_v2  ;;  %v2094_v2 = vld [vmem:[#allocation2 + $0x18] sm:$0xe] }
  0x97   : > { %3126 = vmatpush3.bf16.msra.mxu0 %v3318_v44  ;;  %3033 = vmatprep.subr.bf16.mxu1 %v3323_v19  ;;  %v3331_v44 = vld [vmem:[%s4018_s1 + $0x210] sm:$0xff]   ;;  %v2797_v5 = vrot.slane %v2094_v2, 9 }
  0x98   : > { %3127 = vmatprep.subr.bf16.mxu0 %v3322_v25 }
  0x99   : > { %v2124_v42 = vsel %vm3684_vm11, %v2797_v5, %v2123_v58 }
  0x9a   : > { %3034 = vmatpush3.bf16.msra.mxu1 %v3323_v19  ;;  %v2820_v10 = vcombine.low %v2120_v27, %v2124_v42  ;;  %v3335_v19 = vld [vmem:[%s4018_s1 + $0x230] sm:$0xff]  }
  0x9b   : > { %3128 = vmatpush3.bf16.msra.mxu0 %v3322_v25  ;;  %3163 = vmatprep.subr.bf16.mxu1 %v3327_v33  ;;  %v2099_v25 = vld [vmem:[#allocation2 + $0x40] sm:$0xe] }
  0x9c   : > { %3129 = vmatprep.subr.bf16.mxu0 %v3324_v34  ;;  %v2802_v57 = vrot.slane %v2099_v25, 9  ;;  %v2494_v25 = vlaneseq }
  0x9d   : > { %3036 = vmatmul.mubr.bf16.vlgmr.msra.gmra.mrb[0].mxu1 %v3326_v51 }
  0x9e   : > { %3171 = vmatpush3.bf16.msra.mxu1 %v3327_v33  ;;  %3039 = vmatprep.mubr.bf16.mxu1 %v3329_v9  ;;  %v2144_v8 = vsel %vm3684_vm11, %v2802_v57, %v2143_v26  ;;  %v2495_v12 = vshrl.u32 %v2494_v25, 7 }
  0x9f   : > { %3130 = vmatpush3.bf16.msra.mxu0 %v3324_v34  ;;  %3164 = vmatprep.subr.bf16.mxu1 %v3328_v47  ;;  %v2128_v34 = vsel %vm3684_vm11, %v2798_v35, %v2127_v30 }
  0xa0   : > { %3139 = vmatprep.subr.bf16.mxu0 %v3327_v33  ;;  %v2821_v15 = vcombine.low %v2128_v34, %v2132_v36 }
  0xa2   : > { %3132 = vmatmul.mubr.bf16.vlgmr.msra.gmra.mrb[0].mxu0 %v2785_v60  ;;  %3172 = vmatpush3.bf16.msra.mxu1 %v3328_v47 }
  0xa3   : > { %3140 = vmatpush3.bf16.msra.mxu0 %v3327_v33  ;;  %3135 = vmatprep.mubr.bf16.mxu0 %v2786_v31  ;;  %v2823_v33 = vcombine.low %v2144_v8, %v2148_v55 }
  0xa4   : > { %3141 = vmatprep.subr.bf16.mxu0 %v3328_v47  ;;  %3165 = vmatprep.subr.bf16.mxu1 %v3331_v44 }
  0xa5   : > { %3040 = vmatmul.mubr.bf16.gmra.mrb[4].mxu1 %v3330_v3 }
  0xa6   : > { %3173 = vmatpush3.bf16.msra.mxu1 %v3331_v44  ;;  %3159 = vmatprep.mubr.bf16.mxu1 %v2822_v38 }
  0xa7   : > { %3142 = vmatpush3.bf16.msra.mxu0 %v3328_v47  ;;  %3166 = vmatprep.subr.bf16.mxu1 %v3332_v16 }
  0xa8   : > { %3143 = vmatprep.subr.bf16.mxu0 %v3331_v44 }
  0xaa   : > { %3136 = vmatmul.mubr.bf16.gmra.mrb[4].mxu0 %v2787_v20  ;;  %3174 = vmatpush3.bf16.msra.mxu1 %v3332_v16 }
  0xab   : > { %3144 = vmatpush3.bf16.msra.mxu0 %v3331_v44  ;;  %3167 = vmatprep.subr.bf16.mxu1 %v3333_v17 }
  0xac   : > { %3145 = vmatprep.subr.bf16.mxu0 %v3332_v16  ;;  %3155 = vmatprep.mubr.bf16.mxu0 %v2820_v10 }
  0xae   : > { %3175 = vmatpush3.bf16.msra.mxu1 %v3333_v17 }
  0xaf   : > { %3146 = vmatpush3.bf16.msra.mxu0 %v3332_v16  ;;  %3168 = vmatprep.subr.bf16.mxu1 %v3334_v13 }
  0xb0   : > { %3147 = vmatprep.subr.bf16.mxu0 %v3333_v17 }
  0xb2   : > { %3176 = vmatpush3.bf16.msra.mxu1 %v3334_v13 }
  0xb3   : > { %3148 = vmatpush3.bf16.msra.mxu0 %v3333_v17  ;;  %3169 = vmatprep.subr.bf16.mxu1 %v3335_v19 }
  0xb4   : > { %3149 = vmatprep.subr.bf16.mxu0 %v3334_v13 }
  0xb6   : > { %3177 = vmatpush3.bf16.msra.mxu1 %v3335_v19 }
  0xb7   : > { %3150 = vmatpush3.bf16.msra.mxu0 %v3334_v13  ;;  %3170 = vmatprep.subr.bf16.mxu1 %v3336_v22  ;;  %v3346_v13 = vmov 1983009808  }
  0xb8   : > { %3151 = vmatprep.subr.bf16.mxu0 %v3335_v19 }
  0xba   : > { %3178 = vmatpush3.bf16.msra.mxu1 %v3336_v22 }
  0xbb   : > { %3152 = vmatpush3.bf16.msra.mxu0 %v3335_v19  ;;  %v2492_v19 = vunpack.c.l.s4 %v3346_v13 }
  0xbc   : > { %3153 = vmatprep.subr.bf16.mxu0 %v3336_v22 }
  0xbd   : > { %3160 = vmatmul.mubr.bf16.vlgmr.msra.gmra.mrb[8].mxu1 %v2823_v33  ;;  %v2493_v46 = vunpack.c.0.s8 %v2492_v19 }
  0xbf   : > { %3154 = vmatpush3.bf16.msra.mxu0 %v3336_v22 }
  0xc2   : > { %3156 = vmatmul.mubr.bf16.vlgmr.msra.gmra.mrb[0].mxu0 %v2821_v15 }
 0x170   : > { %v3037_v51 = vpop.f32.mrb[0].mxu1 }
 0x171   : > { %v1109_v49 = vpop.f32.mrb[1].mxu1 }
 0x172   : > { %v3038_v40 = vpop.f32.mrb[2].mxu1 }
 0x173   : > { %v1112_v18 = vpop.f32.mrb[3].mxu1 }
 0x178   : > { %v3041_v6 = vpop.f32.mrb[4].mxu1 }
 0x179   : > { %v1125_v63 = vpop.f32.mrb[5].mxu1 }
 0x17a   : > { %v3042_v48 = vpop.f32.mrb[6].mxu1 }
 0x17b   : > { %v1128_v9 = vpop.f32.mrb[7].mxu1 }
 0x17d   : > { %v3137_v24 = vpop.f32.mrb[4].mxu0 }
 0x17e   : > { %v3183_v28 = vadd.f32 %v3137_v24, %v3041_v6  ;;  %v2070_v37 = vpop.f32.mrb[5].mxu0 }
 0x17f   : > { %v3185_v53 = vadd.f32 %v2070_v37, %v1125_v63  ;;  %v3138_v47 = vpop.f32.mrb[6].mxu0 }
 0x180   : > { %v3187_v11 = vadd.f32 %v3138_v47, %v3042_v48  ;;  %v2073_v56 = vpop.f32.mrb[7].mxu0 }
 0x181   : > { %v3189_v50 = vadd.f32 %v2073_v56, %v1128_v9 }
 0x190   : > { %v3161_v41 = vpop.f32.mrb[8].mxu1 }
 0x191   : > { %v3184_v60 = vadd.f32 %v3183_v28, %v3161_v41  ;;  %v2280_v31 = vpop.f32.mrb[9].mxu1 }
 0x192   : > { %v3186_v61 = vadd.f32 %v3185_v53, %v2280_v31  ;;  %v3162_v14 = vpop.f32.mrb[10].mxu1 }
 0x193   : > { %v2316_v59 = vadd.f32 %v3184_v60, %v2832_v52  ;;  %v3188_v2 = vadd.f32 %v3187_v11, %v3162_v14  ;;  %v2283_v4 = vpop.f32.mrb[11].mxu1 }
 0x194   : > { %v2314_v29 = vadd.f32 %v3186_v61, %v2832_v52  ;;  %v3190_v62 = vadd.f32 %v3189_v50, %v2283_v4 }
 0x195   : > { %v3157_v1 = vpop.f32.mrb[0].mxu0  ;;  %v2317_v44 = vadd.f32 %v3188_v2, %v2832_v52  ;;  %v2324_v5 = vmax.f32 %v2316_v59, 0.0 }
 0x196   : > { %v3179_v3 = vadd.f32 %v3157_v1, %v3037_v51  ;;  %v2264_v39 = vpop.f32.mrb[1].mxu0  ;;  %v2315_v7 = vadd.f32 %v3190_v62, %v2832_v52  ;;  %v2322_v16 = vmax.f32 %v2314_v29, 0.0 }
 0x197   : > { %v3180_v58 = vadd.f32 %v2264_v39, %v1109_v49  ;;  %v3158_v38 = vpop.f32.mrb[2].mxu0  ;;  %v2325_v54 = vmax.f32 %v2317_v44, 0.0 }
 0x198   : > { %v2312_v23 = vadd.f32 %v3179_v3, %v2832_v52  ;;  %v3181_v27 = vadd.f32 %v3158_v38, %v3038_v40  ;;  %v2267_v42 = vpop.f32.mrb[3].mxu0  ;;  %v2323_v20 = vmax.f32 %v2315_v7, 0.0 }
 0x199   : > { %v2329_v17 = vmax.f32 %v2324_v5, %v2325_v54  ;;  %v3182_v10 = vadd.f32 %v2267_v42, %v1112_v18  ;;  %v2310_v35 = vadd.f32 %v3180_v58, %v2832_v52 }
 0x19a   : > { %v2313_v45 = vadd.f32 %v3181_v27, %v2832_v52  ;;  %v3950_v26 = vmax.f32 %v2322_v16, %v2323_v20  ;;  %v2320_v21 = vmax.f32 %v2312_v23, 0.0  ;;  %v3973_v27 = vsub.s32 %v2493_v46, %v2495_v12 }
 0x19b   : > { %v2352_v57 = vsel %vm2330_vm12, %v2329_v17, -inf  ;;  %v2381_v32 = vsel %vm2359_vm13, %v2329_v17, -inf  ;;  %v2410_v22 = vsel %vm2388_vm14, %v2329_v17, -inf  ;;  %v2439_v30 = vsel %vm2417_vm15, %v2329_v17, -inf }
 0x19c   : > { %v2321_v0 = vmax.f32 %v2313_v45, 0.0  ;;  %v2353_v43 = vrot.slane %v2352_v57, 4  ;;  %v2382_v8 = vrot.slane %v2381_v32, 4  ;;  %v2411_v55 = vrot.slane %v2410_v22, 4 }
 0x19d   : > { %v2440_v51 = vrot.slane %v2439_v30, 4  ;;  %v2311_v49 = vadd.f32 %v3182_v10, %v2832_v52  ;;  %v2345_v40 = vsel %vm2330_vm12, %v3950_v26, -inf  ;;  %v2374_v18 = vsel %vm2359_vm13, %v3950_v26, -inf }
 0x19e   : > { %v2327_v33 = vmax.f32 %v2320_v21, %v2321_v0  ;;  %v2354_v34 = vmax.f32 %v2352_v57, %v2353_v43  ;;  %v2383_v36 = vmax.f32 %v2381_v32, %v2382_v8  ;;  %v2412_v15 = vmax.f32 %v2410_v22, %v2411_v55 }
 0x19f   : > { %v2441_v50 = vmax.f32 %v2439_v30, %v2440_v51  ;;  %v2319_v3 = vmax.f32 %v2311_v49, 0.0  ;;  %v2346_v39 = vrot.slane %v2345_v40, 4  ;;  %v2375_v7 = vrot.slane %v2374_v18, 4 }
 0x1a0   : > { %v2338_v6 = vsel %vm2330_vm12, %v2327_v33, -inf  ;;  %v2367_v63 = vsel %vm2359_vm13, %v2327_v33, -inf  ;;  %v2396_v48 = vsel %vm2388_vm14, %v2327_v33, -inf  ;;  %v2425_v9 = vsel %vm2417_vm15, %v2327_v33, -inf }
 0x1a1   : > { %v2339_v24 = vrot.slane %v2338_v6, 4  ;;  %v2368_v28 = vrot.slane %v2367_v63, 4  ;;  %v2397_v37 = vrot.slane %v2396_v48, 4  ;;  %v2426_v53 = vrot.slane %v2425_v9, 4 }
 0x1a2   : > { %v2355_v47 = vrot.slane %v2354_v34, 2  ;;  %v2384_v11 = vrot.slane %v2383_v36, 2  ;;  %v2413_v56 = vrot.slane %v2412_v15, 2  ;;  %v2442_v2 = vrot.slane %v2441_v50, 2 }
 0x1a3   : > { %v2340_v52 = vmax.f32 %v2338_v6, %v2339_v24  ;;  %v2369_v41 = vmax.f32 %v2367_v63, %v2368_v28  ;;  %v2398_v60 = vmax.f32 %v2396_v48, %v2397_v37  ;;  %v2427_v31 = vmax.f32 %v2425_v9, %v2426_v53 }
 0x1a4   : > { %v3964_v61 = vmax.f32 %v2354_v34, %v2355_v47  ;;  %v3966_v14 = vmax.f32 %v2383_v36, %v2384_v11  ;;  %v3968_v59 = vmax.f32 %v2412_v15, %v2413_v56  ;;  %v3970_v44 = vmax.f32 %v2441_v50, %v2442_v2 }
 0x1a5   : > { %v2341_v4 = vrot.slane %v2340_v52, 2  ;;  %v2370_v29 = vrot.slane %v2369_v41, 2  ;;  %v2399_v62 = vrot.slane %v2398_v60, 2  ;;  %v2428_v1 = vrot.slane %v2427_v31, 2 }
 0x1a6   : > { %v2318_v23 = vmax.f32 %v2310_v35, 0.0  ;;  %v2357_v16 = vrot.slane %v3964_v61, 1  ;;  %v2386_v17 = vrot.slane %v3966_v14, 1  ;;  %v2415_v10 = vrot.slane %v3968_v59, 1 }
 0x1a7   : > { %v2342_v5 = vmax.f32 %v2340_v52, %v2341_v4  ;;  %v2371_v58 = vmax.f32 %v2369_v41, %v2370_v29  ;;  %v2400_v38 = vmax.f32 %v2398_v60, %v2399_v62  ;;  %v2429_v54 = vmax.f32 %v2427_v31, %v2428_v1 }
 0x1a8   : > { %v2444_v13 = vrot.slane %v3970_v44, 1  ;;  %v2326_v19 = vmax.f32 %v2318_v23, %v2319_v3  ;;  %v2347_v25 = vmax.f32 %v2345_v40, %v2346_v39  ;;  %v2376_v45 = vmax.f32 %v2374_v18, %v2375_v7 }
 0x1a9   : > { %v2343_v42 = vrot.slane %v2342_v5, 1  ;;  %v2372_v20 = vrot.slane %v2371_v58, 1  ;;  %v2401_v32 = vrot.slane %v2400_v38, 1  ;;  %v2430_v22 = vrot.slane %v2429_v54, 1 }
 0x1aa   : > { %v2331_v0 = vsel %vm2330_vm12, %v2326_v19, -inf  ;;  %v2360_v43 = vsel %vm2359_vm13, %v2326_v19, -inf  ;;  %v2389_v8 = vsel %vm2388_vm14, %v2326_v19, -inf  ;;  %v2418_v55 = vsel %vm2417_vm15, %v2326_v19, -inf }
 0x1ab   : > { %v2344_v21 = vmax.f32 %v2342_v5, %v2343_v42  ;;  %v2373_v57 = vmax.f32 %v2371_v58, %v2372_v20  ;;  %v2332_v35 = vrot.slane %v2331_v0, 4  ;;  %v2361_v30 = vrot.slane %v2360_v43, 4 }
 0x1ac   : > { %v2390_v46 = vrot.slane %v2389_v8, 4  ;;  %v2419_v12 = vrot.slane %v2418_v55, 4  ;;  %v2348_v33 = vrot.slane %v2347_v25, 2  ;;  %v2377_v34 = vrot.slane %v2376_v45, 2 }
 0x1ad   : > { %v2403_v36 = vsel %vm2388_vm14, %v3950_v26, -inf  ;;  %v2432_v15 = vsel %vm2417_vm15, %v3950_v26, -inf  ;;  %v2333_v51 = vmax.f32 %v2331_v0, %v2332_v35  ;;  %v2362_v49 = vmax.f32 %v2360_v43, %v2361_v30 }
 0x1ae   : > { %v2391_v40 = vmax.f32 %v2389_v8, %v2390_v46  ;;  %v2420_v18 = vmax.f32 %v2418_v55, %v2419_v12  ;;  %v2349_v6 = vmax.f32 %v2347_v25, %v2348_v33  ;;  %v2378_v63 = vmax.f32 %v2376_v45, %v2377_v34 }
 0x1af   : > { %v2404_v48 = vrot.slane %v2403_v36, 4  ;;  %v2433_v9 = vrot.slane %v2432_v15, 4  ;;  %v2334_v24 = vrot.slane %v2333_v51, 2  ;;  %v2363_v28 = vrot.slane %v2362_v49, 2 }
 0x1b0   : > { %v2392_v37 = vrot.slane %v2391_v40, 2  ;;  %v2421_v53 = vrot.slane %v2420_v18, 2  ;;  %v2350_v47 = vrot.slane %v2349_v6, 1  ;;  %v2379_v11 = vrot.slane %v2378_v63, 1 }
 0x1b1   : > { %v2405_v56 = vmax.f32 %v2403_v36, %v2404_v48  ;;  %v2434_v50 = vmax.f32 %v2432_v15, %v2433_v9  ;;  %v2335_v52 = vmax.f32 %v2333_v51, %v2334_v24  ;;  %v2364_v26 = vmax.f32 %v2362_v49, %v2363_v28 }
 0x1b2   : > { %v2393_v41 = vmax.f32 %v2391_v40, %v2392_v37  ;;  %v2422_v60 = vmax.f32 %v2420_v18, %v2421_v53  ;;  %v2402_v31 = vmax.f32 %v2400_v38, %v2401_v32  ;;  %v2431_v2 = vmax.f32 %v2429_v54, %v2430_v22 }
 0x1b3   : > { %v2406_v4 = vrot.slane %v2405_v56, 2  ;;  %v2435_v29 = vrot.slane %v2434_v50, 2  ;;  %v2336_v62 = vrot.slane %v2335_v52, 1  ;;  %v2365_v1 = vrot.slane %v2364_v26, 1 }
 0x1b4   : > { %v2394_v3 = vrot.slane %v2393_v41, 1  ;;  %v2423_v39 = vrot.slane %v2422_v60, 1  ;;  %v2351_v7 = vmax.f32 %v2349_v6, %v2350_v47  ;;  %v2380_v5 = vmax.f32 %v2378_v63, %v2379_v11 }
 0x1b5   : > { %v2407_v58 = vmax.f32 %v2405_v56, %v2406_v4  ;;  %v2436_v23 = vmax.f32 %v2434_v50, %v2435_v29  ;;  %v2337_v42 = vmax.f32 %v2335_v52, %v2336_v62  ;;  %v2366_v20 = vmax.f32 %v2364_v26, %v2365_v1 }
 0x1b6   : > { %v2395_v19 = vmax.f32 %v2393_v41, %v2394_v3  ;;  %v2424_v25 = vmax.f32 %v2422_v60, %v2423_v39  ;;  %v2358_v45 = vmax.f32 %v3964_v61, %v2357_v16  ;;  %v2387_v38 = vmax.f32 %v3966_v14, %v2386_v17 }
 0x1b7   : > { %v2408_v54 = vrot.slane %v2407_v58, 1  ;;  %v2437_v32 = vrot.slane %v2436_v23, 1  ;;  %v2451_v22 = vsel %vm2450_vm0, %v2344_v21, %v2337_v42  ;;  %v2461_v0 = vsel %vm2450_vm0, %v2373_v57, %v2366_v20 }
 0x1b8   : > { %v2469_v43 = vsel %vm2450_vm0, %v2402_v31, %v2395_v19  ;;  %v2477_v8 = vsel %vm2450_vm0, %v2431_v2, %v2424_v25  ;;  %v2453_v30 = vsel %vm2452_vm1, %v2351_v7, %v2451_v22  ;;  %v2462_v46 = vsel %vm2452_vm1, %v2380_v5, %v2461_v0 }
 0x1b9   : > { %v2409_v55 = vmax.f32 %v2407_v58, %v2408_v54  ;;  %v2438_v35 = vmax.f32 %v2436_v23, %v2437_v32  ;;  %v2416_v61 = vmax.f32 %v3968_v59, %v2415_v10  ;;  %v2445_v14 = vmax.f32 %v3970_v44, %v2444_v13 }
 0x1ba   : > { %v2455_v16 = vsel %vm2454_vm2, %v2358_v45, %v2453_v30  ;;  %v2463_v17 = vsel %vm2454_vm2, %v2387_v38, %v2462_v46 }
 0x1bb   : > { %v2470_v21 = vsel %vm2452_vm1, %v2409_v55, %v2469_v43  ;;  %v2478_v57 = vsel %vm2452_vm1, %v2438_v35, %v2477_v8  ;;  %v2833_v12 = vpack.c.bf16 %v2463_v17, %v2455_v16 }
 0x1bc   : > { %v2471_v33 = vsel %vm2454_vm2, %v2416_v61, %v2470_v21  ;;  %v2479_v34 = vsel %vm2454_vm2, %v2445_v14, %v2478_v57 }
 0x1bd   : > { %v2834_v36 = vpack.c.bf16 %v2479_v34, %v2471_v33  ;;  %v2497_v59 = vrot.slane %v2833_v12, %v3973_v27 }
 0x1bf   : > { %v2504_v10 = vrot.slane %v2834_v36, %v3973_v27 }
 0x1c1   : > { %v2505_v44 = vcombine.low %v2497_v59, %v2504_v10 }
 0x1c3   : > { %2507 = vst [vmem:[%s170_s18] sm:$0xff] %v2505_v44 }
 0x1c4 PF: > { %s13_s12 = sadd.s32 1, %s3343_s12  }
 0x1c5   : > { %p10_p4 = scmp.ge.s32.totalorder %s13_s12, 4  }
 0x1c7   :  { %12 = sbr.rel (!%p10_p4) target bundleno = 1 (0x1), region = 72 }

// kernel: reinforce_forward.9
= control target key start
LH: loop header
LB: loop body
LE: loop exit
PB: predicated region body
PF: predicated region fallthrough
CT: control target
= control target key end

     0   :  { %s2491_s12 = smov 0   ;;  %s2910_s0 = inlined_call_operand.vmem [shape: bf16[2,4,4,128], index: 0, kind: input, shape index: {}]   ;;  %s2911_s1 = inlined_call_operand.vmem [shape: bf16[9,128,128], index: 1, kind: input, shape index: {}]   ;;  %s2912_s2 = inlined_call_operand.vmem [shape: f32[1,128], index: 2, kind: input, shape index: {}]   ;;  %s2913_s3 = inlined_call_operand.vmem [shape: bf16[2,2,256], index: 3, kind: output, shape index: {}]  }
   0x1 LB: > { %s1823_s13 = sadd.s32 4294967295, %s2467_s12   ;;  %p1827_p0 = scmp.ge.s32.totalorder %s2467_s12, 1  ;;  %s2467_s12 = sphi %s2491_s12, %s13_s12  }
   0x2   : > { %p137_p1 = scmp.lt.s32.totalorder %s2467_s12, 3 }
   0x4   : > { %p138_p2 = pnand %p1827_p0, %p137_p1 }
   0x5   : > { %v2383_v0 = vld [vmem:[%s2911_s1 + $0x40] sm:$0xff] (!%p138_p2)   ;;  %v2385_v2 = vld [vmem:[%s2911_s1 + $0x48] sm:$0xff] (!%p138_p2)   ;;  %p2510_p3 = scmp.lt.s32.totalorder (!%p138_p2), %s1823_s13, 1  ;;  %v2469_v3 = vmov (!%p138_p2), 0   ;;  %v2387_v5 = vld [vmem:[%s2911_s1 + $0x50] sm:$0xff] (!%p138_p2)   ;;  %vm251_vm0 = vcmask (!%p138_p2), 1042432  }
   0x6   : > { %141 = sbr.rel (%p138_p2) target bundleno = 425 (0x1a9), region = 32  ;;  %v2384_v1 = vld [vmem:[%s2911_s1 + $0x100] sm:$0xff] (!%p138_p2)   ;;  %2161 = vmatprep.subr.bf16.mxu1 (!%p138_p2), %v2383_v0  ;;  %170 = vst [vmem:[#allocation2] sm:$0xf] (!%p138_p2), %v2469_v3  ;;  %171 = vst [vmem:[#allocation2 + $0x4] sm:$0x1] (!%p138_p2), %v2469_v3 }
   0x7   : > { %172 = vst [vmem:[#allocation2 + $0x8] sm:$0xf] (!%p138_p2), %v2469_v3  ;;  %173 = vst [vmem:[#allocation2 + $0xc] sm:$0x1] (!%p138_p2), %v2469_v3  ;;  %2241 = vmatprep.subr.bf16.mxu0 (!%p138_p2), %v2384_v1  ;;  %2162 = vmatpush3.bf16.msra.mxu1 (!%p138_p2), %v2383_v0  ;;  %v2386_v4 = vld [vmem:[%s2911_s1 + $0x108] sm:$0xff] (!%p138_p2)   ;;  %v2388_v6 = vld [vmem:[%s2911_s1 + $0x110] sm:$0xff] (!%p138_p2)  }
   0x8   : > { %174 = vst [vmem:[#allocation2 + $0x10] sm:$0xf] (!%p138_p2), %v2469_v3  ;;  %175 = vst [vmem:[#allocation2 + $0x14] sm:$0x1] (!%p138_p2), %v2469_v3  ;;  %2242 = vmatpush3.bf16.msra.mxu0 (!%p138_p2), %v2384_v1  ;;  %2163 = vmatprep.subr.bf16.mxu1 (!%p138_p2), %v2385_v2  ;;  %v2389_v7 = vld [vmem:[%s2911_s1 + $0x58] sm:$0xff] (!%p138_p2)   ;;  %v2391_v9 = vld [vmem:[%s2911_s1 + $0x60] sm:$0xff] (!%p138_p2)  }
   0x9   : > { %176 = vst [vmem:[#allocation2 + $0x18] sm:$0xf] (!%p138_p2), %v2469_v3  ;;  %177 = vst [vmem:[#allocation2 + $0x1c] sm:$0x1] (!%p138_p2), %v2469_v3  ;;  %2243 = vmatprep.subr.bf16.mxu0 (!%p138_p2), %v2386_v4  ;;  %v2390_v8 = vld [vmem:[%s2911_s1 + $0x118] sm:$0xff] (!%p138_p2)   ;;  %v2392_v10 = vld [vmem:[%s2911_s1 + $0x120] sm:$0xff] (!%p138_p2)  }
   0xa   : > { %178 = vst [vmem:[#allocation2 + $0x20] sm:$0xf] (!%p138_p2), %v2469_v3  ;;  %179 = vst [vmem:[#allocation2 + $0x24] sm:$0x1] (!%p138_p2), %v2469_v3  ;;  %v2393_v11 = vld [vmem:[%s2911_s1 + $0x68] sm:$0xff] (!%p138_p2)   ;;  %v2395_v17 = vld [vmem:[%s2911_s1 + $0x70] sm:$0xff] (!%p138_p2)  }
   0xb   : > { %180 = vst [vmem:[#allocation2 + $0x28] sm:$0xf] (!%p138_p2), %v2469_v3  ;;  %181 = vst [vmem:[#allocation2 + $0x2c] sm:$0x1] (!%p138_p2), %v2469_v3  ;;  %2164 = vmatpush3.bf16.msra.mxu1 (!%p138_p2), %v2385_v2  ;;  %vm252_vm1 = vsmask.f32 (!%p138_p2), 2306 }
   0xc   : > { %2244 = vmatpush3.bf16.msra.mxu0 (!%p138_p2), %v2386_v4  ;;  %2165 = vmatprep.subr.bf16.mxu1 (!%p138_p2), %v2387_v5  ;;  %v2394_v13 = vld [vmem:[%s2911_s1 + $0x128] sm:$0xff] (!%p138_p2)   ;;  %v2396_v18 = vld [vmem:[%s2911_s1 + $0x130] sm:$0xff] (!%p138_p2)   ;;  %vm2563_vm2 = vmand (!%p138_p2), %vm251_vm0, %vm252_vm1  ;;  %vm290_vm3 = vsmask.f32 (!%p138_p2), 3328  ;;  %vm291_vm4 = vsmask.f32 (!%p138_p2), 7440 }
   0xd   : > { %s2922_s13 = smov (!%p2510_p3, %s1823_s13), 1  ;;  %2245 = vmatprep.subr.bf16.mxu0 %v2388_v6  ;;  %v2554_v16 = vld [vmem:[#allocation2] sm:$0xf]  ;;  %v2569_v24 = vld [vmem:[#allocation2 + $0x4] sm:$0x1]  ;;  %v2397_v30 = vld [vmem:[%s2911_s1 + $0x78] sm:$0xff]  }
   0xe   : > { %s2070_s4 = sshll.u32 %s2922_s13, 3  ;;  %v294_v21 = vshrl.u32 %v2554_v16, 16  ;;  %v297_v22 = vshll.u32 %v2554_v16, 16  ;;  %v254_v23 = vld [vmem:[#allocation2 + $0x8] sm:$0x7]  ;;  %v303_v34 = vshll.u32 %v2569_v24, 16  ;;  %vm2625_vm5 = vmor %vm290_vm3, %vm291_vm4 }
   0xf   : > { %2166 = vmatpush3.bf16.msra.mxu1 %v2387_v5  ;;  %s2545_s11 = scalar_lea.vmem %s2910_s0, %s2070_s4  ;;  %v2571_v26 = vld [vmem:[#allocation2 + $0xc] sm:$0x1]  ;;  %v2398_v37 = vld [vmem:[%s2911_s1 + $0x138] sm:$0xff]   ;;  %v2586_v40 = vld [vmem:[#allocation2 + $0x14] sm:$0x1]  ;;  %vm592_vm6 = vcmask 1046532  }
  0x10   : > { %2246 = vmatpush3.bf16.msra.mxu0 %v2388_v6  ;;  %2167 = vmatprep.subr.bf16.mxu1 %v2389_v7  ;;  %v1831_v12 = vld.sshfl [vmem:[%s2545_s11] sm:$0x3 pattern:$0x76325410]  ;;  %v296_v27 = vrot.slane %v294_v21, 4  ;;  %v299_v28 = vrot.slane %v297_v22, 5  ;;  %vm2668_vm7 = vmor %vm251_vm0, %vm592_vm6 }
  0x11   : > { %2247 = vmatprep.subr.bf16.mxu0 %v2390_v8  ;;  %v219_v14 = vshrl.u32 %v1831_v12, 16  ;;  %v222_v15 = vshll.u32 %v1831_v12, 16  ;;  %v1832_v29 = vld.sshfl [vmem:[%s2545_s11 + $0x2] sm:$0x3 pattern:$0x76325410] }
  0x12   : > { %v226_v32 = vshrl.u32 %v1832_v29, 16  ;;  %v229_v33 = vshll.u32 %v1832_v29, 16  ;;  %v317_v35 = vshll.u32 %v2571_v26, 16  ;;  %v2581_v36 = vld [vmem:[#allocation2 + $0xc] sm:$0x1]  ;;  %v300_v38 = vor.u32 %v299_v28, %v296_v27  ;;  %v2592_v43 = vld [vmem:[%s2911_s1] sm:$0xff]  }
  0x13   : > { %2168 = vmatpush3.bf16.msra.mxu1 %v2389_v7  ;;  %v221_v19 = vrot.slane %v219_v14, 7  ;;  %v257_v41 = vld [vmem:[#allocation2 + $0x10] sm:$0x7]  ;;  %v2594_v47 = vld [vmem:[#allocation2 + $0x14] sm:$0x1]  ;;  %v2596_v48 = vrot.slane %v303_v34, 5 }
  0x14   : > { %2248 = vmatpush3.bf16.msra.mxu0 %v2390_v8  ;;  %2169 = vmatprep.subr.bf16.mxu1 %v2391_v9  ;;  %v228_v39 = vrot.slane %v226_v32, 7  ;;  %v1833_v42 = vld.sshfl [vmem:[%s2545_s11 + $0x4] sm:$0x3 pattern:$0x76325410]  ;;  %v319_v49 = vrot.slane %v317_v35, 5 }
  0x15   : > { %2249 = vmatprep.subr.bf16.mxu0 %v2392_v10  ;;  %v224_v25 = vor.u32 %v222_v15, %v221_v19  ;;  %v233_v45 = vshrl.u32 %v1833_v42, 16  ;;  %v236_v46 = vshll.u32 %v1833_v42, 16  ;;  %v888_v50 = vshll.u32 %v2581_v36, 16  ;;  %v2600_v52 = vld [vmem:[#allocation2 + $0x1c] sm:$0x1]  ;;  %v2607_v55 = vld [vmem:[%s2911_s1 + $0x140] sm:$0xff]  }
  0x16   : > { %v231_v44 = vor.u32 %v229_v33, %v228_v39  ;;  %v902_v51 = vshll.u32 %v2586_v40, 16  ;;  %v301_v53 = vrot.slane %v300_v38, 4  ;;  %v260_v57 = vld [vmem:[#allocation2 + $0x18] sm:$0x7]  ;;  %v331_v58 = vshll.u32 %v2594_v47, 16  ;;  %s1830_s15 = sshll.u32 %s2922_s13, 1 }
  0x17   : > { %2170 = vmatpush3.bf16.msra.mxu1 %v2391_v9  ;;  %v255_v31 = vsel %vm2563_vm2, %v224_v25, %v254_v23  ;;  %v235_v56 = vrot.slane %v233_v45, 7  ;;  %v1834_v59 = vld.sshfl [vmem:[%s2545_s11 + $0x6] sm:$0x3 pattern:$0x76325410]  ;;  %v345_v0 = vshll.u32 %v2600_v52, 16  ;;  %s168_s18 = scalar_lea.vmem %s2913_s3, %s1830_s15 }
  0x18   : > { %2250 = vmatpush3.bf16.msra.mxu0 %v2392_v10  ;;  %2171 = vmatprep.subr.bf16.mxu1 %v2393_v11  ;;  %256 = vst [vmem:[#allocation2 + $0x8] sm:$0x7] %v255_v31  ;;  %v258_v54 = vsel %vm2563_vm2, %v231_v44, %v257_v41  ;;  %v2611_v60 = vld [vmem:[#allocation2 + $0x1c] sm:$0x1]  ;;  %v240_v1 = vshrl.u32 %v1834_v59, 16  ;;  %v243_v9 = vshll.u32 %v1834_v59, 16  ;;  %v306_v25 = vsel %vm2625_vm5, %v301_v53, %v2596_v48 }
  0x19   : > { %2251 = vmatprep.subr.bf16.mxu0 %v2394_v13  ;;  %259 = vst [vmem:[#allocation2 + $0x10] sm:$0x7] %v258_v54  ;;  %v238_v63 = vor.u32 %v236_v46, %v235_v56  ;;  %v263_v6 = vld [vmem:[#allocation2 + $0x20] sm:$0x7]  ;;  %v916_v10 = vshll.u32 %v2611_v60, 16  ;;  %v333_v19 = vrot.slane %v331_v58, 5 }
  0x1a   : > { %v242_v8 = vrot.slane %v240_v1, 7  ;;  %v347_v29 = vrot.slane %v345_v0, 5  ;;  %vm1710_vm8 = vcmask 1041408   ;;  %vm1725_vm9 = vcmask 1043458  }
  0x1b   : > { %2172 = vmatpush3.bf16.msra.mxu1 %v2393_v11  ;;  %v261_v7 = vsel %vm2563_vm2, %v238_v63, %v260_v57  ;;  %v2636_v31 = vrot.slane %v916_v10, 5  ;;  %v2454_v11 = vld [vmem:[%s2911_s1 + $0x208] sm:$0xff]   ;;  %vm1742_vm10 = vcmask 1041409  }
  0x1c   : > { %2252 = vmatpush3.bf16.msra.mxu0 %v2394_v13  ;;  %2173 = vmatprep.subr.bf16.mxu1 %v2395_v17  ;;  %262 = vst [vmem:[#allocation2 + $0x18] sm:$0x7] %v261_v7  ;;  %v245_v21 = vor.u32 %v243_v9, %v242_v8 }
  0x1d   : > { %2253 = vmatprep.subr.bf16.mxu0 %v2396_v18 }
  0x1f   : > { %2174 = vmatpush3.bf16.msra.mxu1 %v2395_v17  ;;  %v2613_v61 = vld [vmem:[#allocation2 + $0x8] sm:$0xf]  ;;  %v890_v17 = vrot.slane %v888_v50, 5 }
  0x20   : > { %2254 = vmatpush3.bf16.msra.mxu0 %v2396_v18  ;;  %2175 = vmatprep.subr.bf16.mxu1 %v2397_v30  ;;  %v870_v62 = vld [vmem:[#allocation2 + $0x8] sm:$0xf]  ;;  %v308_v2 = vshrl.u32 %v2613_v61, 16  ;;  %v311_v3 = vshll.u32 %v2613_v61, 16  ;;  %v904_v18 = vrot.slane %v902_v51, 5 }
  0x21   : > { %2255 = vmatprep.subr.bf16.mxu0 %v2398_v37  ;;  %v879_v4 = vshrl.u32 %v870_v62, 16  ;;  %v882_v5 = vshll.u32 %v870_v62, 16  ;;  %v872_v27 = vld [vmem:[#allocation2 + $0x10] sm:$0xf] }
  0x22   : > { %v310_v12 = vrot.slane %v308_v2, 4  ;;  %v313_v13 = vrot.slane %v311_v3, 5  ;;  %v2632_v28 = vld [vmem:[#allocation2 + $0x10] sm:$0xf]  ;;  %v893_v34 = vshrl.u32 %v872_v27, 16  ;;  %v896_v35 = vshll.u32 %v872_v27, 16 }
  0x23   : > { %2176 = vmatpush3.bf16.msra.mxu1 %v2397_v30  ;;  %v881_v14 = vrot.slane %v879_v4, 4  ;;  %v884_v15 = vrot.slane %v882_v5, 5  ;;  %v264_v30 = vsel %vm2563_vm2, %v245_v21, %v263_v6  ;;  %v322_v38 = vshrl.u32 %v2632_v28, 16  ;;  %v2644_v45 = vld [vmem:[#allocation2 + $0x18] sm:$0xf]  ;;  %v2401_v27 = vld [vmem:[%s2911_s1 + $0x8] sm:$0xff]  }
  0x24   : > { %2256 = vmatpush3.bf16.msra.mxu0 %v2398_v37  ;;  %2181 = vmatprep.subr.bf16.mxu1 %v2592_v43  ;;  %v314_v22 = vor.u32 %v313_v13, %v310_v12  ;;  %265 = vst [vmem:[#allocation2 + $0x20] sm:$0x7] %v264_v30  ;;  %v2638_v37 = vld [vmem:[#allocation2 + $0x24] sm:$0x1]  ;;  %v325_v39 = vshll.u32 %v2632_v28, 16  ;;  %v895_v42 = vrot.slane %v893_v34, 4 }
  0x25   : > { %2261 = vmatprep.subr.bf16.mxu0 %v2607_v55  ;;  %v885_v23 = vor.u32 %v884_v15, %v881_v14  ;;  %v898_v44 = vrot.slane %v896_v35, 5  ;;  %v324_v46 = vrot.slane %v322_v38, 4  ;;  %v874_v50 = vld [vmem:[#allocation2 + $0x18] sm:$0xf]  ;;  %v336_v53 = vshrl.u32 %v2644_v45, 16 }
  0x26   : > { %v315_v32 = vrot.slane %v314_v22, 4  ;;  %v327_v48 = vrot.slane %v325_v39, 5  ;;  %v339_v54 = vshll.u32 %v2644_v45, 16  ;;  %v907_v56 = vshrl.u32 %v874_v50, 16  ;;  %v2404_v39 = vld [vmem:[%s2911_s1 + $0x150] sm:$0xff]  }
  0x27   : > { %v886_v33 = vrot.slane %v885_v23, 4  ;;  %v899_v51 = vor.u32 %v898_v44, %v895_v42  ;;  %v930_v59 = vshll.u32 %v2638_v37, 16  ;;  %v338_v63 = vrot.slane %v336_v53, 4  ;;  %v2405_v44 = vld [vmem:[%s2911_s1 + $0x18] sm:$0xff]  }
  0x28   : > { %v320_v41 = vsel %vm2625_vm5, %v315_v32, %v319_v49  ;;  %v328_v58 = vor.u32 %v327_v48, %v324_v46  ;;  %v910_v49 = vshll.u32 %v874_v50, 16  ;;  %v341_v0 = vrot.slane %v339_v54, 5  ;;  %v2408_v46 = vld [vmem:[%s2911_s1 + $0x160] sm:$0xff]   ;;  %v2409_v48 = vld [vmem:[%s2911_s1 + $0x28] sm:$0xff]  }
  0x29   : > { %v1851_v20 = vcombine.low %v306_v25, %v320_v41  ;;  %v891_v57 = vsel %vm2625_vm5, %v886_v33, %v890_v17  ;;  %v900_v62 = vrot.slane %v899_v51, 4  ;;  %v909_v1 = vrot.slane %v907_v56, 4 }
  0x2a   : > { %v329_v2 = vrot.slane %v328_v58, 4  ;;  %v912_v4 = vrot.slane %v910_v49, 5  ;;  %v342_v6 = vor.u32 %v341_v0, %v338_v63  ;;  %v932_v23 = vrot.slane %v930_v59, 5  ;;  %v1062_v49 = vld [vmem:[#allocation2 + $0x18] sm:$0xe] }
  0x2b   : > { %2177 = vmatprep.mubr.bf16.mxu1 %v1851_v20  ;;  %v876_v3 = vld [vmem:[#allocation2 + $0x20] sm:$0xf]  ;;  %v905_v5 = vsel %vm2625_vm5, %v900_v62, %v904_v18  ;;  %v1861_v18 = vcombine.low %v2554_v16, %v2613_v61  ;;  %v1078_v33 = vrot.slane %v2586_v40, 5  ;;  %v1060_v16 = vld [vmem:[#allocation2 + $0x8] sm:$0xe]  ;;  %v2406_v20 = vld [vmem:[%s2911_s1 + $0x158] sm:$0xff]  }
  0x2c   : > { %v921_v7 = vshrl.u32 %v876_v3, 16  ;;  %v924_v8 = vshll.u32 %v876_v3, 16  ;;  %v1943_v9 = vcombine.low %v891_v57, %v905_v5  ;;  %v913_v10 = vor.u32 %v912_v4, %v909_v1  ;;  %v2402_v40 = vld [vmem:[%s2911_s1 + $0x148] sm:$0xff]   ;;  %v582_v59 = vld [vmem:[#allocation2 + $0x10] sm:$0xe]  ;;  %v2414_v4 = vld [vmem:[%s2911_s1 + $0x178] sm:$0xff]  }
  0x2d   : > { %v334_v12 = vsel %vm2625_vm5, %v329_v2, %v333_v19  ;;  %v343_v13 = vrot.slane %v342_v6, 4  ;;  %v1074_v19 = vrot.slane %v2581_v36, 5  ;;  %v1061_v36 = vld [vmem:[#allocation2 + $0x10] sm:$0xe]  ;;  %v1953_v34 = vrot.slane %v1060_v16, 9  ;;  %v2410_v57 = vld [vmem:[%s2911_s1 + $0x168] sm:$0xff]  }
  0x2e   : > { %v923_v14 = vrot.slane %v921_v7, 4  ;;  %v926_v15 = vrot.slane %v924_v8, 5  ;;  %2257 = vmatprep.mubr.bf16.mxu0 %v1943_v9  ;;  %v914_v17 = vrot.slane %v913_v10, 4  ;;  %v1954_v38 = vrot.slane %v1061_v36, 9  ;;  %v583_v62 = vld [vmem:[#allocation2 + $0x18] sm:$0xe] }
  0x2f   : > { %v348_v21 = vsel %vm2625_vm5, %v343_v13, %v347_v29  ;;  %v596_v50 = vrot.slane %v2569_v24, 5  ;;  %v600_v51 = vrot.slane %v2571_v26, 5  ;;  %v604_v53 = vrot.slane %v2594_v47, 5  ;;  %v2411_v24 = vld [vmem:[%s2911_s1 + $0x30] sm:$0xff]   ;;  %v580_v26 = vld [vmem:[#allocation2] sm:$0xe] }
  0x30   : > { %v927_v22 = vor.u32 %v926_v15, %v923_v14  ;;  %v1852_v25 = vcombine.low %v334_v12, %v348_v21  ;;  %v919_v30 = vsel %vm2625_vm5, %v914_v17, %v2636_v31  ;;  %v2403_v31 = vld [vmem:[%s2911_s1 + $0x10] sm:$0xff]   ;;  %v1079_v41 = vsel %vm2668_vm7, %v1954_v38, %v1078_v33  ;;  %v581_v47 = vld [vmem:[#allocation2 + $0x8] sm:$0xe]  ;;  %v2416_v9 = vld [vmem:[%s2911_s1 + $0x80] sm:$0xff]  }
  0x31   : > { %v608_v54 = vrot.slane %v2600_v52, 5  ;;  %v1082_v56 = vrot.slane %v2611_v60, 5  ;;  %v1086_v58 = vrot.slane %v2638_v37, 5  ;;  %v1063_v52 = vld [vmem:[#allocation2 + $0x20] sm:$0xe]  ;;  %v2412_v60 = vld [vmem:[%s2911_s1 + $0x170] sm:$0xff]   ;;  %v1862_v10 = vcombine.low %v2632_v28, %v2644_v45 }
  0x32   : > { %v928_v32 = vrot.slane %v927_v22, 4  ;;  %2178 = vmatmul.mubr.bf16.vlgmr.msra.gmra.mrb[0].mxu1 %v1852_v25  ;;  %v1873_v63 = vrot.slane %v582_v59, 9  ;;  %v2413_v37 = vld [vmem:[%s2911_s1 + $0x38] sm:$0xff]   ;;  %v1871_v0 = vrot.slane %v580_v26, 9  ;;  %v1872_v1 = vrot.slane %v581_v47, 9  ;;  %v2417_v14 = vld [vmem:[%s2911_s1 + $0x180] sm:$0xff]  }
  0x33   : > { %2182 = vmatpush3.bf16.msra.mxu1 %v2592_v43  ;;  %2197 = vmatprep.mubr.bf16.mxu1 %v1861_v18  ;;  %v1075_v43 = vsel %vm2668_vm7, %v1953_v34, %v1074_v19  ;;  %v1874_v2 = vrot.slane %v583_v62, 9  ;;  %v1955_v6 = vrot.slane %v1062_v49, 9  ;;  %v1956_v7 = vrot.slane %v1063_v52, 9  ;;  %v2419_v28 = vld [vmem:[%s2911_s1 + $0x88] sm:$0xff]   ;;  %v2434_v18 = vld [vmem:[#allocation2 + $0x10] ss:$8 sps:$4 sm:$0xff]  }
  0x34   : > { %v933_v61 = vsel %vm2625_vm5, %v928_v32, %v932_v23  ;;  %2183 = vmatprep.subr.bf16.mxu1 %v2401_v27  ;;  %v1973_v42 = vcombine.low %v1075_v43, %v1079_v41  ;;  %v2724_v3 = vsel %vm2668_vm7, %v1873_v63, %v604_v53  ;;  %v597_v12 = vsel %vm2668_vm7, %v1871_v0, %v596_v50  ;;  %v2420_v22 = vld [vmem:[%s2911_s1 + $0x188] sm:$0xff]   ;;  %v2421_v23 = vld [vmem:[%s2911_s1 + $0x90] sm:$0xff]   ;;  %v2424_v19 = vld [vmem:[%s2911_s1 + $0x198] sm:$0xff]  }
  0x35   : > { %v1944_v35 = vcombine.low %v919_v30, %v933_v61  ;;  %v2731_v5 = vsel %vm2668_vm7, %v1874_v2, %v608_v54  ;;  %v601_v13 = vsel %vm2668_vm7, %v1872_v1, %v600_v51  ;;  %v1083_v15 = vsel %vm2668_vm7, %v1955_v6, %v1082_v56  ;;  %v2422_v25 = vld [vmem:[%s2911_s1 + $0x190] sm:$0xff]   ;;  %v2425_v30 = vld [vmem:[%s2911_s1 + $0xa0] sm:$0xff]   ;;  %v1351_v33 = vld [vmem:[#allocation2 + $0x18] sm:$0xf] }
  0x36   : > { %v1892_v8 = vcombine.low %v2724_v3, %v2731_v5  ;;  %v1087_v17 = vsel %vm2668_vm7, %v1956_v7, %v1086_v58  ;;  %v1891_v45 = vcombine.low %v597_v12, %v601_v13  ;;  %v1349_v32 = vld [vmem:[#allocation2 + $0x10] sm:$0xf]  ;;  %v2426_v16 = vld [vmem:[%s2911_s1 + $0x1a0] sm:$0xff]   ;;  %v2427_v61 = vld [vmem:[%s2911_s1 + $0xa8] sm:$0xff]  }
  0x37   : > { %2258 = vmatmul.mubr.bf16.vlgmr.msra.gmra.mrb[0].mxu0 %v1944_v35  ;;  %2184 = vmatpush3.bf16.msra.mxu1 %v2401_v27  ;;  %v1974_v21 = vcombine.low %v1083_v15, %v1087_v17  ;;  %v2423_v27 = vld [vmem:[%s2911_s1 + $0x98] sm:$0xff]   ;;  %v1358_v36 = vshrl.u32 %v1349_v32, 16  ;;  %v1361_v34 = vshll.u32 %v1349_v32, 16  ;;  %v1372_v35 = vshrl.u32 %v1351_v33, 16  ;;  %v2429_v38 = vld [vmem:[%s2911_s1 + $0xb0] sm:$0xff]   ;;  %v2433_v56 = vld [vmem:[%s2911_s1 + $0xc0] sm:$0xff]  }
  0x38   : > { %2262 = vmatpush3.bf16.msra.mxu0 %v2607_v55  ;;  %2185 = vmatprep.subr.bf16.mxu1 %v2403_v31  ;;  %v2407_v55 = vld [vmem:[%s2911_s1 + $0x20] sm:$0xff]   ;;  %v2432_v54 = vld [vmem:[%s2911_s1 + $0x1b8] sm:$0xff]   ;;  %v2437_v49 = vld [vmem:[%s2911_s1 + $0xc8] sm:$0xff]  }
  0x39   : > { %2263 = vmatprep.subr.bf16.mxu0 %v2402_v40  ;;  %2277 = vmatprep.mubr.bf16.mxu0 %v1973_v42  ;;  %v1360_v43 = vrot.slane %v1358_v36, 4  ;;  %v1374_v41 = vrot.slane %v1372_v35, 4  ;;  %v2435_v47 = vld [vmem:[%s2911_s1 + $0x1c0] sm:$0xff]   ;;  %v2451_v52 = vld [vmem:[#allocation2 + $0x8] ss:$8 sps:$4 sm:$0xff]   ;;  %v2441_v2 = vld [vmem:[%s2911_s1 + $0xd8] sm:$0xff]  }
  0x3a   : > { %v2436_v59 = vld [vmem:[#allocation2 + $0x20] ss:$8 sps:$4 sm:$0xff]   ;;  %v2440_v1 = vld [vmem:[%s2911_s1 + $0x1d0] sm:$0xff]   ;;  %v2442_v3 = vld [vmem:[%s2911_s1 + $0x1d8] sm:$0xff]  }
  0x3b   : > { %2186 = vmatpush3.bf16.msra.mxu1 %v2403_v31  ;;  %v2428_v31 = vld [vmem:[%s2911_s1 + $0x1a8] sm:$0xff]   ;;  %v1353_v5 = vld [vmem:[#allocation2 + $0x20] sm:$0xf]  ;;  %v2449_v32 = vld [vmem:[%s2911_s1 + $0xf8] sm:$0xff]  }
  0x3c   : > { %2264 = vmatpush3.bf16.msra.mxu0 %v2402_v40  ;;  %2187 = vmatprep.subr.bf16.mxu1 %v2405_v44  ;;  %v1375_v40 = vshll.u32 %v1351_v33, 16  ;;  %v2438_v63 = vld [vmem:[%s2911_s1 + $0x1c8] sm:$0xff]   ;;  %v1386_v7 = vshrl.u32 %v1353_v5, 16  ;;  %v2444_v12 = vld [vmem:[%s2911_s1 + $0x1e0] sm:$0xff]   ;;  %v1539_v33 = vld [vmem:[#allocation2 + $0x10] sm:$0xe] }
  0x3d   : > { %2265 = vmatprep.subr.bf16.mxu0 %v2404_v39  ;;  %v1355_v6 = vld [vmem:[#allocation2 + $0x28] sm:$0xf] }
  0x3e   : > { %v1377_v42 = vrot.slane %v1375_v40, 5  ;;  %v2445_v13 = vld [vmem:[%s2911_s1 + $0xe8] sm:$0xff]   ;;  %v1388_v15 = vrot.slane %v1386_v7, 4  ;;  %v2450_v40 = vld [vmem:[%s2911_s1 + $0x1f8] sm:$0xff]  }
  0x3f   : > { %2188 = vmatpush3.bf16.msra.mxu1 %v2405_v44  ;;  %v2784_v44 = vld [vmem:[#allocation2 + $0x14] sm:$0x1] }
  0x40   : > { %2266 = vmatpush3.bf16.msra.mxu0 %v2404_v39  ;;  %2189 = vmatprep.subr.bf16.mxu1 %v2407_v55  ;;  %v1363_v39 = vrot.slane %v1361_v34, 5  ;;  %v1367_v50 = vshll.u32 %v2784_v44, 16  ;;  %v1378_v51 = vor.u32 %v1377_v42, %v1374_v41  ;;  %v2452_v41 = vld [vmem:[#allocation2 + $0x18] ss:$8 sps:$4 sm:$0xff]  }
  0x41   : > { %2267 = vmatprep.subr.bf16.mxu0 %v2406_v20 }
  0x42   : > { %v1369_v58 = vrot.slane %v1367_v50, 5 }
  0x43   : > { %2190 = vmatpush3.bf16.msra.mxu1 %v2407_v55  ;;  %v2430_v55 = vld [vmem:[%s2911_s1 + $0x1b0] sm:$0xff]  }
  0x44   : > { %2268 = vmatpush3.bf16.msra.mxu0 %v2406_v20  ;;  %2191 = vmatprep.subr.bf16.mxu1 %v2409_v48  ;;  %v2786_v20 = vld [vmem:[#allocation2 + $0x1c] sm:$0x1] }
  0x45   : > { %2269 = vmatprep.subr.bf16.mxu0 %v2408_v46  ;;  %v1381_v53 = vshll.u32 %v2786_v20, 16 }
  0x47   : > { %2192 = vmatpush3.bf16.msra.mxu1 %v2409_v48  ;;  %v1364_v48 = vor.u32 %v1363_v39, %v1360_v43  ;;  %v1383_v26 = vrot.slane %v1381_v53, 5  ;;  %v1557_v39 = vrot.slane %v2786_v20, 5  ;;  %v2456_v53 = vld [vmem:[%s2911_s1 + $0x218] sm:$0xff]  }
  0x48   : > { %2270 = vmatpush3.bf16.msra.mxu0 %v2408_v46  ;;  %2193 = vmatprep.subr.bf16.mxu1 %v2411_v24  ;;  %v2431_v46 = vld [vmem:[%s2911_s1 + $0xb8] sm:$0xff]  }
  0x49   : > { %2271 = vmatprep.subr.bf16.mxu0 %v2410_v57 }
  0x4b   : > { %2194 = vmatpush3.bf16.msra.mxu1 %v2411_v24  ;;  %v1379_v24 = vrot.slane %v1378_v51, 4  ;;  %v2455_v51 = vld [vmem:[%s2911_s1 + $0x210] sm:$0xff]  }
  0x4c   : > { %2272 = vmatpush3.bf16.msra.mxu0 %v2410_v57  ;;  %2195 = vmatprep.subr.bf16.mxu1 %v2413_v37  ;;  %v1365_v57 = vrot.slane %v1364_v48, 4 }
  0x4d   : > { %2273 = vmatprep.subr.bf16.mxu0 %v2412_v60  ;;  %v1384_v62 = vsel %vm2625_vm5, %v1379_v24, %v1383_v26  ;;  %v1542_v24 = vld [vmem:[#allocation2 + $0x28] sm:$0xe] }
  0x4f   : > { %2196 = vmatpush3.bf16.msra.mxu1 %v2413_v37  ;;  %v2439_v37 = vld [vmem:[%s2911_s1 + $0xd0] sm:$0xff]  }
  0x50   : > { %2274 = vmatpush3.bf16.msra.mxu0 %v2412_v60  ;;  %2201 = vmatprep.subr.bf16.mxu1 %v2416_v9  ;;  %v1370_v60 = vsel %vm2625_vm5, %v1365_v57, %v1369_v58  ;;  %v2459_v57 = vld [vmem:[%s2911_s1 + $0x230] sm:$0xff]   ;;  %v1541_v58 = vld [vmem:[#allocation2 + $0x20] sm:$0xe] }
  0x51   : > { %2275 = vmatprep.subr.bf16.mxu0 %v2414_v4  ;;  %v2025_v0 = vcombine.low %v1370_v60, %v1384_v62  ;;  %v2037_v26 = vrot.slane %v1541_v58, 9 }
  0x52   : > { %2198 = vmatmul.mubr.bf16.vlgmr.msra.gmra.mrb[0].mxu1 %v1862_v10  ;;  %v1403_v10 = vshll.u32 %v1355_v6, 16 }
  0x53   : > { %2202 = vmatpush3.bf16.msra.mxu1 %v2416_v9  ;;  %2217 = vmatprep.mubr.bf16.mxu1 %v1891_v45  ;;  %v1400_v9 = vshrl.u32 %v1355_v6, 16 }
  0x54   : > { %2276 = vmatpush3.bf16.msra.mxu0 %v2414_v4  ;;  %2203 = vmatprep.subr.bf16.mxu1 %v2419_v28  ;;  %v2443_v4 = vld [vmem:[%s2911_s1 + $0xe0] sm:$0xff]   ;;  %v1405_v45 = vrot.slane %v1403_v10, 5 }
  0x55   : > { %2281 = vmatprep.subr.bf16.mxu0 %v2417_v14 }
  0x57   : > { %2278 = vmatmul.mubr.bf16.vlgmr.msra.gmra.mrb[0].mxu0 %v1974_v21  ;;  %2204 = vmatpush3.bf16.msra.mxu1 %v2419_v28  ;;  %v1402_v28 = vrot.slane %v1400_v9, 4  ;;  %v2447_v21 = vld [vmem:[%s2911_s1 + $0xf0] sm:$0xff]  }
  0x58   : > { %2282 = vmatpush3.bf16.msra.mxu0 %v2417_v14  ;;  %2205 = vmatprep.subr.bf16.mxu1 %v2421_v23  ;;  %v2446_v14 = vld [vmem:[%s2911_s1 + $0x1e8] sm:$0xff]  }
  0x59   : > { %2283 = vmatprep.subr.bf16.mxu0 %v2420_v22  ;;  %2297 = vmatprep.mubr.bf16.mxu0 %v2434_v18 }
  0x5b   : > { %2206 = vmatpush3.bf16.msra.mxu1 %v2421_v23  ;;  %v2847_v23 = vld [vmem:[#allocation2 + $0x2c] sm:$0x1] }
  0x5c   : > { %2284 = vmatpush3.bf16.msra.mxu0 %v2420_v22  ;;  %2207 = vmatprep.subr.bf16.mxu1 %v2423_v27  ;;  %v2845_v22 = vld [vmem:[#allocation2 + $0x24] sm:$0x1] }
  0x5d   : > { %2285 = vmatprep.subr.bf16.mxu0 %v2422_v25 }
  0x5f   : > { %2208 = vmatpush3.bf16.msra.mxu1 %v2423_v27  ;;  %v1406_v27 = vor.u32 %v1405_v45, %v1402_v28 }
  0x60   : > { %2286 = vmatpush3.bf16.msra.mxu0 %v2422_v25  ;;  %2209 = vmatprep.subr.bf16.mxu1 %v2425_v30  ;;  %v1395_v25 = vshll.u32 %v2845_v22, 16 }
  0x61   : > { %2287 = vmatprep.subr.bf16.mxu0 %v2424_v19  ;;  %v1407_v34 = vrot.slane %v1406_v27, 4 }
  0x62   : > { %v1397_v36 = vrot.slane %v1395_v25, 5 }
  0x63   : > { %2210 = vmatpush3.bf16.msra.mxu1 %v2425_v30  ;;  %v2448_v30 = vld [vmem:[%s2911_s1 + $0x1f0] sm:$0xff]  }
  0x64   : > { %2288 = vmatpush3.bf16.msra.mxu0 %v2424_v19  ;;  %2211 = vmatprep.subr.bf16.mxu1 %v2427_v61  ;;  %v1409_v19 = vshll.u32 %v2847_v23, 16 }
  0x65   : > { %2289 = vmatprep.subr.bf16.mxu0 %v2426_v16 }
  0x66   : > { %v1411_v35 = vrot.slane %v1409_v19, 5 }
  0x67   : > { %2212 = vmatpush3.bf16.msra.mxu1 %v2427_v61 }
  0x68   : > { %2290 = vmatpush3.bf16.msra.mxu0 %v2426_v16  ;;  %2213 = vmatprep.subr.bf16.mxu1 %v2429_v38  ;;  %v1540_v16 = vld [vmem:[#allocation2 + $0x18] sm:$0xe] }
  0x69   : > { %2291 = vmatprep.subr.bf16.mxu0 %v2428_v31  ;;  %v2036_v43 = vrot.slane %v1540_v16, 9 }
  0x6b   : > { %2214 = vmatpush3.bf16.msra.mxu1 %v2429_v38  ;;  %v1553_v38 = vrot.slane %v2784_v44, 5  ;;  %v1558_v20 = vsel %vm2668_vm7, %v2036_v43, %v1557_v39  ;;  %v1757_v39 = vlaneseq }
  0x6c   : > { %2292 = vmatpush3.bf16.msra.mxu0 %v2428_v31  ;;  %2215 = vmatprep.subr.bf16.mxu1 %v2431_v46  ;;  %v2035_v31 = vrot.slane %v1539_v33, 9 }
  0x6d   : > { %2293 = vmatprep.subr.bf16.mxu0 %v2430_v55 }
  0x6e   : > { %v1554_v44 = vsel %vm2668_vm7, %v2035_v31, %v1553_v38  ;;  %v2470_v38 = vmov 1966171168  }
  0x6f   : > { %2216 = vmatpush3.bf16.msra.mxu1 %v2431_v46  ;;  %v2453_v46 = vld [vmem:[%s2911_s1 + $0x200] sm:$0xff]   ;;  %v2055_v50 = vcombine.low %v1554_v44, %v1558_v20  ;;  %v1755_v43 = vunpack.c.l.s4 %v2470_v38 }
  0x70   : > { %2294 = vmatpush3.bf16.msra.mxu0 %v2430_v55  ;;  %2221 = vmatprep.subr.bf16.mxu1 %v2433_v56  ;;  %v1412_v55 = vsel %vm2625_vm5, %v1407_v34, %v1411_v35 }
  0x71   : > { %2295 = vmatprep.subr.bf16.mxu0 %v2432_v54 }
  0x72   : > { %2218 = vmatmul.mubr.bf16.vlgmr.msra.gmra.mrb[0].mxu1 %v1892_v8  ;;  %v1389_v8 = vshll.u32 %v1353_v5, 16 }
  0x73   : > { %2222 = vmatpush3.bf16.msra.mxu1 %v2433_v56  ;;  %2237 = vmatprep.mubr.bf16.mxu1 %v2451_v52  ;;  %v2458_v56 = vld [vmem:[%s2911_s1 + $0x228] sm:$0xff]   ;;  %v1565_v52 = vrot.slane %v2847_v23, 5 }
  0x74   : > { %2296 = vmatpush3.bf16.msra.mxu0 %v2432_v54  ;;  %2223 = vmatprep.subr.bf16.mxu1 %v2437_v49  ;;  %v1391_v17 = vrot.slane %v1389_v8, 5  ;;  %v2457_v54 = vld [vmem:[%s2911_s1 + $0x220] sm:$0xff]  }
  0x75   : > { %2301 = vmatprep.subr.bf16.mxu0 %v2435_v47 }
  0x76   : > { %v1392_v18 = vor.u32 %v1391_v17, %v1388_v15 }
  0x77   : > { %2298 = vmatmul.mubr.bf16.vlgmr.msra.gmra.mrb[0].mxu0 %v2436_v59  ;;  %2224 = vmatpush3.bf16.msra.mxu1 %v2437_v49  ;;  %v2038_v49 = vrot.slane %v1542_v24, 9  ;;  %v2460_v59 = vld [vmem:[%s2911_s1 + $0x238] sm:$0xff]  }
  0x78   : > { %2302 = vmatpush3.bf16.msra.mxu0 %v2435_v47  ;;  %2225 = vmatprep.subr.bf16.mxu1 %v2439_v37  ;;  %v1393_v61 = vrot.slane %v1392_v18, 4  ;;  %v1561_v47 = vrot.slane %v2845_v22, 5 }
  0x79   : > { %2303 = vmatprep.subr.bf16.mxu0 %v2438_v63  ;;  %2317 = vmatprep.mubr.bf16.mxu0 %v2025_v0  ;;  %v1566_v62 = vsel %vm2668_vm7, %v2038_v49, %v1565_v52 }
  0x7a   : > { %v1398_v42 = vsel %vm2625_vm5, %v1393_v61, %v1397_v36  ;;  %v1562_v60 = vsel %vm2668_vm7, %v2037_v26, %v1561_v47 }
  0x7b   : > { %2226 = vmatpush3.bf16.msra.mxu1 %v2439_v37  ;;  %v2026_v48 = vcombine.low %v1398_v42, %v1412_v55 }
  0x7c   : > { %2304 = vmatpush3.bf16.msra.mxu0 %v2438_v63  ;;  %2227 = vmatprep.subr.bf16.mxu1 %v2441_v2  ;;  %v2056_v63 = vcombine.low %v1562_v60, %v1566_v62 }
  0x7d   : > { %2305 = vmatprep.subr.bf16.mxu0 %v2440_v1 }
  0x7f   : > { %2228 = vmatpush3.bf16.msra.mxu1 %v2441_v2 }
  0x80   : > { %2306 = vmatpush3.bf16.msra.mxu0 %v2440_v1  ;;  %2229 = vmatprep.subr.bf16.mxu1 %v2443_v4 }
  0x81   : > { %2307 = vmatprep.subr.bf16.mxu0 %v2442_v3 }
  0x83   : > { %2230 = vmatpush3.bf16.msra.mxu1 %v2443_v4  ;;  %v2065_v4 = vld [vmem:[%s2912_s2] ss:$0 sm:$0xff] }
  0x84   : > { %2308 = vmatpush3.bf16.msra.mxu0 %v2442_v3  ;;  %2231 = vmatprep.subr.bf16.mxu1 %v2445_v13 }
  0x85   : > { %2309 = vmatprep.subr.bf16.mxu0 %v2444_v12 }
  0x87   : > { %2232 = vmatpush3.bf16.msra.mxu1 %v2445_v13 }
  0x88   : > { %2310 = vmatpush3.bf16.msra.mxu0 %v2444_v12  ;;  %2233 = vmatprep.subr.bf16.mxu1 %v2447_v21 }
  0x89   : > { %2311 = vmatprep.subr.bf16.mxu0 %v2446_v14 }
  0x8b   : > { %2234 = vmatpush3.bf16.msra.mxu1 %v2447_v21 }
  0x8c   : > { %2312 = vmatpush3.bf16.msra.mxu0 %v2446_v14  ;;  %2235 = vmatprep.subr.bf16.mxu1 %v2449_v32 }
  0x8d   : > { %2313 = vmatprep.subr.bf16.mxu0 %v2448_v30 }
  0x8f   : > { %2236 = vmatpush3.bf16.msra.mxu1 %v2449_v32 }
  0x90   : > { %2314 = vmatpush3.bf16.msra.mxu0 %v2448_v30 }
  0x91   : > { %2315 = vmatprep.subr.bf16.mxu0 %v2450_v40 }
  0x92   : > { %2238 = vmatmul.mubr.bf16.vlgmr.msra.gmra.mrb[0].mxu1 %v2452_v41 }
  0x94   : > { %2316 = vmatpush3.bf16.msra.mxu0 %v2450_v40 }
  0x95   : > { %2321 = vmatprep.subr.bf16.mxu0 %v2453_v46 }
  0x97   : > { %2318 = vmatmul.mubr.bf16.vlgmr.msra.gmra.mrb[0].mxu0 %v2026_v48 }
  0x98   : > { %2322 = vmatpush3.bf16.msra.mxu0 %v2453_v46  ;;  %2337 = vmatprep.mubr.bf16.mxu0 %v2055_v50 }
  0x99   : > { %2323 = vmatprep.subr.bf16.mxu0 %v2454_v11 }
  0x9c   : > { %2324 = vmatpush3.bf16.msra.mxu0 %v2454_v11  ;;  %v1756_v11 = vunpack.c.0.s8 %v1755_v43 }
  0x9d   : > { %2325 = vmatprep.subr.bf16.mxu0 %v2455_v51 }
  0xa0   : > { %2326 = vmatpush3.bf16.msra.mxu0 %v2455_v51  ;;  %v1758_v51 = vshrl.u32 %v1757_v39, 7 }
  0xa1   : > { %2327 = vmatprep.subr.bf16.mxu0 %v2456_v53 }
  0xa2   : > { %v1759_v26 = vsub.s32 %v1756_v11, %v1758_v51 }
  0xa4   : > { %2328 = vmatpush3.bf16.msra.mxu0 %v2456_v53 }
  0xa5   : > { %2329 = vmatprep.subr.bf16.mxu0 %v2457_v54 }
  0xa8   : > { %2330 = vmatpush3.bf16.msra.mxu0 %v2457_v54 }
  0xa9   : > { %2331 = vmatprep.subr.bf16.mxu0 %v2458_v56 }
  0xac   : > { %2332 = vmatpush3.bf16.msra.mxu0 %v2458_v56 }
  0xad   : > { %2333 = vmatprep.subr.bf16.mxu0 %v2459_v57 }
  0xb0   : > { %2334 = vmatpush3.bf16.msra.mxu0 %v2459_v57 }
  0xb1   : > { %2335 = vmatprep.subr.bf16.mxu0 %v2460_v59 }
  0xb4   : > { %2336 = vmatpush3.bf16.msra.mxu0 %v2460_v59 }
  0xb7   : > { %2338 = vmatmul.mubr.bf16.vlgmr.msra.gmra.mrb[0].mxu0 %v2056_v63 }
 0x165   : > { %v2239_v37 = vpop.f32.mrb[0].mxu1 }
 0x166   : > { %v851_v0 = vpop.f32.mrb[1].mxu1 }
 0x167   : > { %v2240_v1 = vpop.f32.mrb[2].mxu1 }
 0x168   : > { %v854_v2 = vpop.f32.mrb[3].mxu1 }
 0x18a   : > { %v2339_v3 = vpop.f32.mrb[0].mxu0 }
 0x18b   : > { %v2341_v5 = vadd.f32 %v2339_v3, %v2239_v37  ;;  %v1674_v6 = vpop.f32.mrb[1].mxu0 }
 0x18c   : > { %v2342_v7 = vadd.f32 %v1674_v6, %v851_v0  ;;  %v2340_v8 = vpop.f32.mrb[2].mxu0 }
 0x18d   : > { %v1702_v9 = vadd.f32 %v2341_v5, %v2065_v4  ;;  %v2343_v29 = vadd.f32 %v2340_v8, %v2240_v1  ;;  %v1677_v10 = vpop.f32.mrb[3].mxu0 }
 0x18e   : > { %v1700_v12 = vadd.f32 %v2342_v7, %v2065_v4  ;;  %v2344_v13 = vadd.f32 %v1677_v10, %v854_v2 }
 0x18f   : > { %v1703_v14 = vadd.f32 %v2343_v29, %v2065_v4  ;;  %v1706_v17 = vmax.f32 %v1702_v9, 0.0 }
 0x190   : > { %v1701_v15 = vadd.f32 %v2344_v13, %v2065_v4  ;;  %v1704_v45 = vmax.f32 %v1700_v12, 0.0 }
 0x191   : > { %v1707_v28 = vmax.f32 %v1703_v14, 0.0 }
 0x192   : > { %v1705_v21 = vmax.f32 %v1701_v15, 0.0 }
 0x193   : > { %v1709_v22 = vmax.f32 %v1706_v17, %v1707_v28 }
 0x194   : > { %v1708_v23 = vmax.f32 %v1704_v45, %v1705_v21 }
 0x195   : > { %v1718_v18 = vsel %vm1710_vm8, %v1709_v22, -inf  ;;  %v1733_v25 = vsel %vm1725_vm9, %v1709_v22, -inf }
 0x196   : > { %v1719_v27 = vrot.slane %v1718_v18, 4  ;;  %v1734_v19 = vrot.slane %v1733_v25, 4  ;;  %v1711_v30 = vsel %vm1710_vm8, %v1708_v23, -inf  ;;  %v1726_v32 = vsel %vm1725_vm9, %v1708_v23, -inf }
 0x197   : > { %v1712_v33 = vrot.slane %v1711_v30, 4  ;;  %v1727_v16 = vrot.slane %v1726_v32, 4 }
 0x198   : > { %v1720_v61 = vmax.f32 %v1718_v18, %v1719_v27  ;;  %v1735_v36 = vmax.f32 %v1733_v25, %v1734_v19 }
 0x199   : > { %v1713_v34 = vmax.f32 %v1711_v30, %v1712_v33  ;;  %v1728_v35 = vmax.f32 %v1726_v32, %v1727_v16 }
 0x19a   : > { %v1721_v40 = vrot.slane %v1720_v61, 2  ;;  %v1736_v31 = vrot.slane %v1735_v36, 2 }
 0x19b   : > { %v1714_v41 = vrot.slane %v1713_v34, 2  ;;  %v1729_v42 = vrot.slane %v1728_v35, 2 }
 0x19c   : > { %v1722_v55 = vmax.f32 %v1720_v61, %v1721_v40  ;;  %v1737_v46 = vmax.f32 %v1735_v36, %v1736_v31 }
 0x19d   : > { %v1715_v44 = vmax.f32 %v1713_v34, %v1714_v41  ;;  %v1730_v20 = vmax.f32 %v1728_v35, %v1729_v42 }
 0x19e   : > { %v1723_v48 = vrot.slane %v1722_v55, 1  ;;  %v1738_v50 = vrot.slane %v1737_v46, 1 }
 0x19f   : > { %v1716_v53 = vrot.slane %v1715_v44, 1  ;;  %v1731_v54 = vrot.slane %v1730_v20, 1 }
 0x1a0   : > { %v1724_v56 = vmax.f32 %v1722_v55, %v1723_v48  ;;  %v1739_v57 = vmax.f32 %v1737_v46, %v1738_v50 }
 0x1a1   : > { %v1717_v58 = vmax.f32 %v1715_v44, %v1716_v53  ;;  %v1732_v24 = vmax.f32 %v1730_v20, %v1731_v54 }
 0x1a3   : > { %v1743_v47 = vsel %vm1742_vm10, %v1724_v56, %v1717_v58  ;;  %v1747_v49 = vsel %vm1742_vm10, %v1739_v57, %v1732_v24 }
 0x1a4   : > { %v2066_v52 = vpack.c.bf16 %v1747_v49, %v1743_v47 }
 0x1a6   : > { %v1760_v59 = vrot.slane %v2066_v52, %v1759_v26 }
 0x1a8   : > { %2067 = vst.sshfl [vmem:[%s168_s18] sm:$0x5 pattern:$0x73625140] %v1760_v59 }
 0x1a9 PF: > { %s13_s12 = sadd.s32 1, %s2467_s12  }
 0x1aa   : > { %p10_p4 = scmp.ge.s32.totalorder %s13_s12, 4  }
 0x1ac   :  { %12 = sbr.rel (!%p10_p4) target bundleno = 1 (0x1), region = 72 }

// kernel: reinforce_forward.10
= control target key start
LH: loop header
LB: loop body
LE: loop exit
PB: predicated region body
PF: predicated region fallthrough
CT: control target
= control target key end

     0   :  { %s2069_s12 = smov 0   ;;  %s2467_s0 = inlined_call_operand.vmem [shape: bf16[2,2,2,128], index: 0, kind: input, shape index: {}]   ;;  %s2468_s1 = inlined_call_operand.vmem [shape: bf16[9,128,128], index: 1, kind: input, shape index: {}]   ;;  %s2469_s2 = inlined_call_operand.vmem [shape: f32[1,128], index: 2, kind: input, shape index: {}]   ;;  %s2470_s3 = inlined_call_operand.vmem [shape: bf16[2,1,128], index: 3, kind: output, shape index: {}]  }
   0x1 LB: > { %s1463_s13 = sadd.s32 4294967295, %s2043_s12   ;;  %p1467_p0 = scmp.ge.s32.totalorder %s2043_s12, 1  ;;  %s2043_s12 = sphi %s2069_s12, %s13_s12  }
   0x2   : > { %p136_p1 = scmp.lt.s32.totalorder %s2043_s12, 3 }
   0x4   : > { %p137_p2 = pnand %p1467_p0, %p136_p1 }
   0x5   : > { %v1962_v0 = vld [vmem:[%s2468_s1 + $0x40] sm:$0xff] (!%p137_p2)   ;;  %v2045_v1 = vmov (!%p137_p2), 0.0   ;;  %v1964_v3 = vld [vmem:[%s2468_s1 + $0x48] sm:$0xff] (!%p137_p2)   ;;  %vm2046_vm0 = vmmov (!%p137_p2), 0   ;;  %v2047_v5 = vmov (!%p137_p2), 0   ;;  %v1966_v6 = vld [vmem:[%s2468_s1 + $0x50] sm:$0xff] (!%p137_p2)   ;;  %v187_v10 = vlaneseq (!%p137_p2) }
   0x6   : > { %140 = sbr.rel (%p137_p2) target bundleno = 412 (0x19c), region = 32  ;;  %1770 = vmatprep.subr.bf16.mxu0 (!%p137_p2), %v2045_v1  ;;  %1790 = vmatprep.subr.bf16.mxu1 (!%p137_p2), %v2045_v1  ;;  %v1963_v2 = vld [vmem:[%s2468_s1] sm:$0xff] (!%p137_p2)   ;;  %v1965_v4 = vld [vmem:[%s2468_s1 + $0x8] sm:$0xff] (!%p137_p2)   ;;  %165 = vst [vmem:[#allocation2] sm:$0xf] (!%p137_p2), %v2047_v5  ;;  %p157_p3 = scmp.lt.s32.totalorder (!%p137_p2), %s1463_s13, 1 }
   0x7   : > { %1771 = vmatpush3.bf16.msra.mxu0 (!%p137_p2), %v1962_v0  ;;  %1786 = vmatprep.mubr.msk.bf16.mxu0 (!%p137_p2), %vm2046_vm0, %v2045_v1  ;;  %166 = vst [vmem:[#allocation2 + $0x4] sm:$0x1] (!%p137_p2), %v2047_v5  ;;  %167 = vst [vmem:[#allocation2 + $0x8] sm:$0xf] (!%p137_p2), %v2047_v5  ;;  %v1967_v7 = vld [vmem:[%s2468_s1 + $0x10] sm:$0xff] (!%p137_p2)   ;;  %v1968_v8 = vld [vmem:[%s2468_s1 + $0x58] sm:$0xff] (!%p137_p2)  }
   0x8   : > { %1791 = vmatpush3.bf16.msra.mxu1 (!%p137_p2), %v1963_v2  ;;  %1772 = vmatprep.subr.bf16.mxu0 (!%p137_p2), %v2045_v1  ;;  %168 = vst [vmem:[#allocation2 + $0xc] sm:$0x1] (!%p137_p2), %v2047_v5  ;;  %169 = vst [vmem:[#allocation2 + $0x10] sm:$0xf] (!%p137_p2), %v2047_v5  ;;  %v1969_v9 = vld [vmem:[%s2468_s1 + $0x18] sm:$0xff] (!%p137_p2)   ;;  %v1970_v11 = vld [vmem:[%s2468_s1 + $0x60] sm:$0xff] (!%p137_p2)  }
   0x9   : > { %1792 = vmatprep.subr.bf16.mxu1 (!%p137_p2), %v2045_v1  ;;  %1806 = vmatprep.mubr.msk.bf16.mxu1 (!%p137_p2), %vm2046_vm0, %v2045_v1  ;;  %170 = vst [vmem:[#allocation2 + $0x14] sm:$0x1] (!%p137_p2), %v2047_v5  ;;  %171 = vst [vmem:[#allocation2 + $0x18] sm:$0xf] (!%p137_p2), %v2047_v5  ;;  %v1971_v12 = vld [vmem:[%s2468_s1 + $0x20] sm:$0xff] (!%p137_p2)   ;;  %v188_v15 = vshrl.u32 (!%p137_p2), %v187_v10, 7 }
   0xa   : > { %172 = vst [vmem:[#allocation2 + $0x1c] sm:$0x1] (!%p137_p2), %v2047_v5  ;;  %v2048_v13 = vmov (!%p137_p2), 1935823168   ;;  %v1972_v16 = vld [vmem:[%s2468_s1 + $0x68] sm:$0xff] (!%p137_p2)   ;;  %v1974_v21 = vld [vmem:[%s2468_s1 + $0x70] sm:$0xff] (!%p137_p2)  }
   0xb   : > { %1773 = vmatpush3.bf16.msra.mxu0 (!%p137_p2), %v1964_v3  ;;  %v185_v14 = vunpack.c.l.s4 (!%p137_p2), %v2048_v13  ;;  %v1973_v17 = vld [vmem:[%s2468_s1 + $0x28] sm:$0xff] (!%p137_p2)   ;;  %v1975_v22 = vld [vmem:[%s2468_s1 + $0x30] sm:$0xff] (!%p137_p2)   ;;  %v1976_v24 = vld [vmem:[%s2468_s1 + $0x78] sm:$0xff] (!%p137_p2)   ;;  %vm222_vm1 = vcmask (!%p137_p2), 1041408   ;;  %vm223_vm2 = vsmask.f32 (!%p137_p2), 1282 }
   0xc   : > { %1793 = vmatpush3.bf16.msra.mxu1 (!%p137_p2), %v1965_v4  ;;  %1774 = vmatprep.subr.bf16.mxu0 (!%p137_p2), %v2045_v1  ;;  %v1977_v29 = vld [vmem:[%s2468_s1 + $0x38] sm:$0xff] (!%p137_p2)   ;;  %vm2159_vm3 = vmand (!%p137_p2), %vm222_vm1, %vm223_vm2  ;;  %vm251_vm4 = vsmask.f32 (!%p137_p2), 3328  ;;  %vm252_vm5 = vsmask.f32 (!%p137_p2), 7440  ;;  %v1980_v46 = vld [vmem:[%s2468_s1 + $0xc0] sm:$0xff] (!%p137_p2)  }
   0xd   : > { %1794 = vmatprep.subr.bf16.mxu1 %v2045_v1  ;;  %s2478_s13 = smov (!%p157_p3, %s1463_s13), 1  ;;  %v186_v18 = vunpack.c.0.s8 %v185_v14  ;;  %v231_v28 = vld [vmem:[#allocation2] sm:$0xf]  ;;  %vm2177_vm6 = vmor %vm251_vm4, %vm252_vm5  ;;  %v1982_v58 = vld [vmem:[%s2468_s1 + $0xc8] sm:$0xff]   ;;  %vm493_vm7 = vcmask 1042432   ;;  %vm494_vm8 = vcmask 1046532  }
   0xe   : > { %s1468_s5 = sshll.u32 %s2478_s13, 1  ;;  %v225_v27 = vld [vmem:[#allocation2 + $0x8] sm:$0x3]  ;;  %v255_v33 = vshrl.u32 %v231_v28, 16  ;;  %v258_v34 = vshll.u32 %v231_v28, 16  ;;  %v1984_v2 = vld [vmem:[%s2468_s1 + $0xd0] sm:$0xff]   ;;  %vm2254_vm9 = vmor %vm493_vm7, %vm494_vm8  ;;  %s163_s16 = scalar_lea.vmem %s2470_s3, %s2478_s13 }
   0xf   : > { %1775 = vmatpush3.bf16.msra.mxu0 %v1966_v6  ;;  %s2131_s10 = scalar_lea.vmem %s2467_s0, %s1468_s5  ;;  %v189_v20 = vsub.s32 %v186_v18, %v188_v15  ;;  %v2166_v36 = vld [vmem:[#allocation2 + $0x4] sm:$0x1]  ;;  %v2169_v39 = vld [vmem:[#allocation2 + $0xc] sm:$0x1]  ;;  %v228_v61 = vld [vmem:[#allocation2 + $0x10] sm:$0x3] }
  0x10   : > { %1795 = vmatpush3.bf16.msra.mxu1 %v1967_v7  ;;  %1776 = vmatprep.subr.bf16.mxu0 %v2045_v1  ;;  %v1469_v19 = vld.sshfl [vmem:[%s2131_s10] sm:$0x1 pattern:$0x73625140]  ;;  %v257_v37 = vrot.slane %v255_v33, 4  ;;  %v260_v38 = vrot.slane %v258_v34, 5 }
  0x11   : > { %1796 = vmatprep.subr.bf16.mxu1 %v2045_v1  ;;  %v190_v23 = vrot.slane %v1469_v19, %v189_v20  ;;  %v264_v40 = vshll.u32 %v2166_v36, 16  ;;  %v278_v42 = vshll.u32 %v2169_v39, 16  ;;  %v1470_v43 = vld.sshfl [vmem:[%s2131_s10 + $0x1] sm:$0x1 pattern:$0x73625140] }
  0x12   : > { %v261_v41 = vor.u32 %v260_v38, %v257_v37  ;;  %v204_v47 = vrot.slane %v1470_v43, %v189_v20  ;;  %v1979_v5 = vld [vmem:[%s2468_s1 + $0x80] sm:$0xff]   ;;  %v1986_v7 = vld [vmem:[%s2468_s1 + $0xd8] sm:$0xff]   ;;  %v1983_v10 = vld [vmem:[%s2468_s1 + $0x90] sm:$0xff]   ;;  %vm1410_vm10 = vcmask 1040384   ;;  %vm1411_vm11 = vsmask.f32 256 }
  0x13   : > { %1777 = vmatpush3.bf16.msra.mxu0 %v1968_v8  ;;  %v206_v25 = vshrl.u32 %v190_v23, 16  ;;  %v209_v26 = vshll.u32 %v190_v23, 16  ;;  %v266_v45 = vrot.slane %v264_v40, 5  ;;  %v280_v52 = vrot.slane %v278_v42, 5  ;;  %v1981_v8 = vld [vmem:[%s2468_s1 + $0x88] sm:$0xff]   ;;  %v1992_v13 = vld [vmem:[%s2468_s1 + $0xf0] sm:$0xff]   ;;  %vm1412_vm12 = vmand %vm1410_vm10, %vm1411_vm11 }
  0x14   : > { %1797 = vmatpush3.bf16.msra.mxu1 %v1969_v9  ;;  %1778 = vmatprep.subr.bf16.mxu0 %v2045_v1  ;;  %v262_v51 = vrot.slane %v261_v41, 4  ;;  %v213_v53 = vshrl.u32 %v204_v47, 16  ;;  %v216_v54 = vshll.u32 %v204_v47, 16  ;;  %v1988_v9 = vld [vmem:[%s2468_s1 + $0xe0] sm:$0xff]   ;;  %v1989_v15 = vld [vmem:[%s2468_s1 + $0xa8] sm:$0xff]   ;;  %v1991_v20 = vld [vmem:[%s2468_s1 + $0xb0] sm:$0xff]  }
  0x15   : > { %1798 = vmatprep.subr.bf16.mxu1 %v2045_v1  ;;  %v208_v30 = vrot.slane %v206_v25, 7  ;;  %v1987_v14 = vld [vmem:[%s2468_s1 + $0xa0] sm:$0xff]   ;;  %v2003_v34 = vld [vmem:[%s2468_s1 + $0x158] sm:$0xff]   ;;  %v2007_v41 = vld [vmem:[%s2468_s1 + $0x168] sm:$0xff]  }
  0x16   : > { %v215_v59 = vrot.slane %v213_v53, 7  ;;  %v267_v63 = vsel %vm2177_vm6, %v262_v51, %v266_v45  ;;  %v487_v18 = vld [vmem:[#allocation2] sm:$0xe]  ;;  %v2002_v40 = vld [vmem:[%s2468_s1 + $0x118] sm:$0xff]  }
  0x17   : > { %1779 = vmatpush3.bf16.msra.mxu0 %v1970_v11  ;;  %v211_v32 = vor.u32 %v209_v26, %v208_v30  ;;  %v1990_v11 = vld [vmem:[%s2468_s1 + $0xe8] sm:$0xff]   ;;  %v1997_v23 = vld [vmem:[%s2468_s1 + $0x140] sm:$0xff]   ;;  %v2026_v55 = vld [vmem:[%s2468_s1 + $0x1b8] sm:$0xff]  }
  0x18   : > { %1799 = vmatpush3.bf16.msra.mxu1 %v1971_v12  ;;  %1780 = vmatprep.subr.bf16.mxu0 %v2045_v1  ;;  %v218_v62 = vor.u32 %v216_v54, %v215_v59  ;;  %v1985_v12 = vld [vmem:[%s2468_s1 + $0x98] sm:$0xff]   ;;  %v1995_v33 = vld [vmem:[%s2468_s1 + $0x100] sm:$0xff]  }
  0x19   : > { %1800 = vmatprep.subr.bf16.mxu1 %v2045_v1  ;;  %v226_v35 = vsel %vm2159_vm3, %v211_v32, %v225_v27  ;;  %v1999_v27 = vld [vmem:[%s2468_s1 + $0x148] sm:$0xff]   ;;  %v2001_v32 = vld [vmem:[%s2468_s1 + $0x150] sm:$0xff]   ;;  %v2005_v37 = vld [vmem:[%s2468_s1 + $0x160] sm:$0xff]  }
  0x1a   : > { %227 = vst [vmem:[#allocation2 + $0x8] sm:$0x3] %v226_v35  ;;  %v229_v3 = vsel %vm2159_vm3, %v218_v62, %v228_v61  ;;  %v1998_v35 = vld [vmem:[%s2468_s1 + $0x108] sm:$0xff]   ;;  %v2011_v61 = vld [vmem:[%s2468_s1 + $0x178] sm:$0xff]  }
  0x1b   : > { %1781 = vmatpush3.bf16.msra.mxu0 %v1972_v16  ;;  %230 = vst [vmem:[#allocation2 + $0x10] sm:$0x3] %v229_v3  ;;  %v498_v16 = vrot.slane %v2166_v36, 5  ;;  %v2000_v36 = vld [vmem:[%s2468_s1 + $0x110] sm:$0xff]  }
  0x1c   : > { %1801 = vmatpush3.bf16.msra.mxu1 %v1973_v17  ;;  %1782 = vmatprep.subr.bf16.mxu0 %v2045_v1  ;;  %v1994_v17 = vld [vmem:[%s2468_s1 + $0xf8] sm:$0xff]  }
  0x1d   : > { %1802 = vmatprep.subr.bf16.mxu1 %v2045_v1 }
  0x1f   : > { %1783 = vmatpush3.bf16.msra.mxu0 %v1974_v21 }
  0x20   : > { %1803 = vmatpush3.bf16.msra.mxu1 %v1975_v22  ;;  %1784 = vmatprep.subr.bf16.mxu0 %v2045_v1  ;;  %v502_v22 = vrot.slane %v2169_v39, 5 }
  0x21   : > { %1804 = vmatprep.subr.bf16.mxu1 %v2045_v1  ;;  %v232_v44 = vld [vmem:[#allocation2 + $0x8] sm:$0xf] }
  0x22   : > { %v269_v48 = vshrl.u32 %v232_v44, 16  ;;  %v272_v49 = vshll.u32 %v232_v44, 16  ;;  %v1496_v50 = vcombine.low %v231_v28, %v232_v44  ;;  %v488_v19 = vld [vmem:[#allocation2 + $0x8] sm:$0xe]  ;;  %v1993_v28 = vld [vmem:[%s2468_s1 + $0xb8] sm:$0xff]  }
  0x23   : > { %1785 = vmatpush3.bf16.msra.mxu0 %v1976_v24  ;;  %v1996_v21 = vld [vmem:[#allocation2 + $0x8] ss:$8 sps:$4 sm:$0xff]   ;;  %v1505_v24 = vrot.slane %v487_v18, 9  ;;  %v1506_v25 = vrot.slane %v488_v19, 9  ;;  %v2012_v19 = vld [vmem:[%s2468_s1 + $0x180] sm:$0xff]  }
  0x24   : > { %1805 = vmatpush3.bf16.msra.mxu1 %v1977_v29  ;;  %1810 = vmatprep.subr.bf16.mxu0 %v2045_v1  ;;  %v271_v56 = vrot.slane %v269_v48, 4  ;;  %v274_v57 = vrot.slane %v272_v49, 5  ;;  %v732_v38 = vld [vmem:[#allocation2 + $0x8] sm:$0xf]  ;;  %v734_v39 = vld [vmem:[#allocation2 + $0x10] sm:$0xf] }
  0x25   : > { %1830 = vmatprep.subr.bf16.mxu1 %v2045_v1  ;;  %v499_v29 = vsel %vm2254_vm9, %v1505_v24, %v498_v16  ;;  %v503_v30 = vsel %vm2254_vm9, %v1506_v25, %v502_v22  ;;  %v737_v42 = vshrl.u32 %v732_v38, 16  ;;  %v740_v43 = vshll.u32 %v732_v38, 16  ;;  %v877_v47 = vld [vmem:[#allocation2 + $0x10] sm:$0xe]  ;;  %v733_v48 = vld [vmem:[#allocation2 + $0xc] sm:$0x1] }
  0x26   : > { %v275_v60 = vor.u32 %v274_v57, %v271_v56  ;;  %v1523_v31 = vcombine.low %v499_v29, %v503_v30  ;;  %v751_v44 = vshrl.u32 %v734_v39, 16  ;;  %v754_v45 = vshll.u32 %v734_v39, 16  ;;  %v735_v49 = vld [vmem:[#allocation2 + $0x14] sm:$0x1]  ;;  %v2004_v56 = vld [vmem:[%s2468_s1 + $0x120] sm:$0xff]   ;;  %v2019_v22 = vld [vmem:[%s2468_s1 + $0x1d8] sm:$0xff]  }
  0x27   : > { %1807 = vmatmul.mubr.bf16.vlgmr.msra.gmra.mrb[0].mxu1 %v1496_v50  ;;  %v2009_v50 = vld [vmem:[%s2468_s1 + $0x170] sm:$0xff]   ;;  %v1583_v53 = vrot.slane %v877_v47, 9  ;;  %v888_v54 = vrot.slane %v735_v49, 5  ;;  %v739_v57 = vrot.slane %v737_v42, 4  ;;  %v746_v3 = vshll.u32 %v733_v48, 16  ;;  %v2021_v29 = vld [vmem:[%s2468_s1 + $0x1e0] sm:$0xff]  }
  0x28   : > { %1831 = vmatpush3.bf16.msra.mxu1 %v1980_v46  ;;  %1846 = vmatprep.mubr.msk.bf16.mxu1 %vm2046_vm0, %v2045_v1  ;;  %v276_v0 = vrot.slane %v275_v60, 4  ;;  %v876_v46 = vld [vmem:[#allocation2 + $0x8] sm:$0xe]  ;;  %v753_v59 = vrot.slane %v751_v44, 4  ;;  %v756_v60 = vrot.slane %v754_v45, 5  ;;  %v2017_v18 = vld [vmem:[%s2468_s1 + $0x1d0] sm:$0xff]  }
  0x29   : > { %1832 = vmatprep.subr.bf16.mxu1 %v2045_v1  ;;  %v1582_v51 = vrot.slane %v876_v46, 9  ;;  %v2018_v42 = vld [vmem:[%s2468_s1 + $0x198] sm:$0xff]  }
  0x2a   : > { %v281_v4 = vsel %vm2177_vm6, %v276_v0, %v280_v52  ;;  %v884_v52 = vrot.slane %v733_v48, 5  ;;  %v2006_v0 = vld [vmem:[%s2468_s1 + $0x128] sm:$0xff]   ;;  %v2020_v48 = vld [vmem:[%s2468_s1 + $0x1a0] sm:$0xff]  }
  0x2b   : > { %v1487_v6 = vcombine.low %v267_v63, %v281_v4  ;;  %v889_v63 = vsel %vm2254_vm9, %v1583_v53, %v888_v54  ;;  %v757_v4 = vor.u32 %v756_v60, %v753_v59  ;;  %v2024_v54 = vld [vmem:[%s2468_s1 + $0x1b0] sm:$0xff]   ;;  %v2032_v60 = vld [vmem:[%s2468_s1 + $0x218] sm:$0xff]  }
  0x2c   : > { %1833 = vmatpush3.bf16.msra.mxu1 %v1982_v58  ;;  %v742_v58 = vrot.slane %v740_v43, 5  ;;  %v885_v62 = vsel %vm2254_vm9, %v1582_v51, %v884_v52  ;;  %v2025_v43 = vld [vmem:[%s2468_s1 + $0x1f0] sm:$0xff]   ;;  %v2022_v52 = vld [vmem:[%s2468_s1 + $0x1a8] sm:$0xff]  }
  0x2d   : > { %1834 = vmatprep.subr.bf16.mxu1 %v2045_v1  ;;  %1787 = vmatmul.mubr.bf16.vlgmr.msra.gmra.mrb[0].mxu0 %v1487_v6  ;;  %v1600_v6 = vcombine.low %v885_v62, %v889_v63  ;;  %v2031_v59 = vld [vmem:[%s2468_s1 + $0x210] sm:$0xff]   ;;  %v2034_v62 = vld [vmem:[%s2468_s1 + $0x228] sm:$0xff]  }
  0x2e   : > { %1811 = vmatpush3.bf16.msra.mxu0 %v1979_v5  ;;  %1826 = vmatprep.mubr.msk.bf16.mxu0 %vm2046_vm0, %v2045_v1  ;;  %v760_v5 = vshll.u32 %v735_v49, 16  ;;  %v2027_v49 = vld [vmem:[%s2468_s1 + $0x1f8] sm:$0xff]   ;;  %v1263_v63 = vld [vmem:[#allocation2 + $0x10] sm:$0xe] }
  0x2f   : > { %1812 = vmatprep.subr.bf16.mxu0 %v2045_v1 }
  0x30   : > { %1835 = vmatpush3.bf16.msra.mxu1 %v1984_v2  ;;  %v743_v2 = vor.u32 %v742_v58, %v739_v57  ;;  %v2029_v57 = vld [vmem:[%s2468_s1 + $0x200] sm:$0xff]   ;;  %v2030_v58 = vld [vmem:[%s2468_s1 + $0x208] sm:$0xff]  }
  0x31   : > { %1836 = vmatprep.subr.bf16.mxu1 %v2045_v1 }
  0x32   : > { %1813 = vmatpush3.bf16.msra.mxu0 %v1981_v8  ;;  %v2008_v8 = vld [vmem:[%s2468_s1 + $0x130] sm:$0xff]  }
  0x33   : > { %1814 = vmatprep.subr.bf16.mxu0 %v2045_v1 }
  0x34   : > { %1837 = vmatpush3.bf16.msra.mxu1 %v1986_v7  ;;  %v2013_v7 = vld [vmem:[%s2468_s1 + $0x1c0] sm:$0xff]  }
  0x35   : > { %1838 = vmatprep.subr.bf16.mxu1 %v2045_v1 }
  0x36   : > { %1815 = vmatpush3.bf16.msra.mxu0 %v1983_v10  ;;  %v748_v10 = vrot.slane %v746_v3, 5  ;;  %v1659_v3 = vrot.slane %v1263_v63, 9 }
  0x37   : > { %1816 = vmatprep.subr.bf16.mxu0 %v2045_v1 }
  0x38   : > { %1839 = vmatpush3.bf16.msra.mxu1 %v1988_v9  ;;  %v744_v9 = vrot.slane %v743_v2, 4  ;;  %v2035_v2 = vld [vmem:[%s2468_s1 + $0x230] sm:$0xff]  }
  0x39   : > { %1840 = vmatprep.subr.bf16.mxu1 %v2045_v1 }
  0x3a   : > { %1817 = vmatpush3.bf16.msra.mxu0 %v1985_v12  ;;  %v762_v12 = vrot.slane %v760_v5, 5 }
  0x3b   : > { %1818 = vmatprep.subr.bf16.mxu0 %v2045_v1 }
  0x3c   : > { %1841 = vmatpush3.bf16.msra.mxu1 %v1990_v11  ;;  %v758_v11 = vrot.slane %v757_v4, 4 }
  0x3d   : > { %1842 = vmatprep.subr.bf16.mxu1 %v2045_v1 }
  0x3e   : > { %1819 = vmatpush3.bf16.msra.mxu0 %v1987_v14  ;;  %v2010_v14 = vld [vmem:[%s2468_s1 + $0x138] sm:$0xff]   ;;  %v763_v16 = vsel %vm2177_vm6, %v758_v11, %v762_v12 }
  0x3f   : > { %1820 = vmatprep.subr.bf16.mxu0 %v2045_v1 }
  0x40   : > { %1843 = vmatpush3.bf16.msra.mxu1 %v1992_v13  ;;  %v2015_v13 = vld [vmem:[%s2468_s1 + $0x1c8] sm:$0xff]  }
  0x41   : > { %1844 = vmatprep.subr.bf16.mxu1 %v2045_v1 }
  0x42   : > { %1821 = vmatpush3.bf16.msra.mxu0 %v1989_v15  ;;  %v749_v15 = vsel %vm2177_vm6, %v744_v9, %v748_v10 }
  0x43   : > { %1822 = vmatprep.subr.bf16.mxu0 %v2045_v1 }
  0x44   : > { %1845 = vmatpush3.bf16.msra.mxu1 %v1994_v17  ;;  %v1573_v17 = vcombine.low %v749_v15, %v763_v16 }
  0x45   : > { %1870 = vmatprep.subr.bf16.mxu1 %v2045_v1 }
  0x46   : > { %1823 = vmatpush3.bf16.msra.mxu0 %v1991_v20  ;;  %v1119_v20 = vld [vmem:[#allocation2 + $0x10] sm:$0xf] }
  0x47   : > { %1847 = vmatmul.mubr.bf16.vlgmr.msra.gmra.mrb[4].mxu1 %v1996_v21  ;;  %1824 = vmatprep.subr.bf16.mxu0 %v2045_v1  ;;  %v1121_v21 = vld [vmem:[#allocation2 + $0x18] sm:$0xf]  ;;  %v1127_v24 = vshll.u32 %v1119_v20, 16 }
  0x48   : > { %1871 = vmatpush3.bf16.msra.mxu1 %v1997_v23  ;;  %1886 = vmatprep.mubr.msk.bf16.mxu1 %vm2046_vm0, %v2045_v1  ;;  %v1124_v23 = vshrl.u32 %v1119_v20, 16  ;;  %v1138_v25 = vshrl.u32 %v1121_v21, 16 }
  0x49   : > { %1872 = vmatprep.subr.bf16.mxu1 %v2045_v1 }
  0x4a   : > { %1825 = vmatpush3.bf16.msra.mxu0 %v1993_v28  ;;  %v2014_v28 = vld [vmem:[%s2468_s1 + $0x188] sm:$0xff]   ;;  %v1126_v30 = vrot.slane %v1124_v23, 4 }
  0x4b   : > { %1850 = vmatprep.subr.bf16.mxu0 %v2045_v1 }
  0x4c   : > { %1873 = vmatpush3.bf16.msra.mxu1 %v1999_v27  ;;  %v1141_v27 = vshll.u32 %v1121_v21, 16 }
  0x4d   : > { %1874 = vmatprep.subr.bf16.mxu1 %v2045_v1  ;;  %1827 = vmatmul.mubr.bf16.vlgmr.msra.gmra.mrb[4].mxu0 %v1523_v31  ;;  %v1129_v31 = vrot.slane %v1127_v24, 5 }
  0x4e   : > { %1851 = vmatpush3.bf16.msra.mxu0 %v1995_v33  ;;  %1866 = vmatprep.mubr.msk.bf16.mxu0 %vm2046_vm0, %v2045_v1  ;;  %v1143_v33 = vrot.slane %v1141_v27, 5 }
  0x4f   : > { %1852 = vmatprep.subr.bf16.mxu0 %v2045_v1  ;;  %v1130_v38 = vor.u32 %v1129_v31, %v1126_v30 }
  0x50   : > { %1875 = vmatpush3.bf16.msra.mxu1 %v2001_v32  ;;  %v1140_v32 = vrot.slane %v1138_v25, 4 }
  0x51   : > { %1876 = vmatprep.subr.bf16.mxu1 %v2045_v1  ;;  %v1131_v44 = vrot.slane %v1130_v38, 4 }
  0x52   : > { %1853 = vmatpush3.bf16.msra.mxu0 %v1998_v35  ;;  %v2373_v35 = vld [vmem:[#allocation2 + $0x14] sm:$0x1] }
  0x53   : > { %1854 = vmatprep.subr.bf16.mxu0 %v2045_v1  ;;  %v1133_v39 = vshll.u32 %v2373_v35, 16  ;;  %v1271_v4 = vrot.slane %v2373_v35, 5 }
  0x54   : > { %1877 = vmatpush3.bf16.msra.mxu1 %v2003_v34  ;;  %v2016_v34 = vld [vmem:[%s2468_s1 + $0x190] sm:$0xff]  }
  0x55   : > { %1878 = vmatprep.subr.bf16.mxu1 %v2045_v1  ;;  %v1135_v45 = vrot.slane %v1133_v39, 5 }
  0x56   : > { %1855 = vmatpush3.bf16.msra.mxu0 %v2000_v36  ;;  %v2375_v36 = vld [vmem:[#allocation2 + $0x1c] sm:$0x1] }
  0x57   : > { %1856 = vmatprep.subr.bf16.mxu0 %v2045_v1 }
  0x58   : > { %1879 = vmatpush3.bf16.msra.mxu1 %v2005_v37  ;;  %v2023_v37 = vld [vmem:[%s2468_s1 + $0x1e8] sm:$0xff]  }
  0x59   : > { %1880 = vmatprep.subr.bf16.mxu1 %v2045_v1 }
  0x5a   : > { %1857 = vmatpush3.bf16.msra.mxu0 %v2002_v40  ;;  %v1144_v40 = vor.u32 %v1143_v33, %v1140_v32 }
  0x5b   : > { %1858 = vmatprep.subr.bf16.mxu0 %v2045_v1 }
  0x5c   : > { %1881 = vmatpush3.bf16.msra.mxu1 %v2007_v41  ;;  %v1147_v41 = vshll.u32 %v2375_v36, 16  ;;  %v1145_v46 = vrot.slane %v1144_v40, 4 }
  0x5d   : > { %1882 = vmatprep.subr.bf16.mxu1 %v2045_v1 }
  0x5e   : > { %1859 = vmatpush3.bf16.msra.mxu0 %v2004_v56  ;;  %v1149_v47 = vrot.slane %v1147_v41, 5  ;;  %v2028_v56 = vld [vmem:[#allocation2 + $0x10] ss:$8 sps:$4 sm:$0xff]  }
  0x5f   : > { %1860 = vmatprep.subr.bf16.mxu0 %v2045_v1 }
  0x60   : > { %1883 = vmatpush3.bf16.msra.mxu1 %v2009_v50  ;;  %v1136_v50 = vsel %vm2177_vm6, %v1131_v44, %v1135_v45  ;;  %v1150_v51 = vsel %vm2177_vm6, %v1145_v46, %v1149_v47 }
  0x61   : > { %1884 = vmatprep.subr.bf16.mxu1 %v2045_v1  ;;  %v1650_v53 = vcombine.low %v1136_v50, %v1150_v51 }
  0x62   : > { %1861 = vmatpush3.bf16.msra.mxu0 %v2006_v0  ;;  %v1264_v0 = vld [vmem:[#allocation2 + $0x18] sm:$0xe] }
  0x63   : > { %1862 = vmatprep.subr.bf16.mxu0 %v2045_v1  ;;  %v1660_v5 = vrot.slane %v1264_v0, 9 }
  0x64   : > { %1885 = vmatpush3.bf16.msra.mxu1 %v2011_v61  ;;  %v2033_v61 = vld [vmem:[%s2468_s1 + $0x220] sm:$0xff]  }
  0x65   : > { %1910 = vmatprep.subr.bf16.mxu1 %v2045_v1 }
  0x66   : > { %1863 = vmatpush3.bf16.msra.mxu0 %v2008_v8  ;;  %v1272_v8 = vsel %vm2254_vm9, %v1659_v3, %v1271_v4 }
  0x67   : > { %1887 = vmatmul.mubr.bf16.vlgmr.msra.gmra.mrb[8].mxu1 %v1600_v6  ;;  %1864 = vmatprep.subr.bf16.mxu0 %v2045_v1  ;;  %v1275_v6 = vrot.slane %v2375_v36, 5 }
  0x68   : > { %1911 = vmatpush3.bf16.msra.mxu1 %v2013_v7  ;;  %1926 = vmatprep.mubr.msk.bf16.mxu1 %vm2046_vm0, %v2045_v1  ;;  %v2036_v7 = vld [vmem:[%s2468_s1 + $0x238] sm:$0xff]  }
  0x69   : > { %1912 = vmatprep.subr.bf16.mxu1 %v2045_v1  ;;  %v1276_v9 = vsel %vm2254_vm9, %v1660_v5, %v1275_v6 }
  0x6a   : > { %1865 = vmatpush3.bf16.msra.mxu0 %v2010_v14  ;;  %v1677_v10 = vcombine.low %v1272_v8, %v1276_v9 }
  0x6b   : > { %1890 = vmatprep.subr.bf16.mxu0 %v2045_v1 }
  0x6c   : > { %1913 = vmatpush3.bf16.msra.mxu1 %v2015_v13 }
  0x6d   : > { %1914 = vmatprep.subr.bf16.mxu1 %v2045_v1  ;;  %1867 = vmatmul.mubr.bf16.vlgmr.msra.gmra.mrb[8].mxu0 %v1573_v17 }
  0x6e   : > { %1891 = vmatpush3.bf16.msra.mxu0 %v2012_v19  ;;  %1906 = vmatprep.mubr.msk.bf16.mxu0 %vm2046_vm0, %v2045_v1 }
  0x6f   : > { %1892 = vmatprep.subr.bf16.mxu0 %v2045_v1 }
  0x70   : > { %1915 = vmatpush3.bf16.msra.mxu1 %v2017_v18 }
  0x71   : > { %1916 = vmatprep.subr.bf16.mxu1 %v2045_v1 }
  0x72   : > { %1893 = vmatpush3.bf16.msra.mxu0 %v2014_v28 }
  0x73   : > { %1894 = vmatprep.subr.bf16.mxu0 %v2045_v1 }
  0x74   : > { %1917 = vmatpush3.bf16.msra.mxu1 %v2019_v22 }
  0x75   : > { %1918 = vmatprep.subr.bf16.mxu1 %v2045_v1 }
  0x76   : > { %1895 = vmatpush3.bf16.msra.mxu0 %v2016_v34 }
  0x77   : > { %1896 = vmatprep.subr.bf16.mxu0 %v2045_v1 }
  0x78   : > { %1919 = vmatpush3.bf16.msra.mxu1 %v2021_v29 }
  0x79   : > { %1920 = vmatprep.subr.bf16.mxu1 %v2045_v1 }
  0x7a   : > { %1897 = vmatpush3.bf16.msra.mxu0 %v2018_v42 }
  0x7b   : > { %1898 = vmatprep.subr.bf16.mxu0 %v2045_v1 }
  0x7c   : > { %1921 = vmatpush3.bf16.msra.mxu1 %v2023_v37 }
  0x7d   : > { %1922 = vmatprep.subr.bf16.mxu1 %v2045_v1 }
  0x7e   : > { %1899 = vmatpush3.bf16.msra.mxu0 %v2020_v48 }
  0x7f   : > { %1900 = vmatprep.subr.bf16.mxu0 %v2045_v1 }
  0x80   : > { %1923 = vmatpush3.bf16.msra.mxu1 %v2025_v43 }
  0x81   : > { %1924 = vmatprep.subr.bf16.mxu1 %v2045_v1 }
  0x82   : > { %1901 = vmatpush3.bf16.msra.mxu0 %v2022_v52 }
  0x83   : > { %1902 = vmatprep.subr.bf16.mxu0 %v2045_v1 }
  0x84   : > { %1925 = vmatpush3.bf16.msra.mxu1 %v2027_v49 }
  0x86   : > { %1903 = vmatpush3.bf16.msra.mxu0 %v2024_v54 }
  0x87   : > { %1927 = vmatmul.mubr.bf16.vlgmr.msra.gmra.mrb[12].mxu1 %v1650_v53  ;;  %1904 = vmatprep.subr.bf16.mxu0 %v2045_v1 }
  0x8a   : > { %1905 = vmatpush3.bf16.msra.mxu0 %v2026_v55 }
  0x8b   : > { %1930 = vmatprep.subr.bf16.mxu0 %v2045_v1 }
  0x8d   : > { %1907 = vmatmul.mubr.bf16.vlgmr.msra.gmra.mrb[12].mxu0 %v2028_v56 }
  0x8e   : > { %1931 = vmatpush3.bf16.msra.mxu0 %v2029_v57  ;;  %1946 = vmatprep.mubr.msk.bf16.mxu0 %vm2046_vm0, %v2045_v1  ;;  %v1686_v57 = vld [vmem:[%s2469_s2] ss:$0 sm:$0xff] }
  0x8f   : > { %1932 = vmatprep.subr.bf16.mxu0 %v2045_v1 }
  0x92   : > { %1933 = vmatpush3.bf16.msra.mxu0 %v2030_v58 }
  0x93   : > { %1934 = vmatprep.subr.bf16.mxu0 %v2045_v1 }
  0x96   : > { %1935 = vmatpush3.bf16.msra.mxu0 %v2031_v59 }
  0x97   : > { %1936 = vmatprep.subr.bf16.mxu0 %v2045_v1 }
  0x9a   : > { %1937 = vmatpush3.bf16.msra.mxu0 %v2032_v60 }
  0x9b   : > { %1938 = vmatprep.subr.bf16.mxu0 %v2045_v1 }
  0x9e   : > { %1939 = vmatpush3.bf16.msra.mxu0 %v2033_v61 }
  0x9f   : > { %1940 = vmatprep.subr.bf16.mxu0 %v2045_v1 }
  0xa2   : > { %1941 = vmatpush3.bf16.msra.mxu0 %v2034_v62 }
  0xa3   : > { %1942 = vmatprep.subr.bf16.mxu0 %v2045_v1 }
  0xa6   : > { %1943 = vmatpush3.bf16.msra.mxu0 %v2035_v2 }
  0xa7   : > { %1944 = vmatprep.subr.bf16.mxu0 %v2045_v1 }
  0xaa   : > { %1945 = vmatpush3.bf16.msra.mxu0 %v2036_v7 }
  0xad   : > { %1947 = vmatmul.mubr.bf16.vlgmr.msra.gmra.mrb[16].mxu0 %v1677_v10 }
  0xfa   : > { %v480_v11 = vpop.f32.mrb[0].mxu1 }
  0xfb   : > { %v1808_v12 = vpop.f32.mrb[1].mxu1 }
  0xfc   : > { %v483_v13 = vpop.f32.mrb[2].mxu1  ;;  %v1413_v12 = vld [vmem:[%s163_s16] sm:$0x1] }
  0xfd   : > { %v1809_v14 = vpop.f32.mrb[3].mxu1 }
 0x100   : > { %v385_v15 = vpop.f32.mrb[0].mxu0 }
 0x101   : > { %v481_v16 = vadd.f32 %v480_v11, %v385_v15  ;;  %v1788_v17 = vpop.f32.mrb[1].mxu0 }
 0x102   : > { %v388_v18 = vpop.f32.mrb[2].mxu0 }
 0x103   : > { %v484_v19 = vadd.f32 %v483_v13, %v388_v18  ;;  %v1789_v20 = vpop.f32.mrb[3].mxu0 }
 0x11a   : > { %v723_v21 = vpop.f32.mrb[4].mxu1 }
 0x11b   : > { %v1848_v22 = vpop.f32.mrb[5].mxu1 }
 0x11c   : > { %v726_v23 = vpop.f32.mrb[6].mxu1 }
 0x11d   : > { %v1849_v26 = vpop.f32.mrb[7].mxu1 }
 0x120   : > { %v607_v24 = vpop.f32.mrb[4].mxu0 }
 0x121   : > { %v614_v25 = vadd.f32 %v607_v24, %v481_v16  ;;  %v1828_v1 = vpop.f32.mrb[5].mxu0 }
 0x122   : > { %v610_v27 = vpop.f32.mrb[6].mxu0 }
 0x123   : > { %v615_v28 = vadd.f32 %v610_v27, %v484_v19  ;;  %v730_v29 = vadd.f32 %v723_v21, %v614_v25  ;;  %v1829_v30 = vpop.f32.mrb[7].mxu0 }
 0x125   : > { %v731_v31 = vadd.f32 %v726_v23, %v615_v28 }
 0x13a   : > { %v993_v32 = vpop.f32.mrb[8].mxu1 }
 0x13b   : > { %v1888_v33 = vpop.f32.mrb[9].mxu1 }
 0x13c   : > { %v996_v34 = vpop.f32.mrb[10].mxu1 }
 0x13d   : > { %v1889_v35 = vpop.f32.mrb[11].mxu1 }
 0x140   : > { %v867_v36 = vpop.f32.mrb[8].mxu0 }
 0x141   : > { %v874_v37 = vadd.f32 %v867_v36, %v730_v29  ;;  %v1868_v38 = vpop.f32.mrb[9].mxu0 }
 0x142   : > { %v870_v39 = vpop.f32.mrb[10].mxu0 }
 0x143   : > { %v875_v40 = vadd.f32 %v870_v39, %v731_v31  ;;  %v1000_v41 = vadd.f32 %v993_v32, %v874_v37  ;;  %v1869_v42 = vpop.f32.mrb[11].mxu0 }
 0x145   : > { %v1001_v43 = vadd.f32 %v996_v34, %v875_v40 }
 0x15a   : > { %v1254_v44 = vpop.f32.mrb[12].mxu1 }
 0x15b   : > { %v1928_v45 = vpop.f32.mrb[13].mxu1 }
 0x15c   : > { %v1257_v46 = vpop.f32.mrb[14].mxu1 }
 0x15d   : > { %v1929_v47 = vpop.f32.mrb[15].mxu1 }
 0x160   : > { %v1110_v48 = vpop.f32.mrb[12].mxu0 }
 0x161   : > { %v1117_v49 = vadd.f32 %v1110_v48, %v1000_v41  ;;  %v1908_v50 = vpop.f32.mrb[13].mxu0 }
 0x162   : > { %v1113_v51 = vpop.f32.mrb[14].mxu0 }
 0x163   : > { %v1118_v52 = vadd.f32 %v1113_v51, %v1001_v43  ;;  %v1261_v53 = vadd.f32 %v1254_v44, %v1117_v49  ;;  %v1909_v54 = vpop.f32.mrb[15].mxu0 }
 0x165   : > { %v1262_v55 = vadd.f32 %v1257_v46, %v1118_v52 }
 0x180   : > { %v1380_v56 = vpop.f32.mrb[16].mxu0 }
 0x181   : > { %v1387_v58 = vadd.f32 %v1380_v56, %v1261_v53  ;;  %v1948_v59 = vpop.f32.mrb[17].mxu0 }
 0x182   : > { %v1383_v60 = vpop.f32.mrb[18].mxu0 }
 0x183   : > { %v1396_v61 = vadd.f32 %v1686_v57, %v1387_v58  ;;  %v1388_v62 = vadd.f32 %v1383_v60, %v1262_v55  ;;  %v1949_v63 = vpop.f32.mrb[19].mxu0 }
 0x185   : > { %v1397_v0 = vadd.f32 %v1686_v57, %v1388_v62  ;;  %v1398_v2 = vmax.f32 %v1396_v61, 0.0 }
 0x187   : > { %v1399_v3 = vmax.f32 %v1397_v0, 0.0 }
 0x189   : > { %v1400_v4 = vmax.f32 %v1398_v2, %v1399_v3 }
 0x18b   : > { %v1402_v5 = vsel %vm222_vm1, %v1400_v4, -inf }
 0x18c   : > { %v1403_v6 = vrot.slane %v1402_v5, 4 }
 0x18e   : > { %v1404_v7 = vmax.f32 %v1402_v5, %v1403_v6 }
 0x190   : > { %v1405_v8 = vrot.slane %v1404_v7, 2 }
 0x192   : > { %v1406_v9 = vmax.f32 %v1404_v7, %v1405_v8 }
 0x194   : > { %v1407_v10 = vrot.slane %v1406_v9, 1 }
 0x196   : > { %v1408_v11 = vmax.f32 %v1406_v9, %v1407_v10 }
 0x198   : > { %v1409_v13 = vpack.c.bf16 %v1408_v11, %v1408_v11 }
 0x19a   : > { %v1414_v14 = vsel %vm1412_vm12, %v1409_v13, %v1413_v12 }
 0x19b   : > { %1415 = vst [vmem:[%s163_s16] sm:$0x1] %v1414_v14 }
 0x19c PF: > { %s13_s12 = sadd.s32 1, %s2043_s12  }
 0x19d   : > { %p10_p4 = scmp.ge.s32.totalorder %s13_s12, 4  }
 0x19f   :  { %12 = sbr.rel (!%p10_p4) target bundleno = 1 (0x1), region = 72 }

// kernel: reinforce_forward.11
= control target key start
LH: loop header
LB: loop body
LE: loop exit
PB: predicated region body
PF: predicated region fallthrough
CT: control target
= control target key end

     0   :  { %s1869_s12 = smov 0   ;;  %s2209_s0 = inlined_call_operand.vmem [shape: bf16[2,1,1,128], index: 0, kind: input, shape index: {}]   ;;  %s2210_s1 = inlined_call_operand.vmem [shape: bf16[9,128,128], index: 1, kind: input, shape index: {}]   ;;  %s2211_s2 = inlined_call_operand.vmem [shape: f32[1,128], index: 2, kind: input, shape index: {}]   ;;  %s2212_s3 = inlined_call_operand.vmem [shape: bf16[2,1,1,128], index: 3, kind: output, shape index: {}]  }
   0x1 LB: > { %s1271_s13 = sadd.s32 4294967295, %s1843_s12   ;;  %p1275_p0 = scmp.ge.s32.totalorder %s1843_s12, 1  ;;  %s1843_s12 = sphi %s1869_s12, %s13_s12  }
   0x2   : > { %p135_p1 = scmp.lt.s32.totalorder %s1843_s12, 3 }
   0x4   : > { %p136_p2 = pnand %p1275_p0, %p135_p1 }
   0x5   : > { %v1759_v0 = vld [vmem:[%s2210_s1 + $0x40] sm:$0xff] (!%p136_p2)   ;;  %v1845_v1 = vmov (!%p136_p2), 0.0   ;;  %v1761_v3 = vld [vmem:[%s2210_s1 + $0x48] sm:$0xff] (!%p136_p2)   ;;  %vm1846_vm0 = vmmov (!%p136_p2), 0   ;;  %v1847_v5 = vmov (!%p136_p2), 0   ;;  %v1763_v6 = vld [vmem:[%s2210_s1 + $0x50] sm:$0xff] (!%p136_p2)   ;;  %v180_v27 = vlaneseq (!%p136_p2) }
   0x6   : > { %139 = sbr.rel (%p136_p2) target bundleno = 388 (0x184), region = 32  ;;  %1567 = vmatprep.subr.bf16.mxu0 (!%p136_p2), %v1845_v1  ;;  %1587 = vmatprep.subr.bf16.mxu1 (!%p136_p2), %v1845_v1  ;;  %v1760_v2 = vld [vmem:[%s2210_s1] sm:$0xff] (!%p136_p2)   ;;  %v1762_v4 = vld [vmem:[%s2210_s1 + $0x8] sm:$0xff] (!%p136_p2)   ;;  %162 = vst [vmem:[#allocation2] sm:$0xf] (!%p136_p2), %v1847_v5  ;;  %v1764_v7 = vld [vmem:[%s2210_s1 + $0x10] sm:$0xff] (!%p136_p2)  }
   0x7   : > { %1568 = vmatpush3.bf16.msra.mxu0 (!%p136_p2), %v1759_v0  ;;  %1583 = vmatprep.mubr.msk.bf16.mxu0 (!%p136_p2), %vm1846_vm0, %v1845_v1  ;;  %163 = vst [vmem:[#allocation2 + $0x4] sm:$0x1] (!%p136_p2), %v1847_v5  ;;  %164 = vst [vmem:[#allocation2 + $0x8] sm:$0xf] (!%p136_p2), %v1847_v5  ;;  %v1765_v8 = vld [vmem:[%s2210_s1 + $0x58] sm:$0xff] (!%p136_p2)   ;;  %v1767_v10 = vld [vmem:[%s2210_s1 + $0x60] sm:$0xff] (!%p136_p2)  }
   0x8   : > { %1588 = vmatpush3.bf16.msra.mxu1 (!%p136_p2), %v1760_v2  ;;  %1569 = vmatprep.subr.bf16.mxu0 (!%p136_p2), %v1845_v1  ;;  %165 = vst [vmem:[#allocation2 + $0xc] sm:$0x1] (!%p136_p2), %v1847_v5  ;;  %166 = vst [vmem:[#allocation2 + $0x10] sm:$0xf] (!%p136_p2), %v1847_v5  ;;  %v1766_v9 = vld [vmem:[%s2210_s1 + $0x18] sm:$0xff] (!%p136_p2)   ;;  %v1768_v11 = vld [vmem:[%s2210_s1 + $0x20] sm:$0xff] (!%p136_p2)  }
   0x9   : > { %167 = vst [vmem:[#allocation2 + $0x14] sm:$0x1] (!%p136_p2), %v1847_v5  ;;  %1589 = vmatprep.subr.bf16.mxu1 (!%p136_p2), %v1845_v1  ;;  %1603 = vmatprep.mubr.msk.bf16.mxu1 (!%p136_p2), %vm1846_vm0, %v1845_v1  ;;  %v1769_v15 = vld [vmem:[%s2210_s1 + $0x68] sm:$0xff] (!%p136_p2)   ;;  %v1771_v18 = vld [vmem:[%s2210_s1 + $0x70] sm:$0xff] (!%p136_p2)   ;;  %p155_p3 = scmp.lt.s32.totalorder (!%p136_p2), %s1271_s13, 1  ;;  %v1773_v22 = vld [vmem:[%s2210_s1 + $0x78] sm:$0xff] (!%p136_p2)  }
   0xa   : > { %v1770_v16 = vld [vmem:[%s2210_s1 + $0x28] sm:$0xff] (!%p136_p2)   ;;  %v1772_v19 = vld [vmem:[%s2210_s1 + $0x30] sm:$0xff] (!%p136_p2)   ;;  %v1774_v23 = vld [vmem:[%s2210_s1 + $0x38] sm:$0xff] (!%p136_p2)   ;;  %v1848_v30 = vmov (!%p136_p2), 1935823168   ;;  %v181_v32 = vshrl.u32 (!%p136_p2), %v180_v27, 7 }
   0xb   : > { %1570 = vmatpush3.bf16.msra.mxu0 (!%p136_p2), %v1761_v3  ;;  %v1776_v25 = vld [vmem:[%s2210_s1 + $0x80] sm:$0xff] (!%p136_p2)   ;;  %v1778_v28 = vld [vmem:[%s2210_s1 + $0x88] sm:$0xff] (!%p136_p2)   ;;  %v178_v31 = vunpack.c.l.s4 (!%p136_p2), %v1848_v30  ;;  %v1780_v34 = vld [vmem:[%s2210_s1 + $0x90] sm:$0xff] (!%p136_p2)   ;;  %vm189_vm1 = vcmask (!%p136_p2), 1040384   ;;  %vm190_vm2 = vsmask.f32 (!%p136_p2), 7938 }
   0xc   : > { %1590 = vmatpush3.bf16.msra.mxu1 (!%p136_p2), %v1762_v4  ;;  %1571 = vmatprep.subr.bf16.mxu0 (!%p136_p2), %v1845_v1  ;;  %v1777_v26 = vld [vmem:[%s2210_s1 + $0xc0] sm:$0xff] (!%p136_p2)   ;;  %v1779_v29 = vld [vmem:[%s2210_s1 + $0xc8] sm:$0xff] (!%p136_p2)   ;;  %v1781_v36 = vld [vmem:[%s2210_s1 + $0xd0] sm:$0xff] (!%p136_p2)   ;;  %vm1222_vm4 = vsmask.f32 (!%p136_p2), 256 }
   0xd   : > { %1591 = vmatprep.subr.bf16.mxu1 %v1845_v1  ;;  %v195_v12 = vld [vmem:[#allocation2] sm:$0xf]  ;;  %s2214_s13 = smov (!%p155_p3, %s1271_s13), 1  ;;  %v179_v35 = vunpack.c.0.s8 %v178_v31  ;;  %v1782_v38 = vld [vmem:[%s2210_s1 + $0x98] sm:$0xff]   ;;  %vm191_vm3 = vmand %vm189_vm1, %vm190_vm2 }
   0xe   : > { %v1921_v13 = vld [vmem:[#allocation2 + $0x4] sm:$0x1]  ;;  %s157_s27 = scalar_lea.vmem %s2209_s0, %s2214_s13  ;;  %v192_v40 = vld [vmem:[#allocation2 + $0x8] sm:$0x1]  ;;  %v1783_v41 = vld [vmem:[%s2210_s1 + $0xd8] sm:$0xff]   ;;  %s160_s15 = scalar_lea.vmem %s2212_s3, %s2214_s13 }
   0xf   : > { %1572 = vmatpush3.bf16.msra.mxu0 %v1763_v6  ;;  %v1293_v14 = vcombine.low %v195_v12, %v1921_v13  ;;  %v1276_v33 = vld.sshfl [vmem:[%s157_s27] sm:$0x1 pattern:$0x73625140]  ;;  %v182_v37 = vsub.s32 %v179_v35, %v181_v32  ;;  %v1786_v46 = vld [vmem:[%s2210_s1 + $0xa8] sm:$0xff]   ;;  %v1788_v48 = vld [vmem:[%s2210_s1 + $0xb0] sm:$0xff]  }
  0x10   : > { %1592 = vmatpush3.bf16.msra.mxu1 %v1764_v7  ;;  %1573 = vmatprep.subr.bf16.mxu0 %v1845_v1  ;;  %v1784_v44 = vld [vmem:[%s2210_s1 + $0xa0] sm:$0xff]   ;;  %v1787_v47 = vld [vmem:[%s2210_s1 + $0xe8] sm:$0xff]   ;;  %v1789_v50 = vld [vmem:[%s2210_s1 + $0xf0] sm:$0xff]  }
  0x11   : > { %1593 = vmatprep.subr.bf16.mxu1 %v1845_v1  ;;  %v238_v17 = vshll.u32 %v1293_v14, 16  ;;  %v236_v20 = vshrl.u32 %v1293_v14, 16  ;;  %v183_v39 = vrot.slane %v1276_v33, %v182_v37  ;;  %v1785_v45 = vld [vmem:[%s2210_s1 + $0xe0] sm:$0xff]   ;;  %v1790_v52 = vld [vmem:[%s2210_s1 + $0xb8] sm:$0xff]   ;;  %v1795_v58 = vld [vmem:[%s2210_s1 + $0x108] sm:$0xff]  }
  0x12   : > { %v419_v49 = vld [vmem:[#allocation2] sm:$0xe]  ;;  %v1791_v53 = vld [vmem:[%s2210_s1 + $0xf8] sm:$0xff]   ;;  %v1796_v59 = vld [vmem:[%s2210_s1 + $0x148] sm:$0xff]  }
  0x13   : > { %1574 = vmatpush3.bf16.msra.mxu0 %v1765_v8  ;;  %v240_v21 = vrot.slane %v238_v17, 1  ;;  %v185_v42 = vshll.u32 %v183_v39, 16  ;;  %v1326_v51 = vcombine.low %v419_v49, %v1921_v13  ;;  %v1793_v55 = vld [vmem:[%s2210_s1 + $0x100] sm:$0xff]   ;;  %v1797_v60 = vld [vmem:[%s2210_s1 + $0x110] sm:$0xff]   ;;  %v1799_v62 = vld [vmem:[%s2210_s1 + $0x118] sm:$0xff]  }
  0x14   : > { %1594 = vmatpush3.bf16.msra.mxu1 %v1766_v9  ;;  %1575 = vmatprep.subr.bf16.mxu0 %v1845_v1  ;;  %v1794_v56 = vld [vmem:[%s2210_s1 + $0x140] sm:$0xff]   ;;  %v1798_v61 = vld [vmem:[%s2210_s1 + $0x150] sm:$0xff]   ;;  %v1800_v63 = vld [vmem:[%s2210_s1 + $0x158] sm:$0xff]  }
  0x15   : > { %1595 = vmatprep.subr.bf16.mxu1 %v1845_v1  ;;  %v241_v24 = vor.u32 %v240_v21, %v236_v20  ;;  %v193_v43 = vsel %vm191_vm3, %v185_v42, %v192_v40  ;;  %v440_v54 = vrot.slane %v1326_v51, 1  ;;  %v1801_v0 = vld [vmem:[%s2210_s1 + $0x120] sm:$0xff]   ;;  %v639_v3 = vld [vmem:[#allocation2 + $0xc] sm:$0x1]  ;;  %v1805_v9 = vld [vmem:[%s2210_s1 + $0x130] sm:$0xff]  }
  0x16   : > { %194 = vst [vmem:[#allocation2 + $0x8] sm:$0x1] %v193_v43  ;;  %v1802_v4 = vld [vmem:[%s2210_s1 + $0x160] sm:$0xff]   ;;  %v1803_v6 = vld [vmem:[%s2210_s1 + $0x128] sm:$0xff]   ;;  %v1807_v14 = vld [vmem:[%s2210_s1 + $0x138] sm:$0xff]  }
  0x17   : > { %1576 = vmatpush3.bf16.msra.mxu0 %v1767_v10  ;;  %v1804_v7 = vld [vmem:[%s2210_s1 + $0x168] sm:$0xff]   ;;  %v1806_v10 = vld [vmem:[%s2210_s1 + $0x170] sm:$0xff]   ;;  %v1812_v20 = vld [vmem:[%s2210_s1 + $0x1c0] sm:$0xff]  }
  0x18   : > { %1596 = vmatpush3.bf16.msra.mxu1 %v1768_v11  ;;  %1577 = vmatprep.subr.bf16.mxu0 %v1845_v1  ;;  %v759_v11 = vld [vmem:[#allocation2 + $0x8] sm:$0xe]  ;;  %v1819_v27 = vld [vmem:[%s2210_s1 + $0x1a0] sm:$0xff]   ;;  %v980_v30 = vld [vmem:[#allocation2 + $0x14] sm:$0x1] }
  0x19   : > { %1597 = vmatprep.subr.bf16.mxu1 %v1845_v1  ;;  %v1813_v21 = vld [vmem:[%s2210_s1 + $0x188] sm:$0xff]   ;;  %v1825_v37 = vld [vmem:[%s2210_s1 + $0x1b8] sm:$0xff]   ;;  %v1827_v42 = vld [vmem:[%s2210_s1 + $0x200] sm:$0xff]  }
  0x1a   : > { %v1821_v31 = vld [vmem:[%s2210_s1 + $0x1a8] sm:$0xff]   ;;  %v1826_v40 = vld [vmem:[%s2210_s1 + $0x1f8] sm:$0xff]   ;;  %v1834_v49 = vld [vmem:[%s2210_s1 + $0x230] sm:$0xff]  }
  0x1b   : > { %1578 = vmatpush3.bf16.msra.mxu0 %v1769_v15  ;;  %v1400_v15 = vcombine.low %v759_v11, %v639_v3  ;;  %v1822_v33 = vld [vmem:[%s2210_s1 + $0x1e8] sm:$0xff]   ;;  %vm1223_vm5 = vmand %vm189_vm1, %vm1222_vm4 }
  0x1c   : > { %1598 = vmatpush3.bf16.msra.mxu1 %v1770_v16  ;;  %1579 = vmatprep.subr.bf16.mxu0 %v1845_v1  ;;  %v1808_v16 = vld [vmem:[%s2210_s1 + $0x178] sm:$0xff]  }
  0x1d   : > { %1599 = vmatprep.subr.bf16.mxu1 %v1845_v1  ;;  %v531_v57 = vld [vmem:[#allocation2 + $0x8] sm:$0xf] }
  0x1e   : > { %v638_v2 = vld [vmem:[#allocation2 + $0x8] sm:$0xf] }
  0x1f   : > { %1580 = vmatpush3.bf16.msra.mxu0 %v1771_v18  ;;  %v1375_v5 = vcombine.low %v638_v2, %v639_v3  ;;  %v1810_v18 = vld [vmem:[%s2210_s1 + $0x180] sm:$0xff]  }
  0x20   : > { %1600 = vmatpush3.bf16.msra.mxu1 %v1772_v19  ;;  %1581 = vmatprep.subr.bf16.mxu0 %v1845_v1  ;;  %v780_v19 = vrot.slane %v1400_v15, 1 }
  0x21   : > { %1601 = vmatprep.subr.bf16.mxu1 %v1845_v1  ;;  %v665_v8 = vshll.u32 %v1375_v5, 16 }
  0x23   : > { %1582 = vmatpush3.bf16.msra.mxu0 %v1773_v22  ;;  %v667_v13 = vrot.slane %v665_v8, 1  ;;  %v1814_v22 = vld [vmem:[%s2210_s1 + $0x1c8] sm:$0xff]  }
  0x24   : > { %1602 = vmatpush3.bf16.msra.mxu1 %v1774_v23  ;;  %1607 = vmatprep.subr.bf16.mxu0 %v1845_v1  ;;  %v1815_v23 = vld [vmem:[%s2210_s1 + $0x190] sm:$0xff]  }
  0x25   : > { %1627 = vmatprep.subr.bf16.mxu1 %v1845_v1 }
  0x26   : > { %1584 = vmatmul.mubr.bf16.vlgmr.msra.gmra.mrb[0].mxu0 %v241_v24  ;;  %v1816_v24 = vld [vmem:[%s2210_s1 + $0x1d0] sm:$0xff]  }
  0x27   : > { %1604 = vmatmul.mubr.bf16.vlgmr.msra.gmra.mrb[0].mxu1 %v195_v12  ;;  %1608 = vmatpush3.bf16.msra.mxu0 %v1776_v25  ;;  %v663_v12 = vshrl.u32 %v1375_v5, 16  ;;  %v1817_v25 = vld [vmem:[%s2210_s1 + $0x198] sm:$0xff]  }
  0x28   : > { %1628 = vmatpush3.bf16.msra.mxu1 %v1777_v26  ;;  %1609 = vmatprep.subr.bf16.mxu0 %v1845_v1  ;;  %v1818_v26 = vld [vmem:[%s2210_s1 + $0x1d8] sm:$0xff]  }
  0x29   : > { %1629 = vmatprep.subr.bf16.mxu1 %v1845_v1  ;;  %1623 = vmatprep.mubr.msk.bf16.mxu0 %vm1846_vm0, %v1845_v1  ;;  %v668_v17 = vor.u32 %v667_v13, %v663_v12 }
  0x2a   : > { %1643 = vmatprep.mubr.msk.bf16.mxu1 %vm1846_vm0, %v1845_v1 }
  0x2b   : > { %1610 = vmatpush3.bf16.msra.mxu0 %v1778_v28  ;;  %v1820_v28 = vld [vmem:[%s2210_s1 + $0x1e0] sm:$0xff]  }
  0x2c   : > { %1630 = vmatpush3.bf16.msra.mxu1 %v1779_v29  ;;  %1611 = vmatprep.subr.bf16.mxu0 %v1845_v1  ;;  %v979_v29 = vld [vmem:[#allocation2 + $0x10] sm:$0xf] }
  0x2d   : > { %1631 = vmatprep.subr.bf16.mxu1 %v1845_v1  ;;  %v1449_v32 = vcombine.low %v979_v29, %v980_v30 }
  0x2f   : > { %1612 = vmatpush3.bf16.msra.mxu0 %v1780_v34  ;;  %v1823_v34 = vld [vmem:[%s2210_s1 + $0x1b0] sm:$0xff]   ;;  %v1006_v35 = vshll.u32 %v1449_v32, 16 }
  0x30   : > { %1632 = vmatpush3.bf16.msra.mxu1 %v1781_v36  ;;  %1613 = vmatprep.subr.bf16.mxu0 %v1845_v1  ;;  %v1824_v36 = vld [vmem:[%s2210_s1 + $0x1f0] sm:$0xff]  }
  0x31   : > { %1633 = vmatprep.subr.bf16.mxu1 %v1845_v1  ;;  %v1008_v39 = vrot.slane %v1006_v35, 1 }
  0x33   : > { %1614 = vmatpush3.bf16.msra.mxu0 %v1782_v38  ;;  %v1004_v38 = vshrl.u32 %v1449_v32, 16 }
  0x34   : > { %1634 = vmatpush3.bf16.msra.mxu1 %v1783_v41  ;;  %1615 = vmatprep.subr.bf16.mxu0 %v1845_v1  ;;  %v872_v41 = vld [vmem:[#allocation2 + $0x10] sm:$0xf] }
  0x35   : > { %1635 = vmatprep.subr.bf16.mxu1 %v1845_v1  ;;  %v1009_v43 = vor.u32 %v1008_v39, %v1004_v38 }
  0x37   : > { %1616 = vmatpush3.bf16.msra.mxu0 %v1784_v44  ;;  %v1829_v44 = vld [vmem:[%s2210_s1 + $0x208] sm:$0xff]  }
  0x38   : > { %1636 = vmatpush3.bf16.msra.mxu1 %v1785_v45  ;;  %1617 = vmatprep.subr.bf16.mxu0 %v1845_v1  ;;  %v1830_v45 = vld [vmem:[%s2210_s1 + $0x210] sm:$0xff]  }
  0x39   : > { %1637 = vmatprep.subr.bf16.mxu1 %v1845_v1 }
  0x3b   : > { %1618 = vmatpush3.bf16.msra.mxu0 %v1786_v46  ;;  %v1831_v46 = vld [vmem:[%s2210_s1 + $0x218] sm:$0xff]  }
  0x3c   : > { %1638 = vmatpush3.bf16.msra.mxu1 %v1787_v47  ;;  %1619 = vmatprep.subr.bf16.mxu0 %v1845_v1  ;;  %v1832_v47 = vld [vmem:[%s2210_s1 + $0x220] sm:$0xff]  }
  0x3d   : > { %1639 = vmatprep.subr.bf16.mxu1 %v1845_v1 }
  0x3f   : > { %1620 = vmatpush3.bf16.msra.mxu0 %v1788_v48  ;;  %v1833_v48 = vld [vmem:[%s2210_s1 + $0x228] sm:$0xff]  }
  0x40   : > { %1640 = vmatpush3.bf16.msra.mxu1 %v1789_v50  ;;  %1621 = vmatprep.subr.bf16.mxu0 %v1845_v1  ;;  %v1100_v50 = vld [vmem:[#allocation2 + $0x10] sm:$0xe] }
  0x41   : > { %1641 = vmatprep.subr.bf16.mxu1 %v1845_v1  ;;  %v1474_v51 = vcombine.low %v1100_v50, %v980_v30  ;;  %v1483_v30 = vld [vmem:[%s2211_s2] ss:$0 sm:$0xff] }
  0x43   : > { %1622 = vmatpush3.bf16.msra.mxu0 %v1790_v52  ;;  %v1835_v52 = vld [vmem:[%s2210_s1 + $0x238] sm:$0xff]  }
  0x44   : > { %1642 = vmatpush3.bf16.msra.mxu1 %v1791_v53  ;;  %1647 = vmatprep.subr.bf16.mxu0 %v1845_v1  ;;  %v1121_v53 = vrot.slane %v1474_v51, 1 }
  0x45   : > { %1667 = vmatprep.subr.bf16.mxu1 %v1845_v1 }
  0x46   : > { %1624 = vmatmul.mubr.bf16.vlgmr.msra.gmra.mrb[4].mxu0 %v440_v54 }
  0x47   : > { %1648 = vmatpush3.bf16.msra.mxu0 %v1793_v55  ;;  %1644 = vmatmul.mubr.bf16.vlgmr.msra.gmra.mrb[4].mxu1 %v531_v57 }
  0x48   : > { %1668 = vmatpush3.bf16.msra.mxu1 %v1794_v56  ;;  %1649 = vmatprep.subr.bf16.mxu0 %v1845_v1 }
  0x49   : > { %1669 = vmatprep.subr.bf16.mxu1 %v1845_v1  ;;  %1663 = vmatprep.mubr.msk.bf16.mxu0 %vm1846_vm0, %v1845_v1 }
  0x4a   : > { %1683 = vmatprep.mubr.msk.bf16.mxu1 %vm1846_vm0, %v1845_v1 }
  0x4b   : > { %1650 = vmatpush3.bf16.msra.mxu0 %v1795_v58 }
  0x4c   : > { %1670 = vmatpush3.bf16.msra.mxu1 %v1796_v59  ;;  %1651 = vmatprep.subr.bf16.mxu0 %v1845_v1 }
  0x4d   : > { %1671 = vmatprep.subr.bf16.mxu1 %v1845_v1 }
  0x4f   : > { %1652 = vmatpush3.bf16.msra.mxu0 %v1797_v60 }
  0x50   : > { %1672 = vmatpush3.bf16.msra.mxu1 %v1798_v61  ;;  %1653 = vmatprep.subr.bf16.mxu0 %v1845_v1 }
  0x51   : > { %1673 = vmatprep.subr.bf16.mxu1 %v1845_v1 }
  0x53   : > { %1654 = vmatpush3.bf16.msra.mxu0 %v1799_v62 }
  0x54   : > { %1674 = vmatpush3.bf16.msra.mxu1 %v1800_v63  ;;  %1655 = vmatprep.subr.bf16.mxu0 %v1845_v1 }
  0x55   : > { %1675 = vmatprep.subr.bf16.mxu1 %v1845_v1 }
  0x57   : > { %1656 = vmatpush3.bf16.msra.mxu0 %v1801_v0 }
  0x58   : > { %1676 = vmatpush3.bf16.msra.mxu1 %v1802_v4  ;;  %1657 = vmatprep.subr.bf16.mxu0 %v1845_v1 }
  0x59   : > { %1677 = vmatprep.subr.bf16.mxu1 %v1845_v1 }
  0x5b   : > { %1658 = vmatpush3.bf16.msra.mxu0 %v1803_v6 }
  0x5c   : > { %1678 = vmatpush3.bf16.msra.mxu1 %v1804_v7  ;;  %1659 = vmatprep.subr.bf16.mxu0 %v1845_v1 }
  0x5d   : > { %1679 = vmatprep.subr.bf16.mxu1 %v1845_v1 }
  0x5f   : > { %1660 = vmatpush3.bf16.msra.mxu0 %v1805_v9 }
  0x60   : > { %1680 = vmatpush3.bf16.msra.mxu1 %v1806_v10  ;;  %1661 = vmatprep.subr.bf16.mxu0 %v1845_v1 }
  0x61   : > { %1681 = vmatprep.subr.bf16.mxu1 %v1845_v1 }
  0x63   : > { %1662 = vmatpush3.bf16.msra.mxu0 %v1807_v14 }
  0x64   : > { %1682 = vmatpush3.bf16.msra.mxu1 %v1808_v16  ;;  %1687 = vmatprep.subr.bf16.mxu0 %v1845_v1 }
  0x65   : > { %1707 = vmatprep.subr.bf16.mxu1 %v1845_v1 }
  0x66   : > { %1664 = vmatmul.mubr.bf16.vlgmr.msra.gmra.mrb[8].mxu0 %v668_v17 }
  0x67   : > { %1688 = vmatpush3.bf16.msra.mxu0 %v1810_v18  ;;  %1684 = vmatmul.mubr.bf16.vlgmr.msra.gmra.mrb[8].mxu1 %v780_v19 }
  0x68   : > { %1708 = vmatpush3.bf16.msra.mxu1 %v1812_v20  ;;  %1689 = vmatprep.subr.bf16.mxu0 %v1845_v1 }
  0x69   : > { %1709 = vmatprep.subr.bf16.mxu1 %v1845_v1  ;;  %1703 = vmatprep.mubr.msk.bf16.mxu0 %vm1846_vm0, %v1845_v1 }
  0x6a   : > { %1723 = vmatprep.mubr.msk.bf16.mxu1 %vm1846_vm0, %v1845_v1 }
  0x6b   : > { %1690 = vmatpush3.bf16.msra.mxu0 %v1813_v21 }
  0x6c   : > { %1710 = vmatpush3.bf16.msra.mxu1 %v1814_v22  ;;  %1691 = vmatprep.subr.bf16.mxu0 %v1845_v1 }
  0x6d   : > { %1711 = vmatprep.subr.bf16.mxu1 %v1845_v1 }
  0x6f   : > { %1692 = vmatpush3.bf16.msra.mxu0 %v1815_v23 }
  0x70   : > { %1712 = vmatpush3.bf16.msra.mxu1 %v1816_v24  ;;  %1693 = vmatprep.subr.bf16.mxu0 %v1845_v1 }
  0x71   : > { %1713 = vmatprep.subr.bf16.mxu1 %v1845_v1 }
  0x73   : > { %1694 = vmatpush3.bf16.msra.mxu0 %v1817_v25 }
  0x74   : > { %1714 = vmatpush3.bf16.msra.mxu1 %v1818_v26  ;;  %1695 = vmatprep.subr.bf16.mxu0 %v1845_v1 }
  0x75   : > { %1715 = vmatprep.subr.bf16.mxu1 %v1845_v1 }
  0x77   : > { %1696 = vmatpush3.bf16.msra.mxu0 %v1819_v27 }
  0x78   : > { %1716 = vmatpush3.bf16.msra.mxu1 %v1820_v28  ;;  %1697 = vmatprep.subr.bf16.mxu0 %v1845_v1 }
  0x79   : > { %1717 = vmatprep.subr.bf16.mxu1 %v1845_v1 }
  0x7b   : > { %1698 = vmatpush3.bf16.msra.mxu0 %v1821_v31 }
  0x7c   : > { %1718 = vmatpush3.bf16.msra.mxu1 %v1822_v33  ;;  %1699 = vmatprep.subr.bf16.mxu0 %v1845_v1 }
  0x7d   : > { %1719 = vmatprep.subr.bf16.mxu1 %v1845_v1 }
  0x7f   : > { %1700 = vmatpush3.bf16.msra.mxu0 %v1823_v34 }
  0x80   : > { %1720 = vmatpush3.bf16.msra.mxu1 %v1824_v36  ;;  %1701 = vmatprep.subr.bf16.mxu0 %v1845_v1 }
  0x81   : > { %1721 = vmatprep.subr.bf16.mxu1 %v1845_v1 }
  0x83   : > { %1702 = vmatpush3.bf16.msra.mxu0 %v1825_v37  ;;  %v1224_v37 = vld [vmem:[%s160_s15] sm:$0x1] }
  0x84   : > { %1722 = vmatpush3.bf16.msra.mxu1 %v1826_v40  ;;  %1727 = vmatprep.subr.bf16.mxu0 %v1845_v1 }
  0x86   : > { %1704 = vmatmul.mubr.bf16.vlgmr.msra.gmra.mrb[12].mxu0 %v872_v41 }
  0x87   : > { %1728 = vmatpush3.bf16.msra.mxu0 %v1827_v42  ;;  %1724 = vmatmul.mubr.bf16.vlgmr.msra.gmra.mrb[12].mxu1 %v1009_v43 }
  0x88   : > { %1729 = vmatprep.subr.bf16.mxu0 %v1845_v1  ;;  %1743 = vmatprep.mubr.msk.bf16.mxu0 %vm1846_vm0, %v1845_v1 }
  0x8b   : > { %1730 = vmatpush3.bf16.msra.mxu0 %v1829_v44 }
  0x8c   : > { %1731 = vmatprep.subr.bf16.mxu0 %v1845_v1 }
  0x8f   : > { %1732 = vmatpush3.bf16.msra.mxu0 %v1830_v45 }
  0x90   : > { %1733 = vmatprep.subr.bf16.mxu0 %v1845_v1 }
  0x93   : > { %1734 = vmatpush3.bf16.msra.mxu0 %v1831_v46 }
  0x94   : > { %1735 = vmatprep.subr.bf16.mxu0 %v1845_v1 }
  0x97   : > { %1736 = vmatpush3.bf16.msra.mxu0 %v1832_v47 }
  0x98   : > { %1737 = vmatprep.subr.bf16.mxu0 %v1845_v1 }
  0x9b   : > { %1738 = vmatpush3.bf16.msra.mxu0 %v1833_v48 }
  0x9c   : > { %1739 = vmatprep.subr.bf16.mxu0 %v1845_v1 }
  0x9f   : > { %1740 = vmatpush3.bf16.msra.mxu0 %v1834_v49 }
  0xa0   : > { %1741 = vmatprep.subr.bf16.mxu0 %v1845_v1 }
  0xa3   : > { %1742 = vmatpush3.bf16.msra.mxu0 %v1835_v52 }
  0xa6   : > { %1744 = vmatmul.mubr.bf16.vlgmr.msra.gmra.mrb[16].mxu0 %v1121_v53 }
  0xf9   : > { %v325_v54 = vpop.f32.mrb[0].mxu0 }
  0xfa   : > { %v1585_v55 = vpop.f32.mrb[1].mxu0  ;;  %v413_v56 = vpop.f32.mrb[0].mxu1 }
  0xfb   : > { %v414_v57 = vadd.f32 %v413_v56, %v325_v54  ;;  %v328_v58 = vpop.f32.mrb[2].mxu0  ;;  %v1605_v59 = vpop.f32.mrb[1].mxu1 }
  0xfc   : > { %v1586_v60 = vpop.f32.mrb[3].mxu0  ;;  %v416_v61 = vpop.f32.mrb[2].mxu1 }
  0xfd   : > { %v1606_v62 = vpop.f32.mrb[3].mxu1 }
 0x119   : > { %v524_v63 = vpop.f32.mrb[4].mxu0 }
 0x11a   : > { %v530_v0 = vadd.f32 %v524_v63, %v414_v57  ;;  %v1625_v2 = vpop.f32.mrb[5].mxu0  ;;  %v631_v3 = vpop.f32.mrb[4].mxu1 }
 0x11b   : > { %v527_v4 = vpop.f32.mrb[6].mxu0  ;;  %v1645_v5 = vpop.f32.mrb[5].mxu1 }
 0x11c   : > { %v637_v6 = vadd.f32 %v631_v3, %v530_v0  ;;  %v1626_v1 = vpop.f32.mrb[7].mxu0  ;;  %v634_v7 = vpop.f32.mrb[6].mxu1 }
 0x11d   : > { %v1646_v8 = vpop.f32.mrb[7].mxu1 }
 0x139   : > { %v752_v9 = vpop.f32.mrb[8].mxu0 }
 0x13a   : > { %v758_v10 = vadd.f32 %v752_v9, %v637_v6  ;;  %v1665_v11 = vpop.f32.mrb[9].mxu0  ;;  %v864_v12 = vpop.f32.mrb[8].mxu1 }
 0x13b   : > { %v755_v13 = vpop.f32.mrb[10].mxu0  ;;  %v1685_v14 = vpop.f32.mrb[9].mxu1 }
 0x13c   : > { %v870_v15 = vadd.f32 %v864_v12, %v758_v10  ;;  %v1666_v16 = vpop.f32.mrb[11].mxu0  ;;  %v867_v17 = vpop.f32.mrb[10].mxu1 }
 0x13d   : > { %v1686_v18 = vpop.f32.mrb[11].mxu1 }
 0x159   : > { %v972_v19 = vpop.f32.mrb[12].mxu0 }
 0x15a   : > { %v978_v20 = vadd.f32 %v972_v19, %v870_v15  ;;  %v1705_v21 = vpop.f32.mrb[13].mxu0  ;;  %v1093_v22 = vpop.f32.mrb[12].mxu1 }
 0x15b   : > { %v975_v23 = vpop.f32.mrb[14].mxu0  ;;  %v1725_v24 = vpop.f32.mrb[13].mxu1 }
 0x15c   : > { %v1099_v25 = vadd.f32 %v1093_v22, %v978_v20  ;;  %v1706_v26 = vpop.f32.mrb[15].mxu0  ;;  %v1096_v27 = vpop.f32.mrb[14].mxu1 }
 0x15d   : > { %v1726_v28 = vpop.f32.mrb[15].mxu1 }
 0x179   : > { %v1205_v29 = vpop.f32.mrb[16].mxu0 }
 0x17a   : > { %v1211_v31 = vadd.f32 %v1205_v29, %v1099_v25  ;;  %v1745_v32 = vpop.f32.mrb[17].mxu0 }
 0x17b   : > { %v1208_v33 = vpop.f32.mrb[18].mxu0 }
 0x17c   : > { %v1219_v34 = vadd.f32 %v1483_v30, %v1211_v31  ;;  %v1746_v35 = vpop.f32.mrb[19].mxu0 }
 0x17e   : > { %v1220_v36 = vmax.f32 %v1219_v34, 0.0 }
 0x180   : > { %v1221_v38 = vpack.c.bf16 %v1220_v36, %v1220_v36 }
 0x182   : > { %v1225_v39 = vsel %vm1223_vm5, %v1221_v38, %v1224_v37 }
 0x183   : > { %1226 = vst [vmem:[%s160_s15] sm:$0x1] %v1225_v39 }
 0x184 PF: > { %s13_s12 = sadd.s32 1, %s1843_s12  }
 0x185   : > { %p10_p4 = scmp.ge.s32.totalorder %s13_s12, 4  }
 0x187   :  { %12 = sbr.rel (!%p10_p4) target bundleno = 1 (0x1), region = 72 }

// kernel: reinforce_forward.7
= control target key start
LH: loop header
LB: loop body
LE: loop exit
PB: predicated region body
PF: predicated region fallthrough
CT: control target
= control target key end

     0   :  { %s7840_s12 = smov 0   ;;  %s10015_s0 = inlined_call_operand.vmem [shape: bf16[2,16,16,128], index: 0, kind: input, shape index: {}]   ;;  %s10016_s1 = inlined_call_operand.vmem [shape: bf16[9,128,128], index: 1, kind: input, shape index: {}]   ;;  %s10017_s2 = inlined_call_operand.vmem [shape: f32[1,128], index: 2, kind: input, shape index: {}]   ;;  %s10018_s3 = inlined_call_operand.vmem [shape: bf16[2,8,1024], index: 3, kind: output, shape index: {}]  }
   0x1 LB: > { %s6272_s13 = sadd.s32 4294967295, %s7817_s12   ;;  %p6276_p0 = scmp.ge.s32.totalorder %s7817_s12, 1  ;;  %s7817_s12 = sphi %s7840_s12, %s13_s12  }
   0x2   : > { %p137_p1 = scmp.lt.s32.totalorder %s7817_s12, 3 }
   0x4   : > { %p138_p2 = pnand %p6276_p0, %p137_p1 }
   0x6   : > { %141 = sbr.rel (%p138_p2) target bundleno = 757 (0x2f5), region = 32 }
   0xd   : > { %v7615_v0 = vld [vmem:[%s10016_s1 + $0x40] sm:$0xff]   ;;  %v7819_v2 = vmov 0   ;;  %v7617_v3 = vld [vmem:[%s10016_s1 + $0x48] sm:$0xff]   ;;  %v7619_v5 = vld [vmem:[%s10016_s1 + $0x50] sm:$0xff]   ;;  %p161_p3 = scmp.lt.s32.totalorder %s6272_s13, 1  ;;  %vm582_vm0 = vcmask 1043456  }
   0xe   : > { %v7616_v1 = vld [vmem:[%s10016_s1 + $0x100] sm:$0xff]   ;;  %172 = vst [vmem:[#allocation2] sm:$0xf] %v7819_v2  ;;  %173 = vst [vmem:[#allocation2 + $0x4] sm:$0xf] %v7819_v2  ;;  %6902 = vmatprep.subr.bf16.mxu1 %v7615_v0  ;;  %v7618_v4 = vld [vmem:[%s10016_s1 + $0x108] sm:$0xff]  }
   0xf   : > { %174 = vst [vmem:[#allocation2 + $0x8] sm:$0x1] %v7819_v2  ;;  %175 = vst [vmem:[#allocation2 + $0xc] sm:$0xf] %v7819_v2  ;;  %7094 = vmatprep.subr.bf16.mxu0 %v7616_v1  ;;  %6903 = vmatpush3.bf16.msra.mxu1 %v7615_v0  ;;  %v7620_v6 = vld [vmem:[%s10016_s1 + $0x110] sm:$0xff]   ;;  %v7621_v7 = vld [vmem:[%s10016_s1 + $0x58] sm:$0xff]  }
  0x10   : > { %176 = vst [vmem:[#allocation2 + $0x10] sm:$0xf] %v7819_v2  ;;  %177 = vst [vmem:[#allocation2 + $0x14] sm:$0x1] %v7819_v2  ;;  %7095 = vmatpush3.bf16.msra.mxu0 %v7616_v1  ;;  %6904 = vmatprep.subr.bf16.mxu1 %v7617_v3  ;;  %s10110_s13 = smov (!%p161_p3, %s6272_s13), 1  ;;  %v7622_v8 = vld [vmem:[%s10016_s1 + $0x118] sm:$0xff]  }
  0x11   : > { %178 = vst [vmem:[#allocation2 + $0x18] sm:$0xf] %v7819_v2  ;;  %179 = vst [vmem:[#allocation2 + $0x1c] sm:$0xf] %v7819_v2  ;;  %7096 = vmatprep.subr.bf16.mxu0 %v7618_v4  ;;  %v7623_v9 = vld [vmem:[%s10016_s1 + $0x60] sm:$0xff]   ;;  %s6680_s5 = sshll.u32 %s10110_s13, 7 }
  0x12   : > { %180 = vst [vmem:[#allocation2 + $0x20] sm:$0x1] %v7819_v2  ;;  %181 = vst [vmem:[#allocation2 + $0x24] sm:$0xf] %v7819_v2  ;;  %v7624_v10 = vld [vmem:[%s10016_s1 + $0x120] sm:$0xff]   ;;  %v7625_v11 = vld [vmem:[%s10016_s1 + $0x68] sm:$0xff]   ;;  %s7891_s14 = scalar_lea.vmem %s10015_s0, %s6680_s5 }
  0x13   : > { %182 = vst [vmem:[#allocation2 + $0x28] sm:$0xf] %v7819_v2  ;;  %183 = vst [vmem:[#allocation2 + $0x2c] sm:$0x1] %v7819_v2  ;;  %6905 = vmatpush3.bf16.msra.mxu1 %v7617_v3  ;;  %v7626_v15 = vld [vmem:[%s10016_s1 + $0x128] sm:$0xff]   ;;  %vm589_vm2 = vcmask 1040384  }
  0x14   : > { %184 = vst [vmem:[#allocation2 + $0x30] sm:$0xf] %v7819_v2  ;;  %185 = vst [vmem:[#allocation2 + $0x34] sm:$0xf] %v7819_v2  ;;  %7097 = vmatpush3.bf16.msra.mxu0 %v7618_v4  ;;  %6906 = vmatprep.subr.bf16.mxu1 %v7619_v5  ;;  %vm763_vm1 = vsmask.f32 3328 }
  0x15   : > { %186 = vst [vmem:[#allocation2 + $0x38] sm:$0x1] %v7819_v2  ;;  %187 = vst [vmem:[#allocation2 + $0x3c] sm:$0xf] %v7819_v2  ;;  %7098 = vmatprep.subr.bf16.mxu0 %v7620_v6  ;;  %v699_v12 = vld [vmem:[#allocation2] sm:$0xf] }
  0x16   : > { %188 = vst [vmem:[#allocation2 + $0x40] sm:$0xf] %v7819_v2  ;;  %189 = vst [vmem:[#allocation2 + $0x44] sm:$0x1] %v7819_v2  ;;  %v700_v13 = vld [vmem:[#allocation2 + $0x4] sm:$0xf] }
  0x17   : > { %190 = vst [vmem:[#allocation2 + $0x48] sm:$0xf] %v7819_v2  ;;  %191 = vst [vmem:[#allocation2 + $0x4c] sm:$0xf] %v7819_v2  ;;  %6907 = vmatpush3.bf16.msra.mxu1 %v7619_v5  ;;  %v747_v14 = vld [vmem:[#allocation2 + $0x8] sm:$0x1] }
  0x18   : > { %192 = vst [vmem:[#allocation2 + $0x50] sm:$0x1] %v7819_v2  ;;  %193 = vst [vmem:[#allocation2 + $0x54] sm:$0xf] %v7819_v2  ;;  %7099 = vmatpush3.bf16.msra.mxu0 %v7620_v6  ;;  %6908 = vmatprep.subr.bf16.mxu1 %v7621_v7  ;;  %v767_v16 = vshrl.u32 %v699_v12, 16  ;;  %v770_v17 = vshll.u32 %v699_v12, 16 }
  0x19   : > { %194 = vst [vmem:[#allocation2 + $0x58] sm:$0xf] %v7819_v2  ;;  %195 = vst [vmem:[#allocation2 + $0x5c] sm:$0x1] %v7819_v2  ;;  %7100 = vmatprep.subr.bf16.mxu0 %v7622_v8  ;;  %v7627_v18 = vld [vmem:[%s10016_s1 + $0x70] sm:$0xff]   ;;  %v776_v19 = vshll.u32 %v700_v13, 16 }
  0x1a   : > { %196 = vst [vmem:[#allocation2 + $0x60] sm:$0xf] %v7819_v2  ;;  %197 = vst [vmem:[#allocation2 + $0x64] sm:$0xf] %v7819_v2  ;;  %v780_v20 = vshrl.u32 %v700_v13, 16  ;;  %v786_v21 = vshll.u32 %v747_v14, 16 }
  0x1b   : > { %198 = vst [vmem:[#allocation2 + $0x68] sm:$0x1] %v7819_v2  ;;  %199 = vst [vmem:[#allocation2 + $0x6c] sm:$0xf] %v7819_v2  ;;  %6909 = vmatpush3.bf16.msra.mxu1 %v7621_v7  ;;  %v226_v22 = vld [vmem:[%s7891_s14] sm:$0xf] }
  0x1c   : > { %200 = vst [vmem:[#allocation2 + $0x70] sm:$0xf] %v7819_v2  ;;  %201 = vst [vmem:[#allocation2 + $0x74] sm:$0x1] %v7819_v2  ;;  %7101 = vmatpush3.bf16.msra.mxu0 %v7622_v8  ;;  %6910 = vmatprep.subr.bf16.mxu1 %v7623_v9  ;;  %vm764_vm3 = vsmask.f32 7440 }
  0x1d   : > { %202 = vst [vmem:[#allocation2 + $0x78] sm:$0xf] %v7819_v2  ;;  %203 = vst [vmem:[#allocation2 + $0x7c] sm:$0xf] %v7819_v2  ;;  %7102 = vmatprep.subr.bf16.mxu0 %v7624_v10  ;;  %v769_v23 = vrot.slane %v767_v16, 4  ;;  %v772_v24 = vrot.slane %v770_v17, 5 }
  0x1e   : > { %204 = vst [vmem:[#allocation2 + $0x80] sm:$0x1] %v7819_v2  ;;  %205 = vst [vmem:[#allocation2 + $0x84] sm:$0xf] %v7819_v2  ;;  %v227_v25 = vld [vmem:[%s7891_s14 + $0x4] sm:$0xf] }
  0x1f   : > { %206 = vst [vmem:[#allocation2 + $0x88] sm:$0xf] %v7819_v2  ;;  %207 = vst [vmem:[#allocation2 + $0x8c] sm:$0x1] %v7819_v2  ;;  %6911 = vmatpush3.bf16.msra.mxu1 %v7623_v9  ;;  %v778_v26 = vrot.slane %v776_v19, 5  ;;  %v782_v27 = vrot.slane %v780_v20, 4  ;;  %v773_v29 = vor.u32 %v772_v24, %v769_v23 }
  0x20   : > { %208 = vst [vmem:[#allocation2 + $0x90] sm:$0xf] %v7819_v2  ;;  %209 = vst [vmem:[#allocation2 + $0x94] sm:$0xf] %v7819_v2  ;;  %7103 = vmatpush3.bf16.msra.mxu0 %v7624_v10  ;;  %6912 = vmatprep.subr.bf16.mxu1 %v7625_v11  ;;  %vm258_vm4 = vsmask.f32 256 }
  0x21   : > { %210 = vst [vmem:[#allocation2 + $0x98] sm:$0x1] %v7819_v2  ;;  %211 = vst [vmem:[#allocation2 + $0x9c] sm:$0xf] %v7819_v2  ;;  %vm259_vm5 = vsmask.f32 4368  ;;  %7104 = vmatprep.subr.bf16.mxu0 %v7626_v15  ;;  %v783_v35 = vor.u32 %v782_v27, %v778_v26 }
  0x22   : > { %212 = vst [vmem:[#allocation2 + $0xa0] sm:$0xf] %v7819_v2  ;;  %213 = vst [vmem:[#allocation2 + $0xa4] sm:$0x1] %v7819_v2  ;;  %v7628_v28 = vld [vmem:[%s10016_s1 + $0x130] sm:$0xff]   ;;  %v262_v30 = vshrl.u32 %v226_v22, 16 }
  0x23   : > { %214 = vst [vmem:[#allocation2 + $0xa8] sm:$0xf] %v7819_v2  ;;  %215 = vst [vmem:[#allocation2 + $0xac] sm:$0xf] %v7819_v2  ;;  %v265_v31 = vshll.u32 %v226_v22, 16  ;;  %v270_v32 = vshrl.u32 %v227_v25, 16  ;;  %6913 = vmatpush3.bf16.msra.mxu1 %v7625_v11 }
  0x24   : > { %216 = vst [vmem:[#allocation2 + $0xb0] sm:$0x1] %v7819_v2  ;;  %217 = vst [vmem:[#allocation2 + $0xb4] sm:$0xf] %v7819_v2  ;;  %v7629_v33 = vld [vmem:[%s10016_s1 + $0x78] sm:$0xff]   ;;  %v788_v36 = vrot.slane %v786_v21, 5  ;;  %7105 = vmatpush3.bf16.msra.mxu0 %v7626_v15  ;;  %6914 = vmatprep.subr.bf16.mxu1 %v7627_v18 }
  0x25   : > { %218 = vst [vmem:[#allocation2 + $0xb8] sm:$0xf] %v7819_v2  ;;  %219 = vst [vmem:[#allocation2 + $0xbc] sm:$0x1] %v7819_v2  ;;  %v273_v37 = vshll.u32 %v227_v25, 16  ;;  %v7630_v39 = vld [vmem:[%s10016_s1 + $0x138] sm:$0xff]   ;;  %7106 = vmatprep.subr.bf16.mxu0 %v7628_v28 }
  0x26   : > { %220 = vst [vmem:[#allocation2 + $0xc0] sm:$0xf] %v7819_v2  ;;  %221 = vst [vmem:[#allocation2 + $0xc4] sm:$0xf] %v7819_v2  ;;  %vm583_vm7 = vsmask.f32 7938 }
  0x27   : > { %222 = vst [vmem:[#allocation2 + $0xc8] sm:$0x1] %v7819_v2  ;;  %223 = vst [vmem:[#allocation2 + $0xcc] sm:$0xf] %v7819_v2  ;;  %v585_v38 = vld [vmem:[#allocation2 + $0xc] sm:$0xf]  ;;  %6915 = vmatpush3.bf16.msra.mxu1 %v7627_v18 }
  0x28   : > { %224 = vst [vmem:[#allocation2 + $0xd0] sm:$0xf] %v7819_v2  ;;  %225 = vst [vmem:[#allocation2 + $0xd4] sm:$0x1] %v7819_v2  ;;  %v774_v40 = vrot.slane %v773_v29, 4  ;;  %v264_v42 = vrot.slane %v262_v30, 7  ;;  %7107 = vmatpush3.bf16.msra.mxu0 %v7628_v28  ;;  %6916 = vmatprep.subr.bf16.mxu1 %v7629_v33 }
  0x29   : > { %vm7909_vm6 = vmor %vm763_vm1, %vm764_vm3  ;;  %v272_v43 = vrot.slane %v270_v32, 7  ;;  %v784_v44 = vrot.slane %v783_v35, 4  ;;  %v228_v46 = vld [vmem:[%s7891_s14 + $0x8] sm:$0xf]  ;;  %v591_v52 = vld [vmem:[#allocation2 + $0x14] sm:$0x1]  ;;  %7108 = vmatprep.subr.bf16.mxu0 %v7630_v39 }
  0x2a   : > { %vm7918_vm8 = vmor %vm258_vm4, %vm259_vm5  ;;  %v779_v47 = vsel %vm7909_vm6, %v774_v40, %v778_v26  ;;  %v267_v48 = vor.u32 %v265_v31, %v264_v42  ;;  %v268_v49 = vrot.slane %v264_v42, 4  ;;  %v229_v53 = vld [vmem:[%s7891_s14 + $0xc] sm:$0xf]  ;;  %v279_v56 = vshrl.u32 %v228_v46, 16  ;;  %v7946_v61 = vld [vmem:[%s10016_s1] sm:$0xff]   ;;  %s6681_s8 = sshll.u32 %s10110_s13, 5 }
  0x2b   : > { %vm7923_vm9 = vmand %vm582_vm0, %vm583_vm7  ;;  %v275_v50 = vor.u32 %v273_v37, %v272_v43  ;;  %v789_v54 = vsel %vm7909_vm6, %v784_v44, %v788_v36  ;;  %v277_v55 = vrot.slane %v272_v43, 4  ;;  %v282_v57 = vshll.u32 %v228_v46, 16  ;;  %v594_v63 = vld [vmem:[#allocation2 + $0x18] sm:$0xf]  ;;  %v7953_v4 = vld [vmem:[%s10016_s1 + $0x140] sm:$0xff]   ;;  %6917 = vmatpush3.bf16.msra.mxu1 %v7629_v33  ;;  %s170_s11 = scalar_lea.vmem %s10018_s3, %s6681_s8 }
  0x2c   : > { %vm7932_vm10 = vmand %vm589_vm2, %vm258_vm4  ;;  %v6297_v58 = vcombine.low %v779_v47, %v789_v54  ;;  %v586_v60 = vsel %vm7923_vm9, %v267_v48, %v585_v38  ;;  %v287_v62 = vshrl.u32 %v229_v53, 16  ;;  %v281_v1 = vrot.slane %v279_v56, 7  ;;  %v230_v5 = vld [vmem:[%s7891_s14 + $0x10] sm:$0xf]  ;;  %v231_v6 = vld [vmem:[%s7891_s14 + $0x14] sm:$0xf]  ;;  %7109 = vmatpush3.bf16.msra.mxu0 %v7630_v39  ;;  %6950 = vmatprep.subr.bf16.mxu1 %v7946_v61 }
  0x2d   : > { %v276_v59 = vsel %vm7918_vm8, %v268_v49, %v275_v50  ;;  %587 = vst [vmem:[#allocation2 + $0xc] sm:$0xf] %v586_v60  ;;  %v592_v0 = vsel %vm7932_vm10, %v277_v55, %v591_v52  ;;  %v290_v2 = vshll.u32 %v229_v53, 16  ;;  %v598_v9 = vld [vmem:[#allocation2 + $0x20] sm:$0x1]  ;;  %v296_v10 = vshrl.u32 %v230_v5, 16  ;;  %7142 = vmatprep.subr.bf16.mxu0 %v7953_v4 }
  0x2e   : > { %588 = vst [vmem:[#allocation2 + $0x10] sm:$0xf] %v276_v59  ;;  %6918 = vmatprep.mubr.bf16.mxu1 %v6297_v58  ;;  %593 = vst [vmem:[#allocation2 + $0x14] sm:$0x1] %v592_v0  ;;  %v289_v3 = vrot.slane %v287_v62, 7  ;;  %v284_v7 = vor.u32 %v282_v57, %v281_v1  ;;  %v285_v8 = vrot.slane %v281_v1, 4 }
  0x2f   : > { %v299_v11 = vshll.u32 %v230_v5, 16  ;;  %v304_v14 = vshrl.u32 %v231_v6, 16  ;;  %v307_v15 = vshll.u32 %v231_v6, 16  ;;  %v298_v17 = vrot.slane %v296_v10, 7  ;;  %v7968_v21 = vld [vmem:[%s7891_s14 + $0x18] sm:$0xf] }
  0x30   : > { %v292_v12 = vor.u32 %v290_v2, %v289_v3  ;;  %v294_v13 = vrot.slane %v289_v3, 4  ;;  %v595_v16 = vsel %vm7923_vm9, %v284_v7, %v594_v63  ;;  %v601_v24 = vld [vmem:[#allocation2 + $0x24] sm:$0xf]  ;;  %v313_v25 = vshrl.u32 %v7968_v21, 16  ;;  %v7665_v51 = vld [vmem:[%s10016_s1 + $0x98] sm:$0xff]  }
  0x31   : > { %596 = vst [vmem:[#allocation2 + $0x18] sm:$0xf] %v595_v16  ;;  %v7965_v20 = vrot.slane %v304_v14, 7  ;;  %v301_v22 = vor.u32 %v299_v11, %v298_v17  ;;  %v302_v23 = vrot.slane %v298_v17, 4  ;;  %v316_v42 = vshll.u32 %v7968_v21, 16 }
  0x32   : > { %v293_v18 = vsel %vm7918_vm8, %v285_v8, %v292_v12  ;;  %v599_v19 = vsel %vm7932_vm10, %v294_v13, %v598_v9  ;;  %vm1793_vm11 = vcmask 1042432   ;;  %vm1794_vm12 = vcmask 1046532  }
  0x33   : > { %597 = vst [vmem:[#allocation2 + $0x1c] sm:$0xf] %v293_v18  ;;  %600 = vst [vmem:[#allocation2 + $0x20] sm:$0x1] %v599_v19  ;;  %v309_v29 = vor.u32 %v307_v15, %v7965_v20  ;;  %v602_v40 = vsel %vm7923_vm9, %v301_v22, %v601_v24  ;;  %vm5586_vm14 = vcmask 1041408   ;;  %vm5643_vm15 = vcmask 1043458  }
  0x34   : > { %v2616_v26 = vld [vmem:[#allocation2 + $0xc] sm:$0xf]  ;;  %603 = vst [vmem:[#allocation2 + $0x24] sm:$0xf] %v602_v40  ;;  %vm8039_vm13 = vmor %vm1793_vm11, %vm1794_vm12  ;;  %vm5700_vm0 = vcmask 1045508   ;;  %vm5757_vm1 = vcmask 1047558  }
  0x35   : > { %v7971_v27 = vld [vmem:[#allocation2 + $0x10] sm:$0xf]  ;;  %v701_v28 = vld [vmem:[#allocation2 + $0xc] sm:$0xf]  ;;  %v7974_v30 = vld [vmem:[#allocation2 + $0x14] sm:$0x1]  ;;  %v310_v39 = vsel %vm7918_vm8, %v302_v23, %v309_v29 }
  0x36   : > { %v2665_v31 = vshrl.u32 %v2616_v26, 16  ;;  %v2668_v32 = vshll.u32 %v2616_v26, 16  ;;  %v2674_v33 = vshll.u32 %v7971_v27, 16  ;;  %v2678_v35 = vshrl.u32 %v7971_v27, 16  ;;  %v702_v37 = vld [vmem:[#allocation2 + $0x10] sm:$0xf] }
  0x37   : > { %v2684_v36 = vshll.u32 %v7974_v30, 16  ;;  %v748_v38 = vld [vmem:[#allocation2 + $0x14] sm:$0x1]  ;;  %604 = vst [vmem:[#allocation2 + $0x28] sm:$0xf] %v310_v39  ;;  %v791_v49 = vshrl.u32 %v701_v28, 16 }
  0x38   : > { %v2667_v43 = vrot.slane %v2665_v31, 4  ;;  %v2670_v44 = vrot.slane %v2668_v32, 5  ;;  %v2676_v46 = vrot.slane %v2674_v33, 5  ;;  %v2680_v47 = vrot.slane %v2678_v35, 4  ;;  %v2619_v57 = vld [vmem:[#allocation2 + $0x18] sm:$0xf] }
  0x39   : > { %v2686_v48 = vrot.slane %v2684_v36, 5  ;;  %v794_v50 = vshll.u32 %v701_v28, 16  ;;  %v800_v52 = vshll.u32 %v702_v37, 16  ;;  %v804_v55 = vshrl.u32 %v702_v37, 16  ;;  %v703_v18 = vld [vmem:[#allocation2 + $0x18] sm:$0xf] }
  0x3a   : > { %v2671_v53 = vor.u32 %v2670_v44, %v2667_v43  ;;  %v2681_v54 = vor.u32 %v2680_v47, %v2676_v46  ;;  %v810_v56 = vshll.u32 %v748_v38, 16  ;;  %v3439_v58 = vrot.slane %v7974_v30, 5  ;;  %v7985_v63 = vld [vmem:[#allocation2 + $0x1c] sm:$0xf]  ;;  %v7987_v6 = vld [vmem:[#allocation2 + $0x20] sm:$0x1] }
  0x3b   : > { %v793_v59 = vrot.slane %v791_v49, 4  ;;  %v796_v60 = vrot.slane %v794_v50, 5  ;;  %v802_v62 = vrot.slane %v800_v52, 5  ;;  %v806_v2 = vrot.slane %v804_v55, 4  ;;  %v704_v32 = vld [vmem:[#allocation2 + $0x1c] sm:$0xf] }
  0x3c   : > { %v2672_v0 = vrot.slane %v2671_v53, 4  ;;  %v2682_v1 = vrot.slane %v2681_v54, 4  ;;  %v812_v3 = vrot.slane %v810_v56, 5  ;;  %v2689_v7 = vshrl.u32 %v2619_v57, 16  ;;  %v749_v33 = vld [vmem:[#allocation2 + $0x20] sm:$0x1] }
  0x3d   : > { %v797_v5 = vor.u32 %v796_v60, %v793_v59  ;;  %v2692_v8 = vshll.u32 %v2619_v57, 16  ;;  %v2698_v9 = vshll.u32 %v7985_v63, 16  ;;  %v807_v12 = vor.u32 %v806_v2, %v802_v62  ;;  %v605_v39 = vld [vmem:[#allocation2 + $0x2c] sm:$0x1]  ;;  %v2622_v47 = vld [vmem:[#allocation2 + $0x24] sm:$0xf] }
  0x3e   : > { %v2677_v10 = vsel %vm7909_vm6, %v2672_v0, %v2676_v46  ;;  %v2687_v11 = vsel %vm7909_vm6, %v2682_v1, %v2686_v48  ;;  %v2702_v13 = vshrl.u32 %v7985_v63, 16  ;;  %v2691_v16 = vrot.slane %v2689_v7, 4  ;;  %v7634_v48 = vld [vmem:[%s10016_s1 + $0x8] sm:$0xff]   ;;  %v705_v60 = vld [vmem:[#allocation2 + $0x24] sm:$0xf] }
  0x3f   : > { %v6457_v14 = vcombine.low %v2677_v10, %v2687_v11  ;;  %v798_v15 = vrot.slane %v797_v5, 4  ;;  %v2694_v17 = vrot.slane %v2692_v8, 5  ;;  %v808_v19 = vrot.slane %v807_v12, 4  ;;  %v2623_v54 = vld [vmem:[#allocation2 + $0x28] sm:$0xf]  ;;  %v7637_v10 = vld [vmem:[%s10016_s1 + $0x10] sm:$0xff]  }
  0x40   : > { %v2700_v22 = vrot.slane %v2698_v9, 5  ;;  %v2704_v23 = vrot.slane %v2702_v13, 4  ;;  %v2708_v24 = vshll.u32 %v7987_v6, 16  ;;  %v3443_v29 = vrot.slane %v7985_v63, 5  ;;  %v7633_v0 = vld [vmem:[%s10016_s1 + $0x148] sm:$0xff]  }
  0x41   : > { %7110 = vmatprep.mubr.bf16.mxu0 %v6457_v14  ;;  %v803_v26 = vsel %vm7909_vm6, %v798_v15, %v802_v62  ;;  %v2695_v28 = vor.u32 %v2694_v17, %v2691_v16  ;;  %v3446_v31 = vrot.slane %v7987_v6, 5  ;;  %v813_v35 = vsel %vm7909_vm6, %v808_v19, %v812_v3  ;;  %v706_v5 = vld [vmem:[#allocation2 + $0x28] sm:$0xf] }
  0x42   : > { %v2705_v36 = vor.u32 %v2704_v23, %v2700_v22  ;;  %v2710_v37 = vrot.slane %v2708_v24, 5  ;;  %v815_v38 = vshrl.u32 %v703_v18, 16  ;;  %v6298_v40 = vcombine.low %v803_v26, %v813_v35  ;;  %v7635_v24 = vld [vmem:[%s10016_s1 + $0x150] sm:$0xff]   ;;  %v233_v35 = vld [vmem:[%s7891_s14 + $0x1c] sm:$0xf] }
  0x43   : > { %v2696_v43 = vrot.slane %v2695_v28, 4  ;;  %v8004_v44 = vrot.slane %v3443_v29, 4  ;;  %v818_v46 = vshll.u32 %v703_v18, 16  ;;  %v824_v52 = vshll.u32 %v704_v32, 16 }
  0x44   : > { %v2706_v49 = vrot.slane %v2705_v36, 4  ;;  %v817_v50 = vrot.slane %v815_v38, 4  ;;  %v828_v53 = vshrl.u32 %v704_v32, 16  ;;  %6919 = vmatmul.mubr.bf16.vlgmr.msra.gmra.mrb[0].mxu1 %v6298_v40  ;;  %v834_v57 = vshll.u32 %v749_v33, 16  ;;  %v608_v40 = vld [vmem:[#allocation2 + $0x30] sm:$0xf] }
  0x45   : > { %v2701_v55 = vsel %vm7909_vm6, %v2696_v43, %v2700_v22  ;;  %v820_v56 = vrot.slane %v818_v46, 5  ;;  %v311_v59 = vrot.slane %v7965_v20, 4  ;;  %6951 = vmatpush3.bf16.msra.mxu1 %v7946_v61  ;;  %v826_v1 = vrot.slane %v824_v52, 5  ;;  %v7643_v52 = vld [vmem:[%s10016_s1 + $0x20] sm:$0xff]  }
  0x46   : > { %v2711_v62 = vsel %vm7909_vm6, %v2706_v49, %v2710_v37  ;;  %v830_v2 = vrot.slane %v828_v53, 4  ;;  %v2713_v3 = vshrl.u32 %v2622_v47, 16  ;;  %v836_v9 = vrot.slane %v834_v57, 5  ;;  %6952 = vmatprep.subr.bf16.mxu1 %v7634_v48  ;;  %v234_v57 = vld [vmem:[%s7891_s14 + $0x20] sm:$0xf] }
  0x47   : > { %v6458_v7 = vcombine.low %v2701_v55, %v2711_v62  ;;  %v821_v8 = vor.u32 %v820_v56, %v817_v50  ;;  %v606_v20 = vsel %vm7932_vm10, %v311_v59, %v605_v39  ;;  %v2716_v12 = vshll.u32 %v2622_v47, 16  ;;  %v7636_v50 = vld [vmem:[%s10016_s1 + $0x158] sm:$0xff]  }
  0x48   : > { %v831_v61 = vor.u32 %v830_v2, %v826_v1  ;;  %607 = vst [vmem:[#allocation2 + $0x2c] sm:$0x1] %v606_v20  ;;  %v2715_v11 = vrot.slane %v2713_v3, 4  ;;  %v2722_v13 = vshll.u32 %v2623_v54, 16  ;;  %v2726_v15 = vshrl.u32 %v2623_v54, 16 }
  0x49   : > { %7111 = vmatmul.mubr.bf16.vlgmr.msra.gmra.mrb[0].mxu0 %v6458_v7  ;;  %v822_v14 = vrot.slane %v821_v8, 4  ;;  %v839_v16 = vshrl.u32 %v705_v60, 16  ;;  %v842_v17 = vshll.u32 %v705_v60, 16  ;;  %v2718_v19 = vrot.slane %v2716_v12, 5  ;;  %6953 = vmatpush3.bf16.msra.mxu1 %v7634_v48  ;;  %v235_v8 = vld [vmem:[%s7891_s14 + $0x24] sm:$0xf] }
  0x4a   : > { %7143 = vmatpush3.bf16.msra.mxu0 %v7953_v4  ;;  %v832_v18 = vrot.slane %v831_v61, 4  ;;  %v8024_v22 = vrot.slane %v2722_v13, 5  ;;  %v848_v23 = vshll.u32 %v706_v5, 16  ;;  %v2728_v28 = vrot.slane %v2726_v15, 4  ;;  %6954 = vmatprep.subr.bf16.mxu1 %v7637_v10  ;;  %v7640_v4 = vld [vmem:[%s10016_s1 + $0x18] sm:$0xff]  }
  0x4b   : > { %7144 = vmatprep.subr.bf16.mxu0 %v7633_v0  ;;  %v827_v26 = vsel %vm7909_vm6, %v822_v14, %v826_v1  ;;  %v841_v32 = vrot.slane %v839_v16, 4  ;;  %v844_v33 = vrot.slane %v842_v17, 5  ;;  %v2719_v37 = vor.u32 %v2718_v19, %v2715_v11  ;;  %v7638_v11 = vld [vmem:[%s10016_s1 + $0x160] sm:$0xff]   ;;  %v236_v16 = vld [vmem:[%s7891_s14 + $0x28] sm:$0xf] }
  0x4c   : > { %v837_v36 = vsel %vm7909_vm6, %v832_v18, %v836_v9  ;;  %v850_v38 = vrot.slane %v848_v23, 5  ;;  %v852_v39 = vshrl.u32 %v706_v5, 16  ;;  %v2729_v47 = vor.u32 %v2728_v28, %v8024_v22  ;;  %v7645_v17 = vld [vmem:[%s10016_s1 + $0x28] sm:$0xff]  }
  0x4d   : > { %v6299_v46 = vcombine.low %v827_v26, %v837_v36  ;;  %v845_v48 = vor.u32 %v844_v33, %v841_v32  ;;  %v315_v49 = vrot.slane %v313_v25, 7  ;;  %v2720_v53 = vrot.slane %v2719_v37, 4  ;;  %6955 = vmatpush3.bf16.msra.mxu1 %v7637_v10  ;;  %v8086_v26 = vld [vmem:[%s7891_s14 + $0x30] sm:$0xf]  ;;  %v7639_v36 = vld [vmem:[%s10016_s1 + $0x168] sm:$0xff]  }
  0x4e   : > { %7145 = vmatpush3.bf16.msra.mxu0 %v7633_v0  ;;  %v854_v54 = vrot.slane %v852_v39, 4  ;;  %v321_v55 = vshrl.u32 %v233_v35, 16  ;;  %v324_v56 = vshll.u32 %v233_v35, 16  ;;  %v2730_v25 = vrot.slane %v2729_v47, 4  ;;  %6956 = vmatprep.subr.bf16.mxu1 %v7640_v4 }
  0x4f   : > { %6922 = vmatprep.mubr.bf16.mxu1 %v6299_v46  ;;  %v8053_v59 = vld [vmem:[#allocation2 + $0x2c] sm:$0x1]  ;;  %v846_v62 = vrot.slane %v845_v48, 4  ;;  %v318_v1 = vor.u32 %v316_v42, %v315_v49  ;;  %7146 = vmatprep.subr.bf16.mxu0 %v7635_v24  ;;  %v8062_v0 = vsel %vm8039_vm13, %v8004_v44, %v3446_v31  ;;  %v2725_v2 = vsel %vm7909_vm6, %v2720_v53, %v8024_v22  ;;  %v612_v44 = vld [vmem:[#allocation2 + $0x38] sm:$0x1]  ;;  %v7647_v46 = vld [vmem:[%s10016_s1 + $0x30] sm:$0xff]  }
  0x50   : > { %v750_v60 = vld [vmem:[#allocation2 + $0x2c] sm:$0x1]  ;;  %v2732_v3 = vshll.u32 %v8053_v59, 16  ;;  %v855_v5 = vor.u32 %v854_v54, %v850_v38  ;;  %v319_v42 = vrot.slane %v315_v49, 4  ;;  %v323_v6 = vrot.slane %v321_v55, 7 }
  0x51   : > { %v858_v7 = vshll.u32 %v750_v60, 16  ;;  %v851_v21 = vsel %vm7909_vm6, %v846_v62, %v850_v38  ;;  %v609_v31 = vsel %vm7923_vm9, %v318_v1, %v608_v40  ;;  %v330_v61 = vshrl.u32 %v234_v57, 16  ;;  %6957 = vmatpush3.bf16.msra.mxu1 %v7640_v4  ;;  %v615_v4 = vld [vmem:[#allocation2 + $0x3c] sm:$0xf] }
  0x52   : > { %v2734_v9 = vrot.slane %v2732_v3, 5  ;;  %v856_v20 = vrot.slane %v855_v5, 4  ;;  %610 = vst [vmem:[#allocation2 + $0x30] sm:$0xf] %v609_v31  ;;  %7147 = vmatpush3.bf16.msra.mxu0 %v7635_v24  ;;  %v326_v12 = vor.u32 %v324_v56, %v323_v6  ;;  %v328_v13 = vrot.slane %v323_v6, 4  ;;  %6958 = vmatprep.subr.bf16.mxu1 %v7643_v52  ;;  %v7641_v31 = vld [vmem:[%s10016_s1 + $0x170] sm:$0xff]  }
  0x53   : > { %v860_v10 = vrot.slane %v858_v7, 5  ;;  %7148 = vmatprep.subr.bf16.mxu0 %v7636_v50  ;;  %v333_v14 = vshll.u32 %v234_v57, 16  ;;  %v338_v15 = vshrl.u32 %v235_v8, 16  ;;  %v332_v22 = vrot.slane %v330_v61, 7  ;;  %v237_v24 = vld [vmem:[%s7891_s14 + $0x2c] sm:$0xf] }
  0x54   : > { %v2735_v18 = vsel %vm7909_vm6, %v2730_v25, %v2734_v9  ;;  %v341_v23 = vshll.u32 %v235_v8, 16  ;;  %v327_v33 = vsel %vm7918_vm8, %v319_v42, %v326_v12  ;;  %v613_v35 = vsel %vm7932_vm10, %v328_v13, %v612_v44  ;;  %v619_v56 = vld [vmem:[#allocation2 + $0x44] sm:$0x1]  ;;  %v622_v7 = vld [vmem:[#allocation2 + $0x48] sm:$0xf]  ;;  %v7649_v44 = vld [vmem:[%s10016_s1 + $0x38] sm:$0xff]  }
  0x55   : > { %v861_v19 = vsel %vm7909_vm6, %v856_v20, %v860_v10  ;;  %v6459_v28 = vcombine.low %v2725_v2, %v2735_v18  ;;  %611 = vst [vmem:[#allocation2 + $0x34] sm:$0xf] %v327_v33  ;;  %614 = vst [vmem:[#allocation2 + $0x38] sm:$0x1] %v613_v35  ;;  %v335_v37 = vor.u32 %v333_v14, %v332_v22  ;;  %v336_v38 = vrot.slane %v332_v22, 4  ;;  %v7642_v33 = vld [vmem:[%s10016_s1 + $0x178] sm:$0xff]  }
  0x56   : > { %v6300_v32 = vcombine.low %v851_v21, %v861_v19  ;;  %7149 = vmatpush3.bf16.msra.mxu0 %v7636_v50  ;;  %v340_v39 = vrot.slane %v338_v15, 7  ;;  %v347_v40 = vshrl.u32 %v236_v16, 16  ;;  %6959 = vmatpush3.bf16.msra.mxu1 %v7643_v52  ;;  %v350_v47 = vshll.u32 %v236_v16, 16 }
  0x57   : > { %7114 = vmatprep.mubr.bf16.mxu0 %v6459_v28  ;;  %v355_v48 = vshrl.u32 %v237_v24, 16  ;;  %v358_v49 = vshll.u32 %v237_v24, 16  ;;  %v364_v53 = vshrl.u32 %v8086_v26, 16  ;;  %v616_v50 = vsel %vm7923_vm9, %v335_v37, %v615_v4  ;;  %7150 = vmatprep.subr.bf16.mxu0 %v7638_v11 }
  0x58   : > { %6923 = vmatmul.mubr.bf16.gmra.mrb[4].mxu1 %v6300_v32  ;;  %v343_v54 = vor.u32 %v341_v23, %v340_v39  ;;  %v345_v55 = vrot.slane %v340_v39, 4  ;;  %v8101_v57 = vrot.slane %v347_v40, 7  ;;  %6960 = vmatprep.subr.bf16.mxu1 %v7645_v17  ;;  %617 = vst [vmem:[#allocation2 + $0x3c] sm:$0xf] %v616_v50  ;;  %vm6054_vm2 = vcmask 1041409  }
  0x59   : > { %v2625_v52 = vld [vmem:[#allocation2 + $0x30] sm:$0xf]  ;;  %v8103_v60 = vrot.slane %v355_v48, 7  ;;  %v8105_v62 = vrot.slane %v364_v53, 7  ;;  %vm6056_vm3 = vcmask 1042434   ;;  %vm6058_vm4 = vcmask 1043459  }
  0x5a   : > { %v707_v25 = vld [vmem:[#allocation2 + $0x30] sm:$0xf]  ;;  %v2737_v1 = vshrl.u32 %v2625_v52, 16  ;;  %v2740_v2 = vshll.u32 %v2625_v52, 16  ;;  %7151 = vmatpush3.bf16.msra.mxu0 %v7638_v11  ;;  %6961 = vmatpush3.bf16.msra.mxu1 %v7645_v17  ;;  %v344_v8 = vsel %vm7918_vm8, %v336_v38, %v343_v54  ;;  %v620_v21 = vsel %vm7932_vm10, %v345_v55, %v619_v56 }
  0x5b   : > { %v863_v3 = vshrl.u32 %v707_v25, 16  ;;  %v866_v5 = vshll.u32 %v707_v25, 16  ;;  %v352_v42 = vor.u32 %v350_v47, %v8101_v57  ;;  %v353_v6 = vrot.slane %v8101_v57, 4  ;;  %7152 = vmatprep.subr.bf16.mxu0 %v7639_v36  ;;  %6962 = vmatprep.subr.bf16.mxu1 %v7647_v46  ;;  %618 = vst [vmem:[#allocation2 + $0x40] sm:$0xf] %v344_v8 }
  0x5c   : > { %v2739_v9 = vrot.slane %v2737_v1, 4  ;;  %v2742_v20 = vrot.slane %v2740_v2, 5  ;;  %621 = vst [vmem:[#allocation2 + $0x44] sm:$0x1] %v620_v21  ;;  %v8119_v11 = vld [vmem:[#allocation2 + $0x34] sm:$0xf]  ;;  %v360_v14 = vor.u32 %v358_v49, %v8103_v60 }
  0x5d   : > { %v865_v10 = vrot.slane %v863_v3, 4  ;;  %v868_v61 = vrot.slane %v866_v5, 5  ;;  %v8121_v12 = vld [vmem:[#allocation2 + $0x38] sm:$0x1]  ;;  %v708_v13 = vld [vmem:[#allocation2 + $0x34] sm:$0xf]  ;;  %v623_v15 = vsel %vm7923_vm9, %v352_v42, %v622_v7 }
  0x5e   : > { %v2743_v16 = vor.u32 %v2742_v20, %v2739_v9  ;;  %v2746_v17 = vshll.u32 %v8119_v11, 16  ;;  %v2750_v18 = vshrl.u32 %v8119_v11, 16  ;;  %v2756_v19 = vshll.u32 %v8121_v12, 16  ;;  %v751_v22 = vld [vmem:[#allocation2 + $0x38] sm:$0x1]  ;;  %7153 = vmatpush3.bf16.msra.mxu0 %v7639_v36  ;;  %6963 = vmatpush3.bf16.msra.mxu1 %v7647_v46  ;;  %v8145_v1 = vld [vmem:[%s10016_s1 + $0x180] sm:$0xff]  }
  0x5f   : > { %624 = vst [vmem:[#allocation2 + $0x48] sm:$0xf] %v623_v15  ;;  %v869_v23 = vor.u32 %v868_v61, %v865_v10  ;;  %v872_v24 = vshll.u32 %v708_v13, 16  ;;  %v876_v28 = vshrl.u32 %v708_v13, 16  ;;  %v882_v32 = vshll.u32 %v751_v22, 16  ;;  %7154 = vmatprep.subr.bf16.mxu0 %v7641_v31  ;;  %6964 = vmatprep.subr.bf16.mxu1 %v7649_v44 }
  0x60   : > { %v2744_v35 = vrot.slane %v2743_v16, 4  ;;  %v2748_v4 = vrot.slane %v2746_v17, 5  ;;  %v2752_v37 = vrot.slane %v2750_v18, 4  ;;  %v2758_v38 = vrot.slane %v2756_v19, 5  ;;  %v2628_v39 = vld [vmem:[#allocation2 + $0x3c] sm:$0xf] }
  0x61   : > { %v870_v40 = vrot.slane %v869_v23, 4  ;;  %v874_v47 = vrot.slane %v872_v24, 5  ;;  %v878_v48 = vrot.slane %v876_v28, 4  ;;  %v884_v36 = vrot.slane %v882_v32, 5  ;;  %v709_v54 = vld [vmem:[#allocation2 + $0x3c] sm:$0xf] }
  0x62   : > { %v2753_v46 = vor.u32 %v2752_v37, %v2748_v4  ;;  %v2761_v49 = vshrl.u32 %v2628_v39, 16  ;;  %v2764_v53 = vshll.u32 %v2628_v39, 16  ;;  %7155 = vmatpush3.bf16.msra.mxu0 %v7641_v31  ;;  %6965 = vmatpush3.bf16.msra.mxu1 %v7649_v44  ;;  %v2749_v55 = vsel %vm7909_vm6, %v2744_v35, %v2748_v4  ;;  %v8136_v57 = vld [vmem:[#allocation2 + $0x40] sm:$0xf]  ;;  %v626_v4 = vld [vmem:[#allocation2 + $0x50] sm:$0x1] }
  0x63   : > { %v875_v50 = vsel %vm7909_vm6, %v870_v40, %v874_v47  ;;  %v879_v56 = vor.u32 %v878_v48, %v874_v47  ;;  %v8138_v52 = vld [vmem:[#allocation2 + $0x44] sm:$0x1]  ;;  %v361_v25 = vsel %vm7918_vm8, %v353_v6, %v360_v14  ;;  %7156 = vmatprep.subr.bf16.mxu0 %v7642_v33  ;;  %v2770_v7 = vshll.u32 %v8136_v57, 16  ;;  %v710_v31 = vld [vmem:[#allocation2 + $0x40] sm:$0xf] }
  0x64   : > { %v2754_v2 = vrot.slane %v2753_v46, 4  ;;  %v2763_v3 = vrot.slane %v2761_v49, 4  ;;  %v2766_v5 = vrot.slane %v2764_v53, 5  ;;  %625 = vst [vmem:[#allocation2 + $0x4c] sm:$0xf] %v361_v25  ;;  %v2774_v21 = vshrl.u32 %v8136_v57, 16 }
  0x65   : > { %v880_v8 = vrot.slane %v879_v56, 4  ;;  %v2780_v42 = vshll.u32 %v8138_v52, 16  ;;  %v887_v44 = vshrl.u32 %v709_v54, 16  ;;  %v2772_v20 = vrot.slane %v2770_v7, 5  ;;  %v752_v10 = vld [vmem:[#allocation2 + $0x44] sm:$0x1] }
  0x66   : > { %v2759_v6 = vsel %vm7909_vm6, %v2754_v2, %v2758_v38  ;;  %v2767_v9 = vor.u32 %v2766_v5, %v2763_v3  ;;  %v890_v61 = vshll.u32 %v709_v54, 16  ;;  %7157 = vmatpush3.bf16.msra.mxu0 %v7642_v33  ;;  %v2776_v15 = vrot.slane %v2774_v21, 4  ;;  %v2631_v17 = vld [vmem:[#allocation2 + $0x48] sm:$0xf]  ;;  %v7653_v24 = vld [vmem:[%s10016_s1 + $0x80] sm:$0xff]  }
  0x67   : > { %v6460_v13 = vcombine.low %v2749_v55, %v2759_v6  ;;  %v885_v14 = vsel %vm7909_vm6, %v880_v8, %v884_v36  ;;  %v2782_v16 = vrot.slane %v2780_v42, 5  ;;  %7190 = vmatprep.subr.bf16.mxu0 %v8145_v1  ;;  %v889_v22 = vrot.slane %v887_v44, 4  ;;  %v711_v47 = vld [vmem:[#allocation2 + $0x48] sm:$0xf]  ;;  %6998 = vmatprep.subr.bf16.mxu1 %v7653_v24 }
  0x68   : > { %v6301_v18 = vcombine.low %v875_v50, %v885_v14  ;;  %v2768_v19 = vrot.slane %v2767_v9, 4  ;;  %v892_v23 = vrot.slane %v890_v61, 5  ;;  %v2777_v28 = vor.u32 %v2776_v15, %v2772_v20  ;;  %v239_v14 = vld [vmem:[%s7891_s14 + $0x34] sm:$0xf] }
  0x69   : > { %7115 = vmatmul.mubr.bf16.gmra.mrb[4].mxu0 %v6460_v13  ;;  %v896_v32 = vshll.u32 %v710_v31, 16  ;;  %v900_v33 = vshrl.u32 %v710_v31, 16  ;;  %v906_v35 = vshll.u32 %v752_v10, 16  ;;  %v362_v39 = vrot.slane %v8103_v60, 4 }
  0x6a   : > { %6926 = vmatprep.mubr.bf16.mxu1 %v6301_v18  ;;  %v2773_v37 = vsel %vm7909_vm6, %v2768_v19, %v2772_v20  ;;  %v893_v38 = vor.u32 %v892_v23, %v889_v22  ;;  %v2785_v40 = vshrl.u32 %v2631_v17, 16  ;;  %v2778_v48 = vrot.slane %v2777_v28, 4  ;;  %v629_v28 = vld [vmem:[#allocation2 + $0x54] sm:$0xf] }
  0x6b   : > { %v898_v36 = vrot.slane %v896_v32, 5  ;;  %v902_v46 = vrot.slane %v900_v33, 4  ;;  %v908_v49 = vrot.slane %v906_v35, 5  ;;  %v8161_v53 = vld [vmem:[#allocation2 + $0x4c] sm:$0xf]  ;;  %v627_v55 = vsel %vm7932_vm10, %v362_v39, %v626_v4 }
  0x6c   : > { %v894_v54 = vrot.slane %v893_v38, 4  ;;  %v2787_v50 = vrot.slane %v2785_v40, 4  ;;  %v2788_v56 = vshll.u32 %v2631_v17, 16  ;;  %v2783_v25 = vsel %vm7909_vm6, %v2778_v48, %v2782_v16  ;;  %628 = vst [vmem:[#allocation2 + $0x50] sm:$0x1] %v627_v55 }
  0x6d   : > { %v903_v2 = vor.u32 %v902_v46, %v898_v36  ;;  %v2794_v60 = vshll.u32 %v8161_v53, 16  ;;  %v2798_v3 = vshrl.u32 %v8161_v53, 16  ;;  %v712_v5 = vld [vmem:[#allocation2 + $0x4c] sm:$0xf]  ;;  %v6461_v7 = vcombine.low %v2773_v37, %v2783_v25  ;;  %v240_v37 = vld [vmem:[%s7891_s14 + $0x38] sm:$0xf] }
  0x6e   : > { %v899_v8 = vsel %vm7909_vm6, %v894_v54, %v898_v36  ;;  %v2790_v21 = vrot.slane %v2788_v56, 5  ;;  %v911_v42 = vshrl.u32 %v711_v47, 16  ;;  %v914_v9 = vshll.u32 %v711_v47, 16  ;;  %v241_v38 = vld [vmem:[%s7891_s14 + $0x3c] sm:$0xf] }
  0x6f   : > { %v904_v31 = vrot.slane %v903_v2, 4  ;;  %v2796_v44 = vrot.slane %v2794_v60, 5  ;;  %v2800_v6 = vrot.slane %v2798_v3, 4  ;;  %7118 = vmatprep.mubr.bf16.mxu0 %v6461_v7  ;;  %v920_v61 = vshll.u32 %v712_v5, 16  ;;  %v3370_v2 = vld [vmem:[#allocation2 + $0xc] sm:$0xe] }
  0x70   : > { %v2791_v20 = vor.u32 %v2790_v21, %v2787_v50  ;;  %v913_v10 = vrot.slane %v911_v42, 4  ;;  %v924_v13 = vshrl.u32 %v712_v5, 16  ;;  %v916_v17 = vrot.slane %v914_v9, 5  ;;  %v633_v7 = vld [vmem:[#allocation2 + $0x5c] sm:$0x1] }
  0x71   : > { %v909_v15 = vsel %vm7909_vm6, %v904_v31, %v908_v49  ;;  %v2801_v16 = vor.u32 %v2800_v6, %v2796_v44  ;;  %v367_v18 = vshll.u32 %v8086_v26, 16  ;;  %v922_v23 = vrot.slane %v920_v61, 5  ;;  %v636_v6 = vld [vmem:[#allocation2 + $0x60] sm:$0xf] }
  0x72   : > { %v6302_v19 = vcombine.low %v899_v8, %v909_v15  ;;  %v2792_v22 = vrot.slane %v2791_v20, 4  ;;  %v926_v24 = vrot.slane %v924_v13, 4  ;;  %v917_v33 = vor.u32 %v916_v17, %v913_v10  ;;  %v242_v13 = vld [vmem:[%s7891_s14 + $0x40] sm:$0xf] }
  0x73   : > { %v2802_v32 = vrot.slane %v2801_v16, 4  ;;  %v369_v35 = vor.u32 %v367_v18, %v8105_v62  ;;  %v370_v4 = vrot.slane %v8105_v62, 4  ;;  %v8179_v39 = vld [vmem:[#allocation2 + $0x50] sm:$0x1]  ;;  %v372_v48 = vshrl.u32 %v239_v14, 16 }
  0x74   : > { %6927 = vmatmul.mubr.bf16.gmra.mrb[8].mxu1 %v6302_v19  ;;  %v2797_v40 = vsel %vm7909_vm6, %v2792_v22, %v2796_v44  ;;  %v753_v26 = vld [vmem:[#allocation2 + $0x50] sm:$0x1]  ;;  %v927_v47 = vor.u32 %v926_v24, %v922_v23  ;;  %v375_v36 = vshll.u32 %v239_v14, 16  ;;  %v2804_v46 = vshll.u32 %v8179_v39, 16  ;;  %v243_v14 = vld [vmem:[%s7891_s14 + $0x44] sm:$0xf] }
  0x75   : > { %v918_v49 = vrot.slane %v917_v33, 4  ;;  %v930_v54 = vshll.u32 %v753_v26, 16  ;;  %v630_v55 = vsel %vm7923_vm9, %v369_v35, %v629_v28  ;;  %v374_v50 = vrot.slane %v372_v48, 7  ;;  %v640_v19 = vld [vmem:[#allocation2 + $0x68] sm:$0x1] }
  0x76   : > { %v928_v62 = vrot.slane %v927_v47, 4  ;;  %631 = vst [vmem:[#allocation2 + $0x54] sm:$0xf] %v630_v55  ;;  %v381_v56 = vshrl.u32 %v240_v37, 16  ;;  %v384_v25 = vshll.u32 %v240_v37, 16  ;;  %v2806_v60 = vrot.slane %v2804_v46, 5 }
  0x77   : > { %v923_v3 = vsel %vm7909_vm6, %v918_v49, %v922_v23  ;;  %v932_v5 = vrot.slane %v930_v54, 5  ;;  %v389_v8 = vshrl.u32 %v241_v38, 16  ;;  %v377_v21 = vor.u32 %v375_v36, %v374_v50 }
  0x78   : > { %v379_v42 = vrot.slane %v374_v50, 4  ;;  %v383_v31 = vrot.slane %v381_v56, 7  ;;  %v392_v44 = vshll.u32 %v241_v38, 16  ;;  %v2807_v9 = vsel %vm7909_vm6, %v2802_v32, %v2806_v60 }
  0x79   : > { %v933_v20 = vsel %vm7909_vm6, %v928_v62, %v932_v5  ;;  %v391_v10 = vrot.slane %v389_v8, 7  ;;  %v6481_v61 = vrot.slane %v3370_v2, 9  ;;  %v6462_v15 = vcombine.low %v2797_v40, %v2807_v9  ;;  %v643_v8 = vld [vmem:[#allocation2 + $0x6c] sm:$0xf] }
  0x7a   : > { %v6303_v16 = vcombine.low %v923_v3, %v933_v20  ;;  %v378_v17 = vsel %vm7918_vm8, %v370_v4, %v377_v21  ;;  %v634_v18 = vsel %vm7932_vm10, %v379_v42, %v633_v7  ;;  %v386_v22 = vor.u32 %v384_v25, %v383_v31 }
  0x7b   : > { %632 = vst [vmem:[#allocation2 + $0x58] sm:$0xf] %v378_v17  ;;  %635 = vst [vmem:[#allocation2 + $0x5c] sm:$0x1] %v634_v18  ;;  %v387_v23 = vrot.slane %v383_v31, 4  ;;  %v394_v24 = vor.u32 %v392_v44, %v391_v10  ;;  %v396_v28 = vrot.slane %v391_v10, 4  ;;  %7119 = vmatmul.mubr.bf16.gmra.mrb[8].mxu0 %v6462_v15 }
  0x7c   : > { %6930 = vmatprep.mubr.bf16.mxu1 %v6303_v16  ;;  %v3436_v32 = vrot.slane %v7971_v27, 5  ;;  %v398_v33 = vshrl.u32 %v242_v13, 16  ;;  %v401_v35 = vshll.u32 %v242_v13, 16  ;;  %v406_v37 = vshrl.u32 %v243_v14, 16 }
  0x7d   : > { %v2634_v38 = vld [vmem:[#allocation2 + $0x54] sm:$0xf]  ;;  %v395_v4 = vsel %vm7918_vm8, %v387_v23, %v394_v24  ;;  %v637_v26 = vsel %vm7923_vm9, %v386_v22, %v636_v6  ;;  %v641_v47 = vsel %vm7932_vm10, %v396_v28, %v640_v19  ;;  %v409_v48 = vshll.u32 %v243_v14, 16 }
  0x7e   : > { %v713_v40 = vld [vmem:[#allocation2 + $0x54] sm:$0xf]  ;;  %v2809_v36 = vshrl.u32 %v2634_v38, 16  ;;  %v2812_v46 = vshll.u32 %v2634_v38, 16  ;;  %638 = vst [vmem:[#allocation2 + $0x60] sm:$0xf] %v637_v26  ;;  %v8207_v27 = vsel %vm8039_vm13, %v6481_v61, %v3436_v32 }
  0x7f   : > { %v935_v49 = vshrl.u32 %v713_v40, 16  ;;  %v938_v54 = vshll.u32 %v713_v40, 16  ;;  %639 = vst [vmem:[#allocation2 + $0x64] sm:$0xf] %v395_v4  ;;  %642 = vst [vmem:[#allocation2 + $0x68] sm:$0x1] %v641_v47 }
  0x80   : > { %v3438_v55 = vrot.slane %v3436_v32, 4  ;;  %v400_v62 = vrot.slane %v398_v33, 7  ;;  %v8209_v50 = vrot.slane %v406_v37, 7  ;;  %v2811_v56 = vrot.slane %v2809_v36, 4 }
  0x81   : > { %v2814_v25 = vrot.slane %v2812_v46, 5  ;;  %v937_v2 = vrot.slane %v935_v49, 4  ;;  %v940_v60 = vrot.slane %v938_v54, 5  ;;  %vm6060_vm5 = vcmask 1044484  }
  0x82   : > { %v8215_v3 = vsel %vm8039_vm13, %v3438_v55, %v3439_v58  ;;  %v403_v5 = vor.u32 %v401_v35, %v400_v62  ;;  %v404_v7 = vrot.slane %v400_v62, 4  ;;  %v8217_v21 = vld [vmem:[#allocation2 + $0x58] sm:$0xf]  ;;  %v8219_v42 = vld [vmem:[#allocation2 + $0x5c] sm:$0x1]  ;;  %v411_v20 = vor.u32 %v409_v48, %v8209_v50 }
  0x83   : > { %v2815_v31 = vor.u32 %v2814_v25, %v2811_v56  ;;  %v714_v44 = vld [vmem:[#allocation2 + $0x58] sm:$0xf]  ;;  %v941_v6 = vor.u32 %v940_v60, %v937_v2  ;;  %v6513_v9 = vcombine.low %v8207_v27, %v8215_v3  ;;  %v2818_v30 = vshll.u32 %v8217_v21, 16  ;;  %v754_v61 = vld [vmem:[#allocation2 + $0x5c] sm:$0x1] }
  0x84   : > { %v2822_v58 = vshrl.u32 %v8217_v21, 16  ;;  %v2828_v10 = vshll.u32 %v8219_v42, 16  ;;  %v944_v13 = vshll.u32 %v714_v44, 16  ;;  %v948_v16 = vshrl.u32 %v714_v44, 16 }
  0x85   : > { %v2816_v14 = vrot.slane %v2815_v31, 4  ;;  %v942_v15 = vrot.slane %v941_v6, 4  ;;  %v954_v17 = vshll.u32 %v754_v61, 16  ;;  %v2820_v18 = vrot.slane %v2818_v30, 5  ;;  %v2637_v24 = vld [vmem:[#allocation2 + $0x60] sm:$0xf] }
  0x86   : > { %v2824_v19 = vrot.slane %v2822_v58, 4  ;;  %v2830_v22 = vrot.slane %v2828_v10, 5  ;;  %v946_v23 = vrot.slane %v944_v13, 5  ;;  %v950_v28 = vrot.slane %v948_v16, 4  ;;  %v8227_v33 = vld [vmem:[#allocation2 + $0x64] sm:$0xf] }
  0x87   : > { %v956_v32 = vrot.slane %v954_v17, 5  ;;  %v8229_v35 = vld [vmem:[#allocation2 + $0x68] sm:$0x1]  ;;  %v412_v37 = vsel %vm7918_vm8, %v404_v7, %v411_v20  ;;  %v644_v38 = vsel %vm7923_vm9, %v403_v5, %v643_v8  ;;  %v2821_v40 = vsel %vm7909_vm6, %v2816_v14, %v2820_v18  ;;  %v715_v48 = vld [vmem:[#allocation2 + $0x60] sm:$0xf] }
  0x88   : > { %v2825_v4 = vor.u32 %v2824_v19, %v2820_v18  ;;  %v947_v26 = vsel %vm7909_vm6, %v942_v15, %v946_v23  ;;  %v2833_v47 = vshrl.u32 %v2637_v24, 16  ;;  %645 = vst [vmem:[#allocation2 + $0x6c] sm:$0xf] %v644_v38  ;;  %646 = vst [vmem:[#allocation2 + $0x70] sm:$0xf] %v412_v37  ;;  %v951_v36 = vor.u32 %v950_v28, %v946_v23 }
  0x89   : > { %v2836_v46 = vshll.u32 %v2637_v24, 16  ;;  %v2842_v49 = vshll.u32 %v8227_v33, 16  ;;  %v2846_v54 = vshrl.u32 %v8227_v33, 16  ;;  %v2852_v56 = vshll.u32 %v8229_v35, 16  ;;  %v716_v25 = vld [vmem:[#allocation2 + $0x64] sm:$0xf] }
  0x8a   : > { %v2826_v55 = vrot.slane %v2825_v4, 4  ;;  %v2835_v62 = vrot.slane %v2833_v47, 4  ;;  %v959_v2 = vshrl.u32 %v715_v48, 16  ;;  %v952_v60 = vrot.slane %v951_v36, 4  ;;  %v755_v31 = vld [vmem:[#allocation2 + $0x68] sm:$0x1] }
  0x8b   : > { %v2838_v5 = vrot.slane %v2836_v46, 5  ;;  %v2844_v7 = vrot.slane %v2842_v49, 5  ;;  %v2848_v8 = vrot.slane %v2846_v54, 4  ;;  %v2854_v6 = vrot.slane %v2852_v56, 5  ;;  %v647_v14 = vld [vmem:[#allocation2 + $0x74] sm:$0x1] }
  0x8c   : > { %v2831_v44 = vsel %vm7909_vm6, %v2826_v55, %v2830_v22  ;;  %v961_v20 = vrot.slane %v959_v2, 4  ;;  %v962_v30 = vshll.u32 %v715_v48, 16  ;;  %v957_v10 = vsel %vm7909_vm6, %v952_v60, %v956_v32  ;;  %v3371_v19 = vld [vmem:[#allocation2 + $0x18] sm:$0xe]  ;;  %v244_v49 = vld [vmem:[%s7891_s14 + $0x48] sm:$0xf] }
  0x8d   : > { %v6463_v58 = vcombine.low %v2821_v40, %v2831_v44  ;;  %v2839_v61 = vor.u32 %v2838_v5, %v2835_v62  ;;  %v2849_v13 = vor.u32 %v2848_v8, %v2844_v7  ;;  %v6304_v15 = vcombine.low %v947_v26, %v957_v10  ;;  %v245_v54 = vld [vmem:[%s7891_s14 + $0x4c] sm:$0xf]  ;;  %v3372_v8 = vld [vmem:[#allocation2 + $0x24] sm:$0xe] }
  0x8e   : > { %v964_v16 = vrot.slane %v962_v30, 5  ;;  %v968_v17 = vshll.u32 %v716_v25, 16  ;;  %v972_v18 = vshrl.u32 %v716_v25, 16  ;;  %v978_v24 = vshll.u32 %v755_v31, 16 }
  0x8f   : > { %7122 = vmatprep.mubr.bf16.mxu0 %v6463_v58  ;;  %v2840_v23 = vrot.slane %v2839_v61, 4  ;;  %v2850_v22 = vrot.slane %v2849_v13, 4  ;;  %v413_v28 = vrot.slane %v8209_v50, 4  ;;  %v717_v37 = vld [vmem:[#allocation2 + $0x6c] sm:$0xf]  ;;  %6931 = vmatmul.mubr.bf16.gmra.mrb[12].mxu1 %v6304_v15  ;;  %v6482_v5 = vrot.slane %v3371_v19, 9 }
  0x90   : > { %v965_v38 = vor.u32 %v964_v16, %v961_v20  ;;  %v970_v32 = vrot.slane %v968_v17, 5  ;;  %v974_v40 = vrot.slane %v972_v18, 4  ;;  %v718_v4 = vld [vmem:[#allocation2 + $0x70] sm:$0xf]  ;;  %v983_v47 = vshrl.u32 %v717_v37, 16 }
  0x91   : > { %v2845_v26 = vsel %vm7909_vm6, %v2840_v23, %v2844_v7  ;;  %v2855_v48 = vsel %vm7909_vm6, %v2850_v22, %v2854_v6  ;;  %v980_v36 = vrot.slane %v978_v24, 5  ;;  %v648_v46 = vsel %vm7932_vm10, %v413_v28, %v647_v14  ;;  %v650_v61 = vld [vmem:[#allocation2 + $0x78] sm:$0xf]  ;;  %v246_v17 = vld [vmem:[%s7891_s14 + $0x50] sm:$0xf]  ;;  %v7646_v28 = vld [vmem:[%s10016_s1 + $0x188] sm:$0xff]  }
  0x92   : > { %v6464_v50 = vcombine.low %v2845_v26, %v2855_v48  ;;  %v966_v55 = vrot.slane %v965_v38, 4  ;;  %v975_v62 = vor.u32 %v974_v40, %v970_v32  ;;  %649 = vst [vmem:[#allocation2 + $0x74] sm:$0x1] %v648_v46  ;;  %v985_v56 = vrot.slane %v983_v47, 4  ;;  %v654_v19 = vld [vmem:[#allocation2 + $0x80] sm:$0x1] }
  0x93   : > { %v986_v25 = vshll.u32 %v717_v37, 16  ;;  %v992_v2 = vshll.u32 %v718_v4, 16  ;;  %v996_v60 = vshrl.u32 %v718_v4, 16  ;;  %v415_v44 = vshrl.u32 %v244_v49, 16  ;;  %v3373_v46 = vld [vmem:[#allocation2 + $0x30] sm:$0xe] }
  0x94   : > { %7123 = vmatmul.mubr.bf16.gmra.mrb[12].mxu0 %v6464_v50  ;;  %v971_v7 = vsel %vm7909_vm6, %v966_v55, %v970_v32  ;;  %v976_v31 = vrot.slane %v975_v62, 4  ;;  %v418_v6 = vshll.u32 %v244_v49, 16  ;;  %v3444_v10 = vsel %vm8039_vm13, %v6482_v5, %v3443_v29  ;;  %v247_v29 = vld [vmem:[%s7891_s14 + $0x54] sm:$0xf]  ;;  %v7735_v32 = vld [vmem:[#allocation2 + $0x28] sm:$0xf] }
  0x95   : > { %7158 = vmatprep.mubr.bf16.mxu0 %v6513_v9  ;;  %v988_v20 = vrot.slane %v986_v25, 5  ;;  %v994_v30 = vrot.slane %v992_v2, 5  ;;  %v998_v58 = vrot.slane %v996_v60, 4  ;;  %v6514_v14 = vcombine.low %v3444_v10, %v8062_v0  ;;  %v657_v2 = vld [vmem:[#allocation2 + $0x84] sm:$0xf] }
  0x96   : > { %v981_v13 = vsel %vm7909_vm6, %v976_v31, %v980_v36  ;;  %v417_v15 = vrot.slane %v415_v44, 7  ;;  %v423_v16 = vshrl.u32 %v245_v54, 16  ;;  %v426_v18 = vshll.u32 %v245_v54, 16  ;;  %v248_v31 = vld [vmem:[%s7891_s14 + $0x58] sm:$0xf]  ;;  %v7648_v44 = vld [vmem:[%s10016_s1 + $0x190] sm:$0xff]  }
  0x97   : > { %v6305_v27 = vcombine.low %v971_v7, %v981_v13  ;;  %v989_v3 = vor.u32 %v988_v20, %v985_v56  ;;  %v999_v9 = vor.u32 %v998_v58, %v994_v30  ;;  %v6483_v24 = vrot.slane %v3372_v8, 9  ;;  %v249_v10 = vld [vmem:[%s7891_s14 + $0x5c] sm:$0xf] }
  0x98   : > { %v420_v23 = vor.u32 %v418_v6, %v417_v15  ;;  %v421_v63 = vrot.slane %v417_v15, 4  ;;  %v425_v22 = vrot.slane %v423_v16, 7  ;;  %v3450_v40 = vrot.slane %v7735_v32, 5 }
  0x99   : > { %6934 = vmatprep.mubr.bf16.mxu1 %v6305_v27  ;;  %v756_v37 = vld [vmem:[#allocation2 + $0x74] sm:$0x1]  ;;  %v990_v0 = vrot.slane %v989_v3, 4  ;;  %v1000_v38 = vrot.slane %v999_v9, 4  ;;  %v3453_v4 = vrot.slane %v8053_v59, 5  ;;  %v432_v55 = vshrl.u32 %v246_v17, 16 }
  0x9a   : > { %v1002_v47 = vshll.u32 %v756_v37, 16  ;;  %v428_v26 = vor.u32 %v426_v18, %v425_v22  ;;  %v430_v48 = vrot.slane %v425_v22, 4  ;;  %v651_v36 = vsel %vm7923_vm9, %v420_v23, %v650_v61  ;;  %v664_v23 = vld [vmem:[#allocation2 + $0x90] sm:$0xf] }
  0x9b   : > { %v995_v49 = vsel %vm7909_vm6, %v990_v0, %v994_v30  ;;  %652 = vst [vmem:[#allocation2 + $0x78] sm:$0xf] %v651_v36  ;;  %v3451_v54 = vsel %vm8039_vm13, %v6483_v24, %v3450_v40  ;;  %v3452_v50 = vrot.slane %v3450_v40, 4  ;;  %v435_v25 = vshll.u32 %v246_v17, 16  ;;  %v661_v30 = vld [vmem:[#allocation2 + $0x8c] sm:$0x1] }
  0x9c   : > { %v1004_v62 = vrot.slane %v1002_v47, 5  ;;  %7159 = vmatmul.mubr.bf16.vlgmr.msra.gmra.mrb[0].mxu0 %v6514_v14  ;;  %v429_v59 = vsel %vm7918_vm8, %v421_v63, %v428_v26  ;;  %v655_v56 = vsel %vm7932_vm10, %v430_v48, %v654_v19  ;;  %v434_v5 = vrot.slane %v432_v55, 7  ;;  %v3374_v40 = vld [vmem:[#allocation2 + $0x3c] sm:$0xe] }
  0x9d   : > { %7191 = vmatpush3.bf16.msra.mxu0 %v8145_v1  ;;  %653 = vst [vmem:[#allocation2 + $0x7c] sm:$0xf] %v429_v59  ;;  %656 = vst [vmem:[#allocation2 + $0x80] sm:$0x1] %v655_v56  ;;  %v3454_v60 = vsel %vm8039_vm13, %v3452_v50, %v3453_v4  ;;  %v440_v8 = vshrl.u32 %v247_v29, 16  ;;  %v443_v7 = vshll.u32 %v247_v29, 16 }
  0x9e   : > { %v1005_v6 = vsel %vm7909_vm6, %v1000_v38, %v1004_v62  ;;  %v6515_v20 = vcombine.low %v3451_v54, %v3454_v60  ;;  %v6484_v58 = vrot.slane %v3373_v46, 9  ;;  %v3457_v1 = vrot.slane %v8119_v11, 5  ;;  %7192 = vmatprep.subr.bf16.mxu0 %v7646_v28  ;;  %v668_v59 = vld [vmem:[#allocation2 + $0x98] sm:$0x1] }
  0x9f   : > { %v6306_v61 = vcombine.low %v995_v49, %v1005_v6  ;;  %v437_v13 = vor.u32 %v435_v25, %v434_v5  ;;  %v438_v14 = vrot.slane %v434_v5, 4  ;;  %v442_v15 = vrot.slane %v440_v8, 7  ;;  %v7654_v49 = vld [vmem:[%s10016_s1 + $0x1a0] sm:$0xff]  }
  0xa0   : > { %7162 = vmatprep.mubr.bf16.mxu0 %v6515_v20  ;;  %v3458_v16 = vsel %vm8039_vm13, %v6484_v58, %v3457_v1  ;;  %v3459_v17 = vrot.slane %v3457_v1, 4  ;;  %v3460_v27 = vrot.slane %v8121_v12, 5  ;;  %v449_v3 = vshrl.u32 %v248_v31, 16  ;;  %v7650_v12 = vld [vmem:[%s10016_s1 + $0x198] sm:$0xff]   ;;  %v250_v5 = vld [vmem:[%s7891_s14 + $0x60] sm:$0xf] }
  0xa1   : > { %6935 = vmatmul.mubr.bf16.gmra.mrb[16].mxu1 %v6306_v61  ;;  %v445_v9 = vor.u32 %v443_v7, %v442_v15  ;;  %v447_v18 = vrot.slane %v442_v15, 4  ;;  %v658_v11 = vsel %vm7923_vm9, %v437_v13, %v657_v2  ;;  %7193 = vmatpush3.bf16.msra.mxu0 %v7646_v28  ;;  %v452_v19 = vshll.u32 %v248_v31, 16 }
  0xa2   : > { %v719_v63 = vld [vmem:[#allocation2 + $0x78] sm:$0xf]  ;;  %659 = vst [vmem:[#allocation2 + $0x84] sm:$0xf] %v658_v11  ;;  %v3461_v22 = vsel %vm8039_vm13, %v3459_v17, %v3460_v27  ;;  %v451_v24 = vrot.slane %v449_v3, 7  ;;  %v457_v29 = vshrl.u32 %v249_v10, 16  ;;  %7194 = vmatprep.subr.bf16.mxu0 %v7648_v44 }
  0xa3   : > { %v460_v37 = vshll.u32 %v249_v10, 16  ;;  %v1007_v0 = vshrl.u32 %v719_v63, 16  ;;  %v1010_v38 = vshll.u32 %v719_v63, 16  ;;  %v446_v28 = vsel %vm7918_vm8, %v438_v14, %v445_v9 }
  0xa4   : > { %v662_v32 = vsel %vm7932_vm10, %v447_v18, %v661_v30  ;;  %v8308_v4 = vld [vmem:[#allocation2 + $0x7c] sm:$0xf]  ;;  %v757_v47 = vld [vmem:[#allocation2 + $0x80] sm:$0x1]  ;;  %660 = vst [vmem:[#allocation2 + $0x88] sm:$0xf] %v446_v28  ;;  %v6516_v26 = vcombine.low %v3458_v16, %v3461_v22  ;;  %v454_v48 = vor.u32 %v452_v19, %v451_v24 }
  0xa5   : > { %663 = vst [vmem:[#allocation2 + $0x8c] sm:$0x1] %v662_v32  ;;  %v455_v36 = vrot.slane %v451_v24, 4  ;;  %v459_v46 = vrot.slane %v457_v29, 7  ;;  %v1009_v54 = vrot.slane %v1007_v0, 4  ;;  %v1012_v50 = vrot.slane %v1010_v38, 5  ;;  %7195 = vmatpush3.bf16.msra.mxu0 %v7648_v44 }
  0xa6   : > { %v1016_v55 = vshll.u32 %v8308_v4, 16  ;;  %v1020_v62 = vshrl.u32 %v8308_v4, 16  ;;  %v1026_v56 = vshll.u32 %v757_v47, 16  ;;  %7163 = vmatmul.mubr.bf16.gmra.mrb[4].mxu0 %v6516_v26  ;;  %v665_v60 = vsel %vm7923_vm9, %v454_v48, %v664_v23  ;;  %7196 = vmatprep.subr.bf16.mxu0 %v7650_v12  ;;  %v7662_v0 = vld [vmem:[%s10016_s1 + $0x1b0] sm:$0xff]   ;;  %v251_v26 = vld [vmem:[%s7891_s14 + $0x64] sm:$0xf] }
  0xa7   : > { %v462_v25 = vor.u32 %v460_v37, %v459_v46  ;;  %v464_v2 = vrot.slane %v459_v46, 4  ;;  %v1013_v8 = vor.u32 %v1012_v50, %v1009_v54  ;;  %666 = vst [vmem:[#allocation2 + $0x90] sm:$0xf] %v665_v60  ;;  %v6485_v6 = vrot.slane %v3374_v40, 9  ;;  %v671_v50 = vld [vmem:[#allocation2 + $0x9c] sm:$0xf] }
  0xa8   : > { %v1018_v7 = vrot.slane %v1016_v55, 5  ;;  %v1022_v31 = vrot.slane %v1020_v62, 4  ;;  %v1028_v20 = vrot.slane %v1026_v56, 5  ;;  %v3464_v58 = vrot.slane %v8136_v57, 5  ;;  %v7658_v57 = vld [vmem:[%s10016_s1 + $0x1a8] sm:$0xff]  }
  0xa9   : > { %v463_v30 = vsel %vm7918_vm8, %v455_v36, %v462_v25  ;;  %v669_v44 = vsel %vm7932_vm10, %v464_v2, %v668_v59  ;;  %v1014_v1 = vrot.slane %v1013_v8, 4  ;;  %v8323_v61 = vld [vmem:[#allocation2 + $0x84] sm:$0xf]  ;;  %v3467_v13 = vrot.slane %v8138_v52, 5  ;;  %7197 = vmatpush3.bf16.msra.mxu0 %v7650_v12 }
  0xaa   : > { %v1023_v10 = vor.u32 %v1022_v31, %v1018_v7  ;;  %667 = vst [vmem:[#allocation2 + $0x94] sm:$0xf] %v463_v30  ;;  %670 = vst [vmem:[#allocation2 + $0x98] sm:$0x1] %v669_v44  ;;  %v466_v14 = vshrl.u32 %v250_v5, 16  ;;  %v1031_v15 = vshrl.u32 %v8323_v61, 16  ;;  %7198 = vmatprep.subr.bf16.mxu0 %v7654_v49  ;;  %v3465_v52 = vsel %vm8039_vm13, %v6485_v6, %v3464_v58 }
  0xab   : > { %v1034_v16 = vshll.u32 %v8323_v61, 16  ;;  %v3466_v17 = vrot.slane %v3464_v58, 4  ;;  %v1019_v27 = vsel %vm7909_vm6, %v1014_v1, %v1018_v7  ;;  %v8333_v9 = vld [vmem:[#allocation2 + $0x88] sm:$0xf]  ;;  %v469_v12 = vshll.u32 %v250_v5, 16  ;;  %v7666_v58 = vld [vmem:[%s10016_s1 + $0x1b8] sm:$0xff]  }
  0xac   : > { %v1024_v3 = vrot.slane %v1023_v10, 4  ;;  %v758_v18 = vld [vmem:[#allocation2 + $0x8c] sm:$0x1]  ;;  %v8337_v11 = vrot.slane %v466_v14, 7  ;;  %v1033_v19 = vrot.slane %v1031_v15, 4  ;;  %v1040_v63 = vshll.u32 %v8333_v9, 16 }
  0xad   : > { %v1036_v23 = vrot.slane %v1034_v16, 5  ;;  %v1044_v22 = vshrl.u32 %v8333_v9, 16  ;;  %v1050_v29 = vshll.u32 %v758_v18, 16  ;;  %v3468_v37 = vsel %vm8039_vm13, %v3466_v17, %v3467_v13  ;;  %7199 = vmatpush3.bf16.msra.mxu0 %v7654_v49  ;;  %v3375_v7 = vld [vmem:[#allocation2 + $0x48] sm:$0xe] }
  0xae   : > { %v1029_v24 = vsel %vm7909_vm6, %v1024_v3, %v1028_v20  ;;  %v1042_v32 = vrot.slane %v1040_v63, 5  ;;  %v8348_v47 = vld [vmem:[#allocation2 + $0x90] sm:$0xf]  ;;  %7200 = vmatprep.subr.bf16.mxu0 %v7658_v57  ;;  %v6517_v54 = vcombine.low %v3465_v52, %v3468_v37  ;;  %v471_v56 = vor.u32 %v469_v12, %v8337_v11  ;;  %v252_v44 = vld [vmem:[%s7891_s14 + $0x68] sm:$0xf]  ;;  %v8375_v37 = vld [vmem:[%s10016_s1 + $0x1c0] sm:$0xff]  }
  0xaf   : > { %v6307_v38 = vcombine.low %v1019_v27, %v1029_v24  ;;  %v1037_v28 = vor.u32 %v1036_v23, %v1033_v19  ;;  %v1046_v40 = vrot.slane %v1044_v22, 4  ;;  %v1052_v48 = vrot.slane %v1050_v29, 5  ;;  %v675_v15 = vld [vmem:[#allocation2 + $0xa4] sm:$0x1]  ;;  %v253_v3 = vld [vmem:[%s7891_s14 + $0x6c] sm:$0xf] }
  0xb0   : > { %v1055_v36 = vshrl.u32 %v8348_v47, 16  ;;  %v1058_v46 = vshll.u32 %v8348_v47, 16  ;;  %v472_v25 = vrot.slane %v8337_v11, 4  ;;  %7166 = vmatprep.mubr.bf16.mxu0 %v6517_v54  ;;  %v474_v30 = vshrl.u32 %v251_v26, 16  ;;  %v3376_v23 = vld [vmem:[#allocation2 + $0x54] sm:$0xe] }
  0xb1   : > { %6938 = vmatprep.mubr.bf16.mxu1 %v6307_v38  ;;  %v1038_v49 = vrot.slane %v1037_v28, 4  ;;  %v1047_v55 = vor.u32 %v1046_v40, %v1042_v32  ;;  %v8353_v62 = vld [vmem:[#allocation2 + $0x94] sm:$0xf]  ;;  %v759_v59 = vld [vmem:[#allocation2 + $0x98] sm:$0x1]  ;;  %7201 = vmatpush3.bf16.msra.mxu0 %v7658_v57  ;;  %v477_v14 = vshll.u32 %v251_v26, 16  ;;  %v672_v27 = vsel %vm7923_vm9, %v471_v56, %v671_v50 }
  0xb2   : > { %v1057_v2 = vrot.slane %v1055_v36, 4  ;;  %v1060_v60 = vrot.slane %v1058_v46, 5  ;;  %v1064_v5 = vshll.u32 %v8353_v62, 16  ;;  %v1068_v8 = vshrl.u32 %v8353_v62, 16  ;;  %7202 = vmatprep.subr.bf16.mxu0 %v7662_v0  ;;  %673 = vst [vmem:[#allocation2 + $0x9c] sm:$0xf] %v672_v27 }
  0xb3   : > { %v1043_v31 = vsel %vm7909_vm6, %v1038_v49, %v1042_v32  ;;  %v1048_v6 = vrot.slane %v1047_v55, 4  ;;  %v1074_v20 = vshll.u32 %v759_v59, 16  ;;  %v476_v57 = vrot.slane %v474_v30, 7  ;;  %v678_v50 = vld [vmem:[#allocation2 + $0xa8] sm:$0xf] }
  0xb4   : > { %v1061_v1 = vor.u32 %v1060_v60, %v1057_v2  ;;  %v1066_v10 = vrot.slane %v1064_v5, 5  ;;  %v1070_v13 = vrot.slane %v1068_v8, 4  ;;  %v6486_v19 = vrot.slane %v3375_v7, 9  ;;  %v682_v59 = vld [vmem:[#allocation2 + $0xb0] sm:$0x1] }
  0xb5   : > { %v1053_v16 = vsel %vm7909_vm6, %v1048_v6, %v1052_v48  ;;  %v1076_v17 = vrot.slane %v1074_v20, 5  ;;  %7203 = vmatpush3.bf16.msra.mxu0 %v7662_v0  ;;  %v479_v63 = vor.u32 %v477_v14, %v476_v57  ;;  %v481_v22 = vrot.slane %v476_v57, 4  ;;  %v254_v0 = vld [vmem:[%s7891_s14 + $0x70] sm:$0xf]  ;;  %v255_v7 = vld [vmem:[%s7891_s14 + $0x74] sm:$0xf] }
  0xb6   : > { %v6308_v18 = vcombine.low %v1043_v31, %v1053_v16  ;;  %v1062_v52 = vrot.slane %v1061_v1, 4  ;;  %v1071_v11 = vor.u32 %v1070_v13, %v1066_v10  ;;  %v3471_v24 = vrot.slane %v8161_v53, 5  ;;  %7204 = vmatprep.subr.bf16.mxu0 %v7666_v58  ;;  %v685_v13 = vld [vmem:[#allocation2 + $0xb4] sm:$0xf]  ;;  %v3377_v57 = vld [vmem:[#allocation2 + $0x60] sm:$0xe] }
  0xb7   : > { %v3474_v29 = vrot.slane %v8179_v39, 5  ;;  %v483_v28 = vshrl.u32 %v252_v44, 16  ;;  %v486_v32 = vshll.u32 %v252_v44, 16  ;;  %v480_v40 = vsel %vm7918_vm8, %v472_v25, %v479_v63 }
  0xb8   : > { %6939 = vmatmul.mubr.bf16.gmra.mrb[20].mxu1 %v6308_v18  ;;  %v1067_v12 = vsel %vm7909_vm6, %v1062_v52, %v1066_v10  ;;  %v1072_v38 = vrot.slane %v1071_v11, 4  ;;  %v676_v53 = vsel %vm7932_vm10, %v481_v22, %v675_v15  ;;  %v3472_v39 = vsel %vm8039_vm13, %v6486_v19, %v3471_v24  ;;  %674 = vst [vmem:[#allocation2 + $0xa0] sm:$0xf] %v480_v40 }
  0xb9   : > { %v3473_v26 = vrot.slane %v3471_v24, 4  ;;  %677 = vst [vmem:[#allocation2 + $0xa4] sm:$0x1] %v676_v53  ;;  %v485_v36 = vrot.slane %v483_v28, 7  ;;  %v491_v46 = vshrl.u32 %v253_v3, 16  ;;  %v494_v54 = vshll.u32 %v253_v3, 16  ;;  %7205 = vmatpush3.bf16.msra.mxu0 %v7666_v58 }
  0xba   : > { %v1077_v48 = vsel %vm7909_vm6, %v1072_v38, %v1076_v17  ;;  %v6487_v56 = vrot.slane %v3376_v23, 9  ;;  %v3478_v25 = vrot.slane %v8217_v21, 5  ;;  %7238 = vmatprep.subr.bf16.mxu0 %v8375_v37  ;;  %v8393_v31 = vld [vmem:[#allocation2 + $0x9c] sm:$0xf]  ;;  %v3481_v30 = vrot.slane %v8219_v42, 5 }
  0xbb   : > { %v6309_v49 = vcombine.low %v1067_v12, %v1077_v48  ;;  %v3475_v55 = vsel %vm8039_vm13, %v3473_v26, %v3474_v29  ;;  %v488_v60 = vor.u32 %v486_v32, %v485_v36  ;;  %v489_v5 = vrot.slane %v485_v36, 4  ;;  %v689_v38 = vld [vmem:[#allocation2 + $0xbc] sm:$0x1]  ;;  %v2641_v28 = vld [vmem:[#allocation2 + $0x70] sm:$0xf] }
  0xbc   : > { %v6518_v2 = vcombine.low %v3472_v39, %v3475_v55  ;;  %v493_v8 = vrot.slane %v491_v46, 7  ;;  %v3479_v6 = vsel %vm8039_vm13, %v6487_v56, %v3478_v25  ;;  %v3480_v20 = vrot.slane %v3478_v25, 4  ;;  %v3378_v39 = vld [vmem:[#allocation2 + $0x6c] sm:$0xe] }
  0xbd   : > { %6942 = vmatprep.mubr.bf16.mxu1 %v6309_v49  ;;  %v500_v44 = vshrl.u32 %v254_v0, 16  ;;  %v1079_v58 = vshrl.u32 %v8393_v31, 16  ;;  %v1082_v21 = vshll.u32 %v8393_v31, 16  ;;  %v679_v14 = vsel %vm7923_vm9, %v488_v60, %v678_v50 }
  0xbe   : > { %7167 = vmatmul.mubr.bf16.gmra.mrb[8].mxu0 %v6518_v2  ;;  %v496_v1 = vor.u32 %v494_v54, %v493_v8  ;;  %v498_v10 = vrot.slane %v493_v8, 4  ;;  %v3482_v15 = vsel %vm8039_vm13, %v3480_v20, %v3481_v30  ;;  %v503_v17 = vshll.u32 %v254_v0, 16  ;;  %680 = vst [vmem:[#allocation2 + $0xa8] sm:$0xf] %v679_v14 }
  0xbf   : > { %v502_v16 = vrot.slane %v500_v44, 7  ;;  %v1081_v27 = vrot.slane %v1079_v58, 4  ;;  %v1084_v42 = vrot.slane %v1082_v21, 5  ;;  %v8408_v52 = vld [vmem:[#allocation2 + $0xa0] sm:$0xf]  ;;  %v6519_v19 = vcombine.low %v3479_v6, %v3482_v15 }
  0xc0   : > { %v497_v3 = vsel %vm7918_vm8, %v489_v5, %v496_v1  ;;  %v683_v18 = vsel %vm7932_vm10, %v498_v10, %v682_v59  ;;  %v760_v11 = vld [vmem:[#allocation2 + $0xa4] sm:$0x1]  ;;  %v508_v63 = vshrl.u32 %v255_v7, 16  ;;  %v1088_v24 = vshll.u32 %v8408_v52, 16 }
  0xc1   : > { %681 = vst [vmem:[#allocation2 + $0xac] sm:$0xf] %v497_v3  ;;  %684 = vst [vmem:[#allocation2 + $0xb0] sm:$0x1] %v683_v18  ;;  %v505_v23 = vor.u32 %v503_v17, %v502_v16  ;;  %v1085_v22 = vor.u32 %v1084_v42, %v1081_v27  ;;  %v1092_v29 = vshrl.u32 %v8408_v52, 16  ;;  %v1098_v12 = vshll.u32 %v760_v11, 16  ;;  %7170 = vmatprep.mubr.bf16.mxu0 %v6519_v19 }
  0xc2   : > { %v506_v32 = vrot.slane %v502_v16, 4  ;;  %v510_v0 = vrot.slane %v508_v63, 7  ;;  %v511_v40 = vshll.u32 %v255_v7, 16  ;;  %v1090_v48 = vrot.slane %v1088_v24, 5  ;;  %v2642_v16 = vld [vmem:[#allocation2 + $0x74] sm:$0x1] }
  0xc3   : > { %v686_v53 = vsel %vm7923_vm9, %v505_v23, %v685_v13  ;;  %v1086_v26 = vrot.slane %v1085_v22, 4  ;;  %v1094_v36 = vrot.slane %v1092_v29, 4  ;;  %v6488_v46 = vrot.slane %v3377_v57, 9 }
  0xc4   : > { %687 = vst [vmem:[#allocation2 + $0xb4] sm:$0xf] %v686_v53  ;;  %v1100_v54 = vrot.slane %v1098_v12, 5  ;;  %v513_v50 = vor.u32 %v511_v40, %v510_v0  ;;  %v515_v49 = vrot.slane %v510_v0, 4  ;;  %v3485_v55 = vrot.slane %v8227_v33, 5 }
  0xc5   : > { %v1095_v59 = vor.u32 %v1094_v36, %v1090_v48  ;;  %v3488_v56 = vrot.slane %v8229_v35, 5  ;;  %v3492_v25 = vrot.slane %v2641_v28, 5  ;;  %v8416_v2 = vld [vmem:[#allocation2 + $0xa8] sm:$0xf]  ;;  %v6489_v7 = vrot.slane %v3378_v39, 9 }
  0xc6   : > { %v514_v60 = vsel %vm7918_vm8, %v506_v32, %v513_v50  ;;  %v690_v5 = vsel %vm7932_vm10, %v515_v49, %v689_v38  ;;  %v3487_v8 = vrot.slane %v3485_v55, 4  ;;  %v1091_v6 = vsel %vm7909_vm6, %v1086_v26, %v1090_v48  ;;  %v3379_v32 = vld [vmem:[#allocation2 + $0x78] sm:$0xe]  ;;  %v8446_v48 = vld [vmem:[#allocation2 + $0x7c] sm:$0xf] }
  0xc7   : > { %v1096_v20 = vrot.slane %v1095_v59, 4  ;;  %v1103_v35 = vshrl.u32 %v8416_v2, 16  ;;  %688 = vst [vmem:[#allocation2 + $0xb8] sm:$0xf] %v514_v60  ;;  %691 = vst [vmem:[#allocation2 + $0xbc] sm:$0x1] %v690_v5  ;;  %v3486_v44 = vsel %vm8039_vm13, %v6488_v46, %v3485_v55  ;;  %v3493_v28 = vsel %vm8039_vm13, %v6489_v7, %v3492_v25 }
  0xc8   : > { %v8424_v30 = vld [vmem:[#allocation2 + $0xac] sm:$0xf]  ;;  %v761_v33 = vld [vmem:[#allocation2 + $0xb0] sm:$0x1]  ;;  %v1106_v58 = vshll.u32 %v8416_v2, 16  ;;  %v3489_v15 = vsel %vm8039_vm13, %v3487_v8, %v3488_v56  ;;  %v3494_v17 = vrot.slane %v3492_v25, 4 }
  0xc9   : > { %v1112_v21 = vshll.u32 %v8424_v30, 16  ;;  %v1116_v1 = vshrl.u32 %v8424_v30, 16  ;;  %v1122_v10 = vshll.u32 %v761_v33, 16  ;;  %v1101_v13 = vsel %vm7909_vm6, %v1096_v20, %v1100_v54  ;;  %v8448_v36 = vld [vmem:[#allocation2 + $0x80] sm:$0x1] }
  0xca   : > { %v1105_v14 = vrot.slane %v1103_v35, 4  ;;  %v6310_v57 = vcombine.low %v1091_v6, %v1101_v13  ;;  %v1108_v27 = vrot.slane %v1106_v58, 5  ;;  %v6520_v23 = vcombine.low %v3486_v44, %v3489_v15  ;;  %v3380_v55 = vld [vmem:[#allocation2 + $0x84] sm:$0xe]  ;;  %v2647_v60 = vld [vmem:[#allocation2 + $0x88] sm:$0xf] }
  0xcb   : > { %v1114_v42 = vrot.slane %v1112_v21, 5  ;;  %v1118_v3 = vrot.slane %v1116_v1, 4  ;;  %v8436_v18 = vld [vmem:[#allocation2 + $0xb4] sm:$0xf]  ;;  %v1124_v24 = vrot.slane %v1122_v10, 5  ;;  %v3495_v29 = vrot.slane %v2642_v16, 5 }
  0xcc   : > { %v1127_v11 = vshrl.u32 %v8436_v18, 16  ;;  %v1130_v19 = vshll.u32 %v8436_v18, 16  ;;  %6943 = vmatmul.mubr.bf16.gmra.mrb[24].mxu1 %v6310_v57  ;;  %v1109_v63 = vor.u32 %v1108_v27, %v1105_v14  ;;  %7171 = vmatmul.mubr.bf16.gmra.mrb[12].mxu0 %v6520_v23  ;;  %v2648_v5 = vld [vmem:[#allocation2 + $0x8c] sm:$0x1]  ;;  %v2650_v33 = vld [vmem:[#allocation2 + $0x94] sm:$0xf] }
  0xcd   : > { %v1119_v22 = vor.u32 %v1118_v3, %v1114_v42  ;;  %v3496_v26 = vsel %vm8039_vm13, %v3494_v17, %v3495_v29  ;;  %v3381_v35 = vld [vmem:[#allocation2 + $0x90] sm:$0xe]  ;;  %v6490_v58 = vrot.slane %v3379_v32, 9  ;;  %v2651_v21 = vld [vmem:[#allocation2 + $0x98] sm:$0x1]  ;;  %v3499_v13 = vrot.slane %v8446_v48, 5 }
  0xce   : > { %v1129_v12 = vrot.slane %v1127_v11, 4  ;;  %v1132_v38 = vrot.slane %v1130_v19, 5  ;;  %v1110_v0 = vrot.slane %v1109_v63, 4  ;;  %v8442_v53 = vld [vmem:[#allocation2 + $0xb8] sm:$0xf]  ;;  %v6521_v25 = vcombine.low %v3493_v28, %v3496_v26 }
  0xcf   : > { %v1120_v40 = vrot.slane %v1119_v22, 4  ;;  %v762_v39 = vld [vmem:[#allocation2 + $0xbc] sm:$0x1]  ;;  %v1136_v54 = vshll.u32 %v8442_v53, 16  ;;  %v1140_v50 = vshrl.u32 %v8442_v53, 16  ;;  %v3502_v14 = vrot.slane %v8448_v36, 5 }
  0xd0   : > { %v1133_v46 = vor.u32 %v1132_v38, %v1129_v12  ;;  %v1146_v49 = vshll.u32 %v762_v39, 16  ;;  %v1115_v59 = vsel %vm7909_vm6, %v1110_v0, %v1114_v42  ;;  %7174 = vmatprep.mubr.bf16.mxu0 %v6521_v25  ;;  %v3382_v1 = vld [vmem:[#allocation2 + $0x9c] sm:$0xe]  ;;  %v7736_v15 = vld [vmem:[#allocation2] sm:$0xf]  ;;  %v6491_v57 = vrot.slane %v3380_v55, 9 }
  0xd1   : > { %v1125_v56 = vsel %vm7909_vm6, %v1120_v40, %v1124_v24  ;;  %v1138_v6 = vrot.slane %v1136_v54, 5  ;;  %v1142_v20 = vrot.slane %v1140_v50, 4  ;;  %v8458_v16 = vld [vmem:[#allocation2 + $0x4] sm:$0xf]  ;;  %v3506_v27 = vrot.slane %v2647_v60, 5 }
  0xd2   : > { %v6311_v8 = vcombine.low %v1115_v59, %v1125_v56  ;;  %v1134_v7 = vrot.slane %v1133_v46, 4  ;;  %v1148_v44 = vrot.slane %v1146_v49, 5  ;;  %v6321_v17 = vcombine.low %v7736_v15, %v8458_v16  ;;  %v2653_v3 = vld [vmem:[#allocation2 + $0xa0] sm:$0xf]  ;;  %v2654_v22 = vld [vmem:[#allocation2 + $0xa4] sm:$0x1] }
  0xd3   : > { %v1143_v10 = vor.u32 %v1142_v20, %v1138_v6  ;;  %v3509_v42 = vrot.slane %v2648_v5, 5  ;;  %v3500_v23 = vsel %vm8039_vm13, %v6490_v58, %v3499_v13  ;;  %v3501_v63 = vrot.slane %v3499_v13, 4  ;;  %v8465_v24 = vld [vmem:[#allocation2 + $0xac] sm:$0xf]  ;;  %v2657_v26 = vld [vmem:[#allocation2 + $0xb0] sm:$0x1] }
  0xd4   : > { %6946 = vmatprep.mubr.bf16.mxu1 %v6311_v8  ;;  %v1139_v11 = vsel %vm7909_vm6, %v1134_v7, %v1138_v6  ;;  %v3507_v29 = vsel %vm8039_vm13, %v6491_v57, %v3506_v27  ;;  %v3508_v12 = vrot.slane %v3506_v27, 4  ;;  %v6492_v38 = vrot.slane %v3381_v35, 9  ;;  %v3383_v46 = vld [vmem:[#allocation2 + $0xa8] sm:$0xe]  ;;  %v256_v60 = vld [vmem:[%s7891_s14 + $0x78] sm:$0xf] }
  0xd5   : > { %v1144_v19 = vrot.slane %v1143_v10, 4  ;;  %v3513_v28 = vrot.slane %v2650_v33, 5  ;;  %v3503_v0 = vsel %vm8039_vm13, %v3501_v63, %v3502_v14  ;;  %v3516_v40 = vrot.slane %v2651_v21, 5  ;;  %v2659_v8 = vld [vmem:[#allocation2 + $0xb8] sm:$0xf] }
  0xd6   : > { %v6493_v39 = vrot.slane %v3382_v1, 9  ;;  %v6522_v50 = vcombine.low %v3500_v23, %v3503_v0  ;;  %v3510_v49 = vsel %vm8039_vm13, %v3508_v12, %v3509_v42  ;;  %v3520_v56 = vrot.slane %v2653_v3, 5  ;;  %v257_v33 = vld [vmem:[%s7891_s14 + $0x7c] sm:$0xf]  ;;  %v3384_v58 = vld [vmem:[#allocation2 + $0xb4] sm:$0xe] }
  0xd7   : > { %v1149_v32 = vsel %vm7909_vm6, %v1144_v19, %v1148_v44  ;;  %v6523_v55 = vcombine.low %v3507_v29, %v3510_v49  ;;  %v3515_v59 = vrot.slane %v3513_v28, 4  ;;  %v3523_v25 = vrot.slane %v2654_v22, 5  ;;  %v2660_v13 = vld [vmem:[#allocation2 + $0xbc] sm:$0x1]  ;;  %v7738_v15 = vld [vmem:[#allocation2 + $0xc] sm:$0xf] }
  0xd8   : > { %v6312_v54 = vcombine.low %v1139_v11, %v1149_v32  ;;  %7175 = vmatmul.mubr.bf16.gmra.mrb[16].mxu0 %v6522_v50  ;;  %v3527_v5 = vrot.slane %v8465_v24, 5  ;;  %v3514_v7 = vsel %vm8039_vm13, %v6492_v38, %v3513_v28  ;;  %v3522_v20 = vrot.slane %v3520_v56, 4  ;;  %v7740_v11 = vld [vmem:[#allocation2 + $0x18] sm:$0xf]  ;;  %v8489_v19 = vld [vmem:[#allocation2 + $0x1c] sm:$0xf] }
  0xd9   : > { %7178 = vmatprep.mubr.bf16.mxu0 %v6523_v55  ;;  %v3517_v6 = vsel %vm8039_vm13, %v3515_v59, %v3516_v40  ;;  %v6494_v35 = vrot.slane %v3383_v46, 9  ;;  %v3530_v44 = vrot.slane %v2657_v26, 5  ;;  %v3521_v21 = vsel %vm8039_vm13, %v6493_v39, %v3520_v56  ;;  %v692_v24 = vld [vmem:[#allocation2 + $0xc0] sm:$0xf]  ;;  %v7657_v29 = vld [vmem:[%s10016_s1 + $0x88] sm:$0xff]   ;;  %v7661_v56 = vld [vmem:[%s10016_s1 + $0x90] sm:$0xff]  }
  0xda   : > { %6947 = vmatmul.mubr.bf16.gmra.mrb[28].mxu1 %v6312_v54  ;;  %v3524_v1 = vsel %vm8039_vm13, %v3522_v20, %v3523_v25  ;;  %v3529_v10 = vrot.slane %v3527_v5, 4  ;;  %v3534_v14 = vrot.slane %v2659_v8, 5  ;;  %v6524_v27 = vcombine.low %v3514_v7, %v3517_v6  ;;  %v696_v28 = vld [vmem:[#allocation2 + $0xc8] sm:$0x1]  ;;  %v7742_v54 = vld [vmem:[%s10016_s1 + $0x80] sm:$0xff]  }
  0xdb   : > { %6966 = vmatprep.mubr.bf16.mxu1 %v6321_v17  ;;  %v8486_v17 = vld [vmem:[#allocation2 + $0x10] sm:$0xf]  ;;  %v517_v42 = vshrl.u32 %v256_v60, 16  ;;  %v520_v3 = vshll.u32 %v256_v60, 16  ;;  %v6323_v23 = vcombine.low %v7740_v11, %v8489_v19  ;;  %v525_v63 = vshrl.u32 %v257_v33, 16 }
  0xdc   : > { %v6322_v57 = vcombine.low %v7738_v15, %v8486_v17  ;;  %v528_v22 = vshll.u32 %v257_v33, 16  ;;  %v6525_v12 = vcombine.low %v3521_v21, %v3524_v1  ;;  %v6495_v32 = vrot.slane %v3384_v58, 9  ;;  %v7743_v6 = vld [vmem:[#allocation2 + $0x24] sm:$0xf]  ;;  %v8515_v20 = vld [vmem:[#allocation2 + $0x28] sm:$0xf] }
  0xdd   : > { %v519_v38 = vrot.slane %v517_v42, 7  ;;  %v3536_v0 = vrot.slane %v3534_v14, 4  ;;  %v3537_v40 = vrot.slane %v2660_v13, 5  ;;  %v527_v39 = vrot.slane %v525_v63, 7  ;;  %v7670_v1 = vld [vmem:[%s10016_s1 + $0xa0] sm:$0xff]  }
  0xde   : > { %v3528_v50 = vsel %vm8039_vm13, %v6494_v35, %v3527_v5  ;;  %v3531_v49 = vsel %vm8039_vm13, %v3529_v10, %v3530_v44  ;;  %v3535_v60 = vsel %vm8039_vm13, %v6495_v32, %v3534_v14  ;;  %v6324_v33 = vcombine.low %v7743_v6, %v8515_v20  ;;  %v7745_v35 = vld [vmem:[#allocation2 + $0x30] sm:$0xf]  ;;  %v8518_v44 = vld [vmem:[#allocation2 + $0x34] sm:$0xf]  ;;  %v7747_v10 = vld [vmem:[#allocation2 + $0x3c] sm:$0xf] }
  0xdf   : > { %v522_v26 = vor.u32 %v520_v3, %v519_v38  ;;  %v523_v46 = vrot.slane %v519_v38, 4  ;;  %v530_v55 = vor.u32 %v528_v22, %v527_v39  ;;  %v532_v59 = vrot.slane %v527_v39, 4  ;;  %v8527_v13 = vld [vmem:[#allocation2 + $0x40] sm:$0xf]  ;;  %v7749_v63 = vld [vmem:[#allocation2 + $0x48] sm:$0xf] }
  0xe0   : > { %7179 = vmatmul.mubr.bf16.gmra.mrb[20].mxu0 %v6524_v27  ;;  %v3538_v5 = vsel %vm8039_vm13, %v3536_v0, %v3537_v40  ;;  %v6526_v45 = vcombine.low %v3528_v50, %v3531_v49  ;;  %v6325_v58 = vcombine.low %v7745_v35, %v8518_v44  ;;  %v6326_v14 = vcombine.low %v7747_v10, %v8527_v13  ;;  %v8532_v22 = vld [vmem:[#allocation2 + $0x4c] sm:$0xf]  ;;  %v7668_v0 = vld [vmem:[#allocation2 + $0x18] sm:$0xff]   ;;  %v1745_v39 = vld [vmem:[#allocation2] sm:$0xe] }
  0xe1   : > { %7182 = vmatprep.mubr.bf16.mxu0 %v6525_v12  ;;  %v693_v25 = vsel %vm7923_vm9, %v522_v26, %v692_v24  ;;  %v531_v8 = vsel %vm7918_vm8, %v523_v46, %v530_v55  ;;  %v697_v7 = vsel %vm7932_vm10, %v532_v59, %v696_v28  ;;  %v6527_v41 = vcombine.low %v3535_v60, %v3538_v5  ;;  %v7676_v38 = vld [vmem:[%s10016_s1 + $0xa8] sm:$0xff]   ;;  %v7682_v46 = vld [vmem:[%s10016_s1 + $0xb0] sm:$0xff]   ;;  %v1747_v50 = vld [vmem:[#allocation2 + $0x18] sm:$0xe] }
  0xe2   : > { %6967 = vmatmul.mubr.bf16.vlgmr.msra.gmra.mrb[0].mxu1 %v6322_v57  ;;  %694 = vst [vmem:[#allocation2 + $0xc0] sm:$0xf] %v693_v25  ;;  %695 = vst [vmem:[#allocation2 + $0xc4] sm:$0xf] %v531_v8  ;;  %v2890_v42 = vshll.u32 %v8446_v48, 16  ;;  %v2894_v3 = vshrl.u32 %v8446_v48, 16  ;;  %v6327_v24 = vcombine.low %v7749_v63, %v8532_v22 }
  0xe3   : > { %6999 = vmatpush3.bf16.msra.mxu1 %v7742_v54  ;;  %6970 = vmatprep.mubr.bf16.mxu1 %v6323_v23  ;;  %698 = vst [vmem:[#allocation2 + $0xc8] sm:$0x1] %v697_v7  ;;  %v2900_v26 = vshll.u32 %v8448_v36, 16  ;;  %v1746_v54 = vld [vmem:[#allocation2 + $0xc] sm:$0xe]  ;;  %v1798_v49 = vrot.slane %v8458_v16, 5 }
  0xe4   : > { %7000 = vmatprep.subr.bf16.mxu1 %v7657_v29  ;;  %v8540_v28 = vrot.slane %v2890_v42, 5  ;;  %v2896_v48 = vrot.slane %v2894_v3, 4  ;;  %v1805_v55 = vrot.slane %v8486_v17, 5  ;;  %v1812_v59 = vrot.slane %v8489_v19, 5  ;;  %v7751_v25 = vld [vmem:[#allocation2 + $0x54] sm:$0xf] }
  0xe5   : > { %v8552_v60 = vld [vmem:[#allocation2 + $0x58] sm:$0xf]  ;;  %v7753_v5 = vld [vmem:[#allocation2 + $0x8] sm:$0x1]  ;;  %v7754_v7 = vld [vmem:[#allocation2 + $0x14] sm:$0x1] }
  0xe6   : > { %10043 = vst [vmem:[#allocation3_spill] sm:$0xff] %v8540_v28  ;;  %v6328_v36 = vcombine.low %v7751_v25, %v8552_v60  ;;  %v1801_v8 = vrot.slane %v7753_v5, 5  ;;  %v1808_v6 = vrot.slane %v7754_v7, 5  ;;  %v7671_v17 = vld [vmem:[#allocation2 + $0x24] sm:$0xff]   ;;  %v1819_v35 = vrot.slane %v8515_v20, 5 }
  0xe7   : > { %7001 = vmatpush3.bf16.msra.mxu1 %v7657_v29  ;;  %v1748_v19 = vld [vmem:[#allocation2 + $0x24] sm:$0xe]  ;;  %v6347_v10 = vrot.slane %v1747_v50, 9  ;;  %v7757_v42 = vld [vmem:[#allocation2 + $0x20] sm:$0x1]  ;;  %vm6064_vm7 = vcmask 1046534  }
  0xe8   : > { %7002 = vmatprep.subr.bf16.mxu1 %v7661_v56  ;;  %7183 = vmatmul.mubr.bf16.gmra.mrb[24].mxu0 %v6526_v45  ;;  %v8555_v45 = vld [vmem:[#allocation2 + $0x64] sm:$0xf]  ;;  %v1815_v20 = vrot.slane %v7757_v42, 5  ;;  %v1749_v3 = vld [vmem:[#allocation2 + $0x30] sm:$0xe]  ;;  %vm6066_vm8 = vcmask 1047559  }
  0xe9   : > { %7186 = vmatprep.mubr.bf16.mxu0 %v6527_v41  ;;  %v3385_v21 = vld [vmem:[#allocation2 + $0xc0] sm:$0xe]  ;;  %v2662_v15 = vld [vmem:[#allocation2 + $0xc4] sm:$0xf]  ;;  %v7674_v41 = vld [vmem:[#allocation2 + $0x30] sm:$0xff]   ;;  %v8600_v50 = vsel %vm8039_vm13, %v6347_v10, %v1812_v59 }
  0xea   : > { %6971 = vmatmul.mubr.bf16.gmra.mrb[4].mxu1 %v6324_v33  ;;  %v2663_v57 = vld [vmem:[#allocation2 + $0xc8] sm:$0x1]  ;;  %v6496_v27 = vrot.slane %v3385_v21, 9  ;;  %v3541_v11 = vrot.slane %v2662_v15, 5  ;;  %v7755_v33 = vld [vmem:[#allocation2 + $0x60] sm:$0xf] }
  0xeb   : > { %6974 = vmatprep.mubr.bf16.mxu1 %v6325_v58  ;;  %7003 = vmatpush3.bf16.msra.mxu1 %v7661_v56  ;;  %v3544_v23 = vrot.slane %v2663_v57, 5  ;;  %v2897_v56 = vor.u32 %v2896_v48, %v8540_v28  ;;  %v6329_v16 = vcombine.low %v7755_v33, %v8555_v45  ;;  %v8559_v58 = vrot.slane %v2900_v26, 5  ;;  %v8569_v63 = vld [vmem:[#allocation2 + $0x3c] sm:$0xe]  ;;  %v7762_v25 = vld [vmem:[#allocation2 + $0x38] sm:$0x1] }
  0xec   : > { %7004 = vmatprep.subr.bf16.mxu1 %v7665_v51  ;;  %v3542_v29 = vsel %vm8039_vm13, %v6496_v27, %v3541_v11  ;;  %v3543_v12 = vrot.slane %v3541_v11, 4  ;;  %v6345_v21 = vrot.slane %v1745_v39, 9  ;;  %v1800_v15 = vrot.slane %v1798_v49, 4  ;;  %v7761_v39 = vld [vmem:[#allocation2 + $0x78] sm:$0xf] }
  0xed   : > { %10044 = vst [vmem:[#allocation4_spill] sm:$0xff] %v8559_v58  ;;  %v1807_v57 = vrot.slane %v1805_v55, 4  ;;  %v1814_v27 = vrot.slane %v1812_v59, 4  ;;  %v8567_v11 = vrot.slane %v2897_v56, 4  ;;  %v1833_v48 = vrot.slane %v8527_v13, 5  ;;  %v7684_v59 = vld [vmem:[%s10016_s1 + $0x1d0] sm:$0xff]  }
  0xee   : > { %v3545_v32 = vsel %vm8039_vm13, %v3543_v12, %v3544_v23  ;;  %v6348_v23 = vrot.slane %v1748_v19, 9  ;;  %v6331_v26 = vcombine.low %v7761_v39, %v8308_v4  ;;  %v8592_v13 = vsel %vm8039_vm13, %v1800_v15, %v1801_v8  ;;  %v4255_v42 = vld [vmem:[#allocation2 + $0x18] sm:$0xf]  ;;  %v7776_v58 = vld [vmem:[#allocation2 + $0xa4] sm:$0x1] }
  0xef   : > { %7005 = vmatpush3.bf16.msra.mxu1 %v7665_v51  ;;  %v6528_v40 = vcombine.low %v3542_v29, %v3545_v32  ;;  %v7688_v51 = vld [vmem:[%s10016_s1 + $0xb8] sm:$0xff]   ;;  %10045 = vst [vmem:[#allocation5_spill] sm:$0xff] %v8567_v11  ;;  %v7758_v29 = vld [vmem:[#allocation2 + $0x2c] sm:$0x1]  ;;  %v8596_v4 = vsel %vm8039_vm13, %v1807_v57, %v1808_v6  ;;  %v6349_v56 = vrot.slane %v1749_v3, 9  ;;  %v6350_v5 = vrot.slane %v8569_v63, 9 }
  0xf0   : > { %7006 = vmatprep.subr.bf16.mxu1 %v7670_v1  ;;  %v1822_v12 = vrot.slane %v7758_v29, 5  ;;  %v7759_v32 = vld [vmem:[#allocation2 + $0x6c] sm:$0xf]  ;;  %v1835_v7 = vrot.slane %v1833_v48, 4  ;;  %v7763_v6 = vld [vmem:[#allocation2 + $0x44] sm:$0x1] }
  0xf1   : > { %7187 = vmatmul.mubr.bf16.gmra.mrb[28].mxu0 %v6528_v40  ;;  %v1836_v33 = vrot.slane %v7763_v6, 5  ;;  %v1840_v57 = vrot.slane %v8532_v22, 5  ;;  %v8643_v63 = vld [vmem:[#allocation2 + $0x60] sm:$0xe]  ;;  %v7690_v22 = vld [vmem:[%s10016_s1 + $0x1d8] sm:$0xff]   ;;  %v8654_v29 = vsel %vm8039_vm13, %v6350_v5, %v1833_v48  ;;  %v1854_v39 = vrot.slane %v8555_v45, 5 }
  0xf2   : > { %6975 = vmatmul.mubr.bf16.gmra.mrb[8].mxu1 %v6326_v14  ;;  %7206 = vmatprep.mubr.bf16.mxu0 %v7668_v0  ;;  %v7678_v14 = vld [vmem:[%s10016_s1 + $0x1c8] sm:$0xff]   ;;  %v8573_v0 = vld [vmem:[#allocation2 + $0x70] sm:$0xf] }
  0xf3   : > { %6978 = vmatprep.mubr.bf16.mxu1 %v6327_v24  ;;  %7007 = vmatpush3.bf16.msra.mxu1 %v7670_v1  ;;  %v6346_v1 = vrot.slane %v1746_v54, 9  ;;  %v1821_v24 = vrot.slane %v1819_v35, 4  ;;  %v6330_v40 = vcombine.low %v7759_v32, %v8573_v0  ;;  %v8579_v54 = vsel %vm8039_vm13, %v6345_v21, %v1798_v49  ;;  %v7680_v21 = vld [vmem:[#allocation2 + $0x48] sm:$0xff]   ;;  %v4258_v32 = vld [vmem:[#allocation2 + $0x24] sm:$0xf] }
  0xf4   : > { %7008 = vmatprep.subr.bf16.mxu1 %v7676_v38  ;;  %v8604_v49 = vsel %vm8039_vm13, %v1814_v27, %v1815_v20  ;;  %v1752_v27 = vld [vmem:[#allocation2 + $0x54] sm:$0xe]  ;;  %v1842_v48 = vrot.slane %v1840_v57, 4  ;;  %v7764_v5 = vld [vmem:[#allocation2 + $0x50] sm:$0x1]  ;;  %v4331_v15 = vshll.u32 %v4258_v32, 16 }
  0xf5   : > { %v8617_v8 = vsel %vm8039_vm13, %v1821_v24, %v1822_v12  ;;  %v4256_v24 = vld [vmem:[#allocation2 + $0x1c] sm:$0xf]  ;;  %v8658_v12 = vsel %vm8039_vm13, %v1835_v7, %v1836_v33  ;;  %v6352_v6 = vrot.slane %v1752_v27, 9  ;;  %v7683_v20 = vld [vmem:[#allocation2 + $0x54] sm:$0xff]  }
  0xf6   : > { %v7765_v7 = vld [vmem:[#allocation2 + $0x5c] sm:$0x1]  ;;  %v4313_v3 = vshll.u32 %v4256_v24, 16 }
  0xf7   : > { %7009 = vmatpush3.bf16.msra.mxu1 %v7676_v38  ;;  %v1826_v38 = vrot.slane %v8518_v44, 5  ;;  %v8588_v44 = vld [vmem:[%s10016_s1 + $0xc0] sm:$0xff]   ;;  %v1850_v33 = vrot.slane %v7765_v7, 5  ;;  %v4261_v7 = vld [vmem:[#allocation2 + $0x30] sm:$0xf] }
  0xf8   : > { %7010 = vmatprep.subr.bf16.mxu1 %v7682_v46 }
  0xf9   : > { %7207 = vmatmul.mubr.bf16.vlgmr.msra.gmra.mrb[0].mxu0 %v7671_v17  ;;  %v7677_v17 = vld [vmem:[#allocation2 + $0x3c] sm:$0xff]  }
  0xfa   : > { %6979 = vmatmul.mubr.bf16.gmra.mrb[12].mxu1 %v6328_v36  ;;  %7239 = vmatpush3.bf16.msra.mxu0 %v8375_v37  ;;  %v1829_v36 = vrot.slane %v7762_v25, 5  ;;  %v1828_v37 = vrot.slane %v1826_v38, 4  ;;  %v4259_v25 = vld [vmem:[#allocation2 + $0x28] sm:$0xf] }
  0xfb   : > { %6982 = vmatprep.mubr.bf16.mxu1 %v6329_v16  ;;  %7011 = vmatpush3.bf16.msra.mxu1 %v7682_v46  ;;  %v8583_v46 = vsel %vm8039_vm13, %v6346_v1, %v1805_v55  ;;  %v8609_v55 = vsel %vm8039_vm13, %v6348_v23, %v1819_v35  ;;  %v6332_v16 = vcombine.low %v8323_v61, %v8333_v9  ;;  %v4337_v10 = vshll.u32 %v4259_v25, 16 }
  0xfc   : > { %7012 = vmatprep.subr.bf16.mxu1 %v7688_v51  ;;  %7210 = vmatprep.mubr.bf16.mxu0 %v7674_v41  ;;  %v8641_v23 = vsel %vm8039_vm13, %v6349_v56, %v1826_v38  ;;  %v4307_v56 = vshll.u32 %v4255_v42, 16  ;;  %v4341_v1 = vshrl.u32 %v4259_v25, 16  ;;  %v7686_v41 = vld [vmem:[#allocation2 + $0x60] sm:$0xff]   ;;  %v1754_v25 = vld [vmem:[#allocation2 + $0x6c] sm:$0xe]  ;;  %v4333_v9 = vrot.slane %v4331_v15, 5 }
  0xfd   : > { %7240 = vmatprep.subr.bf16.mxu0 %v7678_v14  ;;  %v4355_v15 = vshll.u32 %v4261_v7, 16 }
  0xfe   : > { %7241 = vmatpush3.bf16.msra.mxu0 %v7678_v14  ;;  %v8650_v14 = vsel %vm8039_vm13, %v1828_v37, %v1829_v36  ;;  %v7694_v36 = vld [vmem:[%s10016_s1 + $0x1e0] sm:$0xff]   ;;  %v1843_v37 = vrot.slane %v7764_v5, 5  ;;  %v1856_v5 = vrot.slane %v1854_v39, 4  ;;  %v4309_v19 = vrot.slane %v4307_v56, 5 }
  0xff   : > { %7013 = vmatpush3.bf16.msra.mxu1 %v7688_v51  ;;  %v1751_v51 = vld [vmem:[#allocation2 + $0x48] sm:$0xe]  ;;  %7242 = vmatprep.subr.bf16.mxu0 %v7684_v59 }
 0x100   : > { %7046 = vmatprep.subr.bf16.mxu1 %v8588_v44  ;;  %v6351_v38 = vrot.slane %v1751_v51, 9  ;;  %v7766_v51 = vld [vmem:[#allocation2 + $0x68] sm:$0x1] }
 0x101   : > { %7211 = vmatmul.mubr.bf16.gmra.mrb[4].mxu0 %v7677_v17  ;;  %v1857_v45 = vrot.slane %v7766_v51, 5  ;;  %v4328_v17 = vshrl.u32 %v4258_v32, 16  ;;  %v4257_v32 = vld [vmem:[#allocation2 + $0x20] sm:$0x1]  ;;  %v10046_v51 = vcombine.low %v8348_v47, %v8353_v62  ;;  %v4260_v62 = vld [vmem:[#allocation2 + $0x2c] sm:$0x1] }
 0x102   : > { %6983 = vmatmul.mubr.bf16.gmra.mrb[16].mxu1 %v6330_v40  ;;  %v1847_v40 = vrot.slane %v8552_v60, 5  ;;  %7214 = vmatprep.mubr.bf16.mxu0 %v7680_v21  ;;  %v6353_v60 = vrot.slane %v8643_v63, 9  ;;  %v8672_v63 = vsel %vm8039_vm13, %v6351_v38, %v1840_v57  ;;  %v8688_v38 = vrot.slane %v4313_v3, 5 }
 0x103   : > { %6986 = vmatprep.mubr.bf16.mxu1 %v6331_v26  ;;  %v4304_v26 = vshrl.u32 %v4255_v42, 16  ;;  %7243 = vmatpush3.bf16.msra.mxu0 %v7684_v59  ;;  %v4317_v42 = vshrl.u32 %v4256_v24, 16  ;;  %v8676_v24 = vsel %vm8039_vm13, %v1842_v48, %v1843_v37  ;;  %v1861_v48 = vrot.slane %v8573_v0, 5  ;;  %v4262_v37 = vld [vmem:[#allocation2 + $0x34] sm:$0xf] }
 0x104   : > { %7244 = vmatprep.subr.bf16.mxu0 %v7690_v22  ;;  %v1849_v35 = vrot.slane %v1847_v40, 4  ;;  %v8686_v57 = vsel %vm8039_vm13, %v6352_v6, %v1847_v40  ;;  %v4330_v61 = vrot.slane %v4328_v17, 4  ;;  %v8702_v3 = vsel %vm8039_vm13, %v6353_v60, %v1854_v39  ;;  %v7767_v60 = vld [vmem:[#allocation2 + $0x74] sm:$0x1]  ;;  %v7689_v17 = vld [vmem:[#allocation2 + $0x6c] sm:$0xff]  }
 0x105   : > { %v4306_v27 = vrot.slane %v4304_v26, 4  ;;  %v7698_v26 = vld [vmem:[%s10016_s1 + $0x1e8] sm:$0xff]   ;;  %v4319_v56 = vrot.slane %v4317_v42, 4  ;;  %v8706_v0 = vsel %vm8039_vm13, %v1856_v5, %v1857_v45  ;;  %v4352_v6 = vshrl.u32 %v4261_v7, 16  ;;  %v1755_v7 = vld [vmem:[#allocation2 + $0x78] sm:$0xe] }
 0x106   : > { %v8698_v40 = vsel %vm8039_vm13, %v1849_v35, %v1850_v33  ;;  %v4365_v42 = vshrl.u32 %v4262_v37, 16  ;;  %v7702_v35 = vld [vmem:[%s10016_s1 + $0x1f0] sm:$0xff]   ;;  %v4323_v39 = vshll.u32 %v4257_v32, 16  ;;  %v6354_v33 = vrot.slane %v1754_v25, 9  ;;  %v7768_v32 = vld [vmem:[#allocation2 + $0x7c] sm:$0xf] }
 0x107   : > { %7245 = vmatpush3.bf16.msra.mxu0 %v7690_v22  ;;  %v4343_v22 = vrot.slane %v4341_v1, 4  ;;  %v4310_v47 = vor.u32 %v4309_v19, %v4306_v27  ;;  %v4320_v1 = vor.u32 %v4319_v56, %v8688_v38  ;;  %v1864_v45 = vrot.slane %v7767_v60, 5  ;;  %v4263_v56 = vld [vmem:[#allocation2 + $0x38] sm:$0x1] }
 0x108   : > { %7246 = vmatprep.subr.bf16.mxu0 %v7694_v36  ;;  %v1863_v19 = vrot.slane %v1861_v48, 4  ;;  %v4347_v27 = vshll.u32 %v4260_v62, 16  ;;  %v1868_v25 = vrot.slane %v7768_v32, 5  ;;  %v4357_v60 = vrot.slane %v4355_v15, 5 }
 0x109   : > { %7215 = vmatmul.mubr.bf16.gmra.mrb[8].mxu0 %v7683_v20  ;;  %v4334_v20 = vor.u32 %v4333_v9, %v4330_v61  ;;  %v4367_v61 = vrot.slane %v4365_v42, 4  ;;  %v10047_v9 = vcombine.low %v8393_v31, %v8408_v52  ;;  %v8728_v32 = vsel %vm8039_vm13, %v6354_v33, %v1861_v48  ;;  %v7706_v31 = vld [vmem:[%s10016_s1 + $0x1f8] sm:$0xff]   ;;  %v1756_v42 = vld [vmem:[#allocation2 + $0x84] sm:$0xe]  ;;  %v7769_v33 = vld [vmem:[#allocation2 + $0x80] sm:$0x1] }
 0x10a   : > { %6987 = vmatmul.mubr.bf16.gmra.mrb[20].mxu1 %v6332_v16  ;;  %v8694_v16 = vrot.slane %v4337_v10, 5  ;;  %v4361_v10 = vshll.u32 %v4262_v37, 16  ;;  %7218 = vmatprep.mubr.bf16.mxu0 %v7686_v41  ;;  %v8717_v37 = vrot.slane %v4310_v47, 4  ;;  %v4325_v47 = vrot.slane %v4323_v39, 5 }
 0x10b   : > { %6990 = vmatprep.mubr.bf16.mxu1 %v10046_v51  ;;  %7247 = vmatpush3.bf16.msra.mxu0 %v7694_v36  ;;  %v4354_v51 = vrot.slane %v4352_v6, 4  ;;  %v4321_v36 = vrot.slane %v4320_v1, 4  ;;  %v10048_v6 = vcombine.low %v8416_v2, %v8424_v30  ;;  %v8738_v52 = vsel %vm8039_vm13, %v1863_v19, %v1864_v45  ;;  %v4264_v1 = vld [vmem:[#allocation2 + $0x3c] sm:$0xf]  ;;  %v4265_v30 = vld [vmem:[#allocation2 + $0x40] sm:$0xf] }
 0x10c   : > { %7248 = vmatprep.subr.bf16.mxu0 %v7698_v26  ;;  %v4344_v5 = vor.u32 %v4343_v22, %v8694_v16  ;;  %v8719_v21 = vrot.slane %v4361_v10, 5  ;;  %v7691_v22 = vld [vmem:[#allocation2 + $0x78] sm:$0xff]   ;;  %v4349_v10 = vrot.slane %v4347_v27, 5  ;;  %v6355_v48 = vrot.slane %v1755_v7, 9  ;;  %v7770_v19 = vld [vmem:[#allocation2 + $0x88] sm:$0xf] }
 0x10d   : > { %v1870_v39 = vrot.slane %v1868_v25, 4  ;;  %v4371_v2 = vshll.u32 %v4263_v56, 16  ;;  %v4358_v62 = vor.u32 %v4357_v60, %v4354_v51  ;;  %v4376_v7 = vshrl.u32 %v4264_v1, 16  ;;  %v4267_v60 = vld [vmem:[#allocation2 + $0x48] sm:$0xf] }
 0x10e   : > { %v4345_v15 = vrot.slane %v4344_v5, 4  ;;  %v4368_v45 = vor.u32 %v4367_v61, %v8719_v21  ;;  %v4326_v5 = vsel %vm7909_vm6, %v4321_v36, %v4325_v47  ;;  %v4385_v36 = vshll.u32 %v4265_v30, 16  ;;  %v8759_v61 = vld [vmem:[#allocation2 + $0x4c] sm:$0xf] }
 0x10f   : > { %7249 = vmatpush3.bf16.msra.mxu0 %v7698_v26  ;;  %v4335_v26 = vrot.slane %v4334_v20, 4  ;;  %v1875_v20 = vrot.slane %v7770_v19, 5  ;;  %v4389_v51 = vshrl.u32 %v4265_v30, 16  ;;  %v8763_v47 = vsel %vm8039_vm13, %v6355_v48, %v1868_v25  ;;  %v7771_v27 = vld [vmem:[#allocation2 + $0x8c] sm:$0x1] }
 0x110   : > { %7250 = vmatprep.subr.bf16.mxu0 %v7702_v35  ;;  %v6356_v19 = vrot.slane %v1756_v42, 9  ;;  %v1878_v41 = vrot.slane %v7771_v27, 5  ;;  %v10050_v59 = vcombine.low %v8436_v18, %v8442_v53  ;;  %v10051_v42 = vcombine.low %v8579_v54, %v8592_v13 }
 0x111   : > { %7219 = vmatmul.mubr.bf16.gmra.mrb[12].mxu0 %v7689_v17  ;;  %v8752_v17 = vld [vmem:[%s10016_s1 + $0x200] sm:$0xff]   ;;  %v4340_v56 = vsel %vm7909_vm6, %v4335_v26, %v8694_v16  ;;  %v4270_v16 = vld [vmem:[#allocation2 + $0x54] sm:$0xf]  ;;  %v8769_v26 = vld [vmem:[#allocation2 + $0x58] sm:$0xf]  ;;  %v1877_v30 = vrot.slane %v1875_v20, 4 }
 0x112   : > { %6991 = vmatmul.mubr.bf16.gmra.mrb[24].mxu1 %v10047_v9  ;;  %v1871_v9 = vrot.slane %v7769_v33, 5  ;;  %7222 = vmatprep.mubr.bf16.mxu0 %v7691_v22  ;;  %v7695_v22 = vld [vmem:[#allocation2 + $0x90] sm:$0xff]   ;;  %v4373_v33 = vrot.slane %v4371_v2, 5  ;;  %10049 = vst [vmem:[#allocation6_spill] sm:$0xff] %v8769_v26  ;;  %v8782_v2 = vrot.slane %v4385_v36, 5  ;;  %v4400_v27 = vshrl.u32 %v4267_v60, 16 }
 0x113   : > { %6994 = vmatprep.mubr.bf16.mxu1 %v10048_v6  ;;  %v4316_v6 = vsel %vm7909_vm6, %v8717_v37, %v8688_v38  ;;  %7251 = vmatpush3.bf16.msra.mxu0 %v7702_v35  ;;  %v4379_v38 = vshll.u32 %v4264_v1, 16  ;;  %v7693_v37 = vld [vmem:[#allocation2 + $0x84] sm:$0xff]   ;;  %v4350_v35 = vsel %vm7909_vm6, %v4345_v15, %v4349_v10  ;;  %v4359_v15 = vrot.slane %v4358_v62, 4 }
 0x114   : > { %7252 = vmatprep.subr.bf16.mxu0 %v7706_v31  ;;  %v8767_v1 = vsel %vm8039_vm13, %v1870_v39, %v1871_v9  ;;  %v4369_v10 = vrot.slane %v4368_v45, 4  ;;  %v8774_v25 = vcombine.low %v4316_v6, %v4326_v5  ;;  %v8776_v48 = vcombine.low %v4340_v56, %v4350_v35  ;;  %v4266_v62 = vld [vmem:[#allocation2 + $0x44] sm:$0x1] }
 0x115   : > { %v4378_v39 = vrot.slane %v4376_v7, 4  ;;  %v4381_v9 = vrot.slane %v4379_v38, 5  ;;  %v4391_v45 = vrot.slane %v4389_v51, 4  ;;  %v4403_v18 = vshll.u32 %v4267_v60, 16  ;;  %v7697_v51 = vld [vmem:[#allocation2 + $0x9c] sm:$0xff]  }
 0x116   : > { %v4409_v6 = vshll.u32 %v8759_v61, 16  ;;  %v4413_v54 = vshrl.u32 %v8759_v61, 16  ;;  %v4424_v13 = vshrl.u32 %v4270_v16, 16  ;;  %v4427_v5 = vshll.u32 %v4270_v16, 16 }
 0x117   : > { %7253 = vmatpush3.bf16.msra.mxu0 %v7706_v31  ;;  %v1757_v31 = vld [vmem:[#allocation2 + $0x90] sm:$0xe]  ;;  %v4433_v7 = vshll.u32 %v8769_v26, 16  ;;  %v4437_v38 = vshrl.u32 %v8769_v26, 16  ;;  %v4364_v56 = vsel %vm7909_vm6, %v4359_v15, %v8719_v21  ;;  %v8801_v35 = vsel %vm8039_vm13, %v1877_v30, %v1878_v41  ;;  %v7699_v15 = vld [vmem:[#allocation2 + $0xa8] sm:$0xff]  }
 0x118   : > { %7286 = vmatprep.subr.bf16.mxu0 %v8752_v17  ;;  %v4395_v36 = vshll.u32 %v4266_v62, 16  ;;  %v4382_v60 = vor.u32 %v4381_v9, %v4378_v39  ;;  %v4402_v16 = vrot.slane %v4400_v27, 4  ;;  %v4405_v21 = vrot.slane %v4403_v18, 5  ;;  %v8811_v30 = vld [vmem:[#allocation2 + $0x5c] sm:$0x1] }
 0x119   : > { %7223 = vmatmul.mubr.bf16.gmra.mrb[16].mxu0 %v7693_v37  ;;  %v7696_v37 = vld [vmem:[%s10016_s1 + $0xc8] sm:$0xff]   ;;  %v8809_v53 = vrot.slane %v4409_v6, 5  ;;  %v4415_v41 = vrot.slane %v4413_v54, 4  ;;  %10053 = vst [vmem:[#allocation8_spill] sm:$0xff] %v8811_v30  ;;  %v8813_v62 = vld [vmem:[#allocation2 + $0x9c] sm:$0xe]  ;;  %v10054_v27 = vcombine.low %v8583_v46, %v8596_v4 }
 0x11a   : > { %6995 = vmatmul.mubr.bf16.gmra.mrb[28].mxu1 %v10050_v59  ;;  %v8788_v59 = vsel %vm8039_vm13, %v6356_v19, %v1875_v20  ;;  %7226 = vmatprep.mubr.bf16.mxu0 %v7695_v22  ;;  %v4374_v20 = vsel %vm7909_vm6, %v4369_v10, %v4373_v33  ;;  %v4392_v22 = vor.u32 %v4391_v45, %v8782_v2  ;;  %v8807_v19 = vld [vmem:[#allocation2 + $0x50] sm:$0x1]  ;;  %v7772_v33 = vld [vmem:[#allocation2 + $0x94] sm:$0xf]  ;;  %v4426_v28 = vrot.slane %v4424_v13, 4 }
 0x11b   : > { %7014 = vmatprep.mubr.bf16.mxu1 %v10051_v42  ;;  %10052 = vst [vmem:[#allocation7_spill] sm:$0xff] %v8807_v19  ;;  %v6357_v42 = vrot.slane %v1757_v31, 9  ;;  %v1882_v10 = vrot.slane %v7772_v33, 5  ;;  %v4429_v11 = vrot.slane %v4427_v5, 5  ;;  %v8815_v39 = vrot.slane %v4433_v7, 5 }
 0x11c   : > { %v4439_v9 = vrot.slane %v4437_v38, 4  ;;  %v4273_v45 = vld [vmem:[#allocation2 + $0x60] sm:$0xf]  ;;  %v8820_v18 = vcombine.low %v4364_v56, %v4374_v20  ;;  %v8824_v6 = vrot.slane %v4395_v36, 5  ;;  %v4419_v54 = vshll.u32 %v8807_v19, 16  ;;  %v7700_v56 = vld [vmem:[%s10016_s1 + $0xd0] sm:$0xff]  }
 0x11d   : > { %v10055_v13 = vcombine.low %v8600_v50, %v8604_v49  ;;  %v8831_v5 = vrot.slane %v4382_v60, 4  ;;  %v8833_v7 = vrot.slane %v4392_v22, 4  ;;  %v7773_v46 = vld [vmem:[#allocation2 + $0x98] sm:$0x1]  ;;  %v4406_v38 = vor.u32 %v4405_v21, %v4402_v16  ;;  %v7774_v50 = vld [vmem:[#allocation2 + $0xa0] sm:$0xf] }
 0x11e   : > { %v1885_v4 = vrot.slane %v7773_v46, 5  ;;  %v8840_v20 = vsel %vm8039_vm13, %v6357_v42, %v1882_v10  ;;  %v1889_v49 = vrot.slane %v7774_v50, 5  ;;  %v4443_v36 = vshll.u32 %v8811_v30, 16  ;;  %v8844_v60 = vld [vmem:[#allocation2 + $0x64] sm:$0xf] }
 0x11f   : > { %10056 = vst [vmem:[#allocation9_spill] sm:$0xff] %v8844_v60  ;;  %v1884_v22 = vrot.slane %v1882_v10, 4  ;;  %v4430_v16 = vor.u32 %v4429_v11, %v4426_v28  ;;  %v4440_v21 = vor.u32 %v4439_v9, %v8815_v39  ;;  %v1759_v33 = vld [vmem:[#allocation2 + $0xa8] sm:$0xe]  ;;  %v8847_v46 = vrot.slane %v4419_v54, 5  ;;  %v7704_v11 = vld [vmem:[%s10016_s1 + $0xd8] sm:$0xff]  }
 0x120   : > { %v6358_v42 = vrot.slane %v8813_v62, 9  ;;  %v4451_v31 = vshll.u32 %v4273_v45, 16  ;;  %v4407_v50 = vrot.slane %v4406_v38, 4  ;;  %v1892_v30 = vrot.slane %v7776_v58, 5  ;;  %v7701_v62 = vld [vmem:[#allocation2 + $0xb4] sm:$0xff]  }
 0x121   : > { %7227 = vmatmul.mubr.bf16.gmra.mrb[20].mxu0 %v7697_v51  ;;  %v4457_v51 = vshll.u32 %v8844_v60, 16  ;;  %v4461_v28 = vshrl.u32 %v8844_v60, 16  ;;  %v1891_v10 = vrot.slane %v1889_v49, 4  ;;  %v4445_v9 = vrot.slane %v4443_v36, 5  ;;  %v7777_v26 = vld [vmem:[#allocation2 + $0xb0] sm:$0x1] }
 0x122   : > { %7015 = vmatmul.mubr.bf16.vlgmr.msra.gmra.mrb[0].mxu1 %v10054_v27  ;;  %v7775_v27 = vld [vmem:[#allocation2 + $0xac] sm:$0xf]  ;;  %7230 = vmatprep.mubr.bf16.mxu0 %v7699_v15  ;;  %v6359_v54 = vrot.slane %v1759_v33, 9  ;;  %v1899_v58 = vrot.slane %v7777_v26, 5  ;;  %v10057_v19 = vcombine.low %v8609_v55, %v8617_v8  ;;  %v7707_v60 = vld [vmem:[%s10016_s1 + $0xe0] sm:$0xff]   ;;  %v4398_v36 = vsel %vm7909_vm6, %v8833_v7, %v8824_v6 }
 0x123   : > { %7047 = vmatpush3.bf16.msra.mxu1 %v8588_v44  ;;  %7018 = vmatprep.mubr.bf16.mxu1 %v10055_v13  ;;  %v4416_v44 = vor.u32 %v4415_v41, %v8809_v53  ;;  %v1896_v13 = vrot.slane %v7775_v27, 5  ;;  %v4448_v41 = vshrl.u32 %v4273_v45, 16  ;;  %v7703_v27 = vld [vmem:[#allocation2 + $0xc0] sm:$0xff]   ;;  %v4431_v45 = vrot.slane %v4430_v16, 4  ;;  %v8869_v16 = vld [vmem:[#allocation2 + $0x68] sm:$0x1] }
 0x124   : > { %7048 = vmatprep.subr.bf16.mxu1 %v7696_v37  ;;  %v10058_v55 = vcombine.low %v8641_v23, %v8650_v14  ;;  %v8876_v8 = vsel %vm8039_vm13, %v1884_v22, %v1885_v4  ;;  %v4463_v6 = vrot.slane %v4461_v28, 4  ;;  %v8892_v14 = vsel %vm8039_vm13, %v1891_v10, %v1892_v30  ;;  %v8898_v4 = vld [vmem:[#allocation2 + $0x70] sm:$0xf]  ;;  %v8910_v22 = vld [vmem:[#allocation2 + $0xb4] sm:$0xe] }
 0x125   : > { %v4417_v15 = vrot.slane %v4416_v44, 4  ;;  %v1898_v38 = vrot.slane %v1896_v13, 4  ;;  %v4388_v44 = vsel %vm7909_vm6, %v8831_v5, %v8782_v2  ;;  %v4450_v26 = vrot.slane %v4448_v41, 4  ;;  %v4276_v5 = vld [vmem:[#allocation2 + $0x6c] sm:$0xf]  ;;  %10060 = vst [vmem:[#allocation11_spill] sm:$0xff] %v8892_v14 }
 0x126   : > { %v8880_v2 = vsel %vm8039_vm13, %v6358_v42, %v1889_v49  ;;  %v8896_v7 = vsel %vm8039_vm13, %v6359_v54, %v1896_v13  ;;  %10062 = vst [vmem:[#allocation13_spill] sm:$0xff] %v8898_v4  ;;  %v4467_v30 = vshll.u32 %v8869_v16, 16  ;;  %v8912_v33 = vcombine.low %v4388_v44, %v4398_v36  ;;  %v7778_v42 = vld [vmem:[#allocation2 + $0xb8] sm:$0xf]  ;;  %v8921_v54 = vld [vmem:[#allocation2 + $0x7c] sm:$0xf] }
 0x127   : > { %7049 = vmatpush3.bf16.msra.mxu1 %v7696_v37  ;;  %v4441_v37 = vrot.slane %v4440_v21, 4  ;;  %v4453_v21 = vrot.slane %v4451_v31, 5  ;;  %10059 = vst [vmem:[#allocation10_spill] sm:$0xff] %v8880_v2  ;;  %v4412_v31 = vsel %vm7909_vm6, %v4407_v50, %v8809_v53  ;;  %v4422_v23 = vsel %vm7909_vm6, %v4417_v15, %v8847_v46  ;;  %10061 = vst [vmem:[#allocation12_spill] sm:$0xff] %v8896_v7  ;;  %v4279_v41 = vld [vmem:[#allocation2 + $0x78] sm:$0xf] }
 0x128   : > { %7050 = vmatprep.subr.bf16.mxu1 %v7700_v56  ;;  %v8907_v49 = vsel %vm8039_vm13, %v1898_v38, %v1899_v58  ;;  %v7705_v50 = vld [vmem:[#allocation2 + $0xcc] sm:$0xff]   ;;  %v4472_v15 = vshrl.u32 %v4276_v5, 16  ;;  %v4475_v10 = vshll.u32 %v4276_v5, 16  ;;  %10064 = vst [vmem:[#allocation15_spill] sm:$0xff] %v8921_v54  ;;  %v4282_v38 = vld [vmem:[#allocation2 + $0x84] sm:$0xf] }
 0x129   : > { %7231 = vmatmul.mubr.bf16.gmra.mrb[24].mxu0 %v7701_v62  ;;  %v4446_v53 = vsel %vm7909_vm6, %v4441_v37, %v4445_v9  ;;  %10063 = vst [vmem:[#allocation14_spill] sm:$0xff] %v8907_v49  ;;  %v4454_v46 = vor.u32 %v4453_v21, %v4450_v26  ;;  %v4481_v9 = vshll.u32 %v8898_v4, 16  ;;  %v8923_v62 = vcombine.low %v4412_v31, %v4422_v23  ;;  %v8931_v37 = vld [vmem:[#allocation2 + $0x74] sm:$0x1]  ;;  %v8936_v21 = vld [vmem:[#allocation2 + $0x88] sm:$0xf] }
 0x12a   : > { %7019 = vmatmul.mubr.bf16.gmra.mrb[4].mxu1 %v10057_v19  ;;  %v8882_v19 = vrot.slane %v4457_v51, 5  ;;  %7234 = vmatprep.mubr.bf16.mxu0 %v7703_v27  ;;  %v7709_v51 = vld [vmem:[%s10016_s1 + $0xe8] sm:$0xff]   ;;  %10065 = vst [vmem:[#allocation16_spill] sm:$0xff] %v8931_v37  ;;  %v8933_v58 = vrot.slane %v4467_v30, 5  ;;  %v4485_v44 = vshrl.u32 %v8898_v4, 16  ;;  %v4496_v36 = vshrl.u32 %v4279_v41, 16 }
 0x12b   : > { %7022 = vmatprep.mubr.bf16.mxu1 %v10058_v55  ;;  %7051 = vmatpush3.bf16.msra.mxu1 %v7700_v56  ;;  %v4436_v56 = vsel %vm7909_vm6, %v4431_v45, %v8815_v39  ;;  %v1903_v39 = vrot.slane %v7778_v42, 5  ;;  %v4499_v26 = vshll.u32 %v4279_v41, 16  ;;  %10066 = vst [vmem:[#allocation17_spill] sm:$0xff] %v8936_v21  ;;  %v4285_v55 = vld [vmem:[#allocation2 + $0x90] sm:$0xf]  ;;  %v8944_v31 = vrot.slane %v4454_v46, 4 }
 0x12c   : > { %7052 = vmatprep.subr.bf16.mxu1 %v7704_v11  ;;  %v4464_v28 = vor.u32 %v4463_v6, %v8882_v19  ;;  %v8927_v45 = vcombine.low %v4436_v56, %v4446_v53  ;;  %v10067_v6 = vcombine.low %v8654_v29, %v8658_v12  ;;  %v7711_v5 = vld [vmem:[%s10016_s1 + $0xf0] sm:$0xff]   ;;  %v6360_v23 = vrot.slane %v8910_v22, 9  ;;  %v7779_v53 = vld [vmem:[#allocation2 + $0xbc] sm:$0x1]  ;;  %v8994_v7 = vld [vmem:[#allocation2 + $0x8c] sm:$0x1] }
 0x12d   : > { %v1905_v56 = vrot.slane %v1903_v39, 4  ;;  %v1906_v30 = vrot.slane %v7779_v53, 5  ;;  %v10068_v42 = vcombine.low %v8672_v63, %v8676_v24  ;;  %v8952_v29 = vrot.slane %v4472_v15, 4  ;;  %v8958_v46 = vld [vmem:[#allocation2 + $0x94] sm:$0xf] }
 0x12e   : > { %v8950_v41 = vrot.slane %v4464_v28, 4  ;;  %v8954_v12 = vrot.slane %v4475_v10, 5  ;;  %10069 = vst [vmem:[#allocation18_spill] sm:$0xff] %v8958_v46  ;;  %v4505_v22 = vshll.u32 %v8921_v54, 16  ;;  %v4509_v53 = vshrl.u32 %v8921_v54, 16  ;;  %v7713_v10 = vld [vmem:[%s10016_s1 + $0xf8] sm:$0xff]  }
 0x12f   : > { %7053 = vmatpush3.bf16.msra.mxu1 %v7704_v11  ;;  %v4520_v11 = vshrl.u32 %v4282_v38, 16  ;;  %v4523_v27 = vshll.u32 %v4282_v38, 16  ;;  %v4288_v63 = vld [vmem:[#allocation2 + $0x9c] sm:$0xf]  ;;  %v8962_v24 = vrot.slane %v4485_v44, 4  ;;  %v8965_v28 = vrot.slane %v4496_v36, 4 }
 0x130   : > { %7054 = vmatprep.subr.bf16.mxu1 %v7707_v60  ;;  %v8967_v15 = vrot.slane %v4499_v26, 5  ;;  %v4533_v38 = vshrl.u32 %v8936_v21, 16  ;;  %v8975_v44 = vld [vmem:[#allocation2 + $0xa0] sm:$0xf]  ;;  %v4553_v13 = vshll.u32 %v8958_v46, 16  ;;  %v4511_v54 = vrot.slane %v4509_v53, 4 }
 0x131   : > { %7235 = vmatmul.mubr.bf16.gmra.mrb[28].mxu0 %v7705_v50  ;;  %v4547_v50 = vshll.u32 %v4285_v55, 16  ;;  %v8985_v26 = vld [vmem:[#allocation2 + $0x80] sm:$0x1]  ;;  %v4525_v49 = vrot.slane %v4523_v27, 5  ;;  %v7710_v36 = vld [vmem:[%s10016_s1 + $0x208] sm:$0xff]   ;;  %v4577_v14 = vshll.u32 %v8975_v44, 16  ;;  %v10071_v4 = vcombine.low %v8702_v3, %v8706_v0 }
 0x132   : > { %7023 = vmatmul.mubr.bf16.gmra.mrb[8].mxu1 %v10067_v6  ;;  %v8956_v6 = vrot.slane %v4481_v9, 5  ;;  %7254 = vmatprep.mubr.bf16.mxu0 %v8774_v25  ;;  %v4529_v9 = vshll.u32 %v8936_v21, 16  ;;  %v8983_v25 = vsel %vm8039_vm13, %v6360_v23, %v1903_v39  ;;  %v4557_v21 = vshrl.u32 %v8958_v46, 16  ;;  %v9003_v27 = vld [vmem:[#allocation2 + $0x98] sm:$0x1] }
 0x133   : > { %7026 = vmatprep.mubr.bf16.mxu1 %v10068_v42  ;;  %7055 = vmatpush3.bf16.msra.mxu1 %v7707_v60  ;;  %v4491_v60 = vshll.u32 %v8931_v37, 16  ;;  %v4544_v42 = vshrl.u32 %v4285_v55, 16  ;;  %v8989_v55 = vrot.slane %v4505_v22, 5  ;;  %v4568_v39 = vshrl.u32 %v4288_v63, 16 }
 0x134   : > { %7056 = vmatprep.subr.bf16.mxu1 %v7709_v51  ;;  %v4571_v23 = vshll.u32 %v4288_v63, 16  ;;  %v4581_v2 = vshrl.u32 %v8975_v44, 16  ;;  %v10070_v46 = vcombine.low %v8686_v57, %v8698_v40  ;;  %v9001_v22 = vrot.slane %v4529_v9, 5 }
 0x135   : > { %v4546_v53 = vrot.slane %v4544_v42, 4  ;;  %v4549_v37 = vrot.slane %v4547_v50, 5  ;;  %v9010_v63 = vsel %vm8039_vm13, %v1905_v56, %v1906_v30  ;;  %v4478_v57 = vor.u32 %v8954_v12, %v8952_v29  ;;  %v9030_v12 = vld [vmem:[#allocation2 + $0xa4] sm:$0x1]  ;;  %v4291_v50 = vld [vmem:[#allocation2 + $0xa8] sm:$0xf] }
 0x136   : > { %v9014_v40 = vrot.slane %v4553_v13, 5  ;;  %v4488_v9 = vor.u32 %v8962_v24, %v8956_v6  ;;  %v4512_v3 = vor.u32 %v4511_v54, %v8989_v55  ;;  %v4515_v0 = vshll.u32 %v8985_v26, 16  ;;  %v9043_v42 = vld [vmem:[%s10016_s1 + $0x100] sm:$0xff]  }
 0x137   : > { %7057 = vmatpush3.bf16.msra.mxu1 %v7709_v51  ;;  %v4522_v51 = vrot.slane %v4520_v11, 4  ;;  %v4535_v11 = vrot.slane %v4533_v38, 4  ;;  %v4502_v38 = vor.u32 %v8967_v15, %v8965_v28  ;;  %v9023_v56 = vrot.slane %v4577_v14, 5 }
 0x138   : > { %7058 = vmatprep.subr.bf16.mxu1 %v7711_v5  ;;  %v4583_v13 = vrot.slane %v4581_v2, 4  ;;  %v4539_v29 = vshll.u32 %v8994_v7, 16  ;;  %v4563_v54 = vshll.u32 %v9003_v27, 16  ;;  %v4550_v2 = vor.u32 %v4549_v37, %v4546_v53 }
 0x139   : > { %7255 = vmatmul.mubr.bf16.vlgmr.msra.gmra.mrb[0].mxu0 %v8776_v48  ;;  %v4536_v30 = vor.u32 %v4535_v11, %v9001_v22  ;;  %v7712_v48 = vld [vmem:[%s10016_s1 + $0x210] sm:$0xff]   ;;  %v4489_v24 = vrot.slane %v4488_v9, 4  ;;  %v4503_v28 = vrot.slane %v4502_v38, 4  ;;  %v4517_v15 = vrot.slane %v4515_v0, 5 }
 0x13a   : > { %7027 = vmatmul.mubr.bf16.gmra.mrb[12].mxu1 %v10070_v46  ;;  %v4559_v46 = vrot.slane %v4557_v21, 4  ;;  %7287 = vmatpush3.bf16.msra.mxu0 %v8752_v17  ;;  %v4526_v21 = vor.u32 %v4525_v49, %v4522_v51  ;;  %v4470_v17 = vsel %vm7909_vm6, %v8950_v41, %v8933_v58  ;;  %v4479_v49 = vrot.slane %v4478_v57, 4  ;;  %v9048_v41 = vld [vmem:[#allocation2 + $0xac] sm:$0xf] }
 0x13b   : > { %7030 = vmatprep.mubr.bf16.mxu1 %v10071_v4  ;;  %7059 = vmatpush3.bf16.msra.mxu1 %v7711_v5  ;;  %v4570_v4 = vrot.slane %v4568_v39, 4  ;;  %v4573_v5 = vrot.slane %v4571_v23, 5  ;;  %v4513_v51 = vrot.slane %v4512_v3, 4  ;;  %v4584_v58 = vor.u32 %v4583_v13, %v9023_v56  ;;  %v9059_v3 = vld [vmem:[#allocation2 + $0xb0] sm:$0x1] }
 0x13c   : > { %7060 = vmatprep.subr.bf16.mxu1 %v7713_v10  ;;  %7258 = vmatprep.mubr.bf16.mxu0 %v8820_v18  ;;  %v4493_v18 = vrot.slane %v4491_v60, 5  ;;  %v4560_v14 = vor.u32 %v4559_v46, %v9014_v40  ;;  %v4587_v37 = vshll.u32 %v9030_v12, 16  ;;  %v10072_v60 = vcombine.low %v8728_v32, %v8738_v52 }
 0x13d   : > { %7288 = vmatprep.subr.bf16.mxu0 %v7710_v36  ;;  %v4574_v39 = vor.u32 %v4573_v5, %v4570_v4  ;;  %v4527_v23 = vrot.slane %v4526_v21, 4  ;;  %v4537_v11 = vrot.slane %v4536_v30, 4  ;;  %v4541_v53 = vrot.slane %v4539_v29, 5  ;;  %v9081_v29 = vld [vmem:[#allocation2 + $0xb4] sm:$0xf] }
 0x13e   : > { %7289 = vmatpush3.bf16.msra.mxu0 %v7710_v36  ;;  %v4565_v57 = vrot.slane %v4563_v54, 5  ;;  %v10073_v46 = vcombine.low %v8763_v47, %v8767_v1  ;;  %v4551_v9 = vrot.slane %v4550_v2, 4  ;;  %v4561_v38 = vrot.slane %v4560_v14, 4 }
 0x13f   : > { %7061 = vmatpush3.bf16.msra.mxu1 %v7713_v10  ;;  %v7714_v10 = vld [vmem:[%s10016_s1 + $0x218] sm:$0xff]   ;;  %7290 = vmatprep.subr.bf16.mxu0 %v7712_v48  ;;  %v4592_v32 = vshrl.u32 %v4291_v50, 16  ;;  %v4595_v52 = vshll.u32 %v4291_v50, 16  ;;  %v4484_v36 = vsel %vm7909_vm6, %v4479_v49, %v8956_v6  ;;  %v4494_v0 = vsel %vm7909_vm6, %v4489_v24, %v4493_v18 }
 0x140   : > { %7334 = vmatprep.subr.bf16.mxu1 %v9043_v42  ;;  %v4508_v4 = vsel %vm7909_vm6, %v4503_v28, %v8989_v55  ;;  %v4601_v47 = vshll.u32 %v9048_v41, 16  ;;  %v4575_v1 = vrot.slane %v4574_v39, 4  ;;  %v4585_v5 = vrot.slane %v4584_v58, 4 }
 0x141   : > { %7259 = vmatmul.mubr.bf16.gmra.mrb[4].mxu0 %v8912_v33  ;;  %v4589_v13 = vrot.slane %v4587_v37, 5  ;;  %v4605_v21 = vshrl.u32 %v9048_v41, 16  ;;  %v4518_v6 = vsel %vm7909_vm6, %v4513_v51, %v4517_v15  ;;  %v4532_v30 = vsel %vm7909_vm6, %v4527_v23, %v9001_v22  ;;  %v5013_v15 = vld [vmem:[#allocation2 + $0x48] sm:$0xe] }
 0x142   : > { %7031 = vmatmul.mubr.bf16.gmra.mrb[16].mxu1 %v10072_v60  ;;  %7262 = vmatprep.mubr.bf16.mxu0 %v8923_v62  ;;  %v4542_v55 = vsel %vm7909_vm6, %v4537_v11, %v4541_v53  ;;  %v4611_v33 = vshll.u32 %v9059_v3, 16  ;;  %v7717_v62 = vld [vmem:[%s10016_s1 + $0x220] sm:$0xff]   ;;  %v4556_v54 = vsel %vm7909_vm6, %v4551_v9, %v9014_v40  ;;  %v9091_v22 = vrot.slane %v4592_v32, 4  ;;  %v9106_v40 = vld [vmem:[#allocation2 + $0xb8] sm:$0xf]  ;;  %v7720_v11 = vld [vmem:[%s10016_s1 + $0x228] sm:$0xff]  }
 0x143   : > { %7034 = vmatprep.mubr.bf16.mxu1 %v10073_v46  ;;  %7291 = vmatpush3.bf16.msra.mxu0 %v7712_v48  ;;  %v4566_v48 = vsel %vm7909_vm6, %v4561_v38, %v4565_v57  ;;  %v9093_v18 = vrot.slane %v4595_v52, 5  ;;  %v10074_v2 = vsel %vm7909_vm6, %v8944_v31, %v8882_v19  ;;  %v6392_v49 = vcombine.low %v8983_v25, %v9010_v63  ;;  %v5014_v31 = vld [vmem:[#allocation2 + $0x54] sm:$0xe]  ;;  %v5015_v57 = vld [vmem:[#allocation2 + $0x60] sm:$0xe] }
 0x144   : > { %7292 = vmatprep.subr.bf16.mxu0 %v7714_v10  ;;  %v6599_v14 = vcombine.low %v10074_v2, %v4470_v17  ;;  %v9102_v24 = vcombine.low %v4484_v36, %v4494_v0  ;;  %v9104_v28 = vrot.slane %v4601_v47, 5  ;;  %v4580_v50 = vsel %vm7909_vm6, %v4575_v1, %v9023_v56  ;;  %v10078_v36 = vld [vmem:[#allocation6_spill] sm:$0xff]  ;;  %v5016_v1 = vld [vmem:[#allocation2 + $0x6c] sm:$0xe]  ;;  %v10082_v2 = vld [vmem:[#allocation16_spill] sm:$0xff] }
 0x145   : > { %v4590_v51 = vsel %vm7909_vm6, %v4585_v5, %v4589_v13  ;;  %v9113_v39 = vrot.slane %v4605_v21, 4  ;;  %v4616_v19 = vshrl.u32 %v9081_v29, 16  ;;  %v10075_v17 = vcombine.low %v8788_v59, %v8801_v35  ;;  %v7723_v21 = vld [vmem:[%s10016_s1 + $0x230] sm:$0xff]  }
 0x146   : > { %v9119_v58 = vcombine.low %v4508_v4, %v4518_v6  ;;  %v9121_v37 = vcombine.low %v4532_v30, %v4542_v55  ;;  %v9123_v60 = vcombine.low %v4556_v54, %v4566_v48  ;;  %v9125_v56 = vrot.slane %v4611_v33, 5  ;;  %v10079_v4 = vld [vmem:[#allocation8_spill] sm:$0xff]  ;;  %v10080_v33 = vld [vmem:[#allocation9_spill] sm:$0xff] }
 0x147   : > { %7293 = vmatpush3.bf16.msra.mxu0 %v7714_v10  ;;  %v10076_v23 = vcombine.low %v8840_v20, %v8876_v8  ;;  %v4598_v59 = vor.u32 %v9093_v18, %v9091_v22  ;;  %v4619_v35 = vshll.u32 %v9081_v29, 16  ;;  %v4625_v10 = vshll.u32 %v9106_v40, 16  ;;  %v10077_v20 = vld [vmem:[#allocation7_spill] sm:$0xff]  ;;  %v4297_v6 = vld [vmem:[#allocation2 + $0xc0] sm:$0xf]  ;;  %v10081_v22 = vld [vmem:[#allocation13_spill] sm:$0xff] }
 0x148   : > { %7294 = vmatprep.subr.bf16.mxu0 %v7717_v62  ;;  %v6621_v53 = vrot.slane %v5013_v15, 9  ;;  %v9137_v46 = vcombine.low %v4580_v50, %v4590_v51  ;;  %v5103_v9 = vrot.slane %v8759_v61, 5  ;;  %v5106_v8 = vrot.slane %v10077_v20, 5  ;;  %v9168_v15 = vld [vmem:[#allocation2 + $0xbc] sm:$0x1] }
 0x149   : > { %v6622_v38 = vrot.slane %v5014_v31, 9  ;;  %7263 = vmatmul.mubr.bf16.gmra.mrb[8].mxu0 %v8927_v45  ;;  %v4608_v32 = vor.u32 %v9113_v39, %v9104_v28  ;;  %v9144_v52 = vrot.slane %v4616_v19, 4  ;;  %v5110_v0 = vrot.slane %v10078_v36, 5  ;;  %v10083_v19 = vld [vmem:[#allocation10_spill] sm:$0xff]  ;;  %v10084_v31 = vld [vmem:[#allocation11_spill] sm:$0xff] }
 0x14a   : > { %7035 = vmatmul.mubr.bf16.gmra.mrb[20].mxu1 %v10075_v17  ;;  %v5113_v47 = vrot.slane %v10079_v4, 5  ;;  %7266 = vmatprep.mubr.bf16.mxu0 %v6599_v14  ;;  %v4629_v5 = vshrl.u32 %v9106_v40, 16  ;;  %v9151_v61 = vsel %vm8039_vm13, %v6621_v53, %v5103_v9  ;;  %v5105_v13 = vrot.slane %v5103_v9, 4 }
 0x14b   : > { %7038 = vmatprep.mubr.bf16.mxu1 %v10076_v23  ;;  %7295 = vmatpush3.bf16.msra.mxu0 %v7717_v62  ;;  %v6623_v45 = vrot.slane %v5015_v57, 9  ;;  %v9158_v30 = vsel %vm8039_vm13, %v6622_v38, %v5110_v0  ;;  %v5112_v55 = vrot.slane %v5110_v0, 4  ;;  %v5117_v29 = vrot.slane %v10080_v33, 5  ;;  %v9183_v23 = vld [vmem:[#allocation2 + $0xc4] sm:$0xf]  ;;  %v10087_v38 = vld [vmem:[#allocation14_spill] sm:$0xff] }
 0x14c   : > { %7296 = vmatprep.subr.bf16.mxu0 %v7720_v11  ;;  %v5120_v62 = vrot.slane %v8869_v16, 5  ;;  %v9164_v54 = vsel %vm8039_vm13, %v5105_v13, %v5106_v8  ;;  %v6624_v48 = vrot.slane %v5016_v1, 9  ;;  %v5124_v18 = vrot.slane %v10081_v22, 5  ;;  %v10086_v8 = vld [vmem:[#allocation12_spill] sm:$0xff]  ;;  %v5017_v13 = vld [vmem:[#allocation2 + $0x78] sm:$0xe] }
 0x14d   : > { %v5127_v14 = vrot.slane %v10082_v2, 5  ;;  %v6653_v50 = vcombine.low %v9151_v61, %v9164_v54  ;;  %v9174_v51 = vsel %vm8039_vm13, %v5112_v55, %v5113_v47  ;;  %v9178_v16 = vsel %vm8039_vm13, %v6623_v45, %v5117_v29  ;;  %v7726_v47 = vld [vmem:[%s10016_s1 + $0x238] sm:$0xff]   ;;  %v7732_v61 = vld [vmem:[#allocation2 + $0xa8] sm:$0xff]  }
 0x14e   : > { %v5119_v39 = vrot.slane %v5117_v29, 4  ;;  %v10085_v17 = vcombine.low %v10083_v19, %v10084_v31  ;;  %v4640_v53 = vshrl.u32 %v4297_v6, 16  ;;  %v6654_v57 = vcombine.low %v9158_v30, %v9174_v51  ;;  %v10089_v2 = vld [vmem:[#allocation15_spill] sm:$0xff] }
 0x14f   : > { %7297 = vmatpush3.bf16.msra.mxu0 %v7720_v11  ;;  %v9189_v9 = vsel %vm8039_vm13, %v6624_v48, %v5124_v18  ;;  %v5126_v20 = vrot.slane %v5124_v18, 4  ;;  %v10088_v36 = vcombine.low %v10086_v8, %v10087_v38  ;;  %v9194_v0 = vrot.slane %v4598_v59, 4  ;;  %v5018_v48 = vld [vmem:[#allocation2 + $0x84] sm:$0xe] }
 0x150   : > { %v9196_v4 = vrot.slane %v4619_v35, 5  ;;  %7298 = vmatprep.subr.bf16.mxu0 %v7723_v21  ;;  %v4643_v11 = vshll.u32 %v4297_v6, 16  ;;  %v9203_v1 = vsel %vm8039_vm13, %v5119_v39, %v5120_v62  ;;  %v9205_v45 = vrot.slane %v4625_v10, 5  ;;  %v2643_v6 = vld [vmem:[#allocation2 + $0x78] sm:$0xf] }
 0x151   : > { %v4635_v55 = vshll.u32 %v9168_v15, 16  ;;  %v6655_v59 = vcombine.low %v9178_v16, %v9203_v1  ;;  %v9212_v35 = vsel %vm8039_vm13, %v5126_v20, %v5127_v14  ;;  %7267 = vmatmul.mubr.bf16.gmra.mrb[12].mxu0 %v9102_v24  ;;  %v4609_v33 = vrot.slane %v4608_v32, 4  ;;  %v7715_v24 = vld [vmem:[#allocation2 + $0xc] sm:$0xff]  }
 0x152   : > { %7039 = vmatmul.mubr.bf16.gmra.mrb[24].mxu1 %v10085_v17  ;;  %v9215_v29 = vrot.slane %v4629_v5, 4  ;;  %v4649_v62 = vshll.u32 %v9183_v23, 16  ;;  %v6656_v10 = vcombine.low %v9189_v9, %v9212_v35  ;;  %7270 = vmatprep.mubr.bf16.mxu0 %v9119_v58  ;;  %v9221_v22 = vrot.slane %v4640_v53, 4  ;;  %v10091_v53 = vld [vmem:[#allocation5_spill] sm:$0xff] }
 0x153   : > { %7042 = vmatprep.mubr.bf16.mxu1 %v10088_v36  ;;  %7299 = vmatpush3.bf16.msra.mxu0 %v7723_v21  ;;  %v6625_v18 = vrot.slane %v5017_v13, 9  ;;  %v5131_v14 = vrot.slane %v10089_v2, 5  ;;  %v5134_v39 = vrot.slane %v8985_v26, 5  ;;  %v9225_v32 = vrot.slane %v4643_v11, 5  ;;  %v10090_v21 = vld [vmem:[#allocation4_spill] sm:$0xff] }
 0x154   : > { %v4653_v5 = vshrl.u32 %v9183_v23, 16  ;;  %7300 = vmatprep.subr.bf16.mxu0 %v7726_v47  ;;  %v2881_v19 = vshrl.u32 %v2643_v6, 16  ;;  %v2884_v31 = vshll.u32 %v2643_v6, 16  ;;  %v2903_v20 = vsel %vm7909_vm6, %v10091_v53, %v10090_v21  ;;  %v4300_v6 = vld [vmem:[#allocation2 + $0xcc] sm:$0xf]  ;;  %v7718_v21 = vld [vmem:[#allocation2 + $0x24] sm:$0xff]  }
 0x155   : > { %v9230_v17 = vsel %vm8039_vm13, %v6625_v18, %v5131_v14  ;;  %v5133_v58 = vrot.slane %v5131_v14, 4  ;;  %v6626_v8 = vrot.slane %v5018_v48, 9  ;;  %v4604_v26 = vsel %vm7909_vm6, %v9194_v0, %v9104_v28  ;;  %v9248_v48 = vld [vmem:[#allocation2 + $0xd0] sm:$0xf]  ;;  %v10092_v0 = vld [vmem:[#allocation17_spill] sm:$0xff] }
 0x156   : > { %v4622_v38 = vor.u32 %v9196_v4, %v9144_v52  ;;  %v2883_v36 = vrot.slane %v2881_v19, 4  ;;  %v2886_v11 = vrot.slane %v2884_v31, 5  ;;  %v4614_v13 = vsel %vm7909_vm6, %v4609_v33, %v9125_v56  ;;  %v5019_v56 = vld [vmem:[#allocation2 + $0x90] sm:$0xe]  ;;  %v9262_v33 = vld [vmem:[#allocation2 + $0xc8] sm:$0x1] }
 0x157   : > { %7301 = vmatpush3.bf16.msra.mxu0 %v7726_v47  ;;  %v9252_v28 = vsel %vm8039_vm13, %v5133_v58, %v5134_v39  ;;  %v5138_v52 = vrot.slane %v10092_v0, 5  ;;  %v5141_v4 = vrot.slane %v8994_v7, 5  ;;  %v9256_v18 = vrot.slane %v4649_v62, 5  ;;  %v7716_v19 = vld [vmem:[#allocation2 + $0x18] sm:$0xff]   ;;  %v10093_v31 = vld [vmem:[#allocation18_spill] sm:$0xff] }
 0x158   : > { %v4655_v25 = vrot.slane %v4653_v5, 4  ;;  %v6657_v63 = vcombine.low %v9230_v17, %v9252_v28  ;;  %v4632_v47 = vor.u32 %v9215_v29, %v9205_v45  ;;  %v4646_v2 = vor.u32 %v9225_v32, %v9221_v22  ;;  %v7804_v17 = vld [vmem:[#allocation2 + $0xac] sm:$0xf] }
 0x159   : > { %v9268_v7 = vsel %vm8039_vm13, %v6626_v8, %v5138_v52  ;;  %v5140_v62 = vrot.slane %v5138_v52, 4  ;;  %7271 = vmatmul.mubr.bf16.gmra.mrb[16].mxu0 %v9121_v37  ;;  %v4664_v14 = vshrl.u32 %v4300_v6, 16  ;;  %v4667_v39 = vshll.u32 %v4300_v6, 16  ;;  %v10094_v8 = vld [vmem:[#allocation3_spill] sm:$0xff] }
 0x15a   : > { %7043 = vmatmul.mubr.bf16.gmra.mrb[28].mxu1 %v6392_v49  ;;  %v2887_v49 = vor.u32 %v2886_v11, %v2883_v36  ;;  %7274 = vmatprep.mubr.bf16.mxu0 %v9123_v60  ;;  %v4677_v29 = vshrl.u32 %v9248_v48, 16  ;;  %v6627_v32 = vrot.slane %v5019_v56, 9  ;;  %v5145_v58 = vrot.slane %v10093_v31, 5 }
 0x15b   : > { %7062 = vmatprep.mubr.bf16.mxu1 %v7715_v24  ;;  %v4673_v24 = vshll.u32 %v9248_v48, 16  ;;  %v9276_v22 = vsel %vm8039_vm13, %v5140_v62, %v5141_v4  ;;  %v4656_v37 = vor.u32 %v4655_v25, %v9256_v18  ;;  %v4659_v53 = vshll.u32 %v9262_v33, 16 }
 0x15c   : > { %v2888_v5 = vrot.slane %v2887_v49, 4  ;;  %v6658_v60 = vcombine.low %v9268_v7, %v9276_v22  ;;  %v6605_v11 = vcombine.low %v4604_v26, %v4614_v13  ;;  %v4623_v6 = vrot.slane %v4622_v38, 4  ;;  %v9290_v49 = vld [vmem:[#allocation2 + $0xd4] sm:$0x1]  ;;  %v5020_v13 = vld [vmem:[#allocation2 + $0x9c] sm:$0xe] }
 0x15d   : > { %v4637_v0 = vrot.slane %v4635_v55, 5  ;;  %v4633_v4 = vrot.slane %v4632_v47, 4  ;;  %v9294_v25 = vsel %vm8039_vm13, %v6627_v32, %v5145_v58  ;;  %v5147_v56 = vrot.slane %v5145_v58, 4 }
 0x15e   : > { %v2893_v36 = vsel %vm7909_vm6, %v2888_v5, %v10094_v8  ;;  %v5148_v62 = vrot.slane %v9003_v27, 5  ;;  %v4666_v5 = vrot.slane %v4664_v14, 4  ;;  %v4669_v31 = vrot.slane %v4667_v39, 5  ;;  %v7781_v27 = vld [vmem:[%s10016_s1 + $0x108] sm:$0xff]   ;;  %v7782_v8 = vld [vmem:[#allocation2 + $0x1c] sm:$0xf] }
 0x15f   : > { %v9288_v52 = vcombine.low %v2893_v36, %v2903_v20  ;;  %v9297_v26 = vrot.slane %v4673_v24, 5  ;;  %v4679_v38 = vrot.slane %v4677_v29, 4  ;;  %v4647_v55 = vrot.slane %v4646_v2, 4 }
 0x160   : > { %v4657_v20 = vrot.slane %v4656_v37, 4  ;;  %v4661_v47 = vrot.slane %v4659_v53, 5  ;;  %v9302_v32 = vsel %vm8039_vm13, %v5147_v56, %v5148_v62  ;;  %v4638_v2 = vsel %vm7909_vm6, %v4633_v4, %v4637_v0  ;;  %v5021_v56 = vld [vmem:[#allocation2 + $0xa8] sm:$0xe] }
 0x161   : > { %v6659_v14 = vcombine.low %v9294_v25, %v9302_v32  ;;  %7275 = vmatmul.mubr.bf16.gmra.mrb[20].mxu0 %v9137_v46  ;;  %v4683_v39 = vshll.u32 %v9290_v49, 16  ;;  %v6628_v24 = vrot.slane %v5020_v13, 9  ;;  %v4670_v29 = vor.u32 %v4669_v31, %v4666_v5  ;;  %v7721_v46 = vld [vmem:[#allocation2 + $0x3c] sm:$0xff]  }
 0x162   : > { %7063 = vmatmul.mubr.bf16.vlgmr.msra.gmra.mrb[0].mxu1 %v7716_v19  ;;  %v7719_v19 = vld [vmem:[#allocation2 + $0x30] sm:$0xff]   ;;  %7278 = vmatprep.mubr.bf16.mxu0 %v6605_v11  ;;  %v4680_v58 = vor.u32 %v4679_v38, %v9297_v26  ;;  %v5155_v37 = vrot.slane %v9030_v12, 5  ;;  %v4662_v53 = vsel %vm7909_vm6, %v4657_v20, %v4661_v47  ;;  %v5075_v36 = vrot.slane %v7782_v8, 5 }
 0x163   : > { %7342 = vmatpush3.bf16.msra.mxu1 %v9043_v42  ;;  %7066 = vmatprep.mubr.bf16.mxu1 %v7718_v21  ;;  %v4628_v42 = vsel %vm7909_vm6, %v4623_v6, %v9205_v45  ;;  %v5152_v21 = vrot.slane %v8975_v44, 5  ;;  %v4652_v45 = vsel %vm7909_vm6, %v4647_v55, %v9256_v18  ;;  %v7783_v11 = vld [vmem:[%s10016_s1 + $0x110] sm:$0xff]   ;;  %v5009_v6 = vld [vmem:[#allocation2 + $0x18] sm:$0xe]  ;;  %v4685_v4 = vrot.slane %v4683_v39, 5 }
 0x164   : > { %7335 = vmatprep.subr.bf16.mxu1 %v7781_v27  ;;  %v6606_v0 = vcombine.low %v4628_v42, %v4638_v2  ;;  %v6607_v18 = vcombine.low %v4652_v45, %v4662_v53  ;;  %v4671_v62 = vrot.slane %v4670_v29, 4  ;;  %v4681_v5 = vrot.slane %v4680_v58, 4  ;;  %v7784_v55 = vld [vmem:[#allocation2 + $0x20] sm:$0x1]  ;;  %v7786_v39 = vld [vmem:[#allocation2 + $0x28] sm:$0xf] }
 0x165   : > { %v9329_v44 = vsel %vm8039_vm13, %v6628_v24, %v5152_v21  ;;  %v5154_v12 = vrot.slane %v5152_v21, 4  ;;  %v6617_v38 = vrot.slane %v5009_v6, 9  ;;  %v5077_v13 = vrot.slane %v5075_v36, 4  ;;  %v7722_v29 = vld [vmem:[#allocation2 + $0x48] sm:$0xff]   ;;  %v5022_v45 = vld [vmem:[#allocation2 + $0xb4] sm:$0xe] }
 0x166   : > { %v5078_v20 = vrot.slane %v7784_v55, 5  ;;  %v6629_v42 = vrot.slane %v5021_v56, 9  ;;  %v5159_v2 = vrot.slane %v9048_v41, 5  ;;  %v5082_v24 = vrot.slane %v7786_v39, 5  ;;  %v7724_v53 = vld [vmem:[#allocation2 + $0x54] sm:$0xff]   ;;  %v7788_v6 = vld [vmem:[%s10016_s1 + $0x120] sm:$0xff]  }
 0x167   : > { %7343 = vmatpush3.bf16.msra.mxu1 %v7781_v27  ;;  %v9333_v31 = vsel %vm8039_vm13, %v5154_v12, %v5155_v37  ;;  %v7785_v27 = vld [vmem:[%s10016_s1 + $0x118] sm:$0xff]   ;;  %v4676_v58 = vsel %vm7909_vm6, %v4671_v62, %v9297_v26  ;;  %v4686_v21 = vsel %vm7909_vm6, %v4681_v5, %v4685_v4  ;;  %v5010_v37 = vld [vmem:[#allocation2 + $0x24] sm:$0xe]  ;;  %v5011_v12 = vld [vmem:[#allocation2 + $0x30] sm:$0xe]  ;;  %v5166_v55 = vrot.slane %v9106_v40, 5 }
 0x168   : > { %7336 = vmatprep.subr.bf16.mxu1 %v7783_v11  ;;  %v6660_v47 = vcombine.low %v9329_v44, %v9333_v31  ;;  %v5161_v41 = vrot.slane %v5159_v2, 4  ;;  %v5079_v8 = vsel %vm8039_vm13, %v5077_v13, %v5078_v20  ;;  %v6608_v4 = vcombine.low %v4676_v58, %v4686_v21  ;;  %v5023_v40 = vld [vmem:[#allocation2 + $0xc0] sm:$0xe] }
 0x169   : > { %7279 = vmatmul.mubr.bf16.gmra.mrb[24].mxu0 %v6606_v0  ;;  %v6618_v56 = vrot.slane %v5010_v37, 9  ;;  %v5084_v5 = vrot.slane %v5082_v24, 4  ;;  %v6619_v20 = vrot.slane %v5011_v12, 9  ;;  %v5169_v39 = vrot.slane %v9168_v15, 5  ;;  %v7725_v21 = vld [vmem:[#allocation2 + $0x60] sm:$0xff]   ;;  %v7793_v12 = vld [vmem:[%s10016_s1 + $0x130] sm:$0xff]  }
 0x16a   : > { %7067 = vmatmul.mubr.bf16.gmra.mrb[4].mxu1 %v7719_v19  ;;  %v5162_v19 = vrot.slane %v9059_v3, 5  ;;  %7282 = vmatprep.mubr.bf16.mxu0 %v6607_v18  ;;  %v5076_v3 = vsel %vm8039_vm13, %v6617_v38, %v5075_v36  ;;  %v6630_v18 = vrot.slane %v5022_v45, 9  ;;  %v7789_v38 = vld [vmem:[#allocation2 + $0x2c] sm:$0x1]  ;;  %v5168_v58 = vrot.slane %v5166_v55, 4 }
 0x16b   : > { %7070 = vmatprep.mubr.bf16.mxu1 %v7721_v46  ;;  %7344 = vmatpush3.bf16.msra.mxu1 %v7783_v11  ;;  %v9349_v46 = vsel %vm8039_vm13, %v6629_v42, %v5159_v2  ;;  %v7787_v11 = vld [vmem:[#allocation2 + $0x34] sm:$0xf]  ;;  %v6649_v62 = vcombine.low %v5076_v3, %v5079_v8  ;;  %v5085_v13 = vrot.slane %v7789_v38, 5  ;;  %v7790_v42 = vld [vmem:[#allocation2 + $0x38] sm:$0x1]  ;;  %v5083_v37 = vsel %vm8039_vm13, %v6618_v56, %v5082_v24  ;;  %v7727_v8 = vld [vmem:[#allocation2 + $0x6c] sm:$0xff]  }
 0x16c   : > { %7337 = vmatprep.subr.bf16.mxu1 %v7785_v27  ;;  %v5089_v26 = vrot.slane %v7787_v11, 5  ;;  %v9360_v0 = vsel %vm8039_vm13, %v5161_v41, %v5162_v19  ;;  %v5092_v2 = vrot.slane %v7790_v42, 5  ;;  %v7791_v19 = vld [vmem:[%s10016_s1 + $0x128] sm:$0xff]   ;;  %v5012_v41 = vld [vmem:[#allocation2 + $0x3c] sm:$0xe]  ;;  %v9379_v3 = vsel %vm8039_vm13, %v5168_v58, %v5169_v39 }
 0x16d   : > { %v6661_v36 = vcombine.low %v9349_v46, %v9360_v0  ;;  %v5086_v15 = vsel %vm8039_vm13, %v5084_v5, %v5085_v13  ;;  %v7792_v45 = vld [vmem:[#allocation2 + $0x40] sm:$0xf]  ;;  %v5173_v56 = vrot.slane %v9183_v23, 5  ;;  %v7794_v5 = vld [vmem:[#allocation2 + $0x44] sm:$0x1]  ;;  %v7795_v23 = vld [vmem:[%s10016_s1 + $0x138] sm:$0xff]  }
 0x16e   : > { %v5090_v11 = vsel %vm8039_vm13, %v6619_v20, %v5089_v26  ;;  %v5099_v38 = vrot.slane %v7794_v5, 5  ;;  %v5024_v42 = vld [vmem:[#allocation2 + $0xcc] sm:$0xe]  ;;  %v2986_v28 = vshll.u32 %v7804_v17, 16  ;;  %v7809_v0 = vld [vmem:[#allocation2 + $0xc8] sm:$0x1] }
 0x16f   : > { %7345 = vmatpush3.bf16.msra.mxu1 %v7785_v27  ;;  %v5091_v27 = vrot.slane %v5089_v26, 4  ;;  %v5176_v26 = vrot.slane %v9262_v33, 5  ;;  %v6632_v39 = vrot.slane %v5024_v42, 9 }
 0x170   : > { %7338 = vmatprep.subr.bf16.mxu1 %v7788_v6 }
 0x171   : > { %7283 = vmatmul.mubr.bf16.gmra.mrb[28].mxu0 %v6608_v4  ;;  %v6631_v4 = vrot.slane %v5023_v40, 9 }
 0x172   : > { %7071 = vmatmul.mubr.bf16.gmra.mrb[8].mxu1 %v7722_v29  ;;  %v9371_v29 = vsel %vm8039_vm13, %v6630_v18, %v5166_v55  ;;  %7302 = vmatprep.mubr.bf16.mxu0 %v6649_v62  ;;  %v6650_v18 = vcombine.low %v5083_v37, %v5086_v15  ;;  %v6620_v62 = vrot.slane %v5012_v41, 9  ;;  %v5180_v37 = vrot.slane %v9248_v48, 5  ;;  %v7729_v15 = vld [vmem:[#allocation2 + $0x84] sm:$0xff]  }
 0x173   : > { %7074 = vmatprep.mubr.bf16.mxu1 %v7724_v53  ;;  %7346 = vmatpush3.bf16.msra.mxu1 %v7788_v6  ;;  %v5096_v53 = vrot.slane %v7792_v45, 5  ;;  %v5093_v6 = vsel %vm8039_vm13, %v5091_v27, %v5092_v2  ;;  %v6662_v24 = vcombine.low %v9371_v29, %v9379_v3  ;;  %v9394_v20 = vsel %vm8039_vm13, %v6631_v4, %v5173_v56 }
 0x174   : > { %7339 = vmatprep.subr.bf16.mxu1 %v7791_v19  ;;  %v6651_v13 = vcombine.low %v5090_v11, %v5093_v6  ;;  %v5175_v27 = vrot.slane %v5173_v56, 4  ;;  %v5183_v41 = vrot.slane %v9290_v49, 5  ;;  %v9413_v45 = vsel %vm8039_vm13, %v6632_v39, %v5180_v37  ;;  %v7730_v49 = vld [vmem:[#allocation2 + $0x90] sm:$0xff]  }
 0x175   : > { %v5098_v55 = vrot.slane %v5096_v53, 4  ;;  %v5097_v58 = vsel %vm8039_vm13, %v6620_v62, %v5096_v53  ;;  %v7796_v53 = vld [vmem:[#allocation2 + $0x70] sm:$0xf] }
 0x176   : > { %v9401_v2 = vsel %vm8039_vm13, %v5175_v27, %v5176_v26  ;;  %v2866_v4 = vshll.u32 %v7796_v53, 16  ;;  %v2870_v56 = vshrl.u32 %v7796_v53, 16  ;;  %v7797_v27 = vld [vmem:[#allocation2 + $0x74] sm:$0x1] }
 0x177   : > { %7347 = vmatpush3.bf16.msra.mxu1 %v7791_v19  ;;  %v6663_v33 = vcombine.low %v9394_v20, %v9401_v2  ;;  %v7728_v19 = vld [vmem:[#allocation2 + $0x78] sm:$0xff]   ;;  %v5100_v40 = vsel %vm8039_vm13, %v5098_v55, %v5099_v38  ;;  %v2646_v55 = vld [vmem:[#allocation2 + $0x84] sm:$0xf]  ;;  %v2876_v43 = vshll.u32 %v7797_v27, 16 }
 0x178   : > { %7340 = vmatprep.subr.bf16.mxu1 %v7793_v12  ;;  %v6652_v11 = vcombine.low %v5097_v58, %v5100_v40  ;;  %v2868_v38 = vrot.slane %v2866_v4, 5  ;;  %v2872_v26 = vrot.slane %v2870_v56, 4  ;;  %v2905_v39 = vshrl.u32 %v2646_v55, 16  ;;  %v7798_v58 = vld [vmem:[#allocation2 + $0x88] sm:$0xf] }
 0x179   : > { %7303 = vmatmul.mubr.bf16.vlgmr.msra.gmra.mrb[0].mxu0 %v6650_v18  ;;  %v2914_v40 = vshll.u32 %v7798_v58, 16  ;;  %v2878_v54 = vrot.slane %v2876_v43, 5 }
 0x17a   : > { %7075 = vmatmul.mubr.bf16.gmra.mrb[12].mxu1 %v7725_v21  ;;  %7306 = vmatprep.mubr.bf16.mxu0 %v6651_v13  ;;  %v2640_v21 = vld [vmem:[#allocation2 + $0x6c] sm:$0xf]  ;;  %v7731_v13 = vld [vmem:[#allocation2 + $0x9c] sm:$0xff]  }
 0x17b   : > { %7078 = vmatprep.mubr.bf16.mxu1 %v7727_v8  ;;  %7348 = vmatpush3.bf16.msra.mxu1 %v7793_v12  ;;  %v5182_v8 = vrot.slane %v5180_v37, 4  ;;  %v2857_v6 = vshrl.u32 %v2640_v21, 16  ;;  %v2860_v12 = vshll.u32 %v2640_v21, 16  ;;  %v2918_v21 = vshrl.u32 %v7798_v58, 16  ;;  %v2649_v37 = vld [vmem:[#allocation2 + $0x90] sm:$0xf] }
 0x17c   : > { %7341 = vmatprep.subr.bf16.mxu1 %v7795_v23  ;;  %v2929_v4 = vshrl.u32 %v2649_v37, 16  ;;  %v2932_v56 = vshll.u32 %v2649_v37, 16  ;;  %v7734_v37 = vld [vmem:[#allocation2 + $0xc0] sm:$0xff]  }
 0x17d   : > { %v9417_v18 = vsel %vm8039_vm13, %v5182_v8, %v5183_v41  ;;  %v2859_v62 = vrot.slane %v2857_v6, 4  ;;  %v2862_v5 = vrot.slane %v2860_v12, 5  ;;  %v2907_v41 = vrot.slane %v2905_v39, 4  ;;  %v7733_v6 = vld [vmem:[#allocation2 + $0xb4] sm:$0xff]  }
 0x17e   : > { %v6664_v48 = vcombine.low %v9413_v45, %v9417_v18  ;;  %v9430_v12 = vrot.slane %v2914_v40, 5  ;;  %v2920_v53 = vrot.slane %v2918_v21, 4 }
 0x17f   : > { %7349 = vmatpush3.bf16.msra.mxu1 %v7795_v23  ;;  %v2863_v42 = vor.u32 %v2862_v5, %v2859_v62  ;;  %v2873_v23 = vor.u32 %v2872_v26, %v2868_v38  ;;  %v7800_v5 = vld [vmem:[#allocation2 + $0xa0] sm:$0xf] }
 0x180   : > { %v2962_v26 = vshll.u32 %v7800_v5, 16  ;;  %v2966_v16 = vshrl.u32 %v7800_v5, 16  ;;  %v2921_v43 = vor.u32 %v2920_v53, %v9430_v12  ;;  %v7803_v53 = vld [vmem:[#allocation2 + $0xa4] sm:$0x1] }
 0x181   : > { %7307 = vmatmul.mubr.bf16.gmra.mrb[4].mxu0 %v6652_v11  ;;  %v2652_v11 = vld [vmem:[#allocation2 + $0x9c] sm:$0xf] }
 0x182   : > { %7079 = vmatmul.mubr.bf16.gmra.mrb[16].mxu1 %v7728_v19  ;;  %7310 = vmatprep.mubr.bf16.mxu0 %v6653_v50  ;;  %v2908_v19 = vshll.u32 %v2646_v55, 16  ;;  %v2864_v50 = vrot.slane %v2863_v42, 4  ;;  %v2953_v51 = vshrl.u32 %v2652_v11, 16  ;;  %v2931_v42 = vrot.slane %v2929_v4, 4 }
 0x183   : > { %7082 = vmatprep.mubr.bf16.mxu1 %v7729_v15  ;;  %v2874_v15 = vrot.slane %v2873_v23, 4  ;;  %v2934_v23 = vrot.slane %v2932_v56, 5  ;;  %v9442_v40 = vrot.slane %v2962_v26, 5  ;;  %v2968_v21 = vrot.slane %v2966_v16, 4  ;;  %v2658_v56 = vld [vmem:[#allocation2 + $0xb4] sm:$0xf] }
 0x184   : > { %v2910_v8 = vrot.slane %v2908_v19, 5  ;;  %v2869_v1 = vsel %vm7909_vm6, %v2864_v50, %v2868_v38  ;;  %v2955_v58 = vrot.slane %v2953_v51, 4  ;;  %v2972_v4 = vshll.u32 %v7803_v53, 16  ;;  %v7808_v53 = vld [vmem:[#allocation2 + $0xbc] sm:$0x1] }
 0x185   : > { %v3001_v26 = vshrl.u32 %v2658_v56, 16  ;;  %v3004_v16 = vshll.u32 %v2658_v56, 16 }
 0x186   : > { %v2911_v27 = vor.u32 %v2910_v8, %v2907_v41  ;;  %v2935_v41 = vor.u32 %v2934_v23, %v2931_v42  ;;  %v7802_v8 = vld [vmem:[#allocation2 + $0x98] sm:$0x1]  ;;  %v2974_v42 = vrot.slane %v2972_v4, 5  ;;  %v3020_v4 = vshll.u32 %v7808_v53, 16 }
 0x188   : > { %v2912_v50 = vrot.slane %v2911_v27, 4 }
 0x189   : > { %7311 = vmatmul.mubr.bf16.gmra.mrb[8].mxu0 %v6654_v57  ;;  %v2956_v57 = vshll.u32 %v2652_v11, 16  ;;  %v2948_v11 = vshll.u32 %v7802_v8, 16 }
 0x18a   : > { %7083 = vmatmul.mubr.bf16.gmra.mrb[20].mxu1 %v7730_v49  ;;  %7314 = vmatprep.mubr.bf16.mxu0 %v6655_v59  ;;  %v7799_v49 = vld [vmem:[#allocation2 + $0x94] sm:$0xf]  ;;  %v2879_v59 = vsel %vm7909_vm6, %v2874_v15, %v2878_v54  ;;  %v2922_v15 = vrot.slane %v2921_v43, 4 }
 0x18b   : > { %7086 = vmatprep.mubr.bf16.mxu1 %v7731_v13  ;;  %v2938_v62 = vshll.u32 %v7799_v49, 16  ;;  %v2942_v30 = vshrl.u32 %v7799_v49, 16  ;;  %v7801_v13 = vld [vmem:[#allocation2 + $0x8c] sm:$0x1]  ;;  %v2958_v38 = vrot.slane %v2956_v57, 5  ;;  %v2936_v57 = vrot.slane %v2935_v41, 4 }
 0x18c   : > { %v2924_v55 = vshll.u32 %v7801_v13, 16  ;;  %v2950_v5 = vrot.slane %v2948_v11, 5 }
 0x18d   : > { %v9437_v39 = vrot.slane %v2938_v62, 5  ;;  %v2944_v19 = vrot.slane %v2942_v30, 4  ;;  %v2959_v35 = vor.u32 %v2958_v38, %v2955_v58  ;;  %v2917_v30 = vsel %vm7909_vm6, %v2912_v50, %v9430_v12  ;;  %v2661_v50 = vld [vmem:[#allocation2 + $0xc0] sm:$0xf] }
 0x18e   : > { %v2926_v54 = vrot.slane %v2924_v55, 5  ;;  %v3025_v8 = vshrl.u32 %v2661_v50, 16  ;;  %v3028_v11 = vshll.u32 %v2661_v50, 16 }
 0x18f   : > { %v2945_v9 = vor.u32 %v2944_v19, %v9437_v39  ;;  %v2960_v27 = vrot.slane %v2959_v35, 4  ;;  %v2988_v19 = vrot.slane %v2986_v28, 5  ;;  %v2941_v7 = vsel %vm7909_vm6, %v2936_v57, %v9437_v39  ;;  %v7807_v39 = vld [vmem:[#allocation2 + $0xc4] sm:$0xf] }
 0x190   : > { %v2927_v51 = vsel %vm7909_vm6, %v2922_v15, %v2926_v54  ;;  %v7806_v15 = vld [vmem:[#allocation2 + $0xb0] sm:$0x1]  ;;  %v3030_v28 = vrot.slane %v3028_v11, 5 }
 0x191   : > { %7315 = vmatmul.mubr.bf16.gmra.mrb[12].mxu0 %v6656_v10  ;;  %v2969_v10 = vor.u32 %v2968_v21, %v9442_v40  ;;  %v2946_v55 = vrot.slane %v2945_v9, 4  ;;  %v6467_v38 = vcombine.low %v2917_v30, %v2927_v51  ;;  %v3003_v21 = vrot.slane %v3001_v26, 4 }
 0x192   : > { %7087 = vmatmul.mubr.bf16.gmra.mrb[24].mxu1 %v7732_v61  ;;  %v6465_v61 = vcombine.low %v2869_v1, %v2879_v59  ;;  %7318 = vmatprep.mubr.bf16.mxu0 %v6657_v63  ;;  %v2990_v63 = vshrl.u32 %v7804_v17, 16  ;;  %v7805_v1 = vld [vmem:[#allocation2 + $0xb8] sm:$0xf]  ;;  %v2996_v41 = vshll.u32 %v7806_v15, 16  ;;  %v3038_v9 = vshrl.u32 %v7807_v39, 16 }
 0x193   : > { %7090 = vmatprep.mubr.bf16.mxu1 %v7733_v6  ;;  %v2655_v6 = vld [vmem:[#allocation2 + $0xa8] sm:$0xf]  ;;  %v3010_v59 = vshll.u32 %v7805_v1, 16  ;;  %v3014_v13 = vshrl.u32 %v7805_v1, 16  ;;  %v2970_v43 = vrot.slane %v2969_v10, 4  ;;  %v2951_v22 = vsel %vm7909_vm6, %v2946_v55, %v2950_v5 }
 0x194   : > { %v2977_v49 = vshrl.u32 %v2655_v6, 16  ;;  %v2980_v62 = vshll.u32 %v2655_v6, 16  ;;  %v2992_v58 = vrot.slane %v2990_v63, 4  ;;  %v3034_v6 = vshll.u32 %v7807_v39, 16 }
 0x195   : > { %v3016_v54 = vrot.slane %v3014_v13, 4  ;;  %v2975_v25 = vsel %vm7909_vm6, %v2970_v43, %v2974_v42  ;;  %v3027_v17 = vrot.slane %v3025_v8, 4  ;;  %v3040_v30 = vrot.slane %v3038_v9, 4 }
 0x196   : > { %v2979_v12 = vrot.slane %v2977_v49, 4  ;;  %v2982_v23 = vrot.slane %v2980_v62, 5  ;;  %v2998_v62 = vrot.slane %v2996_v41, 5  ;;  %v3036_v63 = vrot.slane %v3034_v6, 5 }
 0x197   : > { %v3022_v5 = vrot.slane %v3020_v4, 5 }
 0x198   : > { %v2983_v32 = vor.u32 %v2982_v23, %v2979_v12  ;;  %v3041_v46 = vor.u32 %v3040_v30, %v3036_v63 }
 0x199   : > { %7319 = vmatmul.mubr.bf16.gmra.mrb[16].mxu0 %v6658_v60  ;;  %v2965_v60 = vsel %vm7909_vm6, %v2960_v27, %v9442_v40  ;;  %v6468_v40 = vcombine.low %v2941_v7, %v2951_v22 }
 0x19a   : > { %7091 = vmatmul.mubr.bf16.gmra.mrb[28].mxu1 %v7734_v37  ;;  %7322 = vmatprep.mubr.bf16.mxu0 %v6659_v14  ;;  %v3006_v37 = vrot.slane %v3004_v16, 5  ;;  %v2993_v14 = vor.u32 %v2992_v58, %v2988_v19  ;;  %v2984_v56 = vrot.slane %v2983_v32, 4  ;;  %v3042_v55 = vrot.slane %v3041_v46, 4 }
 0x19b   : > { %7126 = vmatprep.mubr.bf16.mxu1 %v6465_v61  ;;  %v3012_v61 = vrot.slane %v3010_v59, 5 }
 0x19c   : > { %v3007_v35 = vor.u32 %v3006_v37, %v3003_v21  ;;  %v2994_v49 = vrot.slane %v2993_v14, 4  ;;  %v2989_v44 = vsel %vm7909_vm6, %v2984_v56, %v2988_v19 }
 0x19d   : > { %v3017_v10 = vor.u32 %v3016_v54, %v3012_v61  ;;  %v9519_v54 = vld [vmem:[%s10017_s2] ss:$0 sm:$0xff] }
 0x19e   : > { %v3008_v51 = vrot.slane %v3007_v35, 4  ;;  %v2999_v31 = vsel %vm7909_vm6, %v2994_v49, %v2998_v62 }
 0x19f   : > { %v3018_v57 = vrot.slane %v3017_v10, 4  ;;  %v6470_v1 = vcombine.low %v2989_v44, %v2999_v31 }
 0x1a0   : > { %v3013_v26 = vsel %vm7909_vm6, %v3008_v51, %v3012_v61 }
 0x1a1   : > { %7323 = vmatmul.mubr.bf16.gmra.mrb[20].mxu0 %v6660_v47  ;;  %v3031_v47 = vor.u32 %v3030_v28, %v3027_v17  ;;  %v3023_v16 = vsel %vm7909_vm6, %v3018_v57, %v3022_v5 }
 0x1a2   : > { %7127 = vmatmul.mubr.bf16.vlgmr.msra.gmra.mrb[16].mxu1 %v9288_v52  ;;  %v6469_v52 = vcombine.low %v2965_v60, %v2975_v25  ;;  %7326 = vmatprep.mubr.bf16.mxu0 %v6661_v36  ;;  %v3044_v36 = vshll.u32 %v7809_v0, 16  ;;  %v6471_v59 = vcombine.low %v3013_v26, %v3023_v16 }
 0x1a3   : > { %7130 = vmatprep.mubr.bf16.mxu1 %v6467_v38  ;;  %v3032_v13 = vrot.slane %v3031_v47, 4 }
 0x1a4   : > { %v3046_v27 = vrot.slane %v3044_v36, 5 }
 0x1a5   : > { %v3037_v43 = vsel %vm7909_vm6, %v3032_v13, %v3036_v63 }
 0x1a6   : > { %v3047_v42 = vsel %vm7909_vm6, %v3042_v55, %v3046_v27  ;;  %vm6062_vm6 = vcmask 1045509  }
 0x1a7   : > { %v6472_v29 = vcombine.low %v3037_v43, %v3047_v42 }
 0x1a9   : > { %7327 = vmatmul.mubr.bf16.gmra.mrb[24].mxu0 %v6662_v24 }
 0x1aa   : > { %7131 = vmatmul.mubr.bf16.gmra.mrb[20].mxu1 %v6468_v40  ;;  %7330 = vmatprep.mubr.bf16.mxu0 %v6663_v33 }
 0x1ab   : > { %7134 = vmatprep.mubr.bf16.mxu1 %v6469_v52 }
 0x1b1   : > { %7331 = vmatmul.mubr.bf16.gmra.mrb[28].mxu0 %v6664_v48 }
 0x1b2   : > { %7135 = vmatmul.mubr.bf16.gmra.mrb[24].mxu1 %v6470_v1 }
 0x1b3   : > { %7138 = vmatprep.mubr.bf16.mxu1 %v6471_v59 }
 0x1ba   : > { %7139 = vmatmul.mubr.bf16.gmra.mrb[28].mxu1 %v6472_v29 }
 0x235   : > { %v7064_v3 = vpop.f32.mrb[0].mxu1 }
 0x236   : > { %v2457_v24 = vpop.f32.mrb[1].mxu1 }
 0x237   : > { %v7065_v20 = vpop.f32.mrb[2].mxu1 }
 0x238   : > { %v2460_v2 = vpop.f32.mrb[3].mxu1 }
 0x23d   : > { %v7068_v33 = vpop.f32.mrb[4].mxu1 }
 0x23e   : > { %v2473_v12 = vpop.f32.mrb[5].mxu1 }
 0x23f   : > { %v7069_v23 = vpop.f32.mrb[6].mxu1 }
 0x240   : > { %v9498_v19 = vpop.f32.mrb[7].mxu1 }
 0x245   : > { %v9500_v58 = vpop.f32.mrb[8].mxu1 }
 0x246   : > { %v9502_v38 = vpop.f32.mrb[9].mxu1 }
 0x247   : > { %v9504_v34 = vpop.f32.mrb[10].mxu1 }
 0x248   : > { %v9506_v21 = vpop.f32.mrb[11].mxu1 }
 0x24c   : > { %v7304_v61 = vpop.f32.mrb[0].mxu0 }
 0x24d   : > { %v9508_v45 = vpop.f32.mrb[12].mxu1  ;;  %v7350_v50 = vadd.f32 %v7304_v61, %v7064_v3  ;;  %v5348_v7 = vpop.f32.mrb[1].mxu0 }
 0x24e   : > { %v9510_v18 = vpop.f32.mrb[13].mxu1  ;;  %v7351_v22 = vadd.f32 %v5348_v7, %v2457_v24  ;;  %v7305_v60 = vpop.f32.mrb[2].mxu0 }
 0x24f   : > { %v9512_v48 = vpop.f32.mrb[14].mxu1  ;;  %v5516_v25 = vadd.f32 %v7350_v50, %v9519_v54  ;;  %v7352_v32 = vadd.f32 %v7305_v60, %v7065_v20  ;;  %v5351_v14 = vpop.f32.mrb[3].mxu0 }
 0x250   : > { %v9514_v37 = vpop.f32.mrb[15].mxu1  ;;  %v5514_v15 = vadd.f32 %v7351_v22, %v9519_v54  ;;  %v7353_v41 = vadd.f32 %v5351_v14, %v2460_v2 }
 0x251   : > { %v5548_v8 = vmax.f32 %v5516_v25, 0.0  ;;  %v5517_v11 = vadd.f32 %v7352_v32, %v9519_v54 }
 0x252   : > { %v5546_v39 = vmax.f32 %v5514_v15, 0.0  ;;  %v5515_v6 = vadd.f32 %v7353_v41, %v9519_v54 }
 0x253   : > { %v5549_v35 = vmax.f32 %v5517_v11, 0.0 }
 0x254   : > { %v5578_v9 = vmax.f32 %v5546_v39, %v5548_v8  ;;  %v5547_v10 = vmax.f32 %v5515_v6, 0.0  ;;  %v7308_v53 = vpop.f32.mrb[4].mxu0 }
 0x255   : > { %v7354_v4 = vadd.f32 %v7308_v53, %v7068_v33  ;;  %v5364_v40 = vpop.f32.mrb[5].mxu0 }
 0x256   : > { %v5587_v52 = vsel %vm5586_vm14, %v5578_v9, -inf  ;;  %v5644_v56 = vsel %vm5643_vm15, %v5578_v9, -inf  ;;  %v5701_v49 = vsel %vm5700_vm0, %v5578_v9, -inf  ;;  %v5758_v62 = vsel %vm5757_vm1, %v5578_v9, -inf  ;;  %v7309_v17 = vpop.f32.mrb[6].mxu0 }
 0x257   : > { %v5588_v28 = vrot.slane %v5587_v52, 4  ;;  %v5645_v63 = vrot.slane %v5644_v56, 4  ;;  %v5702_v30 = vrot.slane %v5701_v49, 4  ;;  %v5759_v51 = vrot.slane %v5758_v62, 4  ;;  %v5367_v57 = vpop.f32.mrb[7].mxu0 }
 0x258   : > { %v5814_v5 = vmax.f32 %v5547_v10, %v5549_v35  ;;  %v9530_v44 = vadd.f32 %v7354_v4, %v9519_v54  ;;  %v7355_v31 = vadd.f32 %v5364_v40, %v2473_v12  ;;  %v7356_v47 = vadd.f32 %v7309_v17, %v7069_v23 }
 0x259   : > { %v5589_v46 = vmax.f32 %v5587_v52, %v5588_v28  ;;  %v5646_v0 = vmax.f32 %v5644_v56, %v5645_v63  ;;  %v5703_v36 = vmax.f32 %v5701_v49, %v5702_v30  ;;  %v5760_v26 = vmax.f32 %v5758_v62, %v5759_v51 }
 0x25a   : > { %v5822_v16 = vsel %vm5586_vm14, %v5814_v5, -inf  ;;  %v5878_v1 = vsel %vm5643_vm15, %v5814_v5, -inf  ;;  %v5934_v59 = vsel %vm5700_vm0, %v5814_v5, -inf  ;;  %v5990_v13 = vsel %vm5757_vm1, %v5814_v5, -inf }
 0x25b   : > { %v5590_v55 = vrot.slane %v5589_v46, 2  ;;  %v5647_v27 = vrot.slane %v5646_v0, 2  ;;  %v5704_v43 = vrot.slane %v5703_v36, 2  ;;  %v5761_v42 = vrot.slane %v5760_v26, 2 }
 0x25c   : > { %v5823_v29 = vrot.slane %v5822_v16, 4  ;;  %v5879_v3 = vrot.slane %v5878_v1, 4  ;;  %v5935_v24 = vrot.slane %v5934_v59, 4  ;;  %v5991_v20 = vrot.slane %v5990_v13, 4  ;;  %v7312_v2 = vpop.f32.mrb[8].mxu0 }
 0x25d   : > { %v5591_v33 = vmax.f32 %v5589_v46, %v5590_v55  ;;  %v5648_v12 = vmax.f32 %v5646_v0, %v5647_v27  ;;  %v5705_v23 = vmax.f32 %v5703_v36, %v5704_v43  ;;  %v5762_v61 = vmax.f32 %v5760_v26, %v5761_v42  ;;  %v5380_v50 = vpop.f32.mrb[9].mxu0 }
 0x25e   : > { %v5824_v7 = vmax.f32 %v5822_v16, %v5823_v29  ;;  %v5880_v22 = vmax.f32 %v5878_v1, %v5879_v3  ;;  %v5936_v60 = vmax.f32 %v5934_v59, %v5935_v24  ;;  %v5992_v25 = vmax.f32 %v5990_v13, %v5991_v20  ;;  %v7313_v32 = vpop.f32.mrb[10].mxu0 }
 0x25f   : > { %v5592_v14 = vrot.slane %v5591_v33, 1  ;;  %v5649_v15 = vrot.slane %v5648_v12, 1  ;;  %v5706_v41 = vrot.slane %v5705_v23, 1  ;;  %v5763_v8 = vrot.slane %v5762_v61, 1  ;;  %v5383_v11 = vpop.f32.mrb[11].mxu0 }
 0x260   : > { %v5825_v39 = vrot.slane %v5824_v7, 2  ;;  %v5881_v6 = vrot.slane %v5880_v22, 2  ;;  %v5937_v9 = vrot.slane %v5936_v60, 2  ;;  %v5993_v35 = vrot.slane %v5992_v25, 2 }
 0x261   : > { %v9536_v10 = vmax.f32 %v5591_v33, %v5592_v14  ;;  %v9538_v53 = vmax.f32 %v5648_v12, %v5649_v15  ;;  %v9540_v4 = vmax.f32 %v5705_v23, %v5706_v41  ;;  %v9542_v40 = vmax.f32 %v5762_v61, %v5763_v8 }
 0x262   : > { %v5826_v52 = vmax.f32 %v5824_v7, %v5825_v39  ;;  %v5882_v56 = vmax.f32 %v5880_v22, %v5881_v6  ;;  %v5938_v49 = vmax.f32 %v5936_v60, %v5937_v9  ;;  %v5994_v62 = vmax.f32 %v5992_v25, %v5993_v35 }
 0x263   : > { %v5552_v17 = vmax.f32 %v9530_v44, 0.0  ;;  %v5518_v28 = vadd.f32 %v7355_v31, %v9519_v54  ;;  %v5521_v63 = vadd.f32 %v7356_v47, %v9519_v54  ;;  %v7357_v30 = vadd.f32 %v5367_v57, %v9498_v19 }
 0x264   : > { %v5827_v51 = vrot.slane %v5826_v52, 1  ;;  %v5883_v5 = vrot.slane %v5882_v56, 1  ;;  %v5939_v46 = vrot.slane %v5938_v49, 1  ;;  %v5995_v0 = vrot.slane %v5994_v62, 1  ;;  %v7316_v36 = vpop.f32.mrb[12].mxu0 }
 0x265   : > { %v5550_v26 = vmax.f32 %v5518_v28, 0.0  ;;  %v5553_v16 = vmax.f32 %v5521_v63, 0.0  ;;  %v5519_v1 = vadd.f32 %v7357_v30, %v9519_v54  ;;  %v7358_v59 = vadd.f32 %v7312_v2, %v9500_v58  ;;  %v5396_v13 = vpop.f32.mrb[13].mxu0 }
 0x266   : > { %v9550_v55 = vmax.f32 %v5826_v52, %v5827_v51  ;;  %v9552_v44 = vmax.f32 %v5882_v56, %v5883_v5  ;;  %v9554_v31 = vmax.f32 %v5938_v49, %v5939_v46  ;;  %v9556_v47 = vmax.f32 %v5994_v62, %v5995_v0  ;;  %v9558_v19 = vpop.f32.mrb[14].mxu0 }
 0x267   : > { %v5579_v57 = vmax.f32 %v5550_v26, %v5552_v17  ;;  %v5551_v27 = vmax.f32 %v5519_v1, 0.0  ;;  %v9561_v43 = vadd.f32 %v7358_v59, %v9519_v54  ;;  %v7359_v42 = vadd.f32 %v5380_v50, %v9502_v38  ;;  %v9564_v29 = vpop.f32.mrb[15].mxu0 }
 0x268   : > { %v7360_v58 = vadd.f32 %v7313_v32, %v9504_v34  ;;  %v9568_v3 = vadd.f32 %v5383_v11, %v9506_v21  ;;  %v9571_v24 = vadd.f32 %v7316_v36, %v9508_v45  ;;  %v9574_v20 = vadd.f32 %v5396_v13, %v9510_v18 }
 0x269   : > { %v5594_v2 = vsel %vm5586_vm14, %v5579_v57, -inf  ;;  %v5651_v33 = vsel %vm5643_vm15, %v5579_v57, -inf  ;;  %v5708_v12 = vsel %vm5700_vm0, %v5579_v57, -inf  ;;  %v5765_v38 = vsel %vm5757_vm1, %v5579_v57, -inf }
 0x26a   : > { %v5595_v23 = vrot.slane %v5594_v2, 4  ;;  %v5652_v61 = vrot.slane %v5651_v33, 4  ;;  %v5709_v34 = vrot.slane %v5708_v12, 4  ;;  %v5766_v50 = vrot.slane %v5765_v38, 4 }
 0x26b   : > { %v5815_v21 = vmax.f32 %v5551_v27, %v5553_v16  ;;  %v5556_v45 = vmax.f32 %v9561_v43, 0.0  ;;  %v9582_v7 = vadd.f32 %v7359_v42, %v9519_v54  ;;  %v9585_v18 = vadd.f32 %v7360_v58, %v9519_v54 }
 0x26c   : > { %v5596_v22 = vmax.f32 %v5594_v2, %v5595_v23  ;;  %v5653_v60 = vmax.f32 %v5651_v33, %v5652_v61  ;;  %v5710_v25 = vmax.f32 %v5708_v12, %v5709_v34  ;;  %v5767_v32 = vmax.f32 %v5765_v38, %v5766_v50  ;;  %v9587_v14 = vpop.f32.mrb[16].mxu0 }
 0x26d   : > { %v5829_v15 = vsel %vm5586_vm14, %v5815_v21, -inf  ;;  %v5885_v41 = vsel %vm5643_vm15, %v5815_v21, -inf  ;;  %v5941_v8 = vsel %vm5700_vm0, %v5815_v21, -inf  ;;  %v5997_v11 = vsel %vm5757_vm1, %v5815_v21, -inf  ;;  %v9593_v39 = vpop.f32.mrb[17].mxu0 }
 0x26e   : > { %v5597_v6 = vrot.slane %v5596_v22, 2  ;;  %v5654_v9 = vrot.slane %v5653_v60, 2  ;;  %v5711_v35 = vrot.slane %v5710_v25, 2  ;;  %v5768_v52 = vrot.slane %v5767_v32, 2  ;;  %v9595_v56 = vpop.f32.mrb[18].mxu0 }
 0x26f   : > { %v5830_v49 = vrot.slane %v5829_v15, 4  ;;  %v5886_v62 = vrot.slane %v5885_v41, 4  ;;  %v5942_v17 = vrot.slane %v5941_v8, 4  ;;  %v5998_v28 = vrot.slane %v5997_v11, 4  ;;  %v9597_v63 = vpop.f32.mrb[19].mxu0 }
 0x270   : > { %v5598_v30 = vmax.f32 %v5596_v22, %v5597_v6  ;;  %v5655_v51 = vmax.f32 %v5653_v60, %v5654_v9  ;;  %v5712_v5 = vmax.f32 %v5710_v25, %v5711_v35  ;;  %v5769_v46 = vmax.f32 %v5767_v32, %v5768_v52 }
 0x271   : > { %v5831_v0 = vmax.f32 %v5829_v15, %v5830_v49  ;;  %v5887_v36 = vmax.f32 %v5885_v41, %v5886_v62  ;;  %v5943_v26 = vmax.f32 %v5941_v8, %v5942_v17  ;;  %v5999_v16 = vmax.f32 %v5997_v11, %v5998_v28 }
 0x272   : > { %v5599_v59 = vrot.slane %v5598_v30, 1  ;;  %v5656_v13 = vrot.slane %v5655_v51, 1  ;;  %v5713_v57 = vrot.slane %v5712_v5, 1  ;;  %v5770_v27 = vrot.slane %v5769_v46, 1 }
 0x273   : > { %v5832_v58 = vrot.slane %v5831_v0, 2  ;;  %v5888_v2 = vrot.slane %v5887_v36, 2  ;;  %v5944_v33 = vrot.slane %v5943_v26, 2  ;;  %v6000_v12 = vrot.slane %v5999_v16, 2 }
 0x274   : > { %v5600_v23 = vmax.f32 %v5598_v30, %v5599_v59  ;;  %v5657_v61 = vmax.f32 %v5655_v51, %v5656_v13  ;;  %v5714_v34 = vmax.f32 %v5712_v5, %v5713_v57  ;;  %v5771_v50 = vmax.f32 %v5769_v46, %v5770_v27  ;;  %v9607_v22 = vpop.f32.mrb[20].mxu0 }
 0x275   : > { %v9599_v1 = vpop.f32.mrb[16].mxu1  ;;  %v5833_v60 = vmax.f32 %v5831_v0, %v5832_v58  ;;  %v5889_v25 = vmax.f32 %v5887_v36, %v5888_v2  ;;  %v5945_v32 = vmax.f32 %v5943_v26, %v5944_v33  ;;  %v6001_v15 = vmax.f32 %v5999_v16, %v6000_v12  ;;  %v9609_v41 = vpop.f32.mrb[21].mxu0 }
 0x276   : > { %v9601_v42 = vpop.f32.mrb[17].mxu1  ;;  %v9613_v8 = vsel %vm6054_vm2, %v5600_v23, %v9536_v10  ;;  %v9617_v11 = vsel %vm6054_vm2, %v5657_v61, %v9538_v53  ;;  %v9621_v6 = vsel %vm6054_vm2, %v5714_v34, %v9540_v4  ;;  %v9625_v9 = vsel %vm6054_vm2, %v5771_v50, %v9542_v40  ;;  %v9627_v35 = vpop.f32.mrb[22].mxu0 }
 0x277   : > { %v9603_v38 = vpop.f32.mrb[18].mxu1  ;;  %v5834_v52 = vrot.slane %v5833_v60, 1  ;;  %v5890_v49 = vrot.slane %v5889_v25, 1  ;;  %v5946_v62 = vrot.slane %v5945_v32, 1  ;;  %v6002_v17 = vrot.slane %v6001_v15, 1  ;;  %v9629_v10 = vpop.f32.mrb[23].mxu0 }
 0x278   : > { %v9605_v21 = vpop.f32.mrb[19].mxu1  ;;  %v5554_v28 = vmax.f32 %v9582_v7, 0.0  ;;  %v5557_v53 = vmax.f32 %v9585_v18, 0.0  ;;  %v5523_v4 = vadd.f32 %v9568_v3, %v9519_v54  ;;  %v9637_v30 = vadd.f32 %v9571_v24, %v9519_v54 }
 0x279   : > { %v5835_v40 = vmax.f32 %v5833_v60, %v5834_v52  ;;  %v5891_v51 = vmax.f32 %v5889_v25, %v5890_v49  ;;  %v5947_v5 = vmax.f32 %v5945_v32, %v5946_v62  ;;  %v6003_v46 = vmax.f32 %v6001_v15, %v6002_v17 }
 0x27a   : > { %v5580_v36 = vmax.f32 %v5554_v28, %v5556_v45  ;;  %v5555_v26 = vmax.f32 %v5523_v4, 0.0  ;;  %v9646_v18 = vadd.f32 %v9574_v20, %v9519_v54  ;;  %v9681_v61 = vadd.f32 %v9558_v19, %v9512_v48 }
 0x27b   : > { %v9652_v24 = vsel %vm6054_vm2, %v5835_v40, %v9550_v55  ;;  %v9656_v16 = vsel %vm6054_vm2, %v5891_v51, %v9552_v44  ;;  %v9660_v43 = vsel %vm6054_vm2, %v5947_v5, %v9554_v31  ;;  %v9664_v45 = vsel %vm6054_vm2, %v6003_v46, %v9556_v47 }
 0x27c   : > { %v5601_v59 = vsel %vm5586_vm14, %v5580_v36, -inf  ;;  %v5658_v13 = vsel %vm5643_vm15, %v5580_v36, -inf  ;;  %v5715_v55 = vsel %vm5700_vm0, %v5580_v36, -inf  ;;  %v5772_v57 = vsel %vm5757_vm1, %v5580_v36, -inf  ;;  %v9674_v27 = vpop.f32.mrb[24].mxu0 }
 0x27d   : > { %v9639_v0 = vpop.f32.mrb[20].mxu1  ;;  %v5602_v31 = vrot.slane %v5601_v59, 4  ;;  %v5659_v58 = vrot.slane %v5658_v13, 4  ;;  %v5716_v2 = vrot.slane %v5715_v55, 4  ;;  %v5773_v33 = vrot.slane %v5772_v57, 4  ;;  %v9676_v47 = vpop.f32.mrb[25].mxu0 }
 0x27e   : > { %v9648_v3 = vpop.f32.mrb[21].mxu1  ;;  %10095 = vst [vmem:[#allocation7_spill] sm:$0xff] %v9676_v47  ;;  %v5816_v12 = vmax.f32 %v5555_v26, %v5557_v53  ;;  %v9685_v34 = vadd.f32 %v9564_v29, %v9514_v37  ;;  %v9687_v50 = vpop.f32.mrb[26].mxu0 }
 0x27f   : > { %v9666_v20 = vpop.f32.mrb[22].mxu1  ;;  %10096 = vst [vmem:[#allocation6_spill] sm:$0xff] %v9687_v50  ;;  %v5603_v60 = vmax.f32 %v5601_v59, %v5602_v31  ;;  %v5660_v25 = vmax.f32 %v5658_v13, %v5659_v58  ;;  %v5717_v32 = vmax.f32 %v5715_v55, %v5716_v2  ;;  %v5774_v15 = vmax.f32 %v5772_v57, %v5773_v33  ;;  %v9689_v52 = vpop.f32.mrb[27].mxu0 }
 0x280   : > { %v9672_v44 = vpop.f32.mrb[23].mxu1  ;;  %10097 = vst [vmem:[#allocation8_spill] sm:$0xff] %v9689_v52  ;;  %v5836_v49 = vsel %vm5586_vm14, %v5816_v12, -inf  ;;  %v5892_v62 = vsel %vm5643_vm15, %v5816_v12, -inf  ;;  %v5948_v17 = vsel %vm5700_vm0, %v5816_v12, -inf  ;;  %v6004_v48 = vsel %vm5757_vm1, %v5816_v12, -inf }
 0x281   : > { %v5604_v19 = vrot.slane %v5603_v60, 2  ;;  %v5661_v28 = vrot.slane %v5660_v25, 2  ;;  %v5718_v37 = vrot.slane %v5717_v32, 2  ;;  %v5775_v29 = vrot.slane %v5774_v15, 2 }
 0x282   : > { %v5837_v4 = vrot.slane %v5836_v49, 4  ;;  %v5893_v40 = vrot.slane %v5892_v62, 4  ;;  %v5949_v51 = vrot.slane %v5948_v17, 4  ;;  %v6005_v5 = vrot.slane %v6004_v48, 4 }
 0x283   : > { %v5605_v36 = vmax.f32 %v5603_v60, %v5604_v19  ;;  %v5662_v26 = vmax.f32 %v5660_v25, %v5661_v28  ;;  %v5719_v59 = vmax.f32 %v5717_v32, %v5718_v37  ;;  %v5776_v13 = vmax.f32 %v5774_v15, %v5775_v29 }
 0x284   : > { %v5838_v57 = vmax.f32 %v5836_v49, %v5837_v4  ;;  %v5894_v31 = vmax.f32 %v5892_v62, %v5893_v40  ;;  %v5950_v58 = vmax.f32 %v5948_v17, %v5949_v51  ;;  %v6006_v2 = vmax.f32 %v6004_v48, %v6005_v5  ;;  %v9703_v12 = vpop.f32.mrb[28].mxu0 }
 0x285   : > { %v9695_v53 = vpop.f32.mrb[24].mxu1  ;;  %v5606_v23 = vrot.slane %v5605_v36, 1  ;;  %v5663_v7 = vrot.slane %v5662_v26, 1  ;;  %v5720_v52 = vrot.slane %v5719_v59, 1  ;;  %v5777_v50 = vrot.slane %v5776_v13, 1  ;;  %v9705_v47 = vpop.f32.mrb[29].mxu0 }
 0x286   : > { %v9697_v46 = vpop.f32.mrb[25].mxu1  ;;  %v5839_v60 = vrot.slane %v5838_v57, 2  ;;  %v5895_v25 = vrot.slane %v5894_v31, 2  ;;  %v5951_v32 = vrot.slane %v5950_v58, 2  ;;  %v6007_v15 = vrot.slane %v6006_v2, 2  ;;  %v9707_v19 = vpop.f32.mrb[30].mxu0 }
 0x287   : > { %v9699_v55 = vpop.f32.mrb[26].mxu1  ;;  %10098 = vst [vmem:[#allocation9_spill] sm:$0xff] %v9707_v19  ;;  %v5607_v49 = vmax.f32 %v5605_v36, %v5606_v23  ;;  %v5664_v62 = vmax.f32 %v5662_v26, %v5663_v7  ;;  %v5721_v17 = vmax.f32 %v5719_v59, %v5720_v52  ;;  %v5778_v48 = vmax.f32 %v5776_v13, %v5777_v50  ;;  %v9709_v28 = vpop.f32.mrb[31].mxu0 }
 0x288   : > { %v9701_v33 = vpop.f32.mrb[27].mxu1  ;;  %10099 = vst [vmem:[#allocation13_spill] sm:$0xff] %v9709_v28  ;;  %v5840_v37 = vmax.f32 %v5838_v57, %v5839_v60  ;;  %v5896_v29 = vmax.f32 %v5894_v31, %v5895_v25  ;;  %v5952_v4 = vmax.f32 %v5950_v58, %v5951_v32  ;;  %v6008_v40 = vmax.f32 %v6006_v2, %v6007_v15 }
 0x289   : > { %v9713_v51 = vsel %vm6056_vm3, %v5607_v49, %v9613_v8  ;;  %v9717_v5 = vsel %vm6056_vm3, %v5664_v62, %v9617_v11  ;;  %v9721_v23 = vsel %vm6056_vm3, %v5721_v17, %v9621_v6  ;;  %v9725_v7 = vsel %vm6056_vm3, %v5778_v48, %v9625_v9 }
 0x28a   : > { %v5841_v52 = vrot.slane %v5840_v37, 1  ;;  %v5897_v36 = vrot.slane %v5896_v29, 1  ;;  %v5953_v26 = vrot.slane %v5952_v4, 1  ;;  %v6009_v59 = vrot.slane %v6008_v40, 1 }
 0x28b   : > { %v10100_v13 = vmax.f32 %v9637_v30, 0.0  ;;  %v10101_v11 = vmax.f32 %v9646_v18, 0.0  ;;  %v5529_v6 = vadd.f32 %v9681_v61, %v9519_v54  ;;  %v5527_v9 = vadd.f32 %v9685_v34, %v9519_v54 }
 0x28c   : > { %v7366_v31 = vadd.f32 %v9587_v14, %v9599_v1  ;;  %v5842_v2 = vmax.f32 %v5840_v37, %v5841_v52  ;;  %v5898_v60 = vmax.f32 %v5896_v29, %v5897_v36  ;;  %v5954_v25 = vmax.f32 %v5952_v4, %v5953_v26 }
 0x28d   : > { %v9727_v50 = vpop.f32.mrb[28].mxu1  ;;  %v5581_v57 = vmax.f32 %v10101_v11, %v10100_v13  ;;  %v6010_v32 = vmax.f32 %v6008_v40, %v6009_v59  ;;  %v5561_v4 = vmax.f32 %v5529_v6, 0.0  ;;  %v7368_v11 = vadd.f32 %v9595_v56, %v9603_v38 }
 0x28e   : > { %v9729_v8 = vpop.f32.mrb[29].mxu1  ;;  %v9751_v34 = vsel %vm6056_vm3, %v5842_v2, %v9652_v24  ;;  %v9755_v14 = vsel %vm6056_vm3, %v5898_v60, %v9656_v16  ;;  %v9759_v1 = vsel %vm6056_vm3, %v5954_v25, %v9660_v43  ;;  %v5559_v24 = vmax.f32 %v5527_v9, 0.0 }
 0x28f   : > { %v9741_v58 = vpop.f32.mrb[30].mxu1  ;;  %v5608_v30 = vsel %vm5586_vm14, %v5581_v57, -inf  ;;  %v5665_v18 = vsel %vm5643_vm15, %v5581_v57, -inf  ;;  %v5722_v61 = vsel %vm5700_vm0, %v5581_v57, -inf  ;;  %v5779_v49 = vsel %vm5757_vm1, %v5581_v57, -inf }
 0x290   : > { %v9743_v15 = vpop.f32.mrb[31].mxu1  ;;  %v9763_v62 = vsel %vm6056_vm3, %v6010_v32, %v9664_v45  ;;  %v5609_v17 = vrot.slane %v5608_v30, 4  ;;  %v5666_v48 = vrot.slane %v5665_v18, 4  ;;  %v5723_v37 = vrot.slane %v5722_v61, 4 }
 0x291   : > { %10102 = vst [vmem:[#allocation16_spill] sm:$0xff] %v9743_v15  ;;  %v5780_v29 = vrot.slane %v5779_v49, 4  ;;  %v5532_v40 = vadd.f32 %v7366_v31, %v9519_v54  ;;  %v7367_v16 = vadd.f32 %v9593_v39, %v9601_v42  ;;  %v5817_v59 = vmax.f32 %v5559_v24, %v5561_v4 }
 0x292   : > { %v5610_v52 = vmax.f32 %v5608_v30, %v5609_v17  ;;  %v5667_v36 = vmax.f32 %v5665_v18, %v5666_v48  ;;  %v5724_v43 = vmax.f32 %v5722_v61, %v5723_v37 }
 0x293   : > { %v5781_v26 = vmax.f32 %v5779_v49, %v5780_v29  ;;  %v5564_v13 = vmax.f32 %v5532_v40, 0.0  ;;  %v5530_v45 = vadd.f32 %v7367_v16, %v9519_v54  ;;  %v5843_v31 = vsel %vm5586_vm14, %v5817_v59, -inf }
 0x294   : > { %v5611_v57 = vrot.slane %v5610_v52, 2  ;;  %v5668_v2 = vrot.slane %v5667_v36, 2  ;;  %v5725_v6 = vrot.slane %v5724_v43, 2  ;;  %v5899_v60 = vsel %vm5643_vm15, %v5817_v59, -inf }
 0x295   : > { %v5782_v9 = vrot.slane %v5781_v26, 2  ;;  %v5955_v39 = vsel %vm5700_vm0, %v5817_v59, -inf  ;;  %v6011_v42 = vsel %vm5757_vm1, %v5817_v59, -inf  ;;  %v5844_v61 = vrot.slane %v5843_v31, 4 }
 0x296   : > { %v5612_v25 = vmax.f32 %v5610_v52, %v5611_v57  ;;  %v5669_v32 = vmax.f32 %v5667_v36, %v5668_v2  ;;  %v5726_v30 = vmax.f32 %v5724_v43, %v5725_v6  ;;  %v5900_v49 = vrot.slane %v5899_v60, 4 }
 0x297   : > { %v5783_v18 = vmax.f32 %v5781_v26, %v5782_v9  ;;  %v5956_v17 = vrot.slane %v5955_v39, 4  ;;  %v6012_v56 = vrot.slane %v6011_v42, 4  ;;  %v5845_v4 = vmax.f32 %v5843_v31, %v5844_v61 }
 0x298   : > { %v5613_v38 = vrot.slane %v5612_v25, 1  ;;  %v5670_v48 = vrot.slane %v5669_v32, 1  ;;  %v5727_v37 = vrot.slane %v5726_v30, 1  ;;  %v5901_v24 = vmax.f32 %v5899_v60, %v5900_v49 }
 0x299   : > { %v5784_v29 = vrot.slane %v5783_v18, 1  ;;  %v5957_v40 = vmax.f32 %v5955_v39, %v5956_v17  ;;  %v6013_v16 = vmax.f32 %v6011_v42, %v6012_v56  ;;  %v5846_v52 = vrot.slane %v5845_v4, 2 }
 0x29a   : > { %v5614_v28 = vmax.f32 %v5612_v25, %v5613_v38  ;;  %v5671_v15 = vmax.f32 %v5669_v32, %v5670_v48  ;;  %v5728_v19 = vmax.f32 %v5726_v30, %v5727_v37  ;;  %v5902_v36 = vrot.slane %v5901_v24, 2 }
 0x29b   : > { %v5785_v59 = vmax.f32 %v5783_v18, %v5784_v29  ;;  %v5958_v43 = vrot.slane %v5957_v40, 2  ;;  %v6014_v26 = vrot.slane %v6013_v16, 2  ;;  %v5847_v31 = vmax.f32 %v5845_v4, %v5846_v52 }
 0x29c   : > { %v9777_v57 = vsel %vm6058_vm4, %v5614_v28, %v9713_v51  ;;  %v9781_v2 = vsel %vm6058_vm4, %v5671_v15, %v9717_v5  ;;  %v9785_v6 = vsel %vm6058_vm4, %v5728_v19, %v9721_v23  ;;  %v5903_v60 = vmax.f32 %v5901_v24, %v5902_v36 }
 0x29d   : > { %v9789_v9 = vsel %vm6058_vm4, %v5785_v59, %v9725_v7  ;;  %v5959_v39 = vmax.f32 %v5957_v40, %v5958_v43  ;;  %v6015_v42 = vmax.f32 %v6013_v16, %v6014_v26  ;;  %v5562_v25 = vmax.f32 %v5530_v45, 0.0 }
 0x29e   : > { %v5533_v28 = vadd.f32 %v7368_v11, %v9519_v54  ;;  %v7369_v51 = vadd.f32 %v9597_v63, %v9605_v21  ;;  %v7370_v5 = vadd.f32 %v9607_v22, %v9639_v0  ;;  %v5848_v15 = vrot.slane %v5847_v31, 1 }
 0x29f   : > { %v5904_v19 = vrot.slane %v5903_v60, 1  ;;  %v5960_v23 = vrot.slane %v5959_v39, 1  ;;  %v6016_v32 = vrot.slane %v6015_v42, 1  ;;  %v5582_v30 = vmax.f32 %v5562_v25, %v5564_v13 }
 0x2a0   : > { %v5565_v7 = vmax.f32 %v5533_v28, 0.0  ;;  %v5531_v18 = vadd.f32 %v7369_v51, %v9519_v54  ;;  %v9798_v61 = vadd.f32 %v7370_v5, %v9519_v54  ;;  %v5849_v45 = vmax.f32 %v5847_v31, %v5848_v15 }
 0x2a1   : > { %v5905_v49 = vmax.f32 %v5903_v60, %v5904_v19  ;;  %v5961_v11 = vmax.f32 %v5959_v39, %v5960_v23  ;;  %v6017_v17 = vmax.f32 %v6015_v42, %v6016_v32  ;;  %v5615_v63 = vsel %vm5586_vm14, %v5582_v30, -inf }
 0x2a2   : > { %v5672_v21 = vsel %vm5643_vm15, %v5582_v30, -inf  ;;  %v5729_v22 = vsel %vm5700_vm0, %v5582_v30, -inf  ;;  %v5786_v0 = vsel %vm5757_vm1, %v5582_v30, -inf  ;;  %v9806_v13 = vsel %vm6058_vm4, %v5849_v45, %v9751_v34 }
 0x2a3   : > { %v9810_v56 = vsel %vm6058_vm4, %v5905_v49, %v9755_v14  ;;  %v9814_v38 = vsel %vm6058_vm4, %v5961_v11, %v9759_v1  ;;  %v9818_v48 = vsel %vm6058_vm4, %v6017_v17, %v9763_v62  ;;  %v5616_v37 = vrot.slane %v5615_v63, 4 }
 0x2a4   : > { %v5673_v29 = vrot.slane %v5672_v21, 4  ;;  %v5730_v4 = vrot.slane %v5729_v22, 4  ;;  %v5787_v24 = vrot.slane %v5786_v0, 4  ;;  %v5563_v40 = vmax.f32 %v5531_v18, 0.0 }
 0x2a5   : > { %v5568_v34 = vmax.f32 %v9798_v61, 0.0  ;;  %v7371_v14 = vadd.f32 %v9609_v41, %v9648_v3  ;;  %v7372_v16 = vadd.f32 %v9627_v35, %v9666_v20  ;;  %v5617_v1 = vmax.f32 %v5615_v63, %v5616_v37 }
 0x2a6   : > { %v5674_v59 = vmax.f32 %v5672_v21, %v5673_v29  ;;  %v5731_v52 = vmax.f32 %v5729_v22, %v5730_v4  ;;  %v5788_v36 = vmax.f32 %v5786_v0, %v5787_v24  ;;  %v5818_v62 = vmax.f32 %v5563_v40, %v5565_v7 }
 0x2a7   : > { %v5534_v43 = vadd.f32 %v7371_v14, %v9519_v54  ;;  %v9827_v26 = vadd.f32 %v7372_v16, %v9519_v54  ;;  %v7373_v31 = vadd.f32 %v9629_v10, %v9672_v44  ;;  %v5618_v60 = vrot.slane %v5617_v1, 2 }
 0x2a8   : > { %v5675_v39 = vrot.slane %v5674_v59, 2  ;;  %v5732_v42 = vrot.slane %v5731_v52, 2  ;;  %v5789_v41 = vrot.slane %v5788_v36, 2  ;;  %v5850_v3 = vsel %vm5586_vm14, %v5818_v62, -inf }
 0x2a9   : > { %v5906_v35 = vsel %vm5643_vm15, %v5818_v62, -inf  ;;  %v5962_v20 = vsel %vm5700_vm0, %v5818_v62, -inf  ;;  %v6018_v25 = vsel %vm5757_vm1, %v5818_v62, -inf  ;;  %v5619_v28 = vmax.f32 %v5617_v1, %v5618_v60 }
 0x2aa   : > { %v5676_v51 = vmax.f32 %v5674_v59, %v5675_v39  ;;  %v5733_v5 = vmax.f32 %v5731_v52, %v5732_v42  ;;  %v5790_v15 = vmax.f32 %v5788_v36, %v5789_v41  ;;  %v5851_v19 = vrot.slane %v5850_v3, 4 }
 0x2ab   : > { %v5907_v23 = vrot.slane %v5906_v35, 4  ;;  %v5963_v32 = vrot.slane %v5962_v20, 4  ;;  %v6019_v10 = vrot.slane %v6018_v25, 4  ;;  %v5620_v44 = vrot.slane %v5619_v28, 1 }
 0x2ac   : > { %v5677_v30 = vrot.slane %v5676_v51, 1  ;;  %v5734_v7 = vrot.slane %v5733_v5, 1  ;;  %v5791_v18 = vrot.slane %v5790_v15, 1  ;;  %v5852_v61 = vmax.f32 %v5850_v3, %v5851_v19 }
 0x2ad   : > { %v5908_v45 = vmax.f32 %v5906_v35, %v5907_v23  ;;  %v5964_v49 = vmax.f32 %v5962_v20, %v5963_v32  ;;  %v6020_v11 = vmax.f32 %v6018_v25, %v6019_v10  ;;  %v5621_v17 = vmax.f32 %v5619_v28, %v5620_v44  ;;  %v10103_v20 = vld [vmem:[#allocation7_spill] sm:$0xff] }
 0x2ae   : > { %v5678_v63 = vmax.f32 %v5676_v51, %v5677_v30  ;;  %v5735_v21 = vmax.f32 %v5733_v5, %v5734_v7  ;;  %v5792_v22 = vmax.f32 %v5790_v15, %v5791_v18  ;;  %v5853_v0 = vrot.slane %v5852_v61, 2 }
 0x2af   : > { %v5909_v37 = vrot.slane %v5908_v45, 2  ;;  %v5965_v29 = vrot.slane %v5964_v49, 2  ;;  %v6021_v4 = vrot.slane %v6020_v11, 2  ;;  %v9837_v24 = vsel %vm6060_vm5, %v5621_v17, %v9777_v57 }
 0x2b0   : > { %v9841_v40 = vsel %vm6060_vm5, %v5678_v63, %v9781_v2  ;;  %v9845_v14 = vsel %vm6060_vm5, %v5735_v21, %v9785_v6  ;;  %v9849_v16 = vsel %vm6060_vm5, %v5792_v22, %v9789_v9  ;;  %v5854_v1 = vmax.f32 %v5852_v61, %v5853_v0 }
 0x2b1   : > { %v5910_v59 = vmax.f32 %v5908_v45, %v5909_v37  ;;  %v5966_v52 = vmax.f32 %v5964_v49, %v5965_v29  ;;  %v6022_v36 = vmax.f32 %v6020_v11, %v6021_v4  ;;  %v5566_v62 = vmax.f32 %v5534_v43, 0.0 }
 0x2b2   : > { %v5569_v57 = vmax.f32 %v9827_v26, 0.0  ;;  %v5535_v60 = vadd.f32 %v7373_v31, %v9519_v54  ;;  %v7374_v2 = vadd.f32 %v9674_v27, %v9695_v53  ;;  %v5855_v39 = vrot.slane %v5854_v1, 1 }
 0x2b3   : > { %v5911_v42 = vrot.slane %v5910_v59, 1  ;;  %v5967_v6 = vrot.slane %v5966_v52, 1  ;;  %v6023_v41 = vrot.slane %v6022_v36, 1  ;;  %v5583_v3 = vmax.f32 %v5566_v62, %v5568_v34 }
 0x2b4   : > { %v5567_v35 = vmax.f32 %v5535_v60, 0.0  ;;  %v9856_v9 = vadd.f32 %v7374_v2, %v9519_v54  ;;  %v7375_v25 = vadd.f32 %v10103_v20, %v9697_v46  ;;  %v5856_v43 = vmax.f32 %v5854_v1, %v5855_v39 }
 0x2b5   : > { %v5912_v28 = vmax.f32 %v5910_v59, %v5911_v42  ;;  %v5968_v26 = vmax.f32 %v5966_v52, %v5967_v6  ;;  %v6024_v51 = vmax.f32 %v6022_v36, %v6023_v41  ;;  %v5622_v31 = vsel %vm5586_vm14, %v5583_v3, -inf }
 0x2b6   : > { %v5679_v27 = vsel %vm5643_vm15, %v5583_v3, -inf  ;;  %v5736_v53 = vsel %vm5700_vm0, %v5583_v3, -inf  ;;  %v5793_v5 = vsel %vm5757_vm1, %v5583_v3, -inf  ;;  %v9866_v34 = vsel %vm6060_vm5, %v5856_v43, %v9806_v13 }
 0x2b7   : > { %v9870_v15 = vsel %vm6060_vm5, %v5912_v28, %v9810_v56  ;;  %v9874_v46 = vsel %vm6060_vm5, %v5968_v26, %v9814_v38  ;;  %v9878_v19 = vsel %vm6060_vm5, %v6024_v51, %v9818_v48  ;;  %v5623_v23 = vrot.slane %v5622_v31, 4  ;;  %v10104_v56 = vld [vmem:[#allocation6_spill] sm:$0xff] }
 0x2b8   : > { %v5680_v32 = vrot.slane %v5679_v27, 4  ;;  %v5737_v10 = vrot.slane %v5736_v53, 4  ;;  %v5794_v44 = vrot.slane %v5793_v5, 4  ;;  %v5819_v30 = vmax.f32 %v5567_v35, %v5569_v57 }
 0x2b9   : > { %v5572_v13 = vmax.f32 %v9856_v9, 0.0  ;;  %v5538_v7 = vadd.f32 %v7375_v25, %v9519_v54  ;;  %v7376_v18 = vadd.f32 %v10104_v56, %v9699_v55  ;;  %v5624_v61 = vmax.f32 %v5622_v31, %v5623_v23 }
 0x2ba   : > { %v5681_v38 = vmax.f32 %v5679_v27, %v5680_v32  ;;  %v5738_v45 = vmax.f32 %v5736_v53, %v5737_v10  ;;  %v5795_v49 = vmax.f32 %v5793_v5, %v5794_v44  ;;  %v5857_v48 = vsel %vm5586_vm14, %v5819_v30, -inf }
 0x2bb   : > { %v5913_v11 = vsel %vm5643_vm15, %v5819_v30, -inf  ;;  %v5969_v17 = vsel %vm5700_vm0, %v5819_v30, -inf  ;;  %v6025_v63 = vsel %vm5757_vm1, %v5819_v30, -inf  ;;  %v5625_v21 = vrot.slane %v5624_v61, 2 }
 0x2bc   : > { %v5682_v22 = vrot.slane %v5681_v38, 2  ;;  %v5739_v0 = vrot.slane %v5738_v45, 2  ;;  %v5796_v37 = vrot.slane %v5795_v49, 2  ;;  %v5858_v54 = vrot.slane %v5857_v48, 4 }
 0x2bd   : > { %v5914_v29 = vrot.slane %v5913_v11, 4  ;;  %v5970_v4 = vrot.slane %v5969_v17, 4  ;;  %v6026_v55 = vrot.slane %v6025_v63, 4  ;;  %v5626_v1 = vmax.f32 %v5624_v61, %v5625_v21 }
 0x2be   : > { %v5683_v59 = vmax.f32 %v5681_v38, %v5682_v22  ;;  %v5740_v52 = vmax.f32 %v5738_v45, %v5739_v0  ;;  %v5797_v36 = vmax.f32 %v5795_v49, %v5796_v37  ;;  %v5859_v62 = vmax.f32 %v5857_v48, %v5858_v54  ;;  %v10105_v45 = vld [vmem:[#allocation8_spill] sm:$0xff] }
 0x2bf   : > { %v5915_v57 = vmax.f32 %v5913_v11, %v5914_v29  ;;  %v5971_v60 = vmax.f32 %v5969_v17, %v5970_v4  ;;  %v6027_v2 = vmax.f32 %v6025_v63, %v6026_v55  ;;  %v5627_v39 = vrot.slane %v5626_v1, 1 }
 0x2c0   : > { %v5684_v42 = vrot.slane %v5683_v59, 1  ;;  %v5741_v6 = vrot.slane %v5740_v52, 1  ;;  %v5798_v41 = vrot.slane %v5797_v36, 1  ;;  %v5860_v3 = vrot.slane %v5859_v62, 2 }
 0x2c1   : > { %v5916_v35 = vrot.slane %v5915_v57, 2  ;;  %v5972_v9 = vrot.slane %v5971_v60, 2  ;;  %v6028_v20 = vrot.slane %v6027_v2, 2  ;;  %v5628_v25 = vmax.f32 %v5626_v1, %v5627_v39  ;;  %v10107_v39 = vld [vmem:[#allocation16_spill] sm:$0xff] }
 0x2c2   : > { %v5685_v43 = vmax.f32 %v5683_v59, %v5684_v42  ;;  %v5742_v28 = vmax.f32 %v5740_v52, %v5741_v6  ;;  %v5799_v26 = vmax.f32 %v5797_v36, %v5798_v41  ;;  %v5861_v51 = vmax.f32 %v5859_v62, %v5860_v3  ;;  %v10108_v42 = vld [vmem:[#allocation13_spill] sm:$0xff] }
 0x2c3   : > { %v5917_v31 = vmax.f32 %v5915_v57, %v5916_v35  ;;  %v5973_v27 = vmax.f32 %v5971_v60, %v5972_v9  ;;  %v6029_v53 = vmax.f32 %v6027_v2, %v6028_v20  ;;  %v9890_v5 = vsel %vm6062_vm6, %v5628_v25, %v9837_v24  ;;  %v9907_v24 = vld [vmem:[%s10017_s2] ss:$0 sm:$0xff]  ;;  %v10106_v60 = vld [vmem:[#allocation9_spill] sm:$0xff] }
 0x2c4   : > { %v9894_v23 = vsel %vm6062_vm6, %v5685_v43, %v9841_v40  ;;  %v9898_v32 = vsel %vm6062_vm6, %v5742_v28, %v9845_v14  ;;  %v9902_v10 = vsel %vm6062_vm6, %v5799_v26, %v9849_v16  ;;  %v5862_v44 = vrot.slane %v5861_v51, 1 }
 0x2c5   : > { %v5918_v30 = vrot.slane %v5917_v31, 1  ;;  %v5974_v56 = vrot.slane %v5973_v27, 1  ;;  %v6030_v61 = vrot.slane %v6029_v53, 1  ;;  %v5570_v38 = vmax.f32 %v5538_v7, 0.0 }
 0x2c6   : > { %v5541_v40 = vadd.f32 %v9907_v24, %v7376_v18  ;;  %v7377_v14 = vadd.f32 %v10105_v45, %v9701_v33  ;;  %v7378_v49 = vadd.f32 %v9703_v12, %v9727_v50  ;;  %v5863_v16 = vmax.f32 %v5861_v51, %v5862_v44 }
 0x2c7   : > { %v5919_v48 = vmax.f32 %v5917_v31, %v5918_v30  ;;  %v5975_v11 = vmax.f32 %v5973_v27, %v5974_v56  ;;  %v6031_v17 = vmax.f32 %v6029_v53, %v6030_v61  ;;  %v5584_v63 = vmax.f32 %v5570_v38, %v5572_v13 }
 0x2c8   : > { %v5573_v21 = vmax.f32 %v5541_v40, 0.0  ;;  %v5539_v7 = vadd.f32 %v9907_v24, %v7377_v14  ;;  %v9916_v22 = vadd.f32 %v9907_v24, %v7378_v49  ;;  %v9920_v18 = vsel %vm6062_vm6, %v5863_v16, %v9866_v34 }
 0x2c9   : > { %v9924_v33 = vsel %vm6062_vm6, %v5919_v48, %v9870_v15  ;;  %v9928_v12 = vsel %vm6062_vm6, %v5975_v11, %v9874_v46  ;;  %v9932_v50 = vsel %vm6062_vm6, %v6031_v17, %v9878_v19  ;;  %v5629_v13 = vsel %vm5586_vm14, %v5584_v63, -inf }
 0x2ca   : > { %v5686_v0 = vsel %vm5643_vm15, %v5584_v63, -inf  ;;  %v5743_v37 = vsel %vm5700_vm0, %v5584_v63, -inf  ;;  %v5800_v34 = vsel %vm5757_vm1, %v5584_v63, -inf  ;;  %v5630_v54 = vrot.slane %v5629_v13, 4 }
 0x2cb   : > { %v5687_v29 = vrot.slane %v5686_v0, 4  ;;  %v5744_v15 = vrot.slane %v5743_v37, 4  ;;  %v5801_v4 = vrot.slane %v5800_v34, 4  ;;  %v5571_v55 = vmax.f32 %v5539_v7, 0.0 }
 0x2cc   : > { %v5576_v46 = vmax.f32 %v9916_v22, 0.0  ;;  %v7379_v19 = vadd.f32 %v9705_v47, %v9729_v8  ;;  %v5631_v1 = vmax.f32 %v5629_v13, %v5630_v54  ;;  %v7380_v2 = vadd.f32 %v10106_v60, %v9741_v58 }
 0x2cd   : > { %v5688_v59 = vmax.f32 %v5686_v0, %v5687_v29  ;;  %v5745_v52 = vmax.f32 %v5743_v37, %v5744_v15  ;;  %v5802_v36 = vmax.f32 %v5800_v34, %v5801_v4  ;;  %v5820_v62 = vmax.f32 %v5571_v55, %v5573_v21 }
 0x2ce   : > { %v5542_v57 = vadd.f32 %v9907_v24, %v7379_v19  ;;  %v7381_v6 = vadd.f32 %v10108_v42, %v10107_v39  ;;  %v5632_v41 = vrot.slane %v5631_v1, 2 }
 0x2cf   : > { %v5689_v3 = vrot.slane %v5688_v59, 2  ;;  %v5746_v35 = vrot.slane %v5745_v52, 2  ;;  %v5803_v9 = vrot.slane %v5802_v36, 2  ;;  %v5864_v20 = vsel %vm5586_vm14, %v5820_v62, -inf }
 0x2d0   : > { %v5920_v47 = vsel %vm5643_vm15, %v5820_v62, -inf  ;;  %v5976_v8 = vsel %vm5700_vm0, %v5820_v62, -inf  ;;  %v6032_v25 = vsel %vm5757_vm1, %v5820_v62, -inf  ;;  %v5633_v43 = vmax.f32 %v5631_v1, %v5632_v41 }
 0x2d1   : > { %v5690_v28 = vmax.f32 %v5688_v59, %v5689_v3  ;;  %v5747_v26 = vmax.f32 %v5745_v52, %v5746_v35  ;;  %v5804_v51 = vmax.f32 %v5802_v36, %v5803_v9  ;;  %v5865_v58 = vrot.slane %v5864_v20, 4 }
 0x2d2   : > { %v5921_v31 = vrot.slane %v5920_v47, 4  ;;  %v5977_v27 = vrot.slane %v5976_v8, 4  ;;  %v6033_v53 = vrot.slane %v6032_v25, 4  ;;  %v5634_v44 = vrot.slane %v5633_v43, 1 }
 0x2d3   : > { %v5691_v30 = vrot.slane %v5690_v28, 1  ;;  %v5748_v56 = vrot.slane %v5747_v26, 1  ;;  %v5805_v61 = vrot.slane %v5804_v51, 1  ;;  %v5866_v38 = vmax.f32 %v5864_v20, %v5865_v58 }
 0x2d4   : > { %v5922_v40 = vmax.f32 %v5920_v47, %v5921_v31  ;;  %v5978_v45 = vmax.f32 %v5976_v8, %v5977_v27  ;;  %v6034_v14 = vmax.f32 %v6032_v25, %v6033_v53  ;;  %v5635_v49 = vmax.f32 %v5633_v43, %v5634_v44 }
 0x2d5   : > { %v5692_v16 = vmax.f32 %v5690_v28, %v5691_v30  ;;  %v5749_v48 = vmax.f32 %v5747_v26, %v5748_v56  ;;  %v5806_v11 = vmax.f32 %v5804_v51, %v5805_v61  ;;  %v5867_v17 = vrot.slane %v5866_v38, 2 }
 0x2d6   : > { %v5923_v63 = vrot.slane %v5922_v40, 2  ;;  %v5979_v21 = vrot.slane %v5978_v45, 2  ;;  %v6035_v7 = vrot.slane %v6034_v14, 2  ;;  %v9952_v22 = vsel %vm6064_vm7, %v5635_v49, %v9890_v5 }
 0x2d7   : > { %v9956_v13 = vsel %vm6064_vm7, %v5692_v16, %v9894_v23  ;;  %v9960_v0 = vsel %vm6064_vm7, %v5749_v48, %v9898_v32  ;;  %v9964_v37 = vsel %vm6064_vm7, %v5806_v11, %v9902_v10  ;;  %v5868_v34 = vmax.f32 %v5866_v38, %v5867_v17 }
 0x2d8   : > { %v5924_v54 = vmax.f32 %v5922_v40, %v5923_v63  ;;  %v5980_v29 = vmax.f32 %v5978_v45, %v5979_v21  ;;  %v6036_v15 = vmax.f32 %v6034_v14, %v6035_v7  ;;  %v5574_v4 = vmax.f32 %v5542_v57, 0.0 }
 0x2d9   : > { %v5545_v5 = vadd.f32 %v9907_v24, %v7380_v2  ;;  %v5543_v55 = vadd.f32 %v9907_v24, %v7381_v6  ;;  %v5869_v19 = vrot.slane %v5868_v34, 1 }
 0x2da   : > { %v5925_v23 = vrot.slane %v5924_v54, 1  ;;  %v5981_v1 = vrot.slane %v5980_v29, 1  ;;  %v6037_v59 = vrot.slane %v6036_v15, 1  ;;  %v5585_v52 = vmax.f32 %v5574_v4, %v5576_v46 }
 0x2db   : > { %v5577_v32 = vmax.f32 %v5545_v5, 0.0  ;;  %v5575_v36 = vmax.f32 %v5543_v55, 0.0  ;;  %v5870_v62 = vmax.f32 %v5868_v34, %v5869_v19 }
 0x2dc   : > { %v5926_v60 = vmax.f32 %v5924_v54, %v5925_v23  ;;  %v5982_v10 = vmax.f32 %v5980_v29, %v5981_v1  ;;  %v6038_v39 = vmax.f32 %v6036_v15, %v6037_v59  ;;  %v5636_v42 = vsel %vm5586_vm14, %v5585_v52, -inf }
 0x2dd   : > { %v5693_v41 = vsel %vm5643_vm15, %v5585_v52, -inf  ;;  %v5750_v57 = vsel %vm5700_vm0, %v5585_v52, -inf  ;;  %v5807_v2 = vsel %vm5757_vm1, %v5585_v52, -inf  ;;  %v9974_v24 = vsel %vm6064_vm7, %v5870_v62, %v9920_v18 }
 0x2de   : > { %v9978_v46 = vsel %vm6064_vm7, %v5926_v60, %v9924_v33  ;;  %v9982_v6 = vsel %vm6064_vm7, %v5982_v10, %v9928_v12  ;;  %v9986_v3 = vsel %vm6064_vm7, %v6038_v39, %v9932_v50  ;;  %v5637_v35 = vrot.slane %v5636_v42, 4 }
 0x2df   : > { %v5694_v9 = vrot.slane %v5693_v41, 4  ;;  %v5751_v20 = vrot.slane %v5750_v57, 4  ;;  %v5808_v47 = vrot.slane %v5807_v2, 4  ;;  %v5821_v8 = vmax.f32 %v5575_v36, %v5577_v32 }
 0x2e0   : > { %v5638_v18 = vmax.f32 %v5636_v42, %v5637_v35 }
 0x2e1   : > { %v5695_v25 = vmax.f32 %v5693_v41, %v5694_v9  ;;  %v5752_v43 = vmax.f32 %v5750_v57, %v5751_v20  ;;  %v5809_v28 = vmax.f32 %v5807_v2, %v5808_v47  ;;  %v5871_v33 = vsel %vm5586_vm14, %v5821_v8, -inf }
 0x2e2   : > { %v5927_v26 = vsel %vm5643_vm15, %v5821_v8, -inf  ;;  %v5983_v12 = vsel %vm5700_vm0, %v5821_v8, -inf  ;;  %v6039_v51 = vsel %vm5757_vm1, %v5821_v8, -inf  ;;  %v5639_v50 = vrot.slane %v5638_v18, 2 }
 0x2e3   : > { %v5696_v58 = vrot.slane %v5695_v25, 2  ;;  %v5753_v31 = vrot.slane %v5752_v43, 2  ;;  %v5810_v27 = vrot.slane %v5809_v28, 2  ;;  %v5872_v53 = vrot.slane %v5871_v33, 4 }
 0x2e4   : > { %v5928_v44 = vrot.slane %v5927_v26, 4  ;;  %v5984_v30 = vrot.slane %v5983_v12, 4  ;;  %v6040_v56 = vrot.slane %v6039_v51, 4  ;;  %v5640_v61 = vmax.f32 %v5638_v18, %v5639_v50 }
 0x2e5   : > { %v5697_v38 = vmax.f32 %v5695_v25, %v5696_v58  ;;  %v5754_v40 = vmax.f32 %v5752_v43, %v5753_v31  ;;  %v5811_v45 = vmax.f32 %v5809_v28, %v5810_v27  ;;  %v5873_v14 = vmax.f32 %v5871_v33, %v5872_v53 }
 0x2e6   : > { %v5929_v49 = vmax.f32 %v5927_v26, %v5928_v44  ;;  %v5985_v16 = vmax.f32 %v5983_v12, %v5984_v30  ;;  %v6041_v48 = vmax.f32 %v6039_v51, %v6040_v56  ;;  %v5641_v11 = vrot.slane %v5640_v61, 1 }
 0x2e7   : > { %v5698_v17 = vrot.slane %v5697_v38, 1  ;;  %v5755_v63 = vrot.slane %v5754_v40, 1  ;;  %v5812_v21 = vrot.slane %v5811_v45, 1  ;;  %v5874_v7 = vrot.slane %v5873_v14, 2 }
 0x2e8   : > { %v5930_v34 = vrot.slane %v5929_v49, 2  ;;  %v5986_v54 = vrot.slane %v5985_v16, 2  ;;  %v6042_v29 = vrot.slane %v6041_v48, 2  ;;  %v5642_v15 = vmax.f32 %v5640_v61, %v5641_v11 }
 0x2e9   : > { %v5699_v4 = vmax.f32 %v5697_v38, %v5698_v17  ;;  %v5756_v5 = vmax.f32 %v5754_v40, %v5755_v63  ;;  %v5813_v55 = vmax.f32 %v5811_v45, %v5812_v21  ;;  %v5875_v19 = vmax.f32 %v5873_v14, %v5874_v7 }
 0x2ea   : > { %v5931_v23 = vmax.f32 %v5929_v49, %v5930_v34  ;;  %v5987_v1 = vmax.f32 %v5985_v16, %v5986_v54  ;;  %v6043_v59 = vmax.f32 %v6041_v48, %v6042_v29  ;;  %v6067_v52 = vsel %vm6066_vm8, %v5642_v15, %v9952_v22 }
 0x2eb   : > { %v6083_v32 = vsel %vm6066_vm8, %v5699_v4, %v9956_v13  ;;  %v6099_v36 = vsel %vm6066_vm8, %v5756_v5, %v9960_v0  ;;  %v6115_v62 = vsel %vm6066_vm8, %v5813_v55, %v9964_v37  ;;  %v5876_v39 = vrot.slane %v5875_v19, 1 }
 0x2ec   : > { %v6682_v60 = vpack.c.bf16 %v6083_v32, %v6067_v52  ;;  %v6683_v10 = vpack.c.bf16 %v6115_v62, %v6099_v36  ;;  %v5932_v42 = vrot.slane %v5931_v23, 1  ;;  %v5988_v41 = vrot.slane %v5987_v1, 1 }
 0x2ed   : > { %v6044_v57 = vrot.slane %v6043_v59, 1  ;;  %v5877_v2 = vmax.f32 %v5875_v19, %v5876_v39 }
 0x2ee   : > { %6213 = vst [vmem:[%s170_s11] sm:$0xff] %v6682_v60  ;;  %6214 = vst [vmem:[%s170_s11 + $0x8] sm:$0xff] %v6683_v10  ;;  %v5933_v35 = vmax.f32 %v5931_v23, %v5932_v42  ;;  %v5989_v22 = vmax.f32 %v5987_v1, %v5988_v41 }
 0x2ef   : > { %v6045_v9 = vmax.f32 %v6043_v59, %v6044_v57  ;;  %v6131_v13 = vsel %vm6066_vm8, %v5877_v2, %v9974_v24 }
 0x2f0   : > { %v6147_v0 = vsel %vm6066_vm8, %v5933_v35, %v9978_v46  ;;  %v6163_v37 = vsel %vm6066_vm8, %v5989_v22, %v9982_v6 }
 0x2f1   : > { %v6179_v20 = vsel %vm6066_vm8, %v6045_v9, %v9986_v3  ;;  %v6684_v47 = vpack.c.bf16 %v6147_v0, %v6131_v13 }
 0x2f2   : > { %v6685_v8 = vpack.c.bf16 %v6179_v20, %v6163_v37 }
 0x2f3   : > { %6215 = vst [vmem:[%s170_s11 + $0x10] sm:$0xff] %v6684_v47 }
 0x2f4   : > { %6216 = vst [vmem:[%s170_s11 + $0x18] sm:$0xff] %v6685_v8 }
 0x2f5 PF: > { %s13_s12 = sadd.s32 1, %s7817_s12  }
 0x2f6   : > { %p10_p4 = scmp.ge.s32.totalorder %s13_s12, 4  }
 0x2f8   :  { %12 = sbr.rel (!%p10_p4) target bundleno = 1 (0x1), region = 72 }

// kernel: reinforce_forward.13
= control target key start
LH: loop header
LB: loop body
LE: loop exit
PB: predicated region body
PF: predicated region fallthrough
CT: control target
= control target key end

     0   :  { %v2085_v1 = vmov 0   ;;  %s2838_s1 = inlined_call_operand.vmem [shape: bf16[128,512], index: 1, kind: input, shape index: {}]   ;;  %s2839_s3 = inlined_call_operand.vmem [shape: bf16[512,512], index: 3, kind: input, shape index: {}]   ;;  %s2840_s0 = inlined_call_operand.vmem [shape: bf16[8,128], index: 0, kind: input, shape index: {}]   ;;  %s2841_s2 = inlined_call_operand.vmem [shape: f32[1,512], index: 2, kind: input, shape index: {}]   ;;  %s2842_s5 = inlined_call_operand.vmem [shape: f32[512,128], index: 5, kind: input, shape index: {}]   ;;  %s2843_s4 = inlined_call_operand.vmem [shape: f32[1,512], index: 4, kind: input, shape index: {}]   ;;  %s2844_s6 = inlined_call_operand.vmem [shape: f32[1,128], index: 6, kind: input, shape index: {}]   ;;  %s2845_s7 = inlined_call_operand.vmem [shape: f32[8,128], index: 7, kind: output, shape index: {}]  }
   0x1   :  { %v1845_v0 = vld [vmem:[%s2838_s1 + $0x4] ss:$16 sps:$4 sm:$0xff]   ;;  %264 = vmatprep.mubr.bf16.mxu0 %v2085_v1  ;;  %305 = vmatprep.mubr.bf16.mxu1 %v2085_v1  ;;  %v1847_v2 = vld [vmem:[%s2838_s1] ss:$16 sps:$4 sm:$0xff]   ;;  %v1869_v10 = vld [vmem:[%s2838_s1 + $0xc] ss:$16 sps:$4 sm:$0xff]  }
   0x2   :  { %232 = vmatprep.subr.bf16.mxu0 %v1845_v0  ;;  %v1848_v3 = vld [vmem:[%s2838_s1 + $0x24] ss:$16 sps:$4 sm:$0xff]   ;;  %v1850_v4 = vld [vmem:[%s2838_s1 + $0x20] ss:$16 sps:$4 sm:$0xff]   ;;  %v1871_v11 = vld [vmem:[%s2838_s1 + $0x8] ss:$16 sps:$4 sm:$0xff]   ;;  %273 = vmatprep.subr.bf16.mxu1 %v1869_v10 }
   0x3   :  { %233 = vmatpush1.bf16.msra.mxu0 %v1847_v2  ;;  %v1851_v5 = vld [vmem:[%s2838_s1 + $0x44] ss:$16 sps:$4 sm:$0xff]   ;;  %v1853_v6 = vld [vmem:[%s2838_s1 + $0x40] ss:$16 sps:$4 sm:$0xff]   ;;  %v1872_v12 = vld [vmem:[%s2838_s1 + $0x2c] ss:$16 sps:$4 sm:$0xff]   ;;  %274 = vmatpush1.bf16.msra.mxu1 %v1871_v11 }
   0x4   :  { %234 = vmatprep.subr.bf16.mxu0 %v1848_v3  ;;  %v1854_v7 = vld [vmem:[%s2838_s1 + $0x64] ss:$16 sps:$4 sm:$0xff]   ;;  %v1856_v8 = vld [vmem:[%s2838_s1 + $0x60] ss:$16 sps:$4 sm:$0xff]   ;;  %v1874_v14 = vld [vmem:[%s2838_s1 + $0x28] ss:$16 sps:$4 sm:$0xff]   ;;  %275 = vmatprep.subr.bf16.mxu1 %v1872_v12 }
   0x5   :  { %v1857_v9 = vld [vmem:[%s2838_s1 + $0x84] ss:$16 sps:$4 sm:$0xff]   ;;  %v1859_v13 = vld [vmem:[%s2838_s1 + $0x80] ss:$16 sps:$4 sm:$0xff]   ;;  %v1875_v15 = vld [vmem:[%s2838_s1 + $0x4c] ss:$16 sps:$4 sm:$0xff]  }
   0x6   :  { %v1860_v16 = vld [vmem:[%s2838_s1 + $0xa4] ss:$16 sps:$4 sm:$0xff]   ;;  %v1862_v17 = vld [vmem:[%s2838_s1 + $0xa0] ss:$16 sps:$4 sm:$0xff]   ;;  %v1877_v18 = vld [vmem:[%s2838_s1 + $0x48] ss:$16 sps:$4 sm:$0xff]  }
   0x7   :  { %235 = vmatpush1.bf16.msra.mxu0 %v1850_v4  ;;  %276 = vmatpush1.bf16.msra.mxu1 %v1874_v14  ;;  %v1878_v19 = vld [vmem:[%s2838_s1 + $0x6c] ss:$16 sps:$4 sm:$0xff]   ;;  %v1863_v20 = vld [vmem:[%s2838_s1 + $0xc4] ss:$16 sps:$4 sm:$0xff]   ;;  %v1865_v21 = vld [vmem:[%s2838_s1 + $0xc0] ss:$16 sps:$4 sm:$0xff]  }
   0x8   :  { %236 = vmatprep.subr.bf16.mxu0 %v1851_v5  ;;  %277 = vmatprep.subr.bf16.mxu1 %v1875_v15  ;;  %v1880_v22 = vld [vmem:[%s2838_s1 + $0x68] ss:$16 sps:$4 sm:$0xff]   ;;  %v1881_v23 = vld [vmem:[%s2838_s1 + $0x8c] ss:$16 sps:$4 sm:$0xff]   ;;  %v1866_v24 = vld [vmem:[%s2838_s1 + $0xe4] ss:$16 sps:$4 sm:$0xff]  }
   0x9   :  { %v1868_v25 = vld [vmem:[%s2838_s1 + $0xe0] ss:$16 sps:$4 sm:$0xff]   ;;  %v1883_v26 = vld [vmem:[%s2838_s1 + $0x88] ss:$16 sps:$4 sm:$0xff]   ;;  %v1884_v27 = vld [vmem:[%s2838_s1 + $0xac] ss:$16 sps:$4 sm:$0xff]  }
   0xa   :  { %v1895_v28 = vld [vmem:[%s2839_s3 + $0x4] ss:$16 sps:$4 sm:$0xff]   ;;  %v39_v29 = vld [vmem:[%s2840_s0] sm:$0xf]  ;;  %v1886_v30 = vld [vmem:[%s2838_s1 + $0xa8] ss:$16 sps:$4 sm:$0xff]  }
   0xb   :  { %237 = vmatpush1.bf16.msra.mxu0 %v1853_v6  ;;  %278 = vmatpush1.bf16.msra.mxu1 %v1877_v18  ;;  %v1887_v31 = vld [vmem:[%s2838_s1 + $0xcc] ss:$16 sps:$4 sm:$0xff]   ;;  %v1893_v32 = vld [vmem:[%s2839_s3] ss:$16 sps:$4 sm:$0xff]   ;;  %v1901_v33 = vld [vmem:[%s2839_s3 + $0x24] ss:$16 sps:$4 sm:$0xff]  }
   0xc   :  { %238 = vmatprep.subr.bf16.mxu0 %v1854_v7  ;;  %279 = vmatprep.subr.bf16.mxu1 %v1878_v19  ;;  %v1889_v34 = vld [vmem:[%s2838_s1 + $0xc8] ss:$16 sps:$4 sm:$0xff]   ;;  %v1890_v35 = vld [vmem:[%s2838_s1 + $0xec] ss:$16 sps:$4 sm:$0xff]   ;;  %v1899_v36 = vld [vmem:[%s2839_s3 + $0x20] ss:$16 sps:$4 sm:$0xff]  }
   0xd   :  { %v1907_v37 = vld [vmem:[%s2839_s3 + $0x44] ss:$16 sps:$4 sm:$0xff]   ;;  %v1892_v38 = vld [vmem:[%s2838_s1 + $0xe8] ss:$16 sps:$4 sm:$0xff]   ;;  %v1898_v39 = vld [vmem:[%s2839_s3 + $0xc] ss:$16 sps:$4 sm:$0xff]  }
   0xe   :  { %v1905_v40 = vld [vmem:[%s2839_s3 + $0x40] ss:$16 sps:$4 sm:$0xff]   ;;  %v1913_v41 = vld [vmem:[%s2839_s3 + $0x64] ss:$16 sps:$4 sm:$0xff]   ;;  %v1896_v42 = vld [vmem:[%s2839_s3 + $0x8] ss:$16 sps:$4 sm:$0xff]  }
   0xf   :  { %239 = vmatpush1.bf16.msra.mxu0 %v1856_v8  ;;  %280 = vmatpush1.bf16.msra.mxu1 %v1880_v22  ;;  %v1904_v43 = vld [vmem:[%s2839_s3 + $0x2c] ss:$16 sps:$4 sm:$0xff]   ;;  %v1911_v44 = vld [vmem:[%s2839_s3 + $0x60] ss:$16 sps:$4 sm:$0xff]   ;;  %v1919_v45 = vld [vmem:[%s2839_s3 + $0x84] ss:$16 sps:$4 sm:$0xff]  }
  0x10   :  { %240 = vmatprep.subr.bf16.mxu0 %v1857_v9  ;;  %281 = vmatprep.subr.bf16.mxu1 %v1881_v23  ;;  %v1902_v46 = vld [vmem:[%s2839_s3 + $0x28] ss:$16 sps:$4 sm:$0xff]   ;;  %v1910_v47 = vld [vmem:[%s2839_s3 + $0x4c] ss:$16 sps:$4 sm:$0xff]   ;;  %v1917_v48 = vld [vmem:[%s2839_s3 + $0x80] ss:$16 sps:$4 sm:$0xff]  }
  0x11   :  { %v1925_v49 = vld [vmem:[%s2839_s3 + $0xa4] ss:$16 sps:$4 sm:$0xff]   ;;  %v1908_v50 = vld [vmem:[%s2839_s3 + $0x48] ss:$16 sps:$4 sm:$0xff]   ;;  %v1916_v51 = vld [vmem:[%s2839_s3 + $0x6c] ss:$16 sps:$4 sm:$0xff]  }
  0x12   :  { %v1923_v52 = vld [vmem:[%s2839_s3 + $0xa0] ss:$16 sps:$4 sm:$0xff]   ;;  %v1931_v53 = vld [vmem:[%s2839_s3 + $0xc4] ss:$16 sps:$4 sm:$0xff]   ;;  %v1914_v54 = vld [vmem:[%s2839_s3 + $0x68] ss:$16 sps:$4 sm:$0xff]  }
  0x13   :  { %241 = vmatpush1.bf16.msra.mxu0 %v1859_v13  ;;  %282 = vmatpush1.bf16.msra.mxu1 %v1883_v26  ;;  %v1922_v55 = vld [vmem:[%s2839_s3 + $0x8c] ss:$16 sps:$4 sm:$0xff]   ;;  %v1929_v56 = vld [vmem:[%s2839_s3 + $0xc0] ss:$16 sps:$4 sm:$0xff]   ;;  %v1937_v57 = vld [vmem:[%s2839_s3 + $0xe4] ss:$16 sps:$4 sm:$0xff]  }
  0x14   :  { %242 = vmatprep.subr.bf16.mxu0 %v1860_v16  ;;  %283 = vmatprep.subr.bf16.mxu1 %v1884_v27  ;;  %v1920_v58 = vld [vmem:[%s2839_s3 + $0x88] ss:$16 sps:$4 sm:$0xff]   ;;  %v1928_v59 = vld [vmem:[%s2839_s3 + $0xac] ss:$16 sps:$4 sm:$0xff]   ;;  %v1935_v60 = vld [vmem:[%s2839_s3 + $0xe0] ss:$16 sps:$4 sm:$0xff]  }
  0x15   :  { %v1943_v61 = vld [vmem:[%s2839_s3 + $0x104] ss:$16 sps:$4 sm:$0xff]   ;;  %v1926_v62 = vld [vmem:[%s2839_s3 + $0xa8] ss:$16 sps:$4 sm:$0xff]   ;;  %v1934_v63 = vld [vmem:[%s2839_s3 + $0xcc] ss:$16 sps:$4 sm:$0xff]  }
  0x16   :  { %v1941_v0 = vld [vmem:[%s2839_s3 + $0x100] ss:$16 sps:$4 sm:$0xff]   ;;  %v1949_v1 = vld [vmem:[%s2839_s3 + $0x124] ss:$16 sps:$4 sm:$0xff]   ;;  %v1932_v2 = vld [vmem:[%s2839_s3 + $0xc8] ss:$16 sps:$4 sm:$0xff]  }
  0x17   :  { %243 = vmatpush1.bf16.msra.mxu0 %v1862_v17  ;;  %284 = vmatpush1.bf16.msra.mxu1 %v1886_v30  ;;  %v1940_v3 = vld [vmem:[%s2839_s3 + $0xec] ss:$16 sps:$4 sm:$0xff]   ;;  %v1947_v4 = vld [vmem:[%s2839_s3 + $0x120] ss:$16 sps:$4 sm:$0xff]   ;;  %v1955_v5 = vld [vmem:[%s2839_s3 + $0x144] ss:$16 sps:$4 sm:$0xff]  }
  0x18   :  { %244 = vmatprep.subr.bf16.mxu0 %v1863_v20  ;;  %285 = vmatprep.subr.bf16.mxu1 %v1887_v31  ;;  %v1938_v6 = vld [vmem:[%s2839_s3 + $0xe8] ss:$16 sps:$4 sm:$0xff]   ;;  %v1946_v7 = vld [vmem:[%s2839_s3 + $0x10c] ss:$16 sps:$4 sm:$0xff]   ;;  %v1953_v8 = vld [vmem:[%s2839_s3 + $0x140] ss:$16 sps:$4 sm:$0xff]  }
  0x19   :  { %v1961_v9 = vld [vmem:[%s2839_s3 + $0x164] ss:$16 sps:$4 sm:$0xff]   ;;  %v1944_v10 = vld [vmem:[%s2839_s3 + $0x108] ss:$16 sps:$4 sm:$0xff]   ;;  %v1952_v11 = vld [vmem:[%s2839_s3 + $0x12c] ss:$16 sps:$4 sm:$0xff]  }
  0x1a   :  { %v1959_v12 = vld [vmem:[%s2839_s3 + $0x160] ss:$16 sps:$4 sm:$0xff]   ;;  %v1967_v13 = vld [vmem:[%s2839_s3 + $0x184] ss:$16 sps:$4 sm:$0xff]   ;;  %v1950_v14 = vld [vmem:[%s2839_s3 + $0x128] ss:$16 sps:$4 sm:$0xff]  }
  0x1b   :  { %245 = vmatpush1.bf16.msra.mxu0 %v1865_v21  ;;  %286 = vmatpush1.bf16.msra.mxu1 %v1889_v34  ;;  %v1958_v15 = vld [vmem:[%s2839_s3 + $0x14c] ss:$16 sps:$4 sm:$0xff]   ;;  %v1965_v16 = vld [vmem:[%s2839_s3 + $0x180] ss:$16 sps:$4 sm:$0xff]   ;;  %v1973_v17 = vld [vmem:[%s2839_s3 + $0x1a4] ss:$16 sps:$4 sm:$0xff]  }
  0x1c   :  { %246 = vmatprep.subr.bf16.mxu0 %v1866_v24  ;;  %287 = vmatprep.subr.bf16.mxu1 %v1890_v35  ;;  %v1956_v18 = vld [vmem:[%s2839_s3 + $0x148] ss:$16 sps:$4 sm:$0xff]   ;;  %v1964_v19 = vld [vmem:[%s2839_s3 + $0x16c] ss:$16 sps:$4 sm:$0xff]   ;;  %v1971_v20 = vld [vmem:[%s2839_s3 + $0x1a0] ss:$16 sps:$4 sm:$0xff]  }
  0x1d   :  { %v1962_v21 = vld [vmem:[%s2839_s3 + $0x168] ss:$16 sps:$4 sm:$0xff]   ;;  %v1970_v22 = vld [vmem:[%s2839_s3 + $0x18c] ss:$16 sps:$4 sm:$0xff]   ;;  %v1979_v26 = vld [vmem:[%s2839_s3 + $0x1c4] ss:$16 sps:$4 sm:$0xff]  }
  0x1e   :  { %v1968_v23 = vld [vmem:[%s2839_s3 + $0x188] ss:$16 sps:$4 sm:$0xff]   ;;  %v1976_v24 = vld [vmem:[%s2839_s3 + $0x1ac] ss:$16 sps:$4 sm:$0xff]   ;;  %v1985_v30 = vld [vmem:[%s2839_s3 + $0x1e4] ss:$16 sps:$4 sm:$0xff]  }
  0x1f   :  { %247 = vmatpush1.bf16.msra.mxu0 %v1868_v25  ;;  %288 = vmatpush1.bf16.msra.mxu1 %v1892_v38  ;;  %v1974_v25 = vld [vmem:[%s2839_s3 + $0x1a8] ss:$16 sps:$4 sm:$0xff]   ;;  %v1982_v27 = vld [vmem:[%s2839_s3 + $0x1cc] ss:$16 sps:$4 sm:$0xff]   ;;  %v1991_v34 = vld [vmem:[%s2839_s3 + $0x204] ss:$16 sps:$4 sm:$0xff]  }
  0x20   :  { %1153 = vmatprep.subr.bf16.mxu0 %v1895_v28  ;;  %1235 = vmatprep.subr.bf16.mxu1 %v1898_v39  ;;  %v1977_v28 = vld [vmem:[%s2839_s3 + $0x1c0] ss:$16 sps:$4 sm:$0xff]   ;;  %v1988_v31 = vld [vmem:[%s2839_s3 + $0x1ec] ss:$16 sps:$4 sm:$0xff]  }
  0x21   :  { %v1994_v35 = vld [vmem:[%s2839_s3 + $0x20c] ss:$16 sps:$4 sm:$0xff]   ;;  %v329_v39 = vld [vmem:[%s2841_s2] sm:$0xf] }
  0x22   :  { %265 = vmatmul.mubr.bf16.vlgmr.msra.gmra.mrb[0].mxu0 %v39_v29  ;;  %306 = vmatmul.mubr.bf16.vlgmr.msra.gmra.mrb[0].mxu1 %v39_v29  ;;  %v1980_v29 = vld [vmem:[%s2839_s3 + $0x1c8] ss:$16 sps:$4 sm:$0xff]  }
  0x23   :  { %1154 = vmatpush1.bf16.msra.mxu0 %v1893_v32  ;;  %1236 = vmatpush1.bf16.msra.mxu1 %v1896_v42  ;;  %v1983_v32 = vld [vmem:[%s2839_s3 + $0x1e0] ss:$16 sps:$4 sm:$0xff]  }
  0x24   :  { %1155 = vmatprep.subr.bf16.mxu0 %v1901_v33  ;;  %1237 = vmatprep.subr.bf16.mxu1 %v1904_v43  ;;  %v1986_v33 = vld [vmem:[%s2839_s3 + $0x1e8] ss:$16 sps:$4 sm:$0xff]  }
  0x27   :  { %1156 = vmatpush1.bf16.msra.mxu0 %v1899_v36  ;;  %1238 = vmatpush1.bf16.msra.mxu1 %v1902_v46  ;;  %v331_v36 = vlaneseq }
  0x28   :  { %1157 = vmatprep.subr.bf16.mxu0 %v1907_v37  ;;  %1239 = vmatprep.subr.bf16.mxu1 %v1910_v47 }
  0x29   :  { %v2423_v37 = vshrl.u32 %v331_v36, 7  ;;  %v2048_v36 = vld [vmem:[%s2839_s3 + $0x32c] ss:$16 sps:$4 sm:$0xff]  }
  0x2b   :  { %1158 = vmatpush1.bf16.msra.mxu0 %v1905_v40  ;;  %1240 = vmatpush1.bf16.msra.mxu1 %v1908_v50  ;;  %v333_v38 = vsub.s32 0, %v2423_v37  ;;  %v337_v40 = vsub.s32 1, %v2423_v37 }
  0x2c   :  { %1159 = vmatprep.subr.bf16.mxu0 %v1913_v41  ;;  %1241 = vmatprep.subr.bf16.mxu1 %v1916_v51  ;;  %v341_v51 = vsub.s32 2, %v2423_v37 }
  0x2d   :  { %v334_v41 = vrot.slane %v329_v39, %v333_v38  ;;  %v338_v42 = vrot.slane %v329_v39, %v337_v40 }
  0x2f   :  { %1160 = vmatpush1.bf16.msra.mxu0 %v1911_v44  ;;  %1242 = vmatpush1.bf16.msra.mxu1 %v1914_v54  ;;  %v1989_v54 = vld [vmem:[%s2839_s3 + $0x200] ss:$16 sps:$4 sm:$0xff]  }
  0x30   :  { %1161 = vmatprep.subr.bf16.mxu0 %v1919_v45  ;;  %1243 = vmatprep.subr.bf16.mxu1 %v1922_v55  ;;  %v1992_v55 = vld [vmem:[%s2839_s3 + $0x208] ss:$16 sps:$4 sm:$0xff]  }
  0x33   :  { %1162 = vmatpush1.bf16.msra.mxu0 %v1917_v48  ;;  %1244 = vmatpush1.bf16.msra.mxu1 %v1920_v58  ;;  %v2000_v58 = vld [vmem:[%s2839_s3 + $0x22c] ss:$16 sps:$4 sm:$0xff]  }
  0x34   :  { %1163 = vmatprep.subr.bf16.mxu0 %v1925_v49  ;;  %1245 = vmatprep.subr.bf16.mxu1 %v1928_v59  ;;  %v342_v59 = vrot.slane %v329_v39, %v341_v51 }
  0x37   :  { %1164 = vmatpush1.bf16.msra.mxu0 %v1923_v52  ;;  %1246 = vmatpush1.bf16.msra.mxu1 %v1926_v62  ;;  %v345_v52 = vsub.s32 3, %v2423_v37  ;;  %v1998_v62 = vld [vmem:[%s2839_s3 + $0x228] ss:$16 sps:$4 sm:$0xff]  }
  0x38   :  { %1165 = vmatprep.subr.bf16.mxu0 %v1931_v53  ;;  %1247 = vmatprep.subr.bf16.mxu1 %v1934_v63  ;;  %v2003_v63 = vld [vmem:[%s2839_s3 + $0x244] ss:$16 sps:$4 sm:$0xff]  }
  0x3b   :  { %1166 = vmatpush1.bf16.msra.mxu0 %v1929_v56  ;;  %1248 = vmatpush1.bf16.msra.mxu1 %v1932_v2 }
  0x3c   :  { %1167 = vmatprep.subr.bf16.mxu0 %v1937_v57  ;;  %1249 = vmatprep.subr.bf16.mxu1 %v1940_v3  ;;  %v1997_v57 = vld [vmem:[%s2839_s3 + $0x224] ss:$16 sps:$4 sm:$0xff]  }
  0x3f   :  { %1168 = vmatpush1.bf16.msra.mxu0 %v1935_v60  ;;  %1250 = vmatpush1.bf16.msra.mxu1 %v1938_v6  ;;  %v346_v60 = vrot.slane %v329_v39, %v345_v52  ;;  %v2001_v6 = vld [vmem:[%s2839_s3 + $0x240] ss:$16 sps:$4 sm:$0xff]  }
  0x40   :  { %1169 = vmatprep.subr.bf16.mxu0 %v1943_v61  ;;  %1251 = vmatprep.subr.bf16.mxu1 %v1946_v7  ;;  %v1995_v61 = vld [vmem:[%s2839_s3 + $0x220] ss:$16 sps:$4 sm:$0xff]   ;;  %v2004_v7 = vld [vmem:[%s2839_s3 + $0x248] ss:$16 sps:$4 sm:$0xff]  }
  0x41   :  { %v2043_v39 = vld [vmem:[%s2839_s3 + $0x320] ss:$16 sps:$4 sm:$0xff]  }
  0x43   :  { %1170 = vmatpush1.bf16.msra.mxu0 %v1941_v0  ;;  %1252 = vmatpush1.bf16.msra.mxu1 %v1944_v10  ;;  %v2006_v0 = vld [vmem:[%s2839_s3 + $0x24c] ss:$16 sps:$4 sm:$0xff]  }
  0x44   :  { %1171 = vmatprep.subr.bf16.mxu0 %v1949_v1  ;;  %1253 = vmatprep.subr.bf16.mxu1 %v1952_v11  ;;  %v2012_v10 = vld [vmem:[%s2839_s3 + $0x26c] ss:$16 sps:$4 sm:$0xff]  }
  0x47   :  { %1172 = vmatpush1.bf16.msra.mxu0 %v1947_v4  ;;  %1254 = vmatpush1.bf16.msra.mxu1 %v1950_v14  ;;  %v2010_v14 = vld [vmem:[%s2839_s3 + $0x268] ss:$16 sps:$4 sm:$0xff]  }
  0x48   :  { %1173 = vmatprep.subr.bf16.mxu0 %v1955_v5  ;;  %1255 = vmatprep.subr.bf16.mxu1 %v1958_v15  ;;  %v2015_v15 = vld [vmem:[%s2839_s3 + $0x284] ss:$16 sps:$4 sm:$0xff]  }
  0x4b   :  { %1174 = vmatpush1.bf16.msra.mxu0 %v1953_v8  ;;  %1256 = vmatpush1.bf16.msra.mxu1 %v1956_v18  ;;  %v2016_v18 = vld [vmem:[%s2839_s3 + $0x288] ss:$16 sps:$4 sm:$0xff]  }
  0x4c   :  { %1175 = vmatprep.subr.bf16.mxu0 %v1961_v9  ;;  %1257 = vmatprep.subr.bf16.mxu1 %v1964_v19  ;;  %v2009_v9 = vld [vmem:[%s2839_s3 + $0x264] ss:$16 sps:$4 sm:$0xff]  }
  0x4d   :  { %v2021_v19 = vld [vmem:[%s2839_s3 + $0x2a4] ss:$16 sps:$4 sm:$0xff]  }
  0x4f   :  { %1176 = vmatpush1.bf16.msra.mxu0 %v1959_v12  ;;  %1258 = vmatpush1.bf16.msra.mxu1 %v1962_v21  ;;  %v2019_v21 = vld [vmem:[%s2839_s3 + $0x2a0] ss:$16 sps:$4 sm:$0xff]  }
  0x50   :  { %1177 = vmatprep.subr.bf16.mxu0 %v1967_v13  ;;  %1259 = vmatprep.subr.bf16.mxu1 %v1970_v22  ;;  %v2007_v13 = vld [vmem:[%s2839_s3 + $0x260] ss:$16 sps:$4 sm:$0xff]   ;;  %v2022_v22 = vld [vmem:[%s2839_s3 + $0x2a8] ss:$16 sps:$4 sm:$0xff]  }
  0x53   :  { %1178 = vmatpush1.bf16.msra.mxu0 %v1965_v16  ;;  %1260 = vmatpush1.bf16.msra.mxu1 %v1968_v23  ;;  %v2018_v16 = vld [vmem:[%s2839_s3 + $0x28c] ss:$16 sps:$4 sm:$0xff]   ;;  %v2027_v23 = vld [vmem:[%s2839_s3 + $0x2c4] ss:$16 sps:$4 sm:$0xff]  }
  0x54   :  { %1179 = vmatprep.subr.bf16.mxu0 %v1973_v17  ;;  %1261 = vmatprep.subr.bf16.mxu1 %v1976_v24  ;;  %v2013_v17 = vld [vmem:[%s2839_s3 + $0x280] ss:$16 sps:$4 sm:$0xff]   ;;  %v2030_v24 = vld [vmem:[%s2839_s3 + $0x2cc] ss:$16 sps:$4 sm:$0xff]  }
  0x57   :  { %1180 = vmatpush1.bf16.msra.mxu0 %v1971_v20  ;;  %1262 = vmatpush1.bf16.msra.mxu1 %v1974_v25  ;;  %v2024_v20 = vld [vmem:[%s2839_s3 + $0x2ac] ss:$16 sps:$4 sm:$0xff]   ;;  %v2025_v25 = vld [vmem:[%s2839_s3 + $0x2c0] ss:$16 sps:$4 sm:$0xff]  }
  0x58   :  { %1181 = vmatprep.subr.bf16.mxu0 %v1979_v26  ;;  %1263 = vmatprep.subr.bf16.mxu1 %v1982_v27  ;;  %v2028_v26 = vld [vmem:[%s2839_s3 + $0x2c8] ss:$16 sps:$4 sm:$0xff]   ;;  %v2033_v27 = vld [vmem:[%s2839_s3 + $0x2e4] ss:$16 sps:$4 sm:$0xff]  }
  0x5b   :  { %1182 = vmatpush1.bf16.msra.mxu0 %v1977_v28  ;;  %1264 = vmatpush1.bf16.msra.mxu1 %v1980_v29  ;;  %v2036_v28 = vld [vmem:[%s2839_s3 + $0x2ec] ss:$16 sps:$4 sm:$0xff]   ;;  %v2031_v29 = vld [vmem:[%s2839_s3 + $0x2e0] ss:$16 sps:$4 sm:$0xff]  }
  0x5c   :  { %1183 = vmatprep.subr.bf16.mxu0 %v1985_v30  ;;  %1265 = vmatprep.subr.bf16.mxu1 %v1988_v31  ;;  %v2034_v30 = vld [vmem:[%s2839_s3 + $0x2e8] ss:$16 sps:$4 sm:$0xff]   ;;  %v2039_v31 = vld [vmem:[%s2839_s3 + $0x304] ss:$16 sps:$4 sm:$0xff]  }
  0x5f   :  { %1184 = vmatpush1.bf16.msra.mxu0 %v1983_v32  ;;  %1266 = vmatpush1.bf16.msra.mxu1 %v1986_v33  ;;  %v2042_v32 = vld [vmem:[%s2839_s3 + $0x30c] ss:$16 sps:$4 sm:$0xff]   ;;  %v2037_v33 = vld [vmem:[%s2839_s3 + $0x300] ss:$16 sps:$4 sm:$0xff]  }
  0x60   :  { %1194 = vmatprep.subr.bf16.mxu0 %v1991_v34  ;;  %1276 = vmatprep.subr.bf16.mxu1 %v1994_v35  ;;  %v2040_v34 = vld [vmem:[%s2839_s3 + $0x308] ss:$16 sps:$4 sm:$0xff]   ;;  %v2045_v35 = vld [vmem:[%s2839_s3 + $0x324] ss:$16 sps:$4 sm:$0xff]  }
  0xf5   :  { %v266_v43 = vpop.f32.mrb[0].mxu0  ;;  %v307_v1 = vpop.f32.mrb[0].mxu1 }
  0xf6   :  { %v351_v44 = vadd.f32 %v334_v41, %v266_v43  ;;  %v268_v45 = vpop.f32.mrb[1].mxu0  ;;  %v2464_v2 = vadd.f32 %v342_v59, %v307_v1  ;;  %v309_v3 = vpop.f32.mrb[1].mxu1  ;;  %v2046_v41 = vld [vmem:[%s2839_s3 + $0x328] ss:$16 sps:$4 sm:$0xff]   ;;  %v2054_v43 = vld [vmem:[%s2839_s3 + $0x34c] ss:$16 sps:$4 sm:$0xff]  }
  0xf7   :  { %v352_v46 = vadd.f32 %v338_v42, %v268_v45  ;;  %v270_v47 = vpop.f32.mrb[2].mxu0  ;;  %v354_v4 = vadd.f32 %v346_v60, %v309_v3  ;;  %v311_v5 = vpop.f32.mrb[2].mxu1  ;;  %v2051_v42 = vld [vmem:[%s2839_s3 + $0x344] ss:$16 sps:$4 sm:$0xff]   ;;  %v2052_v45 = vld [vmem:[%s2839_s3 + $0x348] ss:$16 sps:$4 sm:$0xff]  }
  0xf8   :  { %v355_v48 = vmax.f32 %v351_v44, 0.0  ;;  %v271_v49 = vpop.f32.mrb[3].mxu0  ;;  %v312_v8 = vpop.f32.mrb[3].mxu1  ;;  %v2049_v44 = vld [vmem:[%s2839_s3 + $0x340] ss:$16 sps:$4 sm:$0xff]  }
  0xf9   :  { %v356_v50 = vmax.f32 %v352_v46, 0.0  ;;  %v358_v11 = vmax.f32 %v354_v4, 0.0  ;;  %v2057_v46 = vld [vmem:[%s2839_s3 + $0x364] ss:$16 sps:$4 sm:$0xff]   ;;  %v2060_v47 = vld [vmem:[%s2839_s3 + $0x36c] ss:$16 sps:$4 sm:$0xff]  }
  0xfa   :  { %v359_v56 = vpack.c.bf16 %v355_v48, %v355_v48  ;;  %v2055_v48 = vld [vmem:[%s2839_s3 + $0x360] ss:$16 sps:$4 sm:$0xff]   ;;  %v2058_v49 = vld [vmem:[%s2839_s3 + $0x368] ss:$16 sps:$4 sm:$0xff]   ;;  %v2075_v60 = vld [vmem:[%s2839_s3 + $0x3c4] ss:$16 sps:$4 sm:$0xff]  }
  0xfb   :  { %v360_v53 = vpack.c.bf16 %v356_v50, %v356_v50  ;;  %v362_v12 = vpack.c.bf16 %v358_v11, %v358_v11  ;;  %v2063_v50 = vld [vmem:[%s2839_s3 + $0x384] ss:$16 sps:$4 sm:$0xff]   ;;  %v2070_v59 = vld [vmem:[%s2839_s3 + $0x3a8] ss:$16 sps:$4 sm:$0xff]   ;;  %v2084_v1 = vld [vmem:[%s2839_s3 + $0x3ec] ss:$16 sps:$4 sm:$0xff]  }
  0xfc   :  { %v1337_v3 = vld [vmem:[%s2842_s5 + $0x80] sm:$0xff]  ;;  %v1338_v4 = vld [vmem:[%s2842_s5 + $0x88] sm:$0xff]  ;;  %v357_v11 = vmax.f32 %v2464_v2, 0.0  ;;  %v1340_v2 = vld [vmem:[%s2842_s5 + $0x98] sm:$0xff] }
  0xfd   :  { %1185 = vmatprep.mubr.bf16.mxu0 %v360_v53  ;;  %1267 = vmatprep.mubr.bf16.mxu1 %v360_v53  ;;  %v2066_v53 = vld [vmem:[%s2839_s3 + $0x38c] ss:$16 sps:$4 sm:$0xff]   ;;  %v1369_v5 = vld [vmem:[%s2842_s5 + $0x180] sm:$0xff]  ;;  %v2082_v8 = vld [vmem:[%s2839_s3 + $0x3e8] ss:$16 sps:$4 sm:$0xff]  }
  0xfe   :  { %1186 = vmatmul.mubr.bf16.vlgmr.msra.gmra.mrb[4].mxu0 %v359_v56  ;;  %1268 = vmatmul.mubr.bf16.vlgmr.msra.gmra.mrb[4].mxu1 %v359_v56  ;;  %v2069_v56 = vld [vmem:[%s2839_s3 + $0x3a4] ss:$16 sps:$4 sm:$0xff]  }
  0xff   :  { %1195 = vmatpush1.bf16.msra.mxu0 %v1989_v54  ;;  %1277 = vmatpush1.bf16.msra.mxu1 %v1992_v55  ;;  %v2061_v54 = vld [vmem:[%s2839_s3 + $0x380] ss:$16 sps:$4 sm:$0xff]   ;;  %v2064_v55 = vld [vmem:[%s2839_s3 + $0x388] ss:$16 sps:$4 sm:$0xff]  }
 0x100   :  { %1196 = vmatprep.subr.bf16.mxu0 %v1997_v57  ;;  %1278 = vmatprep.subr.bf16.mxu1 %v2000_v58  ;;  %v2072_v57 = vld [vmem:[%s2839_s3 + $0x3ac] ss:$16 sps:$4 sm:$0xff]   ;;  %v2067_v58 = vld [vmem:[%s2839_s3 + $0x3a0] ss:$16 sps:$4 sm:$0xff]  }
 0x101   :  { %1226 = vmatprep.mubr.bf16.mxu0 %v362_v12  ;;  %1308 = vmatprep.mubr.bf16.mxu1 %v362_v12  ;;  %v1768_v12 = vpack.c.bf16 %v1338_v4, %v1337_v3  ;;  %v1361_v4 = vld [vmem:[%s2842_s5 + $0x140] sm:$0xff] }
 0x103   :  { %1197 = vmatpush1.bf16.msra.mxu0 %v1995_v61  ;;  %1279 = vmatpush1.bf16.msra.mxu1 %v1998_v62  ;;  %v2078_v61 = vld [vmem:[%s2839_s3 + $0x3cc] ss:$16 sps:$4 sm:$0xff]   ;;  %v2073_v62 = vld [vmem:[%s2839_s3 + $0x3c0] ss:$16 sps:$4 sm:$0xff]  }
 0x104   :  { %1198 = vmatprep.subr.bf16.mxu0 %v2003_v63  ;;  %1280 = vmatprep.subr.bf16.mxu1 %v2006_v0  ;;  %v2076_v63 = vld [vmem:[%s2839_s3 + $0x3c8] ss:$16 sps:$4 sm:$0xff]   ;;  %v2081_v0 = vld [vmem:[%s2839_s3 + $0x3e4] ss:$16 sps:$4 sm:$0xff]  }
 0x107   :  { %1199 = vmatpush1.bf16.msra.mxu0 %v2001_v6  ;;  %1281 = vmatpush1.bf16.msra.mxu1 %v2004_v7  ;;  %v1370_v6 = vld [vmem:[%s2842_s5 + $0x188] sm:$0xff]  ;;  %v2079_v7 = vld [vmem:[%s2839_s3 + $0x3e0] ss:$16 sps:$4 sm:$0xff]  }
 0x108   :  { %1200 = vmatprep.subr.bf16.mxu0 %v2009_v9  ;;  %1282 = vmatprep.subr.bf16.mxu1 %v2012_v10  ;;  %v1321_v9 = vld [vmem:[%s2842_s5] sm:$0xff]  ;;  %v1322_v10 = vld [vmem:[%s2842_s5 + $0x8] sm:$0xff] }
 0x10b   :  { %1201 = vmatpush1.bf16.msra.mxu0 %v2007_v13  ;;  %1283 = vmatpush1.bf16.msra.mxu1 %v2010_v14  ;;  %v1800_v13 = vpack.c.bf16 %v1370_v6, %v1369_v5  ;;  %v1353_v14 = vld [vmem:[%s2842_s5 + $0x100] sm:$0xff]  ;;  %v1362_v5 = vld [vmem:[%s2842_s5 + $0x148] sm:$0xff]  ;;  %v1347_v6 = vld [vmem:[%s2842_s5 + $0xd0] sm:$0xff] }
 0x10c   :  { %1202 = vmatprep.subr.bf16.mxu0 %v2015_v15  ;;  %1284 = vmatprep.subr.bf16.mxu1 %v2018_v16  ;;  %v1354_v15 = vld [vmem:[%s2842_s5 + $0x108] sm:$0xff]  ;;  %v1339_v16 = vld [vmem:[%s2842_s5 + $0x90] sm:$0xff] }
 0x10f   :  { %1203 = vmatpush1.bf16.msra.mxu0 %v2013_v17  ;;  %1285 = vmatpush1.bf16.msra.mxu1 %v2016_v18  ;;  %v1371_v17 = vld [vmem:[%s2842_s5 + $0x190] sm:$0xff]  ;;  %v1372_v18 = vld [vmem:[%s2842_s5 + $0x198] sm:$0xff] }
 0x110   :  { %1204 = vmatprep.subr.bf16.mxu0 %v2021_v19  ;;  %1286 = vmatprep.subr.bf16.mxu1 %v2024_v20  ;;  %v1770_v19 = vpack.c.bf16 %v1322_v10, %v1321_v9  ;;  %v1802_v20 = vpack.c.bf16 %v1354_v15, %v1353_v14  ;;  %v1380_v9 = vld [vmem:[%s2842_s5 + $0x1d8] sm:$0xff] }
 0x113   :  { %1205 = vmatpush1.bf16.msra.mxu0 %v2019_v21  ;;  %1287 = vmatpush1.bf16.msra.mxu1 %v2022_v22  ;;  %v1323_v21 = vld [vmem:[%s2842_s5 + $0x10] sm:$0xff]  ;;  %v1324_v22 = vld [vmem:[%s2842_s5 + $0x18] sm:$0xff] }
 0x114   :  { %1206 = vmatprep.subr.bf16.mxu0 %v2027_v23  ;;  %1288 = vmatprep.subr.bf16.mxu1 %v2030_v24  ;;  %v361_v23 = vpack.c.bf16 %v357_v11, %v357_v11  ;;  %v1772_v24 = vpack.c.bf16 %v1340_v2, %v1339_v16  ;;  %v1818_v11 = vpack.c.bf16 %v1362_v5, %v1361_v4  ;;  %v1363_v16 = vld [vmem:[%s2842_s5 + $0x150] sm:$0xff]  ;;  %v1364_v2 = vld [vmem:[%s2842_s5 + $0x158] sm:$0xff] }
 0x117   :  { %1207 = vmatpush1.bf16.msra.mxu0 %v2025_v25  ;;  %1289 = vmatpush1.bf16.msra.mxu1 %v2028_v26  ;;  %v1804_v25 = vpack.c.bf16 %v1372_v18, %v1371_v17  ;;  %v1355_v26 = vld [vmem:[%s2842_s5 + $0x110] sm:$0xff]  ;;  %v1349_v17 = vld [vmem:[%s2842_s5 + $0xe0] sm:$0xff]  ;;  %v1350_v18 = vld [vmem:[%s2842_s5 + $0xe8] sm:$0xff] }
 0x118   :  { %1208 = vmatprep.subr.bf16.mxu0 %v2033_v27  ;;  %1290 = vmatprep.subr.bf16.mxu1 %v2036_v28  ;;  %v1356_v27 = vld [vmem:[%s2842_s5 + $0x118] sm:$0xff]  ;;  %v1341_v28 = vld [vmem:[%s2842_s5 + $0xa0] sm:$0xff] }
 0x11b   :  { %1209 = vmatpush1.bf16.msra.mxu0 %v2031_v29  ;;  %1291 = vmatpush1.bf16.msra.mxu1 %v2034_v30  ;;  %v1342_v29 = vld [vmem:[%s2842_s5 + $0xa8] sm:$0xff]  ;;  %v1373_v30 = vld [vmem:[%s2842_s5 + $0x1a0] sm:$0xff] }
 0x11c   :  { %1210 = vmatprep.subr.bf16.mxu0 %v2039_v31  ;;  %1292 = vmatprep.subr.bf16.mxu1 %v2042_v32  ;;  %v1374_v31 = vld [vmem:[%s2842_s5 + $0x1a8] sm:$0xff]  ;;  %v1774_v32 = vpack.c.bf16 %v1324_v22, %v1323_v21  ;;  %v1822_v22 = vpack.c.bf16 %v1364_v2, %v1363_v16 }
 0x11f   :  { %1211 = vmatpush1.bf16.msra.mxu0 %v2037_v33  ;;  %1293 = vmatpush1.bf16.msra.mxu1 %v2040_v34  ;;  %v1806_v33 = vpack.c.bf16 %v1356_v27, %v1355_v26  ;;  %v1325_v34 = vld [vmem:[%s2842_s5 + $0x20] sm:$0xff]  ;;  %v1334_v26 = vld [vmem:[%s2842_s5 + $0x68] sm:$0xff] }
 0x120   :  { %1212 = vmatprep.subr.bf16.mxu0 %v2045_v35  ;;  %1294 = vmatprep.subr.bf16.mxu1 %v2048_v36  ;;  %v1326_v35 = vld [vmem:[%s2842_s5 + $0x28] sm:$0xff]  ;;  %v1776_v36 = vpack.c.bf16 %v1342_v29, %v1341_v28  ;;  %v1365_v27 = vld [vmem:[%s2842_s5 + $0x160] sm:$0xff] }
 0x121   :  { %v1366_v29 = vld [vmem:[%s2842_s5 + $0x168] sm:$0xff] }
 0x123   :  { %1213 = vmatpush1.bf16.msra.mxu0 %v2043_v39  ;;  %1295 = vmatpush1.bf16.msra.mxu1 %v2046_v41  ;;  %v1808_v39 = vpack.c.bf16 %v1374_v31, %v1373_v30  ;;  %v1357_v41 = vld [vmem:[%s2842_s5 + $0x120] sm:$0xff]  ;;  %v1826_v30 = vpack.c.bf16 %v1366_v29, %v1365_v27  ;;  %v1351_v31 = vld [vmem:[%s2842_s5 + $0xf0] sm:$0xff] }
 0x124   :  { %1214 = vmatprep.subr.bf16.mxu0 %v2051_v42  ;;  %1296 = vmatprep.subr.bf16.mxu1 %v2054_v43  ;;  %v1358_v42 = vld [vmem:[%s2842_s5 + $0x128] sm:$0xff]  ;;  %v1343_v43 = vld [vmem:[%s2842_s5 + $0xb0] sm:$0xff] }
 0x127   :  { %1215 = vmatpush1.bf16.msra.mxu0 %v2049_v44  ;;  %1297 = vmatpush1.bf16.msra.mxu1 %v2052_v45  ;;  %v1344_v44 = vld [vmem:[%s2842_s5 + $0xb8] sm:$0xff]  ;;  %v1375_v45 = vld [vmem:[%s2842_s5 + $0x1b0] sm:$0xff] }
 0x128   :  { %1216 = vmatprep.subr.bf16.mxu0 %v2057_v46  ;;  %1298 = vmatprep.subr.bf16.mxu1 %v2060_v47  ;;  %v1376_v46 = vld [vmem:[%s2842_s5 + $0x1b8] sm:$0xff]  ;;  %v1778_v47 = vpack.c.bf16 %v1326_v35, %v1325_v34 }
 0x129   :  { %v1384_v35 = vld [vmem:[%s2842_s5 + $0x1f8] sm:$0xff] }
 0x12b   :  { %1217 = vmatpush1.bf16.msra.mxu0 %v2055_v48  ;;  %1299 = vmatpush1.bf16.msra.mxu1 %v2058_v49  ;;  %v1810_v48 = vpack.c.bf16 %v1358_v42, %v1357_v41  ;;  %v1327_v49 = vld [vmem:[%s2842_s5 + $0x30] sm:$0xff] }
 0x12c   :  { %1218 = vmatprep.subr.bf16.mxu0 %v2063_v50  ;;  %1300 = vmatprep.subr.bf16.mxu1 %v2066_v53  ;;  %v1328_v50 = vld [vmem:[%s2842_s5 + $0x38] sm:$0xff]  ;;  %v1780_v53 = vpack.c.bf16 %v1344_v44, %v1343_v43  ;;  %v1367_v43 = vld [vmem:[%s2842_s5 + $0x170] sm:$0xff] }
 0x12d   :  { %v1368_v44 = vld [vmem:[%s2842_s5 + $0x178] sm:$0xff] }
 0x12f   :  { %1219 = vmatpush1.bf16.msra.mxu0 %v2061_v54  ;;  %1301 = vmatpush1.bf16.msra.mxu1 %v2064_v55  ;;  %v1812_v54 = vpack.c.bf16 %v1376_v46, %v1375_v45  ;;  %v1359_v55 = vld [vmem:[%s2842_s5 + $0x130] sm:$0xff]  ;;  %v1830_v45 = vpack.c.bf16 %v1368_v44, %v1367_v43  ;;  %v491_v46 = vld [vmem:[%s2843_s4] sm:$0xf] }
 0x130   :  { %1220 = vmatprep.subr.bf16.mxu0 %v2069_v56  ;;  %1302 = vmatprep.subr.bf16.mxu1 %v2072_v57  ;;  %v1360_v56 = vld [vmem:[%s2842_s5 + $0x138] sm:$0xff]  ;;  %v1345_v57 = vld [vmem:[%s2842_s5 + $0xc0] sm:$0xff] }
 0x133   :  { %1221 = vmatpush1.bf16.msra.mxu0 %v2067_v58  ;;  %1303 = vmatpush1.bf16.msra.mxu1 %v2070_v59  ;;  %v1346_v58 = vld [vmem:[%s2842_s5 + $0xc8] sm:$0xff]  ;;  %v1377_v59 = vld [vmem:[%s2842_s5 + $0x1c0] sm:$0xff] }
 0x134   :  { %1222 = vmatprep.subr.bf16.mxu0 %v2075_v60  ;;  %1304 = vmatprep.subr.bf16.mxu1 %v2078_v61  ;;  %v1378_v60 = vld [vmem:[%s2842_s5 + $0x1c8] sm:$0xff]  ;;  %v1782_v61 = vpack.c.bf16 %v1328_v50, %v1327_v49  ;;  %v500_v49 = vrot.slane %v491_v46, %v337_v40  ;;  %v508_v50 = vrot.slane %v491_v46, %v345_v52  ;;  %v1697_v52 = vld [vmem:[%s2844_s6] ss:$0 sm:$0xff] }
 0x135   :  { %v1816_v3 = vpack.c.bf16 %v1378_v60, %v1377_v59 }
 0x137   :  { %1223 = vmatpush1.bf16.msra.mxu0 %v2073_v62  ;;  %1305 = vmatpush1.bf16.msra.mxu1 %v2076_v63  ;;  %v1814_v62 = vpack.c.bf16 %v1360_v56, %v1359_v55  ;;  %v1329_v63 = vld [vmem:[%s2842_s5 + $0x40] sm:$0xff] }
 0x138   :  { %1224 = vmatprep.subr.bf16.mxu0 %v2081_v0  ;;  %1306 = vmatprep.subr.bf16.mxu1 %v2084_v1  ;;  %v1330_v0 = vld [vmem:[%s2842_s5 + $0x48] sm:$0xff]  ;;  %v1784_v1 = vpack.c.bf16 %v1346_v58, %v1345_v57 }
 0x139   :  { %v1786_v10 = vpack.c.bf16 %v1330_v0, %v1329_v63 }
 0x13b   :  { %1225 = vmatpush1.bf16.msra.mxu0 %v2079_v7  ;;  %1307 = vmatpush1.bf16.msra.mxu1 %v2082_v8  ;;  %v1348_v7 = vld [vmem:[%s2842_s5 + $0xd8] sm:$0xff]  ;;  %v1379_v8 = vld [vmem:[%s2842_s5 + $0x1d0] sm:$0xff] }
 0x13c   :  { %1769 = vmatprep.subr.bf16.mxu0 %v1768_v12  ;;  %1801 = vmatprep.subr.bf16.mxu1 %v1800_v13  ;;  %v1331_v12 = vld [vmem:[%s2842_s5 + $0x50] sm:$0xff]  ;;  %v1332_v13 = vld [vmem:[%s2842_s5 + $0x58] sm:$0xff]  ;;  %v1788_v14 = vpack.c.bf16 %v1348_v7, %v1347_v6  ;;  %v1820_v15 = vpack.c.bf16 %v1380_v9, %v1379_v8 }
 0x13d   :  { %v1790_v21 = vpack.c.bf16 %v1332_v13, %v1331_v12 }
 0x13e   :  { %1227 = vmatmul.mubr.bf16.vlgmr.msra.gmra.mrb[4].mxu0 %v361_v23  ;;  %1309 = vmatmul.mubr.bf16.vlgmr.msra.gmra.mrb[4].mxu1 %v361_v23  ;;  %v1792_v23 = vpack.c.bf16 %v1350_v18, %v1349_v17 }
 0x13f   :  { %1771 = vmatpush3.bf16.msra.mxu0 %v1770_v19  ;;  %1803 = vmatpush3.bf16.msra.mxu1 %v1802_v20  ;;  %v1381_v19 = vld [vmem:[%s2842_s5 + $0x1e0] sm:$0xff]  ;;  %v1382_v20 = vld [vmem:[%s2842_s5 + $0x1e8] sm:$0xff] }
 0x140   :  { %1773 = vmatprep.subr.bf16.mxu0 %v1772_v24  ;;  %1805 = vmatprep.subr.bf16.mxu1 %v1804_v25  ;;  %v1824_v24 = vpack.c.bf16 %v1382_v20, %v1381_v19  ;;  %v1333_v25 = vld [vmem:[%s2842_s5 + $0x60] sm:$0xff] }
 0x141   :  { %v1794_v28 = vpack.c.bf16 %v1334_v26, %v1333_v25 }
 0x143   :  { %1775 = vmatpush3.bf16.msra.mxu0 %v1774_v32  ;;  %1807 = vmatpush3.bf16.msra.mxu1 %v1806_v33  ;;  %v1352_v32 = vld [vmem:[%s2842_s5 + $0xf8] sm:$0xff]  ;;  %v1383_v33 = vld [vmem:[%s2842_s5 + $0x1f0] sm:$0xff] }
 0x144   :  { %1777 = vmatprep.subr.bf16.mxu0 %v1776_v36  ;;  %1809 = vmatprep.subr.bf16.mxu1 %v1808_v39  ;;  %v1796_v34 = vpack.c.bf16 %v1352_v32, %v1351_v31  ;;  %v1335_v36 = vld [vmem:[%s2842_s5 + $0x70] sm:$0xff]  ;;  %v1336_v39 = vld [vmem:[%s2842_s5 + $0x78] sm:$0xff]  ;;  %v1828_v41 = vpack.c.bf16 %v1384_v35, %v1383_v33 }
 0x145   :  { %v1798_v42 = vpack.c.bf16 %v1336_v39, %v1335_v36 }
 0x147   :  { %1779 = vmatpush3.bf16.msra.mxu0 %v1778_v47  ;;  %1811 = vmatpush3.bf16.msra.mxu1 %v1810_v48  ;;  %v496_v47 = vrot.slane %v491_v46, %v333_v38  ;;  %v504_v48 = vrot.slane %v491_v46, %v341_v51 }
 0x148   :  { %1781 = vmatprep.subr.bf16.mxu0 %v1780_v53  ;;  %1813 = vmatprep.subr.bf16.mxu1 %v1812_v54 }
 0x14b   :  { %1783 = vmatpush3.bf16.msra.mxu0 %v1782_v61  ;;  %1815 = vmatpush3.bf16.msra.mxu1 %v1814_v62 }
 0x14c   :  { %1785 = vmatprep.subr.bf16.mxu0 %v1784_v1  ;;  %1817 = vmatprep.subr.bf16.mxu1 %v1816_v3 }
 0x14f   :  { %1787 = vmatpush3.bf16.msra.mxu0 %v1786_v10  ;;  %1819 = vmatpush3.bf16.msra.mxu1 %v1818_v11 }
 0x150   :  { %1789 = vmatprep.subr.bf16.mxu0 %v1788_v14  ;;  %1821 = vmatprep.subr.bf16.mxu1 %v1820_v15 }
 0x153   :  { %1791 = vmatpush3.bf16.msra.mxu0 %v1790_v21  ;;  %1823 = vmatpush3.bf16.msra.mxu1 %v1822_v22 }
 0x154   :  { %1793 = vmatprep.subr.bf16.mxu0 %v1792_v23  ;;  %1825 = vmatprep.subr.bf16.mxu1 %v1824_v24 }
 0x157   :  { %1795 = vmatpush3.bf16.msra.mxu0 %v1794_v28  ;;  %1827 = vmatpush3.bf16.msra.mxu1 %v1826_v30 }
 0x158   :  { %1797 = vmatprep.subr.bf16.mxu0 %v1796_v34  ;;  %1829 = vmatprep.subr.bf16.mxu1 %v1828_v41 }
 0x15b   :  { %1799 = vmatpush3.bf16.msra.mxu0 %v1798_v42  ;;  %1831 = vmatpush3.bf16.msra.mxu1 %v1830_v45 }
 0x211   :  { %v1228_v53 = vpop.f32.mrb[4].mxu0  ;;  %v1310_v54 = vpop.f32.mrb[4].mxu1 }
 0x212   :  { %v1832_v55 = vadd.f32 %v1228_v53, %v496_v47  ;;  %v1834_v56 = vadd.f32 %v1310_v54, %v504_v48  ;;  %v1230_v57 = vpop.f32.mrb[5].mxu0  ;;  %v1312_v58 = vpop.f32.mrb[5].mxu1 }
 0x213   :  { %v1833_v59 = vadd.f32 %v1230_v57, %v500_v49  ;;  %v1835_v60 = vadd.f32 %v1312_v58, %v508_v50  ;;  %v1232_v61 = vpop.f32.mrb[6].mxu0  ;;  %v1314_v62 = vpop.f32.mrb[6].mxu1 }
 0x214   :  { %v1233_v38 = vpop.f32.mrb[7].mxu0  ;;  %v1315_v63 = vpop.f32.mrb[7].mxu1  ;;  %v1317_v1 = vmax.f32 %v1832_v55, 0.0  ;;  %v1319_v3 = vmax.f32 %v1834_v56, 0.0 }
 0x215   :  { %v1318_v0 = vmax.f32 %v1833_v59, 0.0  ;;  %v1320_v51 = vmax.f32 %v1835_v60, 0.0 }
 0x217   :  { %1456 = vmatprep.mubr.f32.mxu0 %v1318_v0  ;;  %1526 = vmatprep.mubr.f32.mxu1 %v1320_v51 }
 0x218   :  { %1457 = vmatmul.mubr.f32.vlgmr.msra.gmra.mrb[8].mxu0 %v1317_v1  ;;  %1527 = vmatmul.mubr.f32.vlgmr.msra.gmra.mrb[8].mxu1 %v1319_v3 }
 0x2eb   :  { %v1730_v37 = vpop.f32.mrb[8].mxu0  ;;  %v1765_v40 = vpop.f32.mrb[8].mxu1 }
 0x2ec   :  { %v1731_v4 = vpop.f32.mrb[9].mxu0  ;;  %v1766_v5 = vpop.f32.mrb[9].mxu1 }
 0x2ed   :  { %v1732_v6 = vadd.f32 %v1731_v4, %v1730_v37  ;;  %v1767_v7 = vadd.f32 %v1766_v5, %v1765_v40 }
 0x2ef   :  { %v1459_v8 = vadd.f32 %v1732_v6, %v1697_v52 }
 0x2f1   :  { %v1529_v9 = vadd.f32 %v1767_v7, %v1459_v8 }
 0x2f3   :  { %1532 = vst [vmem:[%s2845_s7] sm:$0xff] %v1529_v9 }

</bundles_post_ra>
